<compile_context>
chip_gen: v7x
topology: tpu7x:2x2x1
jax: 0.10.0
libtpu: 0.0.40
codegen_flags: <defaults>
</compile_context>

<pallas_src>
import functools

import jax
import jax.numpy as jnp
from jax import lax
from jax.experimental import pallas as pl
from jax.experimental.pallas import tpu as pltpu


# ---------------------------------------------------------------------------
# Kernel
# ---------------------------------------------------------------------------
def _layernorm(x, g, b, eps=1e-5):
    mu = jnp.mean(x, axis=-1, keepdims=True)
    var = jnp.mean((x - mu) ** 2, axis=-1, keepdims=True)
    return (x - mu) * lax.rsqrt(var + eps) * g + b


def encoder_block_kernel(
    x_ref,
    ln1g_ref, ln1b_ref,
    wqkv_ref, bqkv_ref,
    wo_ref, bo_ref,
    ln2g_ref, ln2b_ref,
    w1_ref, b1_ref, w2_ref, b2_ref,
    o_ref,
    *, n_heads, qkv_dim,
):
    bt, s, e = x_ref.shape
    d = qkv_dim
    hd = n_heads * d
    m = bt * s                                            # MXU rows per step

    x = x_ref[...].astype(jnp.float32).reshape(m, e)      # (M, E) f32

    # ---------------- LayerNorm 1 (f32, VPU) ------------------------------
    h = _layernorm(x, ln1g_ref[0], ln1b_ref[0])

    # ---------------- Fused QKV projection --------------------------------
    # One full-width MXU pass: (M, E) @ (E, 3*H*D).  The 1/sqrt(D) attention
    # scale is pre-folded into the Q columns/bias by the wrapper.
    qkv = jnp.dot(h.astype(jnp.bfloat16), wqkv_ref[...],
                  preferred_element_type=jnp.float32) + bqkv_ref[0]

    # ---------------- Per-head attention -----------------------------------
    # Heads are static lane slices of the fused QKV result.  S and D are tiny
    # in the test config, so the score/PV einsums are small; the MXU-heavy
    # work (QKV / out-proj / MLP) is now full-width.  For production S, block
    # S to a multiple of 128 and batch heads for lane-dense score vregs.
    ctx_heads = []
    for i in range(n_heads):
        q = qkv[:, i * d:(i + 1) * d].reshape(bt, s, d).astype(jnp.bfloat16)
        k = qkv[:, hd + i * d:hd + (i + 1) * d].reshape(bt, s, d).astype(jnp.bfloat16)
        v = qkv[:, 2 * hd + i * d:2 * hd + (i + 1) * d].reshape(bt, s, d).astype(jnp.bfloat16)

        scores = jnp.einsum("bqd,bkd->bqk", q, k,
                            preferred_element_type=jnp.float32)
        scores = scores - jnp.max(scores, axis=-1, keepdims=True)
        p = jnp.exp(scores)
        p = p * pl.reciprocal(jnp.sum(p, axis=-1, keepdims=True), approx=True)
        ctx = jnp.einsum("bqk,bkd->bqd", p.astype(jnp.bfloat16), v,
                         preferred_element_type=jnp.float32)
        ctx_heads.append(ctx.reshape(m, d).astype(jnp.bfloat16))

    # Lane-contiguous (M, H*D) context -> single full-K output projection.
    ctx = jnp.concatenate(ctx_heads, axis=-1)
    attn = jnp.dot(ctx, wo_ref[...], preferred_element_type=jnp.float32) + bo_ref[0]
    x = x + attn                                          # residual 1 (f32)

    # ---------------- LayerNorm 2 + MLP ------------------------------------
    h = _layernorm(x, ln2g_ref[0], ln2b_ref[0])
    h1 = jnp.dot(h.astype(jnp.bfloat16), w1_ref[...],
                 preferred_element_type=jnp.float32) + b1_ref[0]
    # Exact (erf-based) GELU to match torch.nn.GELU default, in f32.
    h1 = 0.5 * h1 * (1.0 + lax.erf(h1 * jnp.float32(0.7071067811865476)))
    # TODO(synk): for production mlp_hidden (3072), chunk the hidden dim
    # (512-1024 column blocks of w1/w2, accumulate into h2) so the f32 (M, Hm)
    # intermediate never materializes and w1/w2 can stream.
    h2 = jnp.dot(h1.astype(jnp.bfloat16), w2_ref[...],
                 preferred_element_type=jnp.float32) + b2_ref[0]
    x = x + h2                                            # residual 2 (f32)

    o_ref[...] = x.reshape(bt, s, e).astype(o_ref.dtype)


# ---------------------------------------------------------------------------
# Wrapper
# ---------------------------------------------------------------------------
def prepare_encoder_params(params, *, n_heads, qkv_dim):
    """One-time weight preprocessing (hoisted out of the per-call path)."""
    scale = jnp.float32(qkv_dim ** (-0.5))
    wqkv = jnp.concatenate(
        [params["wq"] * scale, params["wk"], params["wv"]], axis=1
    ).astype(jnp.bfloat16)                                 # (E, 3*H*D)
    bqkv = jnp.concatenate(
        [params["bq"] * scale, params["bk"], params["bv"]], axis=1
    ).astype(jnp.float32)                                  # (1, 3*H*D)
    return {
        "ln1_g": params["ln1_g"].astype(jnp.float32),
        "ln1_b": params["ln1_b"].astype(jnp.float32),
        "wqkv": wqkv, "bqkv": bqkv,
        "wo": params["wo"].astype(jnp.bfloat16),           # (H*D, E)
        "bo": params["bo"].astype(jnp.float32),
        "ln2_g": params["ln2_g"].astype(jnp.float32),
        "ln2_b": params["ln2_b"].astype(jnp.float32),
        "w1": params["w1"].astype(jnp.bfloat16),
        "b1": params["b1"].astype(jnp.float32),
        "w2": params["w2"].astype(jnp.bfloat16),
        "b2": params["b2"].astype(jnp.float32),
    }


def _pick_b_tile(B, S):
    # Target ~256 MXU rows per grid step (fills the 256-row MXU on v6e/v7x),
    # but keep >= 4 grid steps so each of v7x's two TensorCores gets >= 2
    # pipelined steps.  On v5e, 128 rows already fill the 128x128 MXU.
    target_rows, min_steps = 256, 4
    bt = min(max(1, B // min_steps), max(1, target_rows // S))
    while B % bt:
        bt -= 1
    return bt


def _encoder_pallas_call(x, p, *, n_heads, qkv_dim, b_tile, single_buffer_weights):
    B, S, E = x.shape
    H, D = n_heads, qkv_dim
    HD = H * D
    Hm = p["w1"].shape[1]

    weight_kwargs = {}
    if single_buffer_weights:
        # Weights are identical every grid step -> no need to double-buffer.
        weight_kwargs = dict(pipeline_mode=pl.Buffered(1))

    def wspec(shape):
        nd = len(shape)
        return pl.BlockSpec(shape, lambda b: (0,) * nd, **weight_kwargs)

    in_specs = [
        pl.BlockSpec((b_tile, S, E), lambda b: (b, 0, 0)),   # x (double-buffered)
        wspec((1, E)), wspec((1, E)),                        # ln1 gamma/beta
        wspec((E, 3 * HD)), wspec((1, 3 * HD)),              # fused wqkv, bqkv
        wspec((HD, E)), wspec((1, E)),                       # wo, bo
        wspec((1, E)), wspec((1, E)),                        # ln2 gamma/beta
        wspec((E, Hm)), wspec((1, Hm)),                      # w1, b1
        wspec((Hm, E)), wspec((1, E)),                       # w2, b2
    ]

    # Advisory cost estimate so XLA schedules neighbours around the call.
    flops = int(
        2 * B * S * E * 3 * HD        # fused QKV projection
        + 4 * B * H * S * S * D       # scores + PV
        + 2 * B * S * HD * E          # output projection
        + 4 * B * S * E * Hm          # MLP fc1 + fc2
    )
    transcendentals = int(B * H * S * S + B * S * Hm)        # exp + erf
    bytes_accessed = int(
        4 * B * S * E * 2                                    # x in + out (f32)
        + 2 * (E * 3 * HD + HD * E + E * Hm + Hm * E)        # bf16 weights
        + 4 * (3 * HD + 5 * E + Hm)                          # biases + LN params
    )

    kernel = functools.partial(encoder_block_kernel, n_heads=n_heads, qkv_dim=qkv_dim)

    return pl.pallas_call(
        kernel,
        out_shape=jax.ShapeDtypeStruct((B, S, E), x.dtype),
        grid=(B // b_tile,),
        in_specs=in_specs,
        out_specs=pl.BlockSpec((b_tile, S, E), lambda b: (b, 0, 0)),
        compiler_params=pltpu.CompilerParams(
            dimension_semantics=("parallel",),
            # Explicit scoped-VMEM budget (re-derived for v7x's 64 MiB physical
            # VMEM; well within v5e/v6e limits and far above this test's needs).
            vmem_limit_bytes=32 * 1024 * 1024,
        ),
        cost_estimate=pl.CostEstimate(
            flops=flops, transcendentals=transcendentals,
            bytes_accessed=bytes_accessed),
    )(x, p["ln1_g"], p["ln1_b"], p["wqkv"], p["bqkv"], p["wo"], p["bo"],
      p["ln2_g"], p["ln2_b"], p["w1"], p["b1"], p["w2"], p["b2"])


def encoder_block(x, prepared_params, *, n_heads, qkv_dim, b_tile=None):
    B, S, E = x.shape
    if b_tile is None:
        b_tile = _pick_b_tile(B, S)
    assert B % b_tile == 0, "batch must be divisible by b_tile"

    try:
        return _encoder_pallas_call(
            x, prepared_params, n_heads=n_heads, qkv_dim=qkv_dim,
            b_tile=b_tile, single_buffer_weights=True)
    except Exception:
        # pl.Buffered(1) not supported by this JAX build -> fall back to the
        # default double-buffered weight specs (correctness identical).
        return _encoder_pallas_call(
            x, prepared_params, n_heads=n_heads, qkv_dim=qkv_dim,
            b_tile=b_tile, single_buffer_weights=False)


# ---------------------------------------------------------------------------
# Pure-JAX reference (f32, matches the PyTorch module)
# ---------------------------------------------------------------------------
def encoder_block_ref(x, p, *, n_heads, qkv_dim):
    def ln(z, g, b):
        mu = z.mean(-1, keepdims=True)
        var = ((z - mu) ** 2).mean(-1, keepdims=True)
        return (z - mu) / jnp.sqrt(var + 1e-5) * g + b

    h = ln(x, p["ln1_g"][0], p["ln1_b"][0])
    q = h @ p["wq"] + p["bq"][0]
    k = h @ p["wk"] + p["bk"][0]
    v = h @ p["wv"] + p["bv"][0]
    B, S, _ = x.shape
    q = q.reshape(B, S, n_heads, qkv_dim).transpose(0, 2, 1, 3)
    k = k.reshape(B, S, n_heads, qkv_dim).transpose(0, 2, 1, 3)
    v = v.reshape(B, S, n_heads, qkv_dim).transpose(0, 2, 1, 3)
    scores = jnp.einsum("bhqd,bhkd->bhqk", q, k) * (qkv_dim ** -0.5)
    attn = jax.nn.softmax(scores, axis=-1)
    o = jnp.einsum("bhqk,bhkd->bhqd", attn, v).transpose(0, 2, 1, 3).reshape(B, S, -1)
    x = x + (o @ p["wo"] + p["bo"][0])

    h = ln(x, p["ln2_g"][0], p["ln2_b"][0])
    h1 = jax.nn.gelu(h @ p["w1"] + p["b1"][0], approximate=False)
    x = x + (h1 @ p["w2"] + p["b2"][0])
    return x


# ---------------------------------------------------------------------------
# Main
# ---------------------------------------------------------------------------
if __name__ == "__main__":
    # Small, TPU-friendly dims consistent with the module's structure.
    # b_tile auto-selects 8 -> 128 MXU rows per step, grid = 4 parallel steps.
    B, S = 32, 16
    embed_dim = 128
    n_heads = 4
    qkv_dim = 32
    mlp_hidden = 256
    HD = n_heads * qkv_dim

    ks = jax.random.split(jax.random.PRNGKey(0), 13)

    def w(k, shape, scale=0.02):
        return (scale * jax.random.normal(k, shape)).astype(jnp.float32)

    params = {
        "ln1_g": jnp.ones((1, embed_dim), jnp.float32),
        "ln1_b": jnp.zeros((1, embed_dim), jnp.float32),
        "wq": w(ks[0], (embed_dim, HD)),
        "bq": w(ks[1], (1, HD)),
        "wk": w(ks[2], (embed_dim, HD)),
        "bk": w(ks[3], (1, HD)),
        "wv": w(ks[4], (embed_dim, HD)),
        "bv": w(ks[5], (1, HD)),
        "wo": w(ks[6], (HD, embed_dim)),
        "bo": w(ks[7], (1, embed_dim)),
        "ln2_g": jnp.ones((1, embed_dim), jnp.float32),
        "ln2_b": jnp.zeros((1, embed_dim), jnp.float32),
        "w1": w(ks[8], (embed_dim, mlp_hidden)),
        "b1": w(ks[9], (1, mlp_hidden)),
        "w2": w(ks[10], (mlp_hidden, embed_dim)),
        "b2": w(ks[11], (1, embed_dim)),
    }

    x = jax.random.normal(ks[12], (B, S, embed_dim), jnp.float32)

    # One-time weight prep (fused QKV, scale fold, bf16 casts) — not per-call.
    prep = prepare_encoder_params(params, n_heads=n_heads, qkv_dim=qkv_dim)
    prep = jax.tree_util.tree_map(jax.block_until_ready, prep)

    out = encoder_block(x, prep, n_heads=n_heads, qkv_dim=qkv_dim)
    out = jax.block_until_ready(out)

    ref = encoder_block_ref(x, params, n_heads=n_heads, qkv_dim=qkv_dim)
    assert out.shape == (B, S, embed_dim)
    max_err = float(jnp.max(jnp.abs(out - ref)))
    # bf16 MXU operands with f32 accumulation: compare against the f32
    # reference with a bf16-appropriate tolerance.
    assert jnp.allclose(out, ref, atol=1e-2, rtol=1e-2), f"max_abs_err={max_err}"

    print("KERNEL_OK")
</pallas_src>

<mosaic_0001>
module attributes {stable_mosaic.version = 11 : i64} {
  func.func @encoder_block_kernel(%arg0: i32, %arg1: memref<8x16x128xf32, #tpu.memory_space<vmem>>, %arg2: memref<1x128xf32, #tpu.memory_space<vmem>>, %arg3: memref<1x128xf32, #tpu.memory_space<vmem>>, %arg4: memref<128x384xbf16, #tpu.memory_space<vmem>>, %arg5: memref<1x384xf32, #tpu.memory_space<vmem>>, %arg6: memref<128x128xbf16, #tpu.memory_space<vmem>>, %arg7: memref<1x128xf32, #tpu.memory_space<vmem>>, %arg8: memref<1x128xf32, #tpu.memory_space<vmem>>, %arg9: memref<1x128xf32, #tpu.memory_space<vmem>>, %arg10: memref<128x256xbf16, #tpu.memory_space<vmem>>, %arg11: memref<1x256xf32, #tpu.memory_space<vmem>>, %arg12: memref<256x128xbf16, #tpu.memory_space<vmem>>, %arg13: memref<1x128xf32, #tpu.memory_space<vmem>>, %arg14: memref<8x16x128xf32, #tpu.memory_space<vmem>>) attributes {dimension_semantics = [#tpu.dimension_semantics<parallel>], iteration_bounds = array<i64: 4>, scalar_prefetch = 0 : i64, scratch_operands = 0 : i64, tpu.core_type = #tpu.core_type<tc>, window_params = [{transform_indices = @transform_0, window_bounds = array<i64: 8, 16, 128>}, {pipeline_mode = #tpu.pipeline_mode<synchronous>, transform_indices = @transform_1, window_bounds = array<i64: 1, 128>}, {pipeline_mode = #tpu.pipeline_mode<synchronous>, transform_indices = @transform_2, window_bounds = array<i64: 1, 128>}, {pipeline_mode = #tpu.pipeline_mode<synchronous>, transform_indices = @transform_3, window_bounds = array<i64: 128, 384>}, {pipeline_mode = #tpu.pipeline_mode<synchronous>, transform_indices = @transform_4, window_bounds = array<i64: 1, 384>}, {pipeline_mode = #tpu.pipeline_mode<synchronous>, transform_indices = @transform_5, window_bounds = array<i64: 128, 128>}, {pipeline_mode = #tpu.pipeline_mode<synchronous>, transform_indices = @transform_6, window_bounds = array<i64: 1, 128>}, {pipeline_mode = #tpu.pipeline_mode<synchronous>, transform_indices = @transform_7, window_bounds = array<i64: 1, 128>}, {pipeline_mode = #tpu.pipeline_mode<synchronous>, transform_indices = @transform_8, window_bounds = array<i64: 1, 128>}, {pipeline_mode = #tpu.pipeline_mode<synchronous>, transform_indices = @transform_9, window_bounds = array<i64: 128, 256>}, {pipeline_mode = #tpu.pipeline_mode<synchronous>, transform_indices = @transform_10, window_bounds = array<i64: 1, 256>}, {pipeline_mode = #tpu.pipeline_mode<synchronous>, transform_indices = @transform_11, window_bounds = array<i64: 256, 128>}, {pipeline_mode = #tpu.pipeline_mode<synchronous>, transform_indices = @transform_12, window_bounds = array<i64: 1, 128>}, {transform_indices = @transform_13, window_bounds = array<i64: 8, 16, 128>}]} {
    %c0 = arith.constant 0 : index
    %c0_0 = arith.constant 0 : index
    %c0_1 = arith.constant 0 : index
    %0 = vector.load %arg1[%c0, %c0_0, %c0_1] : memref<8x16x128xf32, #tpu.memory_space<vmem>>, vector<8x16x128xf32>
    %1 = vector.shape_cast %0 : vector<8x16x128xf32> to vector<128x128xf32>
    %c0_2 = arith.constant 0 : index
    %c0_3 = arith.constant 0 : index
    %2 = vector.load %arg2[%c0_2, %c0_3] : memref<1x128xf32, #tpu.memory_space<vmem>>, vector<1x128xf32>
    %3 = vector.shape_cast %2 : vector<1x128xf32> to vector<128xf32>
    %c0_4 = arith.constant 0 : index
    %c0_5 = arith.constant 0 : index
    %4 = vector.load %arg3[%c0_4, %c0_5] : memref<1x128xf32, #tpu.memory_space<vmem>>, vector<1x128xf32>
    %5 = vector.shape_cast %4 : vector<1x128xf32> to vector<128xf32>
    %cst = arith.constant dense<0.000000e+00> : vector<128xf32>
    %6 = vector.multi_reduction <add>, %1, %cst [1] : vector<128x128xf32> to vector<128xf32>
    %7 = vector.shape_cast %6 : vector<128xf32> to vector<128x1xf32>
    %cst_6 = arith.constant 1.280000e+02 : f32
    %8 = vector.broadcast %cst_6 : f32 to vector<128x1xf32>
    %9 = arith.divf %7, %8 : vector<128x1xf32>
    %10 = vector.broadcast %9 : vector<128x1xf32> to vector<128x128xf32>
    %11 = arith.subf %1, %10 : vector<128x128xf32>
    %12 = arith.mulf %11, %11 : vector<128x128xf32>
    %cst_7 = arith.constant dense<0.000000e+00> : vector<128xf32>
    %13 = vector.multi_reduction <add>, %12, %cst_7 [1] : vector<128x128xf32> to vector<128xf32>
    %14 = vector.shape_cast %13 : vector<128xf32> to vector<128x1xf32>
    %cst_8 = arith.constant 1.280000e+02 : f32
    %15 = vector.broadcast %cst_8 : f32 to vector<128x1xf32>
    %16 = arith.divf %14, %15 : vector<128x1xf32>
    %17 = vector.broadcast %9 : vector<128x1xf32> to vector<128x128xf32>
    %18 = arith.subf %1, %17 : vector<128x128xf32>
    %cst_9 = arith.constant 9.99999974E-6 : f32
    %19 = vector.broadcast %cst_9 : f32 to vector<128x1xf32>
    %20 = arith.addf %16, %19 : vector<128x1xf32>
    %21 = math.rsqrt %20 : vector<128x1xf32>
    %22 = vector.broadcast %21 : vector<128x1xf32> to vector<128x128xf32>
    %23 = arith.mulf %18, %22 : vector<128x128xf32>
    %24 = vector.shape_cast %3 : vector<128xf32> to vector<1x128xf32>
    %25 = vector.broadcast %24 : vector<1x128xf32> to vector<128x128xf32>
    %26 = arith.mulf %23, %25 : vector<128x128xf32>
    %27 = vector.shape_cast %5 : vector<128xf32> to vector<1x128xf32>
    %28 = vector.broadcast %27 : vector<1x128xf32> to vector<128x128xf32>
    %29 = arith.addf %26, %28 : vector<128x128xf32>
    %30 = arith.truncf %29 : vector<128x128xf32> to vector<128x128xbf16>
    %c0_10 = arith.constant 0 : index
    %c0_11 = arith.constant 0 : index
    %31 = vector.load %arg4[%c0_10, %c0_11] : memref<128x384xbf16, #tpu.memory_space<vmem>>, vector<128x384xbf16>
    %cst_12 = arith.constant dense<0.000000e+00> : vector<128x384xf32>
    %32 = tpu.matmul %30, %31, %cst_12 {dimension_numbers = #tpu.dot_dimension_numbers<[1], [0], [0], [1], [0, 0, 1, 1], [], []>} : vector<128x128xbf16>, vector<128x384xbf16>, vector<128x384xf32> -> vector<128x384xf32>
    %c0_13 = arith.constant 0 : index
    %c0_14 = arith.constant 0 : index
    %33 = vector.load %arg5[%c0_13, %c0_14] : memref<1x384xf32, #tpu.memory_space<vmem>>, vector<1x384xf32>
    %34 = vector.shape_cast %33 : vector<1x384xf32> to vector<384xf32>
    %35 = vector.shape_cast %34 : vector<384xf32> to vector<1x384xf32>
    %36 = vector.broadcast %35 : vector<1x384xf32> to vector<128x384xf32>
    %37 = arith.addf %32, %36 : vector<128x384xf32>
    %38 = vector.extract_strided_slice %37 {offsets = [0, 0], sizes = [128, 32], strides = [1, 1]} : vector<128x384xf32> to vector<128x32xf32>
    %39 = vector.shape_cast %38 : vector<128x32xf32> to vector<8x16x32xf32>
    %40 = arith.truncf %39 : vector<8x16x32xf32> to vector<8x16x32xbf16>
    %41 = vector.extract_strided_slice %37 {offsets = [0, 128], sizes = [128, 32], strides = [1, 1]} : vector<128x384xf32> to vector<128x32xf32>
    %42 = vector.shape_cast %41 : vector<128x32xf32> to vector<8x16x32xf32>
    %43 = arith.truncf %42 : vector<8x16x32xf32> to vector<8x16x32xbf16>
    %44 = vector.extract_strided_slice %37 {offsets = [0, 256], sizes = [128, 32], strides = [1, 1]} : vector<128x384xf32> to vector<128x32xf32>
    %45 = vector.shape_cast %44 : vector<128x32xf32> to vector<8x16x32xf32>
    %46 = arith.truncf %45 : vector<8x16x32xf32> to vector<8x16x32xbf16>
    "tpu.trace_start"() <{level = 10 : i32, message = "bqd,bkd->bqk"}> : () -> ()
    %cst_15 = arith.constant dense<0.000000e+00> : vector<8x16x16xf32>
    %47 = tpu.matmul %40, %43, %cst_15 {dimension_numbers = #tpu.dot_dimension_numbers<[2], [2], [1], [1], [0, 0, 0, 1, 1, 1], [0], [0]>} : vector<8x16x32xbf16>, vector<8x16x32xbf16>, vector<8x16x16xf32> -> vector<8x16x16xf32>
    "tpu.trace_stop"() : () -> ()
    %cst_16 = arith.constant dense<0xFF800000> : vector<8x16xf32>
    %48 = vector.multi_reduction <maximumf>, %47, %cst_16 [2] : vector<8x16x16xf32> to vector<8x16xf32>
    %49 = vector.shape_cast %48 : vector<8x16xf32> to vector<8x16x1xf32>
    %50 = vector.broadcast %49 : vector<8x16x1xf32> to vector<8x16x16xf32>
    %51 = arith.subf %47, %50 : vector<8x16x16xf32>
    %52 = math.exp %51 : vector<8x16x16xf32>
    %cst_17 = arith.constant dense<0.000000e+00> : vector<8x16xf32>
    %53 = vector.multi_reduction <add>, %52, %cst_17 [2] : vector<8x16x16xf32> to vector<8x16xf32>
    %54 = vector.shape_cast %53 : vector<8x16xf32> to vector<8x16x1xf32>
    %55 = tpu.reciprocal %54 {approx = true} : vector<8x16x1xf32> -> vector<8x16x1xf32>
    %56 = vector.broadcast %55 : vector<8x16x1xf32> to vector<8x16x16xf32>
    %57 = arith.mulf %52, %56 : vector<8x16x16xf32>
    %58 = arith.truncf %57 : vector<8x16x16xf32> to vector<8x16x16xbf16>
    "tpu.trace_start"() <{level = 10 : i32, message = "bqk,bkd->bqd"}> : () -> ()
    %cst_18 = arith.constant dense<0.000000e+00> : vector<8x16x32xf32>
    %59 = tpu.matmul %58, %46, %cst_18 {dimension_numbers = #tpu.dot_dimension_numbers<[2], [1], [1], [2], [0, 0, 0, 1, 1, 2], [0], [0]>} : vector<8x16x16xbf16>, vector<8x16x32xbf16>, vector<8x16x32xf32> -> vector<8x16x32xf32>
    "tpu.trace_stop"() : () -> ()
    %60 = vector.shape_cast %59 : vector<8x16x32xf32> to vector<128x32xf32>
    %61 = arith.truncf %60 : vector<128x32xf32> to vector<128x32xbf16>
    %62 = vector.extract_strided_slice %37 {offsets = [0, 32], sizes = [128, 32], strides = [1, 1]} : vector<128x384xf32> to vector<128x32xf32>
    %63 = vector.shape_cast %62 : vector<128x32xf32> to vector<8x16x32xf32>
    %64 = arith.truncf %63 : vector<8x16x32xf32> to vector<8x16x32xbf16>
    %65 = vector.extract_strided_slice %37 {offsets = [0, 160], sizes = [128, 32], strides = [1, 1]} : vector<128x384xf32> to vector<128x32xf32>
    %66 = vector.shape_cast %65 : vector<128x32xf32> to vector<8x16x32xf32>
    %67 = arith.truncf %66 : vector<8x16x32xf32> to vector<8x16x32xbf16>
    %68 = vector.extract_strided_slice %37 {offsets = [0, 288], sizes = [128, 32], strides = [1, 1]} : vector<128x384xf32> to vector<128x32xf32>
    %69 = vector.shape_cast %68 : vector<128x32xf32> to vector<8x16x32xf32>
    %70 = arith.truncf %69 : vector<8x16x32xf32> to vector<8x16x32xbf16>
    "tpu.trace_start"() <{level = 10 : i32, message = "bqd,bkd->bqk"}> : () -> ()
    %cst_19 = arith.constant dense<0.000000e+00> : vector<8x16x16xf32>
    %71 = tpu.matmul %64, %67, %cst_19 {dimension_numbers = #tpu.dot_dimension_numbers<[2], [2], [1], [1], [0, 0, 0, 1, 1, 1], [0], [0]>} : vector<8x16x32xbf16>, vector<8x16x32xbf16>, vector<8x16x16xf32> -> vector<8x16x16xf32>
    "tpu.trace_stop"() : () -> ()
    %cst_20 = arith.constant dense<0xFF800000> : vector<8x16xf32>
    %72 = vector.multi_reduction <maximumf>, %71, %cst_20 [2] : vector<8x16x16xf32> to vector<8x16xf32>
    %73 = vector.shape_cast %72 : vector<8x16xf32> to vector<8x16x1xf32>
    %74 = vector.broadcast %73 : vector<8x16x1xf32> to vector<8x16x16xf32>
    %75 = arith.subf %71, %74 : vector<8x16x16xf32>
    %76 = math.exp %75 : vector<8x16x16xf32>
    %cst_21 = arith.constant dense<0.000000e+00> : vector<8x16xf32>
    %77 = vector.multi_reduction <add>, %76, %cst_21 [2] : vector<8x16x16xf32> to vector<8x16xf32>
    %78 = vector.shape_cast %77 : vector<8x16xf32> to vector<8x16x1xf32>
    %79 = tpu.reciprocal %78 {approx = true} : vector<8x16x1xf32> -> vector<8x16x1xf32>
    %80 = vector.broadcast %79 : vector<8x16x1xf32> to vector<8x16x16xf32>
    %81 = arith.mulf %76, %80 : vector<8x16x16xf32>
    %82 = arith.truncf %81 : vector<8x16x16xf32> to vector<8x16x16xbf16>
    "tpu.trace_start"() <{level = 10 : i32, message = "bqk,bkd->bqd"}> : () -> ()
    %cst_22 = arith.constant dense<0.000000e+00> : vector<8x16x32xf32>
    %83 = tpu.matmul %82, %70, %cst_22 {dimension_numbers = #tpu.dot_dimension_numbers<[2], [1], [1], [2], [0, 0, 0, 1, 1, 2], [0], [0]>} : vector<8x16x16xbf16>, vector<8x16x32xbf16>, vector<8x16x32xf32> -> vector<8x16x32xf32>
    "tpu.trace_stop"() : () -> ()
    %84 = vector.shape_cast %83 : vector<8x16x32xf32> to vector<128x32xf32>
    %85 = arith.truncf %84 : vector<128x32xf32> to vector<128x32xbf16>
    %86 = vector.extract_strided_slice %37 {offsets = [0, 64], sizes = [128, 32], strides = [1, 1]} : vector<128x384xf32> to vector<128x32xf32>
    %87 = vector.shape_cast %86 : vector<128x32xf32> to vector<8x16x32xf32>
    %88 = arith.truncf %87 : vector<8x16x32xf32> to vector<8x16x32xbf16>
    %89 = vector.extract_strided_slice %37 {offsets = [0, 192], sizes = [128, 32], strides = [1, 1]} : vector<128x384xf32> to vector<128x32xf32>
    %90 = vector.shape_cast %89 : vector<128x32xf32> to vector<8x16x32xf32>
    %91 = arith.truncf %90 : vector<8x16x32xf32> to vector<8x16x32xbf16>
    %92 = vector.extract_strided_slice %37 {offsets = [0, 320], sizes = [128, 32], strides = [1, 1]} : vector<128x384xf32> to vector<128x32xf32>
    %93 = vector.shape_cast %92 : vector<128x32xf32> to vector<8x16x32xf32>
    %94 = arith.truncf %93 : vector<8x16x32xf32> to vector<8x16x32xbf16>
    "tpu.trace_start"() <{level = 10 : i32, message = "bqd,bkd->bqk"}> : () -> ()
    %cst_23 = arith.constant dense<0.000000e+00> : vector<8x16x16xf32>
    %95 = tpu.matmul %88, %91, %cst_23 {dimension_numbers = #tpu.dot_dimension_numbers<[2], [2], [1], [1], [0, 0, 0, 1, 1, 1], [0], [0]>} : vector<8x16x32xbf16>, vector<8x16x32xbf16>, vector<8x16x16xf32> -> vector<8x16x16xf32>
    "tpu.trace_stop"() : () -> ()
    %cst_24 = arith.constant dense<0xFF800000> : vector<8x16xf32>
    %96 = vector.multi_reduction <maximumf>, %95, %cst_24 [2] : vector<8x16x16xf32> to vector<8x16xf32>
    %97 = vector.shape_cast %96 : vector<8x16xf32> to vector<8x16x1xf32>
    %98 = vector.broadcast %97 : vector<8x16x1xf32> to vector<8x16x16xf32>
    %99 = arith.subf %95, %98 : vector<8x16x16xf32>
    %100 = math.exp %99 : vector<8x16x16xf32>
    %cst_25 = arith.constant dense<0.000000e+00> : vector<8x16xf32>
    %101 = vector.multi_reduction <add>, %100, %cst_25 [2] : vector<8x16x16xf32> to vector<8x16xf32>
    %102 = vector.shape_cast %101 : vector<8x16xf32> to vector<8x16x1xf32>
    %103 = tpu.reciprocal %102 {approx = true} : vector<8x16x1xf32> -> vector<8x16x1xf32>
    %104 = vector.broadcast %103 : vector<8x16x1xf32> to vector<8x16x16xf32>
    %105 = arith.mulf %100, %104 : vector<8x16x16xf32>
    %106 = arith.truncf %105 : vector<8x16x16xf32> to vector<8x16x16xbf16>
    "tpu.trace_start"() <{level = 10 : i32, message = "bqk,bkd->bqd"}> : () -> ()
    %cst_26 = arith.constant dense<0.000000e+00> : vector<8x16x32xf32>
    %107 = tpu.matmul %106, %94, %cst_26 {dimension_numbers = #tpu.dot_dimension_numbers<[2], [1], [1], [2], [0, 0, 0, 1, 1, 2], [0], [0]>} : vector<8x16x16xbf16>, vector<8x16x32xbf16>, vector<8x16x32xf32> -> vector<8x16x32xf32>
    "tpu.trace_stop"() : () -> ()
    %108 = vector.shape_cast %107 : vector<8x16x32xf32> to vector<128x32xf32>
    %109 = arith.truncf %108 : vector<128x32xf32> to vector<128x32xbf16>
    %110 = vector.extract_strided_slice %37 {offsets = [0, 96], sizes = [128, 32], strides = [1, 1]} : vector<128x384xf32> to vector<128x32xf32>
    %111 = vector.shape_cast %110 : vector<128x32xf32> to vector<8x16x32xf32>
    %112 = arith.truncf %111 : vector<8x16x32xf32> to vector<8x16x32xbf16>
    %113 = vector.extract_strided_slice %37 {offsets = [0, 224], sizes = [128, 32], strides = [1, 1]} : vector<128x384xf32> to vector<128x32xf32>
    %114 = vector.shape_cast %113 : vector<128x32xf32> to vector<8x16x32xf32>
    %115 = arith.truncf %114 : vector<8x16x32xf32> to vector<8x16x32xbf16>
    %116 = vector.extract_strided_slice %37 {offsets = [0, 352], sizes = [128, 32], strides = [1, 1]} : vector<128x384xf32> to vector<128x32xf32>
    %117 = vector.shape_cast %116 : vector<128x32xf32> to vector<8x16x32xf32>
    %118 = arith.truncf %117 : vector<8x16x32xf32> to vector<8x16x32xbf16>
    "tpu.trace_start"() <{level = 10 : i32, message = "bqd,bkd->bqk"}> : () -> ()
    %cst_27 = arith.constant dense<0.000000e+00> : vector<8x16x16xf32>
    %119 = tpu.matmul %112, %115, %cst_27 {dimension_numbers = #tpu.dot_dimension_numbers<[2], [2], [1], [1], [0, 0, 0, 1, 1, 1], [0], [0]>} : vector<8x16x32xbf16>, vector<8x16x32xbf16>, vector<8x16x16xf32> -> vector<8x16x16xf32>
    "tpu.trace_stop"() : () -> ()
    %cst_28 = arith.constant dense<0xFF800000> : vector<8x16xf32>
    %120 = vector.multi_reduction <maximumf>, %119, %cst_28 [2] : vector<8x16x16xf32> to vector<8x16xf32>
    %121 = vector.shape_cast %120 : vector<8x16xf32> to vector<8x16x1xf32>
    %122 = vector.broadcast %121 : vector<8x16x1xf32> to vector<8x16x16xf32>
    %123 = arith.subf %119, %122 : vector<8x16x16xf32>
    %124 = math.exp %123 : vector<8x16x16xf32>
    %cst_29 = arith.constant dense<0.000000e+00> : vector<8x16xf32>
    %125 = vector.multi_reduction <add>, %124, %cst_29 [2] : vector<8x16x16xf32> to vector<8x16xf32>
    %126 = vector.shape_cast %125 : vector<8x16xf32> to vector<8x16x1xf32>
    %127 = tpu.reciprocal %126 {approx = true} : vector<8x16x1xf32> -> vector<8x16x1xf32>
    %128 = vector.broadcast %127 : vector<8x16x1xf32> to vector<8x16x16xf32>
    %129 = arith.mulf %124, %128 : vector<8x16x16xf32>
    %130 = arith.truncf %129 : vector<8x16x16xf32> to vector<8x16x16xbf16>
    "tpu.trace_start"() <{level = 10 : i32, message = "bqk,bkd->bqd"}> : () -> ()
    %cst_30 = arith.constant dense<0.000000e+00> : vector<8x16x32xf32>
    %131 = tpu.matmul %130, %118, %cst_30 {dimension_numbers = #tpu.dot_dimension_numbers<[2], [1], [1], [2], [0, 0, 0, 1, 1, 2], [0], [0]>} : vector<8x16x16xbf16>, vector<8x16x32xbf16>, vector<8x16x32xf32> -> vector<8x16x32xf32>
    "tpu.trace_stop"() : () -> ()
    %132 = vector.shape_cast %131 : vector<8x16x32xf32> to vector<128x32xf32>
    %133 = arith.truncf %132 : vector<128x32xf32> to vector<128x32xbf16>
    %134 = tpu.concatenate %61, %85, %109, %133 in 1 : vector<128x32xbf16>, vector<128x32xbf16>, vector<128x32xbf16>, vector<128x32xbf16> -> vector<128x128xbf16>
    %c0_31 = arith.constant 0 : index
    %c0_32 = arith.constant 0 : index
    %135 = vector.load %arg6[%c0_31, %c0_32] : memref<128x128xbf16, #tpu.memory_space<vmem>>, vector<128x128xbf16>
    %cst_33 = arith.constant dense<0.000000e+00> : vector<128x128xf32>
    %136 = tpu.matmul %134, %135, %cst_33 {dimension_numbers = #tpu.dot_dimension_numbers<[1], [0], [0], [1], [0, 0, 1, 1], [], []>} : vector<128x128xbf16>, vector<128x128xbf16>, vector<128x128xf32> -> vector<128x128xf32>
    %c0_34 = arith.constant 0 : index
    %c0_35 = arith.constant 0 : index
    %137 = vector.load %arg7[%c0_34, %c0_35] : memref<1x128xf32, #tpu.memory_space<vmem>>, vector<1x128xf32>
    %138 = vector.shape_cast %137 : vector<1x128xf32> to vector<128xf32>
    %139 = vector.shape_cast %138 : vector<128xf32> to vector<1x128xf32>
    %140 = vector.broadcast %139 : vector<1x128xf32> to vector<128x128xf32>
    %141 = arith.addf %136, %140 : vector<128x128xf32>
    %142 = arith.addf %1, %141 : vector<128x128xf32>
    %c0_36 = arith.constant 0 : index
    %c0_37 = arith.constant 0 : index
    %143 = vector.load %arg8[%c0_36, %c0_37] : memref<1x128xf32, #tpu.memory_space<vmem>>, vector<1x128xf32>
    %144 = vector.shape_cast %143 : vector<1x128xf32> to vector<128xf32>
    %c0_38 = arith.constant 0 : index
    %c0_39 = arith.constant 0 : index
    %145 = vector.load %arg9[%c0_38, %c0_39] : memref<1x128xf32, #tpu.memory_space<vmem>>, vector<1x128xf32>
    %146 = vector.shape_cast %145 : vector<1x128xf32> to vector<128xf32>
    %cst_40 = arith.constant dense<0.000000e+00> : vector<128xf32>
    %147 = vector.multi_reduction <add>, %142, %cst_40 [1] : vector<128x128xf32> to vector<128xf32>
    %148 = vector.shape_cast %147 : vector<128xf32> to vector<128x1xf32>
    %cst_41 = arith.constant 1.280000e+02 : f32
    %149 = vector.broadcast %cst_41 : f32 to vector<128x1xf32>
    %150 = arith.divf %148, %149 : vector<128x1xf32>
    %151 = vector.broadcast %150 : vector<128x1xf32> to vector<128x128xf32>
    %152 = arith.subf %142, %151 : vector<128x128xf32>
    %153 = arith.mulf %152, %152 : vector<128x128xf32>
    %cst_42 = arith.constant dense<0.000000e+00> : vector<128xf32>
    %154 = vector.multi_reduction <add>, %153, %cst_42 [1] : vector<128x128xf32> to vector<128xf32>
    %155 = vector.shape_cast %154 : vector<128xf32> to vector<128x1xf32>
    %cst_43 = arith.constant 1.280000e+02 : f32
    %156 = vector.broadcast %cst_43 : f32 to vector<128x1xf32>
    %157 = arith.divf %155, %156 : vector<128x1xf32>
    %158 = vector.broadcast %150 : vector<128x1xf32> to vector<128x128xf32>
    %159 = arith.subf %142, %158 : vector<128x128xf32>
    %cst_44 = arith.constant 9.99999974E-6 : f32
    %160 = vector.broadcast %cst_44 : f32 to vector<128x1xf32>
    %161 = arith.addf %157, %160 : vector<128x1xf32>
    %162 = math.rsqrt %161 : vector<128x1xf32>
    %163 = vector.broadcast %162 : vector<128x1xf32> to vector<128x128xf32>
    %164 = arith.mulf %159, %163 : vector<128x128xf32>
    %165 = vector.shape_cast %144 : vector<128xf32> to vector<1x128xf32>
    %166 = vector.broadcast %165 : vector<1x128xf32> to vector<128x128xf32>
    %167 = arith.mulf %164, %166 : vector<128x128xf32>
    %168 = vector.shape_cast %146 : vector<128xf32> to vector<1x128xf32>
    %169 = vector.broadcast %168 : vector<1x128xf32> to vector<128x128xf32>
    %170 = arith.addf %167, %169 : vector<128x128xf32>
    %171 = arith.truncf %170 : vector<128x128xf32> to vector<128x128xbf16>
    %c0_45 = arith.constant 0 : index
    %c0_46 = arith.constant 0 : index
    %172 = vector.load %arg10[%c0_45, %c0_46] : memref<128x256xbf16, #tpu.memory_space<vmem>>, vector<128x256xbf16>
    %cst_47 = arith.constant dense<0.000000e+00> : vector<128x256xf32>
    %173 = tpu.matmul %171, %172, %cst_47 {dimension_numbers = #tpu.dot_dimension_numbers<[1], [0], [0], [1], [0, 0, 1, 1], [], []>} : vector<128x128xbf16>, vector<128x256xbf16>, vector<128x256xf32> -> vector<128x256xf32>
    %c0_48 = arith.constant 0 : index
    %c0_49 = arith.constant 0 : index
    %174 = vector.load %arg11[%c0_48, %c0_49] : memref<1x256xf32, #tpu.memory_space<vmem>>, vector<1x256xf32>
    %175 = vector.shape_cast %174 : vector<1x256xf32> to vector<256xf32>
    %176 = vector.shape_cast %175 : vector<256xf32> to vector<1x256xf32>
    %177 = vector.broadcast %176 : vector<1x256xf32> to vector<128x256xf32>
    %178 = arith.addf %173, %177 : vector<128x256xf32>
    %cst_50 = arith.constant 5.000000e-01 : f32
    %179 = vector.broadcast %cst_50 : f32 to vector<128x256xf32>
    %180 = arith.mulf %179, %178 : vector<128x256xf32>
    %cst_51 = arith.constant 0.707106769 : f32
    %181 = vector.broadcast %cst_51 : f32 to vector<128x256xf32>
    %182 = arith.mulf %178, %181 : vector<128x256xf32>
    %183 = math.erf %182 : vector<128x256xf32>
    %cst_52 = arith.constant 1.000000e+00 : f32
    %184 = vector.broadcast %cst_52 : f32 to vector<128x256xf32>
    %185 = arith.addf %184, %183 : vector<128x256xf32>
    %186 = arith.mulf %180, %185 : vector<128x256xf32>
    %187 = arith.truncf %186 : vector<128x256xf32> to vector<128x256xbf16>
    %c0_53 = arith.constant 0 : index
    %c0_54 = arith.constant 0 : index
    %188 = vector.load %arg12[%c0_53, %c0_54] : memref<256x128xbf16, #tpu.memory_space<vmem>>, vector<256x128xbf16>
    %cst_55 = arith.constant dense<0.000000e+00> : vector<128x128xf32>
    %189 = tpu.matmul %187, %188, %cst_55 {dimension_numbers = #tpu.dot_dimension_numbers<[1], [0], [0], [1], [0, 0, 1, 1], [], []>} : vector<128x256xbf16>, vector<256x128xbf16>, vector<128x128xf32> -> vector<128x128xf32>
    %c0_56 = arith.constant 0 : index
    %c0_57 = arith.constant 0 : index
    %190 = vector.load %arg13[%c0_56, %c0_57] : memref<1x128xf32, #tpu.memory_space<vmem>>, vector<1x128xf32>
    %191 = vector.shape_cast %190 : vector<1x128xf32> to vector<128xf32>
    %192 = vector.shape_cast %191 : vector<128xf32> to vector<1x128xf32>
    %193 = vector.broadcast %192 : vector<1x128xf32> to vector<128x128xf32>
    %194 = arith.addf %189, %193 : vector<128x128xf32>
    %195 = arith.addf %142, %194 : vector<128x128xf32>
    %196 = vector.shape_cast %195 : vector<128x128xf32> to vector<8x16x128xf32>
    %c0_58 = arith.constant 0 : index
    %c0_59 = arith.constant 0 : index
    %c0_60 = arith.constant 0 : index
    %197 = vector.load %arg14[%c0_58, %c0_59, %c0_60] : memref<8x16x128xf32, #tpu.memory_space<vmem>>, vector<8x16x128xf32>
    tpu.vector_store %arg14[%c0_58, %c0_59, %c0_60], %196 {strides = array<i32>} : memref<8x16x128xf32, #tpu.memory_space<vmem>>, vector<8x16x128xf32>,
    return
  }
  func.func @transform_0(%arg0: i32) -> (i32, i32, i32) {
    %c0_i32 = arith.constant 0 : i32
    %c0_i32_0 = arith.constant 0 : i32
    %c0_i32_1 = arith.constant 0 : i32
    return %arg0, %c0_i32, %c0_i32_0 : i32, i32, i32
  }
  func.func @transform_1(%arg0: i32) -> (i32, i32) {
    %c0_i32 = arith.constant 0 : i32
    %c0_i32_0 = arith.constant 0 : i32
    %c0_i32_1 = arith.constant 0 : i32
    return %c0_i32, %c0_i32_0 : i32, i32
  }
  func.func @transform_2(%arg0: i32) -> (i32, i32) {
    %c0_i32 = arith.constant 0 : i32
    %c0_i32_0 = arith.constant 0 : i32
    %c0_i32_1 = arith.constant 0 : i32
    return %c0_i32, %c0_i32_0 : i32, i32
  }
  func.func @transform_3(%arg0: i32) -> (i32, i32) {
    %c0_i32 = arith.constant 0 : i32
    %c0_i32_0 = arith.constant 0 : i32
    %c0_i32_1 = arith.constant 0 : i32
    return %c0_i32, %c0_i32_0 : i32, i32
  }
  func.func @transform_4(%arg0: i32) -> (i32, i32) {
    %c0_i32 = arith.constant 0 : i32
    %c0_i32_0 = arith.constant 0 : i32
    %c0_i32_1 = arith.constant 0 : i32
    return %c0_i32, %c0_i32_0 : i32, i32
  }
  func.func @transform_5(%arg0: i32) -> (i32, i32) {
    %c0_i32 = arith.constant 0 : i32
    %c0_i32_0 = arith.constant 0 : i32
    %c0_i32_1 = arith.constant 0 : i32
    return %c0_i32, %c0_i32_0 : i32, i32
  }
  func.func @transform_6(%arg0: i32) -> (i32, i32) {
    %c0_i32 = arith.constant 0 : i32
    %c0_i32_0 = arith.constant 0 : i32
    %c0_i32_1 = arith.constant 0 : i32
    return %c0_i32, %c0_i32_0 : i32, i32
  }
  func.func @transform_7(%arg0: i32) -> (i32, i32) {
    %c0_i32 = arith.constant 0 : i32
    %c0_i32_0 = arith.constant 0 : i32
    %c0_i32_1 = arith.constant 0 : i32
    return %c0_i32, %c0_i32_0 : i32, i32
  }
  func.func @transform_8(%arg0: i32) -> (i32, i32) {
    %c0_i32 = arith.constant 0 : i32
    %c0_i32_0 = arith.constant 0 : i32
    %c0_i32_1 = arith.constant 0 : i32
    return %c0_i32, %c0_i32_0 : i32, i32
  }
  func.func @transform_9(%arg0: i32) -> (i32, i32) {
    %c0_i32 = arith.constant 0 : i32
    %c0_i32_0 = arith.constant 0 : i32
    %c0_i32_1 = arith.constant 0 : i32
    return %c0_i32, %c0_i32_0 : i32, i32
  }
  func.func @transform_10(%arg0: i32) -> (i32, i32) {
    %c0_i32 = arith.constant 0 : i32
    %c0_i32_0 = arith.constant 0 : i32
    %c0_i32_1 = arith.constant 0 : i32
    return %c0_i32, %c0_i32_0 : i32, i32
  }
  func.func @transform_11(%arg0: i32) -> (i32, i32) {
    %c0_i32 = arith.constant 0 : i32
    %c0_i32_0 = arith.constant 0 : i32
    %c0_i32_1 = arith.constant 0 : i32
    return %c0_i32, %c0_i32_0 : i32, i32
  }
  func.func @transform_12(%arg0: i32) -> (i32, i32) {
    %c0_i32 = arith.constant 0 : i32
    %c0_i32_0 = arith.constant 0 : i32
    %c0_i32_1 = arith.constant 0 : i32
    return %c0_i32, %c0_i32_0 : i32, i32
  }
  func.func @transform_13(%arg0: i32) -> (i32, i32, i32) {
    %c0_i32 = arith.constant 0 : i32
    %c0_i32_0 = arith.constant 0 : i32
    %c0_i32_1 = arith.constant 0 : i32
    return %arg0, %c0_i32, %c0_i32_0 : i32, i32, i32
  }
}

module attributes {stable_mosaic.version = 11 : i64} {
  func.func @encoder_block_kernel(%arg0: i32, %arg1: memref<8x16x128xf32, #tpu.memory_space<vmem>>, %arg2: memref<1x128xf32, #tpu.memory_space<vmem>>, %arg3: memref<1x128xf32, #tpu.memory_space<vmem>>, %arg4: memref<128x384xbf16, #tpu.memory_space<vmem>>, %arg5: memref<1x384xf32, #tpu.memory_space<vmem>>, %arg6: memref<128x128xbf16, #tpu.memory_space<vmem>>, %arg7: memref<1x128xf32, #tpu.memory_space<vmem>>, %arg8: memref<1x128xf32, #tpu.memory_space<vmem>>, %arg9: memref<1x128xf32, #tpu.memory_space<vmem>>, %arg10: memref<128x256xbf16, #tpu.memory_space<vmem>>, %arg11: memref<1x256xf32, #tpu.memory_space<vmem>>, %arg12: memref<256x128xbf16, #tpu.memory_space<vmem>>, %arg13: memref<1x128xf32, #tpu.memory_space<vmem>>, %arg14: memref<8x16x128xf32, #tpu.memory_space<vmem>>) attributes {dimension_semantics = [#tpu.dimension_semantics<parallel>], iteration_bounds = array<i64: 4>, scalar_prefetch = 0 : i64, scratch_operands = 0 : i64, tpu.core_type = #tpu.core_type<tc>, window_params = [{transform_indices = @transform_0, window_bounds = array<i64: 8, 16, 128>}, {pipeline_mode = #tpu.pipeline_mode<synchronous>, transform_indices = @transform_1, window_bounds = array<i64: 1, 128>}, {pipeline_mode = #tpu.pipeline_mode<synchronous>, transform_indices = @transform_2, window_bounds = array<i64: 1, 128>}, {pipeline_mode = #tpu.pipeline_mode<synchronous>, transform_indices = @transform_3, window_bounds = array<i64: 128, 384>}, {pipeline_mode = #tpu.pipeline_mode<synchronous>, transform_indices = @transform_4, window_bounds = array<i64: 1, 384>}, {pipeline_mode = #tpu.pipeline_mode<synchronous>, transform_indices = @transform_5, window_bounds = array<i64: 128, 128>}, {pipeline_mode = #tpu.pipeline_mode<synchronous>, transform_indices = @transform_6, window_bounds = array<i64: 1, 128>}, {pipeline_mode = #tpu.pipeline_mode<synchronous>, transform_indices = @transform_7, window_bounds = array<i64: 1, 128>}, {pipeline_mode = #tpu.pipeline_mode<synchronous>, transform_indices = @transform_8, window_bounds = array<i64: 1, 128>}, {pipeline_mode = #tpu.pipeline_mode<synchronous>, transform_indices = @transform_9, window_bounds = array<i64: 128, 256>}, {pipeline_mode = #tpu.pipeline_mode<synchronous>, transform_indices = @transform_10, window_bounds = array<i64: 1, 256>}, {pipeline_mode = #tpu.pipeline_mode<synchronous>, transform_indices = @transform_11, window_bounds = array<i64: 256, 128>}, {pipeline_mode = #tpu.pipeline_mode<synchronous>, transform_indices = @transform_12, window_bounds = array<i64: 1, 128>}, {transform_indices = @transform_13, window_bounds = array<i64: 8, 16, 128>}]} {
    %c0 = arith.constant 0 : index
    %c0_0 = arith.constant 0 : index
    %c0_1 = arith.constant 0 : index
    %0 = vector.load %arg1[%c0, %c0_0, %c0_1] : memref<8x16x128xf32, #tpu.memory_space<vmem>>, vector<8x16x128xf32>
    %1 = vector.shape_cast %0 : vector<8x16x128xf32> to vector<128x128xf32>
    %c0_2 = arith.constant 0 : index
    %c0_3 = arith.constant 0 : index
    %2 = vector.load %arg2[%c0_2, %c0_3] : memref<1x128xf32, #tpu.memory_space<vmem>>, vector<1x128xf32>
    %3 = vector.shape_cast %2 : vector<1x128xf32> to vector<128xf32>
    %c0_4 = arith.constant 0 : index
    %c0_5 = arith.constant 0 : index
    %4 = vector.load %arg3[%c0_4, %c0_5] : memref<1x128xf32, #tpu.memory_space<vmem>>, vector<1x128xf32>
    %5 = vector.shape_cast %4 : vector<1x128xf32> to vector<128xf32>
    %cst = arith.constant dense<0.000000e+00> : vector<128xf32>
    %6 = vector.multi_reduction <add>, %1, %cst [1] : vector<128x128xf32> to vector<128xf32>
    %7 = vector.shape_cast %6 : vector<128xf32> to vector<128x1xf32>
    %cst_6 = arith.constant 1.280000e+02 : f32
    %8 = vector.broadcast %cst_6 : f32 to vector<128x1xf32>
    %9 = arith.divf %7, %8 : vector<128x1xf32>
    %10 = vector.broadcast %9 : vector<128x1xf32> to vector<128x128xf32>
    %11 = arith.subf %1, %10 : vector<128x128xf32>
    %12 = arith.mulf %11, %11 : vector<128x128xf32>
    %cst_7 = arith.constant dense<0.000000e+00> : vector<128xf32>
    %13 = vector.multi_reduction <add>, %12, %cst_7 [1] : vector<128x128xf32> to vector<128xf32>
    %14 = vector.shape_cast %13 : vector<128xf32> to vector<128x1xf32>
    %cst_8 = arith.constant 1.280000e+02 : f32
    %15 = vector.broadcast %cst_8 : f32 to vector<128x1xf32>
    %16 = arith.divf %14, %15 : vector<128x1xf32>
    %17 = vector.broadcast %9 : vector<128x1xf32> to vector<128x128xf32>
    %18 = arith.subf %1, %17 : vector<128x128xf32>
    %cst_9 = arith.constant 9.99999974E-6 : f32
    %19 = vector.broadcast %cst_9 : f32 to vector<128x1xf32>
    %20 = arith.addf %16, %19 : vector<128x1xf32>
    %21 = math.rsqrt %20 : vector<128x1xf32>
    %22 = vector.broadcast %21 : vector<128x1xf32> to vector<128x128xf32>
    %23 = arith.mulf %18, %22 : vector<128x128xf32>
    %24 = vector.shape_cast %3 : vector<128xf32> to vector<1x128xf32>
    %25 = vector.broadcast %24 : vector<1x128xf32> to vector<128x128xf32>
    %26 = arith.mulf %23, %25 : vector<128x128xf32>
    %27 = vector.shape_cast %5 : vector<128xf32> to vector<1x128xf32>
    %28 = vector.broadcast %27 : vector<1x128xf32> to vector<128x128xf32>
    %29 = arith.addf %26, %28 : vector<128x128xf32>
    %30 = arith.truncf %29 : vector<128x128xf32> to vector<128x128xbf16>
    %c0_10 = arith.constant 0 : index
    %c0_11 = arith.constant 0 : index
    %31 = vector.load %arg4[%c0_10, %c0_11] : memref<128x384xbf16, #tpu.memory_space<vmem>>, vector<128x384xbf16>
    %cst_12 = arith.constant dense<0.000000e+00> : vector<128x384xf32>
    %32 = tpu.matmul %30, %31, %cst_12 {dimension_numbers = #tpu.dot_dimension_numbers<[1], [0], [0], [1], [0, 0, 1, 1], [], []>} : vector<128x128xbf16>, vector<128x384xbf16>, vector<128x384xf32> -> vector<128x384xf32>
    %c0_13 = arith.constant 0 : index
    %c0_14 = arith.constant 0 : index
    %33 = vector.load %arg5[%c0_13, %c0_14] : memref<1x384xf32, #tpu.memory_space<vmem>>, vector<1x384xf32>
    %34 = vector.shape_cast %33 : vector<1x384xf32> to vector<384xf32>
    %35 = vector.shape_cast %34 : vector<384xf32> to vector<1x384xf32>
    %36 = vector.broadcast %35 : vector<1x384xf32> to vector<128x384xf32>
    %37 = arith.addf %32, %36 : vector<128x384xf32>
    %38 = vector.extract_strided_slice %37 {offsets = [0, 0], sizes = [128, 32], strides = [1, 1]} : vector<128x384xf32> to vector<128x32xf32>
    %39 = vector.shape_cast %38 : vector<128x32xf32> to vector<8x16x32xf32>
    %40 = arith.truncf %39 : vector<8x16x32xf32> to vector<8x16x32xbf16>
    %41 = vector.extract_strided_slice %37 {offsets = [0, 128], sizes = [128, 32], strides = [1, 1]} : vector<128x384xf32> to vector<128x32xf32>
    %42 = vector.shape_cast %41 : vector<128x32xf32> to vector<8x16x32xf32>
    %43 = arith.truncf %42 : vector<8x16x32xf32> to vector<8x16x32xbf16>
    %44 = vector.extract_strided_slice %37 {offsets = [0, 256], sizes = [128, 32], strides = [1, 1]} : vector<128x384xf32> to vector<128x32xf32>
    %45 = vector.shape_cast %44 : vector<128x32xf32> to vector<8x16x32xf32>
    %46 = arith.truncf %45 : vector<8x16x32xf32> to vector<8x16x32xbf16>
    "tpu.trace_start"() <{level = 10 : i32, message = "bqd,bkd->bqk"}> : () -> ()
    %cst_15 = arith.constant dense<0.000000e+00> : vector<8x16x16xf32>
    %47 = tpu.matmul %40, %43, %cst_15 {dimension_numbers = #tpu.dot_dimension_numbers<[2], [2], [1], [1], [0, 0, 0, 1, 1, 1], [0], [0]>} : vector<8x16x32xbf16>, vector<8x16x32xbf16>, vector<8x16x16xf32> -> vector<8x16x16xf32>
    "tpu.trace_stop"() : () -> ()
    %cst_16 = arith.constant dense<0xFF800000> : vector<8x16xf32>
    %48 = vector.multi_reduction <maximumf>, %47, %cst_16 [2] : vector<8x16x16xf32> to vector<8x16xf32>
    %49 = vector.shape_cast %48 : vector<8x16xf32> to vector<8x16x1xf32>
    %50 = vector.broadcast %49 : vector<8x16x1xf32> to vector<8x16x16xf32>
    %51 = arith.subf %47, %50 : vector<8x16x16xf32>
    %52 = math.exp %51 : vector<8x16x16xf32>
    %cst_17 = arith.constant dense<0.000000e+00> : vector<8x16xf32>
    %53 = vector.multi_reduction <add>, %52, %cst_17 [2] : vector<8x16x16xf32> to vector<8x16xf32>
    %54 = vector.shape_cast %53 : vector<8x16xf32> to vector<8x16x1xf32>
    %55 = tpu.reciprocal %54 {approx = true} : vector<8x16x1xf32> -> vector<8x16x1xf32>
    %56 = vector.broadcast %55 : vector<8x16x1xf32> to vector<8x16x16xf32>
    %57 = arith.mulf %52, %56 : vector<8x16x16xf32>
    %58 = arith.truncf %57 : vector<8x16x16xf32> to vector<8x16x16xbf16>
    "tpu.trace_start"() <{level = 10 : i32, message = "bqk,bkd->bqd"}> : () -> ()
    %cst_18 = arith.constant dense<0.000000e+00> : vector<8x16x32xf32>
    %59 = tpu.matmul %58, %46, %cst_18 {dimension_numbers = #tpu.dot_dimension_numbers<[2], [1], [1], [2], [0, 0, 0, 1, 1, 2], [0], [0]>} : vector<8x16x16xbf16>, vector<8x16x32xbf16>, vector<8x16x32xf32> -> vector<8x16x32xf32>
    "tpu.trace_stop"() : () -> ()
    %60 = vector.shape_cast %59 : vector<8x16x32xf32> to vector<128x32xf32>
    %61 = arith.truncf %60 : vector<128x32xf32> to vector<128x32xbf16>
    %62 = vector.extract_strided_slice %37 {offsets = [0, 32], sizes = [128, 32], strides = [1, 1]} : vector<128x384xf32> to vector<128x32xf32>
    %63 = vector.shape_cast %62 : vector<128x32xf32> to vector<8x16x32xf32>
    %64 = arith.truncf %63 : vector<8x16x32xf32> to vector<8x16x32xbf16>
    %65 = vector.extract_strided_slice %37 {offsets = [0, 160], sizes = [128, 32], strides = [1, 1]} : vector<128x384xf32> to vector<128x32xf32>
    %66 = vector.shape_cast %65 : vector<128x32xf32> to vector<8x16x32xf32>
    %67 = arith.truncf %66 : vector<8x16x32xf32> to vector<8x16x32xbf16>
    %68 = vector.extract_strided_slice %37 {offsets = [0, 288], sizes = [128, 32], strides = [1, 1]} : vector<128x384xf32> to vector<128x32xf32>
    %69 = vector.shape_cast %68 : vector<128x32xf32> to vector<8x16x32xf32>
    %70 = arith.truncf %69 : vector<8x16x32xf32> to vector<8x16x32xbf16>
    "tpu.trace_start"() <{level = 10 : i32, message = "bqd,bkd->bqk"}> : () -> ()
    %cst_19 = arith.constant dense<0.000000e+00> : vector<8x16x16xf32>
    %71 = tpu.matmul %64, %67, %cst_19 {dimension_numbers = #tpu.dot_dimension_numbers<[2], [2], [1], [1], [0, 0, 0, 1, 1, 1], [0], [0]>} : vector<8x16x32xbf16>, vector<8x16x32xbf16>, vector<8x16x16xf32> -> vector<8x16x16xf32>
    "tpu.trace_stop"() : () -> ()
    %cst_20 = arith.constant dense<0xFF800000> : vector<8x16xf32>
    %72 = vector.multi_reduction <maximumf>, %71, %cst_20 [2] : vector<8x16x16xf32> to vector<8x16xf32>
    %73 = vector.shape_cast %72 : vector<8x16xf32> to vector<8x16x1xf32>
    %74 = vector.broadcast %73 : vector<8x16x1xf32> to vector<8x16x16xf32>
    %75 = arith.subf %71, %74 : vector<8x16x16xf32>
    %76 = math.exp %75 : vector<8x16x16xf32>
    %cst_21 = arith.constant dense<0.000000e+00> : vector<8x16xf32>
    %77 = vector.multi_reduction <add>, %76, %cst_21 [2] : vector<8x16x16xf32> to vector<8x16xf32>
    %78 = vector.shape_cast %77 : vector<8x16xf32> to vector<8x16x1xf32>
    %79 = tpu.reciprocal %78 {approx = true} : vector<8x16x1xf32> -> vector<8x16x1xf32>
    %80 = vector.broadcast %79 : vector<8x16x1xf32> to vector<8x16x16xf32>
    %81 = arith.mulf %76, %80 : vector<8x16x16xf32>
    %82 = arith.truncf %81 : vector<8x16x16xf32> to vector<8x16x16xbf16>
    "tpu.trace_start"() <{level = 10 : i32, message = "bqk,bkd->bqd"}> : () -> ()
    %cst_22 = arith.constant dense<0.000000e+00> : vector<8x16x32xf32>
    %83 = tpu.matmul %82, %70, %cst_22 {dimension_numbers = #tpu.dot_dimension_numbers<[2], [1], [1], [2], [0, 0, 0, 1, 1, 2], [0], [0]>} : vector<8x16x16xbf16>, vector<8x16x32xbf16>, vector<8x16x32xf32> -> vector<8x16x32xf32>
    "tpu.trace_stop"() : () -> ()
    %84 = vector.shape_cast %83 : vector<8x16x32xf32> to vector<128x32xf32>
    %85 = arith.truncf %84 : vector<128x32xf32> to vector<128x32xbf16>
    %86 = vector.extract_strided_slice %37 {offsets = [0, 64], sizes = [128, 32], strides = [1, 1]} : vector<128x384xf32> to vector<128x32xf32>
    %87 = vector.shape_cast %86 : vector<128x32xf32> to vector<8x16x32xf32>
    %88 = arith.truncf %87 : vector<8x16x32xf32> to vector<8x16x32xbf16>
    %89 = vector.extract_strided_slice %37 {offsets = [0, 192], sizes = [128, 32], strides = [1, 1]} : vector<128x384xf32> to vector<128x32xf32>
    %90 = vector.shape_cast %89 : vector<128x32xf32> to vector<8x16x32xf32>
    %91 = arith.truncf %90 : vector<8x16x32xf32> to vector<8x16x32xbf16>
    %92 = vector.extract_strided_slice %37 {offsets = [0, 320], sizes = [128, 32], strides = [1, 1]} : vector<128x384xf32> to vector<128x32xf32>
    %93 = vector.shape_cast %92 : vector<128x32xf32> to vector<8x16x32xf32>
    %94 = arith.truncf %93 : vector<8x16x32xf32> to vector<8x16x32xbf16>
    "tpu.trace_start"() <{level = 10 : i32, message = "bqd,bkd->bqk"}> : () -> ()
    %cst_23 = arith.constant dense<0.000000e+00> : vector<8x16x16xf32>
    %95 = tpu.matmul %88, %91, %cst_23 {dimension_numbers = #tpu.dot_dimension_numbers<[2], [2], [1], [1], [0, 0, 0, 1, 1, 1], [0], [0]>} : vector<8x16x32xbf16>, vector<8x16x32xbf16>, vector<8x16x16xf32> -> vector<8x16x16xf32>
    "tpu.trace_stop"() : () -> ()
    %cst_24 = arith.constant dense<0xFF800000> : vector<8x16xf32>
    %96 = vector.multi_reduction <maximumf>, %95, %cst_24 [2] : vector<8x16x16xf32> to vector<8x16xf32>
    %97 = vector.shape_cast %96 : vector<8x16xf32> to vector<8x16x1xf32>
    %98 = vector.broadcast %97 : vector<8x16x1xf32> to vector<8x16x16xf32>
    %99 = arith.subf %95, %98 : vector<8x16x16xf32>
    %100 = math.exp %99 : vector<8x16x16xf32>
    %cst_25 = arith.constant dense<0.000000e+00> : vector<8x16xf32>
    %101 = vector.multi_reduction <add>, %100, %cst_25 [2] : vector<8x16x16xf32> to vector<8x16xf32>
    %102 = vector.shape_cast %101 : vector<8x16xf32> to vector<8x16x1xf32>
    %103 = tpu.reciprocal %102 {approx = true} : vector<8x16x1xf32> -> vector<8x16x1xf32>
    %104 = vector.broadcast %103 : vector<8x16x1xf32> to vector<8x16x16xf32>
    %105 = arith.mulf %100, %104 : vector<8x16x16xf32>
    %106 = arith.truncf %105 : vector<8x16x16xf32> to vector<8x16x16xbf16>
    "tpu.trace_start"() <{level = 10 : i32, message = "bqk,bkd->bqd"}> : () -> ()
    %cst_26 = arith.constant dense<0.000000e+00> : vector<8x16x32xf32>
    %107 = tpu.matmul %106, %94, %cst_26 {dimension_numbers = #tpu.dot_dimension_numbers<[2], [1], [1], [2], [0, 0, 0, 1, 1, 2], [0], [0]>} : vector<8x16x16xbf16>, vector<8x16x32xbf16>, vector<8x16x32xf32> -> vector<8x16x32xf32>
    "tpu.trace_stop"() : () -> ()
    %108 = vector.shape_cast %107 : vector<8x16x32xf32> to vector<128x32xf32>
    %109 = arith.truncf %108 : vector<128x32xf32> to vector<128x32xbf16>
    %110 = vector.extract_strided_slice %37 {offsets = [0, 96], sizes = [128, 32], strides = [1, 1]} : vector<128x384xf32> to vector<128x32xf32>
    %111 = vector.shape_cast %110 : vector<128x32xf32> to vector<8x16x32xf32>
    %112 = arith.truncf %111 : vector<8x16x32xf32> to vector<8x16x32xbf16>
    %113 = vector.extract_strided_slice %37 {offsets = [0, 224], sizes = [128, 32], strides = [1, 1]} : vector<128x384xf32> to vector<128x32xf32>
    %114 = vector.shape_cast %113 : vector<128x32xf32> to vector<8x16x32xf32>
    %115 = arith.truncf %114 : vector<8x16x32xf32> to vector<8x16x32xbf16>
    %116 = vector.extract_strided_slice %37 {offsets = [0, 352], sizes = [128, 32], strides = [1, 1]} : vector<128x384xf32> to vector<128x32xf32>
    %117 = vector.shape_cast %116 : vector<128x32xf32> to vector<8x16x32xf32>
    %118 = arith.truncf %117 : vector<8x16x32xf32> to vector<8x16x32xbf16>
    "tpu.trace_start"() <{level = 10 : i32, message = "bqd,bkd->bqk"}> : () -> ()
    %cst_27 = arith.constant dense<0.000000e+00> : vector<8x16x16xf32>
    %119 = tpu.matmul %112, %115, %cst_27 {dimension_numbers = #tpu.dot_dimension_numbers<[2], [2], [1], [1], [0, 0, 0, 1, 1, 1], [0], [0]>} : vector<8x16x32xbf16>, vector<8x16x32xbf16>, vector<8x16x16xf32> -> vector<8x16x16xf32>
    "tpu.trace_stop"() : () -> ()
    %cst_28 = arith.constant dense<0xFF800000> : vector<8x16xf32>
    %120 = vector.multi_reduction <maximumf>, %119, %cst_28 [2] : vector<8x16x16xf32> to vector<8x16xf32>
    %121 = vector.shape_cast %120 : vector<8x16xf32> to vector<8x16x1xf32>
    %122 = vector.broadcast %121 : vector<8x16x1xf32> to vector<8x16x16xf32>
    %123 = arith.subf %119, %122 : vector<8x16x16xf32>
    %124 = math.exp %123 : vector<8x16x16xf32>
    %cst_29 = arith.constant dense<0.000000e+00> : vector<8x16xf32>
    %125 = vector.multi_reduction <add>, %124, %cst_29 [2] : vector<8x16x16xf32> to vector<8x16xf32>
    %126 = vector.shape_cast %125 : vector<8x16xf32> to vector<8x16x1xf32>
    %127 = tpu.reciprocal %126 {approx = true} : vector<8x16x1xf32> -> vector<8x16x1xf32>
    %128 = vector.broadcast %127 : vector<8x16x1xf32> to vector<8x16x16xf32>
    %129 = arith.mulf %124, %128 : vector<8x16x16xf32>
    %130 = arith.truncf %129 : vector<8x16x16xf32> to vector<8x16x16xbf16>
    "tpu.trace_start"() <{level = 10 : i32, message = "bqk,bkd->bqd"}> : () -> ()
    %cst_30 = arith.constant dense<0.000000e+00> : vector<8x16x32xf32>
    %131 = tpu.matmul %130, %118, %cst_30 {dimension_numbers = #tpu.dot_dimension_numbers<[2], [1], [1], [2], [0, 0, 0, 1, 1, 2], [0], [0]>} : vector<8x16x16xbf16>, vector<8x16x32xbf16>, vector<8x16x32xf32> -> vector<8x16x32xf32>
    "tpu.trace_stop"() : () -> ()
    %132 = vector.shape_cast %131 : vector<8x16x32xf32> to vector<128x32xf32>
    %133 = arith.truncf %132 : vector<128x32xf32> to vector<128x32xbf16>
    %134 = tpu.concatenate %61, %85, %109, %133 in 1 : vector<128x32xbf16>, vector<128x32xbf16>, vector<128x32xbf16>, vector<128x32xbf16> -> vector<128x128xbf16>
    %c0_31 = arith.constant 0 : index
    %c0_32 = arith.constant 0 : index
    %135 = vector.load %arg6[%c0_31, %c0_32] : memref<128x128xbf16, #tpu.memory_space<vmem>>, vector<128x128xbf16>
    %cst_33 = arith.constant dense<0.000000e+00> : vector<128x128xf32>
    %136 = tpu.matmul %134, %135, %cst_33 {dimension_numbers = #tpu.dot_dimension_numbers<[1], [0], [0], [1], [0, 0, 1, 1], [], []>} : vector<128x128xbf16>, vector<128x128xbf16>, vector<128x128xf32> -> vector<128x128xf32>
    %c0_34 = arith.constant 0 : index
    %c0_35 = arith.constant 0 : index
    %137 = vector.load %arg7[%c0_34, %c0_35] : memref<1x128xf32, #tpu.memory_space<vmem>>, vector<1x128xf32>
    %138 = vector.shape_cast %137 : vector<1x128xf32> to vector<128xf32>
    %139 = vector.shape_cast %138 : vector<128xf32> to vector<1x128xf32>
    %140 = vector.broadcast %139 : vector<1x128xf32> to vector<128x128xf32>
    %141 = arith.addf %136, %140 : vector<128x128xf32>
    %142 = arith.addf %1, %141 : vector<128x128xf32>
    %c0_36 = arith.constant 0 : index
    %c0_37 = arith.constant 0 : index
    %143 = vector.load %arg8[%c0_36, %c0_37] : memref<1x128xf32, #tpu.memory_space<vmem>>, vector<1x128xf32>
    %144 = vector.shape_cast %143 : vector<1x128xf32> to vector<128xf32>
    %c0_38 = arith.constant 0 : index
    %c0_39 = arith.constant 0 : index
    %145 = vector.load %arg9[%c0_38, %c0_39] : memref<1x128xf32, #tpu.memory_space<vmem>>, vector<1x128xf32>
    %146 = vector.shape_cast %145 : vector<1x128xf32> to vector<128xf32>
    %cst_40 = arith.constant dense<0.000000e+00> : vector<128xf32>
    %147 = vector.multi_reduction <add>, %142, %cst_40 [1] : vector<128x128xf32> to vector<128xf32>
    %148 = vector.shape_cast %147 : vector<128xf32> to vector<128x1xf32>
    %cst_41 = arith.constant 1.280000e+02 : f32
    %149 = vector.broadcast %cst_41 : f32 to vector<128x1xf32>
    %150 = arith.divf %148, %149 : vector<128x1xf32>
    %151 = vector.broadcast %150 : vector<128x1xf32> to vector<128x128xf32>
    %152 = arith.subf %142, %151 : vector<128x128xf32>
    %153 = arith.mulf %152, %152 : vector<128x128xf32>
    %cst_42 = arith.constant dense<0.000000e+00> : vector<128xf32>
    %154 = vector.multi_reduction <add>, %153, %cst_42 [1] : vector<128x128xf32> to vector<128xf32>
    %155 = vector.shape_cast %154 : vector<128xf32> to vector<128x1xf32>
    %cst_43 = arith.constant 1.280000e+02 : f32
    %156 = vector.broadcast %cst_43 : f32 to vector<128x1xf32>
    %157 = arith.divf %155, %156 : vector<128x1xf32>
    %158 = vector.broadcast %150 : vector<128x1xf32> to vector<128x128xf32>
    %159 = arith.subf %142, %158 : vector<128x128xf32>
    %cst_44 = arith.constant 9.99999974E-6 : f32
    %160 = vector.broadcast %cst_44 : f32 to vector<128x1xf32>
    %161 = arith.addf %157, %160 : vector<128x1xf32>
    %162 = math.rsqrt %161 : vector<128x1xf32>
    %163 = vector.broadcast %162 : vector<128x1xf32> to vector<128x128xf32>
    %164 = arith.mulf %159, %163 : vector<128x128xf32>
    %165 = vector.shape_cast %144 : vector<128xf32> to vector<1x128xf32>
    %166 = vector.broadcast %165 : vector<1x128xf32> to vector<128x128xf32>
    %167 = arith.mulf %164, %166 : vector<128x128xf32>
    %168 = vector.shape_cast %146 : vector<128xf32> to vector<1x128xf32>
    %169 = vector.broadcast %168 : vector<1x128xf32> to vector<128x128xf32>
    %170 = arith.addf %167, %169 : vector<128x128xf32>
    %171 = arith.truncf %170 : vector<128x128xf32> to vector<128x128xbf16>
    %c0_45 = arith.constant 0 : index
    %c0_46 = arith.constant 0 : index
    %172 = vector.load %arg10[%c0_45, %c0_46] : memref<128x256xbf16, #tpu.memory_space<vmem>>, vector<128x256xbf16>
    %cst_47 = arith.constant dense<0.000000e+00> : vector<128x256xf32>
    %173 = tpu.matmul %171, %172, %cst_47 {dimension_numbers = #tpu.dot_dimension_numbers<[1], [0], [0], [1], [0, 0, 1, 1], [], []>} : vector<128x128xbf16>, vector<128x256xbf16>, vector<128x256xf32> -> vector<128x256xf32>
    %c0_48 = arith.constant 0 : index
    %c0_49 = arith.constant 0 : index
    %174 = vector.load %arg11[%c0_48, %c0_49] : memref<1x256xf32, #tpu.memory_space<vmem>>, vector<1x256xf32>
    %175 = vector.shape_cast %174 : vector<1x256xf32> to vector<256xf32>
    %176 = vector.shape_cast %175 : vector<256xf32> to vector<1x256xf32>
    %177 = vector.broadcast %176 : vector<1x256xf32> to vector<128x256xf32>
    %178 = arith.addf %173, %177 : vector<128x256xf32>
    %cst_50 = arith.constant 5.000000e-01 : f32
    %179 = vector.broadcast %cst_50 : f32 to vector<128x256xf32>
    %180 = arith.mulf %179, %178 : vector<128x256xf32>
    %cst_51 = arith.constant 0.707106769 : f32
    %181 = vector.broadcast %cst_51 : f32 to vector<128x256xf32>
    %182 = arith.mulf %178, %181 : vector<128x256xf32>
    %183 = math.erf %182 : vector<128x256xf32>
    %cst_52 = arith.constant 1.000000e+00 : f32
    %184 = vector.broadcast %cst_52 : f32 to vector<128x256xf32>
    %185 = arith.addf %184, %183 : vector<128x256xf32>
    %186 = arith.mulf %180, %185 : vector<128x256xf32>
    %187 = arith.truncf %186 : vector<128x256xf32> to vector<128x256xbf16>
    %c0_53 = arith.constant 0 : index
    %c0_54 = arith.constant 0 : index
    %188 = vector.load %arg12[%c0_53, %c0_54] : memref<256x128xbf16, #tpu.memory_space<vmem>>, vector<256x128xbf16>
    %cst_55 = arith.constant dense<0.000000e+00> : vector<128x128xf32>
    %189 = tpu.matmul %187, %188, %cst_55 {dimension_numbers = #tpu.dot_dimension_numbers<[1], [0], [0], [1], [0, 0, 1, 1], [], []>} : vector<128x256xbf16>, vector<256x128xbf16>, vector<128x128xf32> -> vector<128x128xf32>
    %c0_56 = arith.constant 0 : index
    %c0_57 = arith.constant 0 : index
    %190 = vector.load %arg13[%c0_56, %c0_57] : memref<1x128xf32, #tpu.memory_space<vmem>>, vector<1x128xf32>
    %191 = vector.shape_cast %190 : vector<1x128xf32> to vector<128xf32>
    %192 = vector.shape_cast %191 : vector<128xf32> to vector<1x128xf32>
    %193 = vector.broadcast %192 : vector<1x128xf32> to vector<128x128xf32>
    %194 = arith.addf %189, %193 : vector<128x128xf32>
    %195 = arith.addf %142, %194 : vector<128x128xf32>
    %196 = vector.shape_cast %195 : vector<128x128xf32> to vector<8x16x128xf32>
    %c0_58 = arith.constant 0 : index
    %c0_59 = arith.constant 0 : index
    %c0_60 = arith.constant 0 : index
    %197 = vector.load %arg14[%c0_58, %c0_59, %c0_60] : memref<8x16x128xf32, #tpu.memory_space<vmem>>, vector<8x16x128xf32>
    tpu.vector_store %arg14[%c0_58, %c0_59, %c0_60], %196 {strides = array<i32>} : memref<8x16x128xf32, #tpu.memory_space<vmem>>, vector<8x16x128xf32>,
    return
  }
  func.func @transform_0(%arg0: i32) -> (i32, i32, i32) {
    %c0_i32 = arith.constant 0 : i32
    %c0_i32_0 = arith.constant 0 : i32
    %c0_i32_1 = arith.constant 0 : i32
    return %arg0, %c0_i32, %c0_i32_0 : i32, i32, i32
  }
  func.func @transform_1(%arg0: i32) -> (i32, i32) {
    %c0_i32 = arith.constant 0 : i32
    %c0_i32_0 = arith.constant 0 : i32
    %c0_i32_1 = arith.constant 0 : i32
    return %c0_i32, %c0_i32_0 : i32, i32
  }
  func.func @transform_2(%arg0: i32) -> (i32, i32) {
    %c0_i32 = arith.constant 0 : i32
    %c0_i32_0 = arith.constant 0 : i32
    %c0_i32_1 = arith.constant 0 : i32
    return %c0_i32, %c0_i32_0 : i32, i32
  }
  func.func @transform_3(%arg0: i32) -> (i32, i32) {
    %c0_i32 = arith.constant 0 : i32
    %c0_i32_0 = arith.constant 0 : i32
    %c0_i32_1 = arith.constant 0 : i32
    return %c0_i32, %c0_i32_0 : i32, i32
  }
  func.func @transform_4(%arg0: i32) -> (i32, i32) {
    %c0_i32 = arith.constant 0 : i32
    %c0_i32_0 = arith.constant 0 : i32
    %c0_i32_1 = arith.constant 0 : i32
    return %c0_i32, %c0_i32_0 : i32, i32
  }
  func.func @transform_5(%arg0: i32) -> (i32, i32) {
    %c0_i32 = arith.constant 0 : i32
    %c0_i32_0 = arith.constant 0 : i32
    %c0_i32_1 = arith.constant 0 : i32
    return %c0_i32, %c0_i32_0 : i32, i32
  }
  func.func @transform_6(%arg0: i32) -> (i32, i32) {
    %c0_i32 = arith.constant 0 : i32
    %c0_i32_0 = arith.constant 0 : i32
    %c0_i32_1 = arith.constant 0 : i32
    return %c0_i32, %c0_i32_0 : i32, i32
  }
  func.func @transform_7(%arg0: i32) -> (i32, i32) {
    %c0_i32 = arith.constant 0 : i32
    %c0_i32_0 = arith.constant 0 : i32
    %c0_i32_1 = arith.constant 0 : i32
    return %c0_i32, %c0_i32_0 : i32, i32
  }
  func.func @transform_8(%arg0: i32) -> (i32, i32) {
    %c0_i32 = arith.constant 0 : i32
    %c0_i32_0 = arith.constant 0 : i32
    %c0_i32_1 = arith.constant 0 : i32
    return %c0_i32, %c0_i32_0 : i32, i32
  }
  func.func @transform_9(%arg0: i32) -> (i32, i32) {
    %c0_i32 = arith.constant 0 : i32
    %c0_i32_0 = arith.constant 0 : i32
    %c0_i32_1 = arith.constant 0 : i32
    return %c0_i32, %c0_i32_0 : i32, i32
  }
  func.func @transform_10(%arg0: i32) -> (i32, i32) {
    %c0_i32 = arith.constant 0 : i32
    %c0_i32_0 = arith.constant 0 : i32
    %c0_i32_1 = arith.constant 0 : i32
    return %c0_i32, %c0_i32_0 : i32, i32
  }
  func.func @transform_11(%arg0: i32) -> (i32, i32) {
    %c0_i32 = arith.constant 0 : i32
    %c0_i32_0 = arith.constant 0 : i32
    %c0_i32_1 = arith.constant 0 : i32
    return %c0_i32, %c0_i32_0 : i32, i32
  }
  func.func @transform_12(%arg0: i32) -> (i32, i32) {
    %c0_i32 = arith.constant 0 : i32
    %c0_i32_0 = arith.constant 0 : i32
    %c0_i32_1 = arith.constant 0 : i32
    return %c0_i32, %c0_i32_0 : i32, i32
  }
  func.func @transform_13(%arg0: i32) -> (i32, i32, i32) {
    %c0_i32 = arith.constant 0 : i32
    %c0_i32_0 = arith.constant 0 : i32
    %c0_i32_1 = arith.constant 0 : i32
    return %arg0, %c0_i32, %c0_i32_0 : i32, i32, i32
  }
}

</mosaic_0001>

<bundles_post_ra>
// kernel: tpu_custom_call.1
= control target key start
LH: loop header
LB: loop body
LE: loop exit
PB: predicated region body
PF: predicated region fallthrough
CT: control target
= control target key end

     0   :  { %s10436_s0 = inlined_call_operand.hbm [shape: f32[32,16,128], index: 0, kind: input, shape index: {}]   ;;  %s10437_s1 = inlined_call_operand.vmem [shape: f32[1,128], index: 1, kind: input, shape index: {}]   ;;  %s10438_s2 = inlined_call_operand.vmem [shape: f32[1,128], index: 2, kind: input, shape index: {}]   ;;  %s10439_s3 = inlined_call_operand.hbm [shape: bf16[128,384], index: 3, kind: input, shape index: {}]   ;;  %s10440_s4 = inlined_call_operand.vmem [shape: f32[1,384], index: 4, kind: input, shape index: {}]   ;;  %s10441_s5 = inlined_call_operand.hbm [shape: bf16[128,128], index: 5, kind: input, shape index: {}]   ;;  %s10442_s6 = inlined_call_operand.vmem [shape: f32[1,128], index: 6, kind: input, shape index: {}]   ;;  %s10443_s7 = inlined_call_operand.vmem [shape: f32[1,128], index: 7, kind: input, shape index: {}]   ;;  %s10444_s8 = inlined_call_operand.vmem [shape: f32[1,128], index: 8, kind: input, shape index: {}]   ;;  %s10445_s9 = inlined_call_operand.hbm [shape: bf16[128,256], index: 9, kind: input, shape index: {}]   ;;  %s10446_s10 = inlined_call_operand.vmem [shape: f32[1,256], index: 10, kind: input, shape index: {}]   ;;  %s10447_s11 = inlined_call_operand.hbm [shape: bf16[256,128], index: 11, kind: input, shape index: {}]   ;;  %s10448_s12 = inlined_call_operand.vmem [shape: f32[1,128], index: 12, kind: input, shape index: {}]   ;;  %s10449_s13 = inlined_call_operand.hbm [shape: f32[32,16,128], index: 13, kind: output, shape index: {}]  }
   0x1   :  { %10491 = sst [smem:[#allocation44_spill]] %s10439_s3 }
   0x2   :  { %10492 = sst [smem:[#allocation45_spill]] %s10444_s8 }
   0x3   :  { %10493 = sst [smem:[#allocation46_spill]] %s10446_s10 }
   0x4   :  { %10494 = sst [smem:[#allocation47_spill]] %s10448_s12 }
   0x5   :  { %10495 = sst [smem:[#allocation48_spill]] %s10449_s13 }
   0x6   :  { %18 = vsyncpa [#allocation3], 0 }
   0x7   :  { %20 = vsyncpa [#allocation3 + $0x1], 0 }
   0x8   :  { %21 = vsyncpa [#allocation6], 0 }
   0x9   :  { %22 = vsyncpa [#allocation9], 0 }
   0xa   :  { %23 = vsyncpa [#allocation4], 0 }
   0xb   :  { %25 = vsyncpa [#allocation4 + $0x1], 0  ;;  %s8131_s25 = smov 0   ;;  %s8133_s26 = smov 0  }
   0xc   :  { %s8135_s27 = smov 0   ;;  %s8137_s28 = smov 0  }
   0xd LB: > { %10496 = sst [smem:[#allocation16_spill]] %s8027_s25  ;;  %s8152_s29 = sadd.s32 4294967295, %s8039_s28   ;;  %s8039_s28 = sphi %s8137_s28, %s10601_s28   ;;  %s8035_s27 = sphi %s8135_s27, %s10600_s27   ;;  %s8031_s26 = sphi %s8133_s26, %s10599_s26   ;;  %s8027_s25 = sphi %s8131_s25, %s10598_s25  }
   0xe   : > { %s6392_s30 = sadd.s32 4294967294, %s8039_s28   ;;  %p51_p0 = scmp.ne.s32.totalorder %s8031_s26, %s8027_s25 }
   0xf   : > { %p10452_p1 = scmp.eq.s32.totalorder %s8152_s29, 0  ;;  %p333_p3 = scmp.eq.s32.totalorder %s6392_s30, 3 }
  0x10   : > { %p6393_p5 = scmp.ge.s32.totalorder %s8039_s28, 1  ;;  %p340_p7 = scmp.lt.s32.totalorder %s8039_s28, 5 }
  0x11   : > { %p8161_p4 = por %p10452_p1, %p51_p0  ;;  %p8166_p6 = por %p333_p3, %p51_p0 }
  0x12   : > { %p8171_p8 = pnand %p6393_p5, %p340_p7  ;;  %s8041_s17 = smov [#allocation5]  }
  0x13   : > { %s10497_s14 = scalar_select %p8161_p4, 1, 0 }
  0x14   : > { %s10498_s15 = scalar_select %p8166_p6, 1, 0 }
  0x15   : > { %s10500_s16 = scalar_select %p8171_p8, 1, 0 }
  0x16   : > { %10499 = sst [smem:[#allocation17_spill]] %s10498_s15  ;;  %s358_s18 = sshll.u32 %s8041_s17, 4  ;;  %s359_s18 = int_to_ptr.vmem [resolvable:$true] %s358_s18 }
  0x17   : > { %p7262_p9 = pneg %p8171_p8  ;;  %s8042_s20 = smov [#allocation8]  }
  0x18   : > { %s396_s21 = sshll.u32 %s8042_s20, 4  ;;  %s10502_s3 = sld [smem:[#allocation44_spill]]  ;;  %s8183_s21 = int_to_ptr.vmem [resolvable:$true] %s396_s21 }
  0x19   : > { %p8179_p10 = pnand %p7262_p9, %p10452_p1 }
  0x1b   : > { %p8193_p12 = pneg %p8179_p10 }
  0x1e   : > { %s7823_s24 = scalar_lea.hbm %s10502_s3, 3072 }
  0x1f   : > { %p7824_p11 = scmp.ne.s32.totalorder %s10502_s3, %s7823_s24  ;;  %p7830_p3 = scmp.lt.u32.totalorder %s7823_s24, %s10502_s3 }
  0x21   : > { %p7826_p13 = pnand %p8193_p12, %p7824_p11 }
  0x23   : > { %p7827_p0 = pneg %p7826_p13 }
  0x25   : > { %p7832_p5 = pnand %p7830_p3, %p7827_p0 }
  0x27   : > { %7835 = shalt.err (!%p7832_p5)
}
  0x28   : > { %s7836_s22 = scalar_lea.vmem %s359_s18, 3072  ;;  %p7844_p2 = scmp.lt.s32.totalorder %s359_s18, %s359_s18 }
  0x29   : > { %p7837_p7 = scmp.ne.s32.totalorder %s359_s18, %s7836_s22  ;;  %p7845_p6 = scmp.lt.s32.totalorder %s7836_s22, %s7836_s22 }
  0x2b   : > { %p7839_p9 = pnand %p7837_p7, %p8193_p12  ;;  %p7846_p4 = por %p7845_p6, %p7844_p2 }
  0x2d   : > { %p7840_p1 = pneg %p7839_p9 }
  0x2f   : > { %p7847_p8 = pnand %p7846_p4, %p7840_p1 }
  0x31   : > { %7850 = shalt.err (!%p7847_p8)
}
  0x32   : > { %s8043_s15 = smov 192   ;;  %s8044_s23 = smov 12  }
  0x33   : > { %7265 = dma.hbm_to_vmem [thread:$0]  (!%p8179_p10), %s10502_s3, 3072, %s359_s18, [#allocation6], %s8043_s15, %s8043_s15, %s8044_s23  }
  0x34   : > { %s7851_s13 = scalar_lea.hbm %s10445_s9, 2048 }
  0x35   : > { %p7852_p11 = scmp.ne.s32.totalorder %s10445_s9, %s7851_s13  ;;  %p7858_p4 = scmp.lt.u32.totalorder %s7851_s13, %s10445_s9 }
  0x37   : > { %p7854_p1 = pnand %p7852_p11, %p8193_p12 }
  0x39   : > { %p7855_p2 = pneg %p7854_p1 }
  0x3b   : > { %p7860_p6 = pnand %p7858_p4, %p7855_p2 }
  0x3d   : > { %7863 = shalt.err (!%p7860_p6)
}
  0x3e   : > { %s7864_s18 = scalar_lea.vmem %s8183_s21, 2048  ;;  %p7872_p3 = scmp.lt.s32.totalorder %s8183_s21, %s8183_s21 }
  0x3f   : > { %p7865_p8 = scmp.ne.s32.totalorder %s8183_s21, %s7864_s18  ;;  %p7873_p5 = scmp.lt.s32.totalorder %s7864_s18, %s7864_s18 }
  0x41   : > { %p7867_p13 = pnand %p7865_p8, %p8193_p12  ;;  %p7874_p7 = por %p7873_p5, %p7872_p3 }
  0x43   : > { %p7868_p0 = pneg %p7867_p13 }
  0x45   : > { %p7875_p9 = pnand %p7874_p7, %p7868_p0 }
  0x47   : > { %7878 = shalt.err (!%p7875_p9)
}
  0x48   : > { %s10456_s10 = smov 128   ;;  %s10457_s8 = smov 8  }
  0x49   : > { %7271 = dma.hbm_to_vmem [thread:$0]  (!%p8179_p10), %s10445_s9, 2048, %s8183_s21, [#allocation9], %s10456_s10, %s10456_s10, %s10457_s8  }
  0x4a   : > { %s8047_s15 = smov [#allocation7]   ;;  %s7879_s30 = scalar_lea.hbm %s10441_s5, 1024 }
  0x4b   : > { %s374_s23 = sshll.u32 %s8047_s15, 4  ;;  %p7880_p11 = scmp.ne.s32.totalorder %s10441_s5, %s7879_s30  ;;  %s375_s23 = int_to_ptr.vmem [resolvable:$true] %s374_s23 }
  0x4c   : > { %p7886_p4 = scmp.lt.u32.totalorder %s7879_s30, %s10441_s5 }
  0x4d   : > { %p7882_p1 = pnand %p7880_p11, %p8193_p12 }
  0x4f   : > { %p7883_p2 = pneg %p7882_p1 }
  0x51   : > { %p7888_p6 = pnand %p7886_p4, %p7883_p2 }
  0x53   : > { %7891 = shalt.err (!%p7888_p6)
}
  0x54   : > { %s7892_s21 = scalar_lea.vmem %s375_s23, 1024  ;;  %p7900_p3 = scmp.lt.s32.totalorder %s375_s23, %s375_s23 }
  0x55   : > { %p7893_p8 = scmp.ne.s32.totalorder %s375_s23, %s7892_s21  ;;  %p7901_p5 = scmp.lt.s32.totalorder %s7892_s21, %s7892_s21 }
  0x57   : > { %p7895_p13 = pnand %p7893_p8, %p8193_p12  ;;  %p7902_p7 = por %p7901_p5, %p7900_p3 }
  0x59   : > { %p7896_p0 = pneg %p7895_p13 }
  0x5b   : > { %p7903_p9 = pnand %p7902_p7, %p7896_p0 }
  0x5d   : > { %7906 = shalt.err (!%p7903_p9)
}
  0x5e   : > { %s8048_s12 = smov 64   ;;  %s8049_s13 = smov 4  }
  0x5f   : > { %7268 = dma.hbm_to_vmem [thread:$0]  (!%p8179_p10), %s10441_s5, 1024, %s375_s23, [#allocation6], %s8048_s12, %s8048_s12, %s8049_s13  }
  0x60   : > { %s8050_s25 = smov [#allocation10]   ;;  %s7907_s22 = scalar_lea.hbm %s10447_s11, 2048 }
  0x61   : > { %s412_s24 = sshll.u32 %s8050_s25, 4  ;;  %p7908_p11 = scmp.ne.s32.totalorder %s10447_s11, %s7907_s22  ;;  %s413_s24 = int_to_ptr.vmem [resolvable:$true] %s412_s24 }
  0x62   : > { %p7914_p4 = scmp.lt.u32.totalorder %s7907_s22, %s10447_s11 }
  0x63   : > { %p7910_p1 = pnand %p7908_p11, %p8193_p12 }
  0x65   : > { %p7911_p2 = pneg %p7910_p1 }
  0x67   : > { %p7916_p6 = pnand %p7914_p4, %p7911_p2 }
  0x69   : > { %7919 = shalt.err (!%p7916_p6)
}
  0x6a   : > { %s7920_s23 = scalar_lea.vmem %s413_s24, 2048  ;;  %p7928_p3 = scmp.lt.s32.totalorder %s413_s24, %s413_s24 }
  0x6b   : > { %p7921_p8 = scmp.ne.s32.totalorder %s413_s24, %s7920_s23  ;;  %p7929_p5 = scmp.lt.s32.totalorder %s7920_s23, %s7920_s23 }
  0x6d   : > { %p7923_p13 = pnand %p7921_p8, %p8193_p12  ;;  %p7930_p7 = por %p7929_p5, %p7928_p3 }
  0x6f   : > { %p7924_p0 = pneg %p7923_p13 }
  0x71   : > { %p7931_p9 = pnand %p7930_p7, %p7924_p0 }
  0x73   : > { %7934 = shalt.err (!%p7931_p9)
}
  0x74   : > { %7274 = dma.hbm_to_vmem [thread:$0]  (!%p8179_p10), %s10447_s11, 2048, %s413_s24, [#allocation9], %s8048_s12, %s8048_s12, %s8049_s13  }
  0x75   : > { %s8272_s17 = sadd.s32 1, %s8039_s28   ;;  %s38_s10 = sadd.s32 1, %s8035_s27 }
  0x76   : > { %s35_s19 = ssub.s32 %s8039_s28, %s8272_s17  ;;  %p45_p12 = scmp.ne.s32.totalorder %s8035_s27, %s8031_s26 }
  0x77   : > { %p36_p11 = scmp.eq.s32.totalorder %s35_s19, 0  ;;  %p46_p1 = scmp.eq.s32.totalorder %s8039_s28, 0 }
  0x78   : > { %p10504_p2 = scmp.eq.s32.totalorder %s8152_s29, 3  ;;  %p7287_p6 = scmp.lt.s32.totalorder %s8039_s28, 4 }
  0x79   : > { %s8288_s25 = scalar_select %p36_p11, %s8035_s27, %s38_s10  }
  0x7a   : > { %p8282_p4 = por %p10504_p2, %p45_p12  ;;  %p47_p8 = por %p46_p1, %p45_p12 }
  0x7b   : > { %s429_s30 = sand.u32 1, %s8035_s27   ;;  %s6551_s12 = sshll.u32 %s8039_s28, 11 }
  0x7c   : > { %s6399_s20 = sshll.u32 %s429_s30, 7  ;;  %s8295_s22 = scalar_lea.hbm %s10436_s0, %s6551_s12 }
  0x7d   : > { %s433_s18 = scalar_lea.vmem [#allocation2], %s6399_s20  ;;  %p8299_p10 = pnand %p7287_p6, %p47_p8 }
  0x7e   : > { %s441_s21 = sshll.u32 %s433_s18, 4  ;;  %s8303_s3 = scalar_lea.sflag [#allocation3], %s429_s30  ;;  %s8297_s21 = int_to_ptr.vmem [resolvable:$true] %s441_s21 }
  0x7f   : > { %s7935_s15 = scalar_lea.hbm %s8295_s22, 2048  ;;  %p7937_p0 = pneg %p8299_p10 }
  0x80   : > { %p7936_p13 = scmp.ne.s32.totalorder %s8295_s22, %s7935_s15  ;;  %s7940_s20 = scalar_lea.hbm %s10436_s0, 8192 }
  0x81   : > { %p7941_p7 = scmp.lt.u32.totalorder %s8295_s22, %s10436_s0  ;;  %p7942_p9 = scmp.lt.u32.totalorder %s7940_s20, %s7935_s15 }
  0x82   : > { %p7938_p3 = pnand %p7937_p0, %p7936_p13  ;;  %p7944_p11 = scmp.lt.u32.totalorder %s7935_s15, %s8295_s22 }
  0x83   : > { %p7943_p12 = por %p7942_p9, %p7941_p7 }
  0x84   : > { %p7939_p5 = pneg %p7938_p3 }
  0x85   : > { %p7945_p1 = por %p7944_p11, %p7943_p12 }
  0x87   : > { %p7946_p2 = pnand %p7945_p1, %p7939_p5 }
  0x89   : > { %7949 = shalt.err (!%p7946_p2)
}
  0x8a   : > { %s7950_s30 = scalar_lea.vmem %s8297_s21, 2048  ;;  %s8051_s24 = smov [#allocation2]  }
  0x8b   : > { %p7951_p6 = scmp.ne.s32.totalorder %s8297_s21, %s7950_s30  ;;  %s7955_s18 = sshll.u32 %s8051_s24, 4  ;;  %s7956_s18 = int_to_ptr.vmem [resolvable:$false] %s7955_s18 }
  0x8c   : > { %s7957_s10 = scalar_lea.vmem %s7956_s18, 4096  ;;  %p7958_p3 = scmp.lt.s32.totalorder %s8297_s21, %s7956_s18 }
  0x8d   : > { %p7953_p8 = pnand %p7951_p6, %p7937_p0  ;;  %p7959_p7 = scmp.lt.s32.totalorder %s7957_s10, %s7950_s30 }
  0x8f   : > { %p7954_p13 = pneg %p7953_p8  ;;  %p7960_p9 = por %p7959_p7, %p7958_p3 }
  0x91   : > { %p7961_p12 = pnand %p7960_p9, %p7954_p13 }
  0x93   : > { %7964 = shalt.err (!%p7961_p12)
}
  0x94   : > { %s10507_s15 = smov 8   ;;  %s10508_s19 = smov 128  }
  0x95   : > { %7278 = dma.hbm_to_vmem [thread:$0]  (!%p8299_p10), %s8295_s22, 2048, %s8297_s21, %s8303_s3, %s10508_s19, %s10508_s19, %s10507_s15  }
  0x96   : > { %p10509_p0 = scmp.ne.s32.totalorder %s10500_s16, 0 }
  0x98   : > { %453 = sbr.rel (%p10509_p0) target bundleno = 4642 (0x1222), region = 72 }
  0x9f   : > { %s8337_s20 = sand.u32 1, %s8031_s26   ;;  %p10510_p5 = scmp.ne.s32.totalorder %s10497_s14, 0 }
  0xa0   : > { %s6404_s12 = sshll.u32 %s8337_s20, 7  ;;  %s456_s13 = scalar_lea.sflag [#allocation3], %s8337_s20 }
  0xa1   : > { %s8343_s23 = scalar_lea.vmem [#allocation2], %s6404_s12 }
  0xa2   : > { %8010 = dma.done.wait (%p10510_p5), %s456_s13, 2048  }
  0xa3   : > { %8012 = vsyncadd (%p10510_p5), %s456_s13, 4294965248  ;;  %p10511_p10 = scmp.eq.s32.totalorder %s8152_s29, 0 }
  0xa5   : > { %8014 = dma.done.wait (%p10511_p10), [#allocation6], 4096   ;;  %p10512_p11 = pmov %p10511_p10 }
  0xa6   : > { %p10513_p1 = pmov %p10511_p10 }
  0xa7   : > { %8016 = vsyncadd (%p10512_p11), [#allocation6], 4294963200 }
  0xa8   : > { %8018 = dma.done.wait (%p10513_p1), [#allocation9], 4096   ;;  %p10514_p2 = pmov %p10513_p1 }
  0xa9   : > { %v521_v0 = vld [vmem:[%s8343_s23] sm:$0xff]  ;;  %v523_v1 = vld [vmem:[%s8343_s23 + $0x10] sm:$0xff]  ;;  %v522_v2 = vld [vmem:[%s8343_s23 + $0x8] sm:$0xff]  ;;  %vm8054_vm0 = vmmov 0   ;;  %vm1179_vm1 = vcmask 261120   ;;  %vm1556_vm2 = vcmask 130048  }
  0xaa   : > { %8020 = vsyncadd (%p10514_p2), [#allocation9], 4294963200  ;;  %539 = vadd.xlane.f32.xlu0 %v521_v0  ;;  %543 = vadd.xlane.f32.xlu1 %v523_v1  ;;  %v524_v3 = vld [vmem:[%s8343_s23 + $0x18] sm:$0xff]  ;;  %v525_v4 = vld [vmem:[%s8343_s23 + $0x20] sm:$0xff]  ;;  %s8055_s24 = smov 96   ;;  %s8056_s18 = smov 64  }
  0xab   : > { %v526_v5 = vld [vmem:[%s8343_s23 + $0x28] sm:$0xff]  ;;  %v8364_v6 = vld [vmem:[%s8343_s23 + $0x30] sm:$0xff]  ;;  %v8367_v7 = vld [vmem:[%s8343_s23 + $0x38] sm:$0xff]  ;;  %s8057_s10 = smov 32   ;;  %vm5149_vm3 = vcmask 523264   ;;  %vm5166_vm4 = vcmask 785408  }
  0xac   : > { %v8370_v8 = vld [vmem:[%s8343_s23 + $0x40] sm:$0xff]  ;;  %v8373_v9 = vld [vmem:[%s8343_s23 + $0x48] sm:$0xff]  ;;  %v8378_v10 = vld [vmem:[%s8343_s23 + $0x50] sm:$0xff]  ;;  %s10587_s22 = sld [smem:[#allocation45_spill]]  ;;  %s10588_s30 = sld [smem:[#allocation46_spill]] }
  0xad   : > { %v8381_v11 = vld [vmem:[%s8343_s23 + $0x58] sm:$0xff]  ;;  %v8386_v12 = vld [vmem:[%s8343_s23 + $0x60] sm:$0xff]  ;;  %v8389_v13 = vld [vmem:[%s8343_s23 + $0x68] sm:$0xff]  ;;  %s10339_s15 = scalar_lea.vmem [#allocation11], %s6404_s12  ;;  %s6553_s12 = sshll.u32 %s8152_s29, 11 }
  0xae   : > { %541 = vadd.xlane.f32.xlu0 %v522_v2  ;;  %545 = vadd.xlane.f32.xlu1 %v524_v3  ;;  %v8394_v14 = vld [vmem:[%s8343_s23 + $0x70] sm:$0xff]  ;;  %v8397_v15 = vld [vmem:[%s8343_s23 + $0x78] sm:$0xff]  ;;  %v7345_v17 = vld [vmem:[#allocation5] ss:$12 sps:$4 sm:$0xff]   ;;  %s6281_s19 = sshll.u32 %s10339_s15, 4  ;;  %s10593_s14 = sld [smem:[#allocation48_spill]]  ;;  %s10390_s19 = int_to_ptr.vmem [resolvable:$true] %s6281_s19 }
  0xaf   : > { %v7343_v16 = vld [vmem:[#allocation5 + $0x4] ss:$12 sps:$4 sm:$0xff]   ;;  %v7346_v18 = vld [vmem:[#allocation5 + $0x1c] ss:$12 sps:$4 sm:$0xff]   ;;  %s6267_s29 = scalar_lea.sflag [#allocation4], %s8337_s20  ;;  %s8058_s21 = smov [#allocation11]  }
  0xb0   : > { %v7348_v19 = vld [vmem:[#allocation5 + $0x8] ss:$12 sps:$4 sm:$0xff]   ;;  %945 = vmatprep.subr.bf16.mxu0 %v7343_v16  ;;  %v7349_v58 = vld [vmem:[#allocation5 + $0x18] ss:$12 sps:$4 sm:$0xff]   ;;  %s7969_s3 = sshll.u32 %s8058_s21, 4  ;;  %s7970_s3 = int_to_ptr.vmem [resolvable:$false] %s7969_s3 }
  0xb1   : > { %946 = vmatpush1.bf16.msra.mxu0 %v7345_v17  ;;  %6778 = vmatprep.subr.bf16.mxu1 %v7348_v19  ;;  %p7972_p3 = scmp.lt.s32.totalorder %s10390_s19, %s7970_s3 }
  0xb2   : > { %547 = vadd.xlane.f32.xlu0 %v525_v4  ;;  %549 = vadd.xlane.f32.xlu1 %v526_v5 }
  0xb3   : > { %947 = vmatprep.subr.bf16.mxu0 %v7346_v18  ;;  %6779 = vmatpush3.bf16.msra.mxu1 %v7348_v19  ;;  %v7354_v18 = vld [vmem:[#allocation5 + $0x4c] ss:$12 sps:$4 sm:$0xff]  }
  0xb4   : > { %v7356_v19 = vld [vmem:[#allocation5 + $0x38] ss:$12 sps:$4 sm:$0xff]   ;;  %s10388_s16 = scalar_lea.hbm %s10593_s14, %s6553_s12 }
  0xb5   : > { %948 = vmatpush1.bf16.msra.mxu0 %v7349_v58 }
  0xb6   : > { %551 = vadd.xlane.f32.xlu0 %v8364_v6  ;;  %553 = vadd.xlane.f32.xlu1 %v8367_v7 }
  0xba   : > { %555 = vadd.xlane.f32.xlu0 %v8370_v8  ;;  %557 = vadd.xlane.f32.xlu1 %v8373_v9 }
  0xbe   : > { %559 = vadd.xlane.f32.xlu0 %v8378_v10  ;;  %561 = vadd.xlane.f32.xlu1 %v8381_v11 }
  0xc2   : > { %563 = vadd.xlane.f32.xlu0 %v8386_v12  ;;  %565 = vadd.xlane.f32.xlu1 %v8389_v13 }
  0xc6   : > { %567 = vadd.xlane.f32.xlu0 %v8394_v14  ;;  %569 = vadd.xlane.f32.xlu1 %v8397_v15 }
 0x137   : > { %v540_v20 = vpop.xlane.xlu0 %539  ;;  %v544_v21 = vpop.xlane.xlu1 %543 }
 0x138   : > { %v572_v22 = vmul.f32 0.0078125, %v540_v20  ;;  %v574_v23 = vmul.f32 0.0078125, %v544_v21 }
 0x13a   : > { %v8403_v24 = vsub.f32 %v521_v0, %v572_v22  ;;  %v8405_v25 = vsub.f32 %v523_v1, %v574_v23  ;;  %v7350_v0 = vld [vmem:[#allocation5 + $0x34] ss:$12 sps:$4 sm:$0xff]  }
 0x13b   : > { %v542_v26 = vpop.xlane.xlu0 %541  ;;  %v546_v27 = vpop.xlane.xlu1 %545  ;;  %v7352_v1 = vld [vmem:[#allocation5 + $0x20] ss:$12 sps:$4 sm:$0xff]   ;;  %949 = vmatprep.subr.bf16.mxu0 %v7350_v0  ;;  %v7357_v22 = vld [vmem:[#allocation5 + $0x48] ss:$12 sps:$4 sm:$0xff]  }
 0x13c   : > { %v573_v28 = vmul.f32 0.0078125, %v542_v26  ;;  %v604_v29 = vmul.f32 %v8403_v24, %v8403_v24  ;;  %v575_v30 = vmul.f32 0.0078125, %v546_v27  ;;  %v606_v31 = vmul.f32 %v8405_v25, %v8405_v25  ;;  %6780 = vmatprep.subr.bf16.mxu1 %v7352_v1 }
 0x13d   : > { %6781 = vmatpush3.bf16.msra.mxu1 %v7352_v1 }
 0x13e   : > { %620 = vadd.xlane.f32.xlu0 %v604_v29  ;;  %v8411_v32 = vsub.f32 %v522_v2, %v573_v28  ;;  %v8413_v33 = vsub.f32 %v524_v3, %v575_v30  ;;  %6782 = vmatprep.subr.bf16.mxu1 %v7356_v19  ;;  %v7358_v29 = vld [vmem:[#allocation5 + $0x64] ss:$12 sps:$4 sm:$0xff]  }
 0x13f   : > { %v548_v34 = vpop.xlane.xlu0 %547  ;;  %v550_v35 = vpop.xlane.xlu1 %549  ;;  %v7360_v30 = vld [vmem:[#allocation5 + $0x50] ss:$12 sps:$4 sm:$0xff]  }
 0x140   : > { %v576_v36 = vmul.f32 0.0078125, %v548_v34  ;;  %v605_v37 = vmul.f32 %v8411_v32, %v8411_v32  ;;  %v577_v38 = vmul.f32 0.0078125, %v550_v35  ;;  %v607_v39 = vmul.f32 %v8413_v33, %v8413_v33 }
 0x141   : > { %6783 = vmatpush3.bf16.msra.mxu1 %v7356_v19 }
 0x142   : > { %624 = vadd.xlane.f32.xlu0 %v606_v31  ;;  %622 = vadd.xlane.f32.xlu1 %v605_v37  ;;  %v8419_v40 = vsub.f32 %v525_v4, %v576_v36  ;;  %v8421_v41 = vsub.f32 %v526_v5, %v577_v38  ;;  %v7361_v31 = vld [vmem:[#allocation5 + $0x60] ss:$12 sps:$4 sm:$0xff]   ;;  %v7364_v36 = vld [vmem:[#allocation5 + $0x68] ss:$12 sps:$4 sm:$0xff]   ;;  %v7365_v37 = vld [vmem:[#allocation5 + $0x78] ss:$12 sps:$4 sm:$0xff]  }
 0x143   : > { %v552_v42 = vpop.xlane.xlu0 %551  ;;  %v554_v43 = vpop.xlane.xlu1 %553  ;;  %6784 = vmatprep.subr.bf16.mxu1 %v7360_v30  ;;  %v7368_v38 = vld [vmem:[#allocation5 + $0x80] ss:$12 sps:$4 sm:$0xff]  }
 0x144   : > { %v578_v44 = vmul.f32 0.0078125, %v552_v42  ;;  %v608_v45 = vmul.f32 %v8419_v40, %v8419_v40  ;;  %v579_v46 = vmul.f32 0.0078125, %v554_v43  ;;  %v609_v47 = vmul.f32 %v8421_v41, %v8421_v41  ;;  %v7370_v42 = vld [vmem:[#allocation5 + $0xac] ss:$12 sps:$4 sm:$0xff]  }
 0x145   : > { %6785 = vmatpush3.bf16.msra.mxu1 %v7360_v30  ;;  %v7372_v43 = vld [vmem:[#allocation5 + $0x98] ss:$12 sps:$4 sm:$0xff]  }
 0x146   : > { %626 = vadd.xlane.f32.xlu1 %v607_v39  ;;  %628 = vadd.xlane.f32.xlu0 %v608_v45  ;;  %v8428_v48 = vsub.f32 %v8364_v6, %v578_v44  ;;  %v8431_v49 = vsub.f32 %v8367_v7, %v579_v46  ;;  %v7353_v7 = vld [vmem:[#allocation5 + $0x30] ss:$12 sps:$4 sm:$0xff]   ;;  %v7373_v44 = vld [vmem:[#allocation5 + $0xa8] ss:$12 sps:$4 sm:$0xff]   ;;  %v10460_v46 = vmov 0  }
 0x147   : > { %v556_v50 = vpop.xlane.xlu0 %555  ;;  %v558_v51 = vpop.xlane.xlu1 %557  ;;  %950 = vmatpush1.bf16.msra.mxu0 %v7353_v7  ;;  %6786 = vmatprep.subr.bf16.mxu1 %v7364_v36  ;;  %v7369_v39 = vld [vmem:[#allocation5 + $0x90] ss:$12 sps:$4 sm:$0xff]  }
 0x148   : > { %v580_v52 = vmul.f32 0.0078125, %v556_v50  ;;  %v610_v53 = vmul.f32 %v8428_v48, %v8428_v48  ;;  %v581_v54 = vmul.f32 0.0078125, %v558_v51  ;;  %v611_v55 = vmul.f32 %v8431_v49, %v8431_v49  ;;  %951 = vmatprep.subr.bf16.mxu0 %v7354_v18  ;;  %v7374_v45 = vld [vmem:[#allocation5 + $0xb0] ss:$12 sps:$4 sm:$0xff]   ;;  %977 = vmatprep.mubr.bf16.mxu0 %v10460_v46 }
 0x149   : > { %6787 = vmatpush3.bf16.msra.mxu1 %v7364_v36 }
 0x14a   : > { %630 = vadd.xlane.f32.xlu1 %v609_v47  ;;  %632 = vadd.xlane.f32.xlu0 %v610_v53  ;;  %v8438_v56 = vsub.f32 %v8370_v8, %v580_v52  ;;  %v8441_v57 = vsub.f32 %v8373_v9, %v581_v54 }
 0x14b   : > { %v560_v59 = vpop.xlane.xlu0 %559  ;;  %v562_v60 = vpop.xlane.xlu1 %561  ;;  %952 = vmatpush1.bf16.msra.mxu0 %v7357_v22  ;;  %6788 = vmatprep.subr.bf16.mxu1 %v7368_v38  ;;  %v8482_v22 = vld [vmem:[%s10437_s1] ss:$0 sm:$0xff] }
 0x14c   : > { %v582_v61 = vmul.f32 0.0078125, %v560_v59  ;;  %v612_v62 = vmul.f32 %v8438_v56, %v8438_v56  ;;  %v583_v63 = vmul.f32 0.0078125, %v562_v60  ;;  %v613_v2 = vmul.f32 %v8441_v57, %v8441_v57  ;;  %953 = vmatprep.subr.bf16.mxu0 %v7358_v29 }
 0x14d   : > { %6789 = vmatpush3.bf16.msra.mxu1 %v7368_v38 }
 0x14e   : > { %634 = vadd.xlane.f32.xlu1 %v611_v55  ;;  %636 = vadd.xlane.f32.xlu0 %v612_v62  ;;  %v8448_v3 = vsub.f32 %v8378_v10, %v582_v61  ;;  %v8451_v4 = vsub.f32 %v8381_v11, %v583_v63 }
 0x14f   : > { %v564_v5 = vpop.xlane.xlu0 %563  ;;  %v566_v6 = vpop.xlane.xlu1 %565  ;;  %954 = vmatpush1.bf16.msra.mxu0 %v7361_v31  ;;  %6790 = vmatprep.subr.bf16.mxu1 %v7372_v43 }
 0x150   : > { %v584_v8 = vmul.f32 0.0078125, %v564_v5  ;;  %v614_v9 = vmul.f32 %v8448_v3, %v8448_v3  ;;  %v585_v16 = vmul.f32 0.0078125, %v566_v6  ;;  %v615_v10 = vmul.f32 %v8451_v4, %v8451_v4 }
 0x151   : > { %6791 = vmatpush3.bf16.msra.mxu1 %v7372_v43 }
 0x152   : > { %638 = vadd.xlane.f32.xlu1 %v613_v2  ;;  %640 = vadd.xlane.f32.xlu0 %v614_v9  ;;  %v8458_v11 = vsub.f32 %v8386_v12, %v584_v8  ;;  %v8461_v17 = vsub.f32 %v8389_v13, %v585_v16 }
 0x153   : > { %v568_v20 = vpop.xlane.xlu0 %567  ;;  %v570_v21 = vpop.xlane.xlu1 %569  ;;  %6792 = vmatprep.subr.bf16.mxu1 %v7374_v45 }
 0x154   : > { %v586_v23 = vmul.f32 0.0078125, %v568_v20  ;;  %v616_v26 = vmul.f32 %v8458_v11, %v8458_v11  ;;  %v587_v27 = vmul.f32 0.0078125, %v570_v21  ;;  %v617_v12 = vmul.f32 %v8461_v17, %v8461_v17 }
 0x155   : > { %6793 = vmatpush3.bf16.msra.mxu1 %v7374_v45 }
 0x156   : > { %642 = vadd.xlane.f32.xlu1 %v615_v10  ;;  %644 = vadd.xlane.f32.xlu0 %v616_v26  ;;  %v8468_v13 = vsub.f32 %v8394_v14, %v586_v23  ;;  %v8471_v28 = vsub.f32 %v8397_v15, %v587_v27  ;;  %v7362_v14 = vld [vmem:[#allocation5 + $0x7c] ss:$12 sps:$4 sm:$0xff]   ;;  %v7366_v15 = vld [vmem:[#allocation5 + $0x94] ss:$12 sps:$4 sm:$0xff]  }
 0x157   : > { %955 = vmatprep.subr.bf16.mxu0 %v7362_v14  ;;  %v8489_v14 = vld [vmem:[%s10438_s2] ss:$0 sm:$0xff] }
 0x158   : > { %v618_v34 = vmul.f32 %v8468_v13, %v8468_v13  ;;  %v619_v35 = vmul.f32 %v8471_v28, %v8471_v28  ;;  %956 = vmatpush1.bf16.msra.mxu0 %v7365_v37 }
 0x159   : > { %957 = vmatprep.subr.bf16.mxu0 %v7366_v15 }
 0x15a   : > { %646 = vadd.xlane.f32.xlu1 %v617_v12  ;;  %648 = vadd.xlane.f32.xlu0 %v618_v34 }
 0x15c   : > { %958 = vmatpush1.bf16.msra.mxu0 %v7369_v39 }
 0x15d   : > { %959 = vmatprep.subr.bf16.mxu0 %v7370_v42 }
 0x15e   : > { %650 = vadd.xlane.f32.xlu1 %v619_v35 }
 0x160   : > { %960 = vmatpush1.bf16.msra.mxu0 %v7373_v44 }
 0x1cb   : > { %v621_v47 = vpop.xlane.xlu0 %620 }
 0x1cc   : > { %v652_v50 = vmul.f32 0.0078125, %v621_v47 }
 0x1ce   : > { %v668_v51 = vadd.f32 1e-05, %v652_v50 }
 0x1cf   : > { %v623_v52 = vpop.xlane.xlu1 %622  ;;  %v625_v53 = vpop.xlane.xlu0 %624 }
 0x1d0   : > { %7423 = vrsqrt.f32 %v668_v51  ;;  %v653_v54 = vmul.f32 0.0078125, %v623_v52  ;;  %v654_v55 = vmul.f32 0.0078125, %v625_v53 }
 0x1d2   : > { %v669_v58 = vadd.f32 1e-05, %v653_v54  ;;  %v670_v59 = vadd.f32 1e-05, %v654_v55 }
 0x1d3   : > { %v627_v60 = vpop.xlane.xlu1 %626  ;;  %v629_v61 = vpop.xlane.xlu0 %628 }
 0x1d4   : > { %7425 = vrsqrt.f32 %v669_v58  ;;  %v655_v62 = vmul.f32 0.0078125, %v627_v60  ;;  %v656_v63 = vmul.f32 0.0078125, %v629_v61 }
 0x1d5   : > { %7427 = vrsqrt.f32 %v670_v59 }
 0x1d6   : > { %v671_v0 = vadd.f32 1e-05, %v655_v62  ;;  %v672_v1 = vadd.f32 1e-05, %v656_v63 }
 0x1d7   : > { %v631_v2 = vpop.xlane.xlu1 %630  ;;  %v633_v5 = vpop.xlane.xlu0 %632 }
 0x1d8   : > { %7429 = vrsqrt.f32 %v671_v0  ;;  %v657_v6 = vmul.f32 0.0078125, %v631_v2  ;;  %v658_v7 = vmul.f32 0.0078125, %v633_v5 }
 0x1d9   : > { %7431 = vrsqrt.f32 %v672_v1 }
 0x1da   : > { %v7424_v8 = vpop.eup %7423  ;;  %v673_v9 = vadd.f32 1e-05, %v657_v6  ;;  %v674_v16 = vadd.f32 1e-05, %v658_v7 }
 0x1db   : > { %v635_v10 = vpop.xlane.xlu1 %634  ;;  %v637_v18 = vpop.xlane.xlu0 %636  ;;  %v700_v19 = vmul.f32 %v7424_v8, %v8403_v24 }
 0x1dc   : > { %7433 = vrsqrt.f32 %v673_v9  ;;  %v659_v20 = vmul.f32 0.0078125, %v635_v10  ;;  %v660_v21 = vmul.f32 0.0078125, %v637_v18 }
 0x1dd   : > { %7435 = vrsqrt.f32 %v674_v16  ;;  %v722_v34 = vmul.f32 %v8482_v22, %v700_v19 }
 0x1de   : > { %v7426_v23 = vpop.eup %7425  ;;  %v675_v26 = vadd.f32 1e-05, %v659_v20  ;;  %v676_v27 = vadd.f32 1e-05, %v660_v21 }
 0x1df   : > { %v7428_v12 = vpop.eup %7427  ;;  %v639_v29 = vpop.xlane.xlu1 %638  ;;  %v701_v31 = vmul.f32 %v7426_v23, %v8411_v32  ;;  %v744_v45 = vadd.f32 %v8489_v14, %v722_v34 }
 0x1e0   : > { %v641_v30 = vpop.xlane.xlu0 %640  ;;  %7437 = vrsqrt.f32 %v675_v26  ;;  %v661_v24 = vmul.f32 0.0078125, %v639_v29  ;;  %v702_v36 = vmul.f32 %v7428_v12, %v8405_v25 }
 0x1e1   : > { %v662_v35 = vmul.f32 0.0078125, %v641_v30  ;;  %7439 = vrsqrt.f32 %v676_v27  ;;  %v723_v37 = vmul.f32 %v8482_v22, %v701_v31 }
 0x1e2   : > { %v7430_v15 = vpop.eup %7429  ;;  %v677_v38 = vadd.f32 1e-05, %v661_v24  ;;  %v724_v32 = vmul.f32 %v8482_v22, %v702_v36 }
 0x1e3   : > { %v678_v39 = vadd.f32 1e-05, %v662_v35  ;;  %v7432_v42 = vpop.eup %7431  ;;  %v643_v43 = vpop.xlane.xlu1 %642  ;;  %v745_v47 = vadd.f32 %v8489_v14, %v723_v37  ;;  %v703_v50 = vmul.f32 %v7430_v15, %v8413_v33 }
 0x1e4   : > { %v645_v44 = vpop.xlane.xlu0 %644  ;;  %7441 = vrsqrt.f32 %v677_v38  ;;  %v663_v51 = vmul.f32 0.0078125, %v643_v43  ;;  %v704_v54 = vmul.f32 %v7432_v42, %v8419_v40  ;;  %v746_v60 = vadd.f32 %v8489_v14, %v724_v32 }
 0x1e5   : > { %v664_v25 = vmul.f32 0.0078125, %v645_v44  ;;  %7443 = vrsqrt.f32 %v678_v39  ;;  %v760_v52 = vpack.c.bf16 %v745_v47, %v744_v45  ;;  %v725_v53 = vmul.f32 %v8482_v22, %v703_v50 }
 0x1e6   : > { %v7434_v55 = vpop.eup %7433  ;;  %v679_v58 = vadd.f32 1e-05, %v663_v51  ;;  %v726_v1 = vmul.f32 %v8482_v22, %v704_v54 }
 0x1e7   : > { %v680_v59 = vadd.f32 1e-05, %v664_v25  ;;  %v7436_v61 = vpop.eup %7435  ;;  %v647_v62 = vpop.xlane.xlu1 %646  ;;  %978 = vmatmul.mubr.bf16.vlgmr.msra.gmra.mrb[0].mxu0 %v760_v52  ;;  %6794 = vmatprep.mubr.bf16.mxu1 %v760_v52  ;;  %v747_v33 = vadd.f32 %v8489_v14, %v725_v53  ;;  %v705_v0 = vmul.f32 %v7434_v55, %v8421_v41 }
 0x1e8   : > { %v649_v63 = vpop.xlane.xlu0 %648  ;;  %7445 = vrsqrt.f32 %v679_v58  ;;  %v665_v2 = vmul.f32 0.0078125, %v647_v62  ;;  %987 = vmatprep.mubr.bf16.mxu0 %v10460_v46  ;;  %v706_v40 = vmul.f32 %v7436_v61, %v8428_v48  ;;  %v748_v19 = vadd.f32 %v8489_v14, %v726_v1 }
 0x1e9   : > { %v666_v5 = vmul.f32 0.0078125, %v649_v63  ;;  %7447 = vrsqrt.f32 %v680_v59  ;;  %v761_v6 = vpack.c.bf16 %v747_v33, %v746_v60  ;;  %v727_v7 = vmul.f32 %v8482_v22, %v705_v0  ;;  %v800_v33 = vld [vmem:[%s10440_s4] sm:$0x7] }
 0x1ea   : > { %v7438_v8 = vpop.eup %7437  ;;  %v681_v9 = vadd.f32 1e-05, %v665_v2  ;;  %v728_v10 = vmul.f32 %v8482_v22, %v706_v40 }
 0x1eb   : > { %v682_v16 = vadd.f32 1e-05, %v666_v5  ;;  %v7440_v18 = vpop.eup %7439  ;;  %v651_v41 = vpop.xlane.xlu1 %650  ;;  %6795 = vmatmul.mubr.bf16.vlgmr.msra.gmra.mrb[0].mxu1 %v761_v6  ;;  %v749_v20 = vadd.f32 %v8489_v14, %v727_v7  ;;  %v707_v21 = vmul.f32 %v7438_v8, %v8431_v49 }
 0x1ec   : > { %7449 = vrsqrt.f32 %v681_v9  ;;  %v667_v48 = vmul.f32 0.0078125, %v651_v41  ;;  %v708_v23 = vmul.f32 %v7440_v18, %v8438_v56  ;;  %v750_v30 = vadd.f32 %v8489_v14, %v728_v10 }
 0x1ed   : > { %7451 = vrsqrt.f32 %v682_v16  ;;  %v762_v26 = vpack.c.bf16 %v749_v20, %v748_v19  ;;  %v729_v27 = vmul.f32 %v8482_v22, %v707_v21 }
 0x1ee   : > { %v7442_v12 = vpop.eup %7441  ;;  %v683_v29 = vadd.f32 1e-05, %v667_v48  ;;  %v730_v49 = vmul.f32 %v8482_v22, %v708_v23 }
 0x1ef   : > { %v7444_v31 = vpop.eup %7443  ;;  %988 = vmatmul.mubr.bf16.gmra.mrb[4].mxu0 %v761_v6  ;;  %6798 = vmatprep.mubr.bf16.mxu1 %v762_v26  ;;  %v751_v34 = vadd.f32 %v8489_v14, %v729_v27  ;;  %v709_v24 = vmul.f32 %v7442_v12, %v8441_v57 }
 0x1f0   : > { %7453 = vrsqrt.f32 %v683_v29  ;;  %997 = vmatprep.mubr.bf16.mxu0 %v10460_v46  ;;  %v710_v56 = vmul.f32 %v7444_v31, %v8448_v3  ;;  %v752_v39 = vadd.f32 %v8489_v14, %v730_v49 }
 0x1f1   : > { %v763_v35 = vpack.c.bf16 %v751_v34, %v750_v30  ;;  %v731_v36 = vmul.f32 %v8482_v22, %v709_v24 }
 0x1f2   : > { %v7446_v37 = vpop.eup %7445  ;;  %v732_v15 = vmul.f32 %v8482_v22, %v710_v56 }
 0x1f3   : > { %v7448_v38 = vpop.eup %7447  ;;  %6799 = vmatmul.mubr.bf16.gmra.mrb[4].mxu1 %v763_v35  ;;  %v753_v32 = vadd.f32 %v8489_v14, %v731_v36  ;;  %v711_v57 = vmul.f32 %v7446_v37, %v8451_v4 }
 0x1f4   : > { %v712_v42 = vmul.f32 %v7448_v38, %v8458_v11  ;;  %v754_v45 = vadd.f32 %v8489_v14, %v732_v15 }
 0x1f5   : > { %v764_v43 = vpack.c.bf16 %v753_v32, %v752_v39  ;;  %v733_v44 = vmul.f32 %v8482_v22, %v711_v57 }
 0x1f6   : > { %v7450_v3 = vpop.eup %7449  ;;  %v734_v25 = vmul.f32 %v8482_v22, %v712_v42 }
 0x1f7   : > { %v7452_v47 = vpop.eup %7451  ;;  %998 = vmatmul.mubr.bf16.gmra.mrb[8].mxu0 %v762_v26  ;;  %6802 = vmatprep.mubr.bf16.mxu1 %v764_v43  ;;  %v755_v50 = vadd.f32 %v8489_v14, %v733_v44  ;;  %v713_v51 = vmul.f32 %v7450_v3, %v8461_v17 }
 0x1f8   : > { %1007 = vmatprep.mubr.bf16.mxu0 %v10460_v46  ;;  %v714_v4 = vmul.f32 %v7452_v47, %v8468_v13  ;;  %v756_v54 = vadd.f32 %v8489_v14, %v734_v25 }
 0x1f9   : > { %v765_v11 = vpack.c.bf16 %v755_v50, %v754_v45  ;;  %v735_v52 = vmul.f32 %v8482_v22, %v713_v51 }
 0x1fa   : > { %v7454_v53 = vpop.eup %7453  ;;  %v736_v59 = vmul.f32 %v8482_v22, %v714_v4 }
 0x1fb   : > { %6803 = vmatmul.mubr.bf16.gmra.mrb[8].mxu1 %v765_v11  ;;  %v757_v55 = vadd.f32 %v8489_v14, %v735_v52  ;;  %v715_v58 = vmul.f32 %v7454_v53, %v8471_v28  ;;  %v10462_v28 = vmov 0.0  }
 0x1fc   : > { %v758_v13 = vadd.f32 %v8489_v14, %v736_v59  ;;  %6810 = vmatprep.subr.bf16.mxu1 %v10462_v28  ;;  %6834 = vmatprep.subr.bf16.mxu0 %v10462_v28 }
 0x1fd   : > { %v766_v17 = vpack.c.bf16 %v757_v55, %v756_v54  ;;  %v737_v60 = vmul.f32 %v8482_v22, %v715_v58  ;;  %v802_v22 = vlaneseq }
 0x1ff   : > { %1008 = vmatmul.mubr.bf16.gmra.mrb[12].mxu0 %v763_v35  ;;  %6806 = vmatprep.mubr.bf16.mxu1 %v766_v17  ;;  %v759_v61 = vadd.f32 %v8489_v14, %v737_v60  ;;  %v8549_v14 = vshrl.u32 %v802_v22, 7 }
 0x200   : > { %1017 = vmatprep.mubr.bf16.mxu0 %v10460_v46 }
 0x201   : > { %v767_v62 = vpack.c.bf16 %v759_v61, %v758_v13  ;;  %10515 = vst [vmem:[#allocation18_spill] sm:$0xff] %v8549_v14  ;;  %v10459_v63 = vsub.s32 0, %v8549_v14  ;;  %v10458_v0 = vsub.s32 1, %v8549_v14  ;;  %v812_v2 = vsub.s32 2, %v8549_v14 }
 0x203   : > { %6807 = vmatmul.mubr.bf16.gmra.mrb[12].mxu1 %v767_v62  ;;  %v8558_v1 = vrot.slane %v800_v33, %v10459_v63  ;;  %v8563_v40 = vrot.slane %v800_v33, %v10458_v0  ;;  %v8567_v10 = vrot.slane %v800_v33, %v812_v2 }
 0x204   : > { %6812 = vmatprep.mubr.msk.bf16.mxu1 %vm8054_vm0, %v10462_v28 }
 0x207   : > { %1018 = vmatmul.mubr.bf16.gmra.mrb[16].mxu0 %v764_v43 }
 0x208   : > { %1027 = vmatprep.mubr.bf16.mxu0 %v10460_v46 }
 0x20f   : > { %1028 = vmatmul.mubr.bf16.gmra.mrb[20].mxu0 %v765_v11 }
 0x210   : > { %1037 = vmatprep.mubr.bf16.mxu0 %v10460_v46 }
 0x217   : > { %1038 = vmatmul.mubr.bf16.gmra.mrb[24].mxu0 %v766_v17 }
 0x218   : > { %1047 = vmatprep.mubr.bf16.mxu0 %v10460_v46 }
 0x21f   : > { %1048 = vmatmul.mubr.bf16.gmra.mrb[28].mxu0 %v767_v62 }
 0x220   : > { %6836 = vmatprep.mubr.msk.bf16.mxu0 %vm8054_vm0, %v10462_v28 }
 0x2ba   : > { %v979_v5 = vpop.f32.mrb[0].mxu0 }
 0x2bb   : > { %v981_v6 = vpop.f32.mrb[1].mxu0  ;;  %v980_v8 = vadd.f32 %v979_v5, %v8558_v1 }
 0x2bc   : > { %v983_v7 = vpop.f32.mrb[2].mxu0  ;;  %v982_v18 = vadd.f32 %v981_v6, %v8563_v40 }
 0x2bd   : > { %v984_v9 = vadd.f32 %v983_v7, %v8558_v1  ;;  %v985_v16 = vpop.f32.mrb[3].mxu0 }
 0x2be   : > { %v986_v41 = vadd.f32 %v985_v16, %v8563_v40  ;;  %v6796_v19 = vpop.f32.mrb[0].mxu1 }
 0x2bf   : > { %v8571_v20 = vpack.c.bf16 %v984_v9, %v980_v8  ;;  %v1092_v21 = vpop.f32.mrb[1].mxu1  ;;  %v1101_v26 = vadd.f32 %v6796_v19, %v8567_v10 }
 0x2c0   : > { %v8573_v48 = vpack.c.bf16 %v986_v41, %v982_v18  ;;  %v6797_v23 = vpop.f32.mrb[2].mxu1  ;;  %v1093_v29 = vadd.f32 %v1092_v21, %v8567_v10 }
 0x2c1   : > { %v1104_v27 = vadd.f32 %v6797_v23, %v8567_v10  ;;  %v1095_v12 = vpop.f32.mrb[3].mxu1 }
 0x2c2   : > { %v1096_v30 = vadd.f32 %v1095_v12, %v8567_v10  ;;  %v989_v31 = vpop.f32.mrb[4].mxu0  ;;  %v1184_v34 = vsel %vm1179_vm1, %v8573_v48, 0 }
 0x2c3   : > { %v8581_v24 = vpack.c.bf16 %v1104_v27, %v1101_v26  ;;  %v991_v49 = vpop.f32.mrb[5].mxu0  ;;  %6811 = vmatpush3.bf16.xpose.msra.mxu1 %v1184_v34  ;;  %v990_v36 = vadd.f32 %v989_v31, %v8558_v1 }
 0x2c4   : > { %v8583_v56 = vpack.c.bf16 %v1096_v30, %v1093_v29  ;;  %v993_v35 = vpop.f32.mrb[6].mxu0  ;;  %6816 = vmatprep.subr.bf16.mxu1 %v10462_v28  ;;  %v992_v38 = vadd.f32 %v991_v49, %v8563_v40 }
 0x2c5   : > { %v994_v37 = vadd.f32 %v993_v35, %v8558_v1  ;;  %v995_v15 = vpop.f32.mrb[7].mxu0 }
 0x2c6   : > { %v996_v39 = vadd.f32 %v995_v15, %v8563_v40  ;;  %v6800_v32 = vpop.f32.mrb[4].mxu1 }
 0x2c7   : > { %v8590_v57 = vpack.c.bf16 %v994_v37, %v990_v36  ;;  %v1117_v42 = vadd.f32 %v6800_v32, %v8567_v10  ;;  %v1108_v43 = vpop.f32.mrb[5].mxu1 }
 0x2c8   : > { %v8593_v44 = vpack.c.bf16 %v996_v39, %v992_v38  ;;  %v1109_v3 = vadd.f32 %v1108_v43, %v8567_v10  ;;  %v6801_v45 = vpop.f32.mrb[6].mxu1 }
 0x2c9   : > { %v1120_v47 = vadd.f32 %v6801_v45, %v8567_v10  ;;  %v1111_v50 = vpop.f32.mrb[7].mxu1 }
 0x2ca   : > { %v1112_v51 = vadd.f32 %v1111_v50, %v8567_v10  ;;  %v999_v25 = vpop.f32.mrb[8].mxu0  ;;  %6813 = vmatmul.mubr.msk.bf16.vlgmr.msra.gmra.mrb[16].mxu1 %vm1179_vm1, %v8571_v20  ;;  %v1231_v4 = vsel %vm1179_vm1, %v8593_v44, 0 }
 0x2cb   : > { %v8602_v11 = vpack.c.bf16 %v1120_v47, %v1117_v42  ;;  %v1001_v52 = vpop.f32.mrb[9].mxu0  ;;  %6817 = vmatpush3.bf16.xpose.msra.mxu1 %v1231_v4  ;;  %6818 = vmatprep.mubr.msk.bf16.mxu1 %vm8054_vm0, %v10462_v28  ;;  %v1000_v55 = vadd.f32 %v999_v25, %v8558_v1 }
 0x2cc   : > { %v8606_v53 = vpack.c.bf16 %v1112_v51, %v1109_v3  ;;  %v1003_v54 = vpop.f32.mrb[10].mxu0  ;;  %6822 = vmatprep.subr.bf16.mxu1 %v10462_v28  ;;  %v1002_v17 = vadd.f32 %v1001_v52, %v8563_v40 }
 0x2cd   : > { %v1004_v58 = vadd.f32 %v1003_v54, %v8558_v1  ;;  %v1005_v59 = vpop.f32.mrb[11].mxu0 }
 0x2ce   : > { %v1006_v60 = vadd.f32 %v1005_v59, %v8563_v40  ;;  %v6804_v13 = vpop.f32.mrb[8].mxu1 }
 0x2cf   : > { %v8613_v61 = vpack.c.bf16 %v1004_v58, %v1000_v55  ;;  %v1133_v62 = vadd.f32 %v6804_v13, %v8567_v10  ;;  %v1124_v22 = vpop.f32.mrb[9].mxu1 }
 0x2d0   : > { %v8616_v33 = vpack.c.bf16 %v1006_v60, %v1002_v17  ;;  %v1125_v2 = vadd.f32 %v1124_v22, %v8567_v10  ;;  %v6805_v5 = vpop.f32.mrb[10].mxu1 }
 0x2d1   : > { %v1136_v6 = vadd.f32 %v6805_v5, %v8567_v10  ;;  %v1127_v7 = vpop.f32.mrb[11].mxu1 }
 0x2d2   : > { %v1128_v8 = vadd.f32 %v1127_v7, %v8567_v10  ;;  %v1009_v9 = vpop.f32.mrb[12].mxu0  ;;  %6819 = vmatmul.mubr.msk.bf16.vlgmr.msra.gmra.mrb[20].mxu1 %vm1179_vm1, %v8590_v57  ;;  %v1278_v16 = vsel %vm1179_vm1, %v8616_v33, 0 }
 0x2d3   : > { %v8625_v18 = vpack.c.bf16 %v1136_v6, %v1133_v62  ;;  %v1011_v41 = vpop.f32.mrb[13].mxu0  ;;  %6823 = vmatpush3.bf16.xpose.msra.mxu1 %v1278_v16  ;;  %6824 = vmatprep.mubr.msk.bf16.mxu1 %vm8054_vm0, %v10462_v28  ;;  %v1010_v23 = vadd.f32 %v1009_v9, %v8558_v1 }
 0x2d4   : > { %v8629_v19 = vpack.c.bf16 %v1128_v8, %v1125_v2  ;;  %v1013_v21 = vpop.f32.mrb[14].mxu0  ;;  %6828 = vmatprep.subr.bf16.mxu1 %v10462_v28  ;;  %v1012_v12 = vadd.f32 %v1011_v41, %v8563_v40 }
 0x2d5   : > { %v1014_v26 = vadd.f32 %v1013_v21, %v8558_v1  ;;  %v1015_v27 = vpop.f32.mrb[15].mxu0 }
 0x2d6   : > { %v1016_v29 = vadd.f32 %v1015_v27, %v8563_v40  ;;  %v6808_v30 = vpop.f32.mrb[12].mxu1 }
 0x2d7   : > { %v8636_v31 = vpack.c.bf16 %v1014_v26, %v1010_v23  ;;  %v1149_v34 = vadd.f32 %v6808_v30, %v8567_v10  ;;  %v1140_v49 = vpop.f32.mrb[13].mxu1 }
 0x2d8   : > { %v8639_v35 = vpack.c.bf16 %v1016_v29, %v1012_v12  ;;  %v1141_v36 = vadd.f32 %v1140_v49, %v8567_v10  ;;  %v6809_v37 = vpop.f32.mrb[14].mxu1 }
 0x2d9   : > { %v1152_v15 = vadd.f32 %v6809_v37, %v8567_v10  ;;  %v1143_v38 = vpop.f32.mrb[15].mxu1 }
 0x2da   : > { %v1144_v39 = vadd.f32 %v1143_v38, %v8567_v10  ;;  %v1019_v32 = vpop.f32.mrb[16].mxu0  ;;  %6825 = vmatmul.mubr.msk.bf16.vlgmr.msra.gmra.mrb[24].mxu1 %vm1179_vm1, %v8613_v61  ;;  %v1325_v42 = vsel %vm1179_vm1, %v8639_v35, 0 }
 0x2db   : > { %v8648_v43 = vpack.c.bf16 %v1152_v15, %v1149_v34  ;;  %v1021_v3 = vpop.f32.mrb[17].mxu0  ;;  %6829 = vmatpush3.bf16.xpose.msra.mxu1 %v1325_v42  ;;  %6830 = vmatprep.mubr.msk.bf16.mxu1 %vm8054_vm0, %v10462_v28  ;;  %v1020_v10 = vadd.f32 %v1019_v32, %v8558_v1 }
 0x2dc   : > { %v8652_v45 = vpack.c.bf16 %v1144_v39, %v1141_v36  ;;  %v1023_v47 = vpop.f32.mrb[18].mxu0  ;;  %6840 = vmatprep.subr.bf16.mxu1 %v10462_v28  ;;  %v1022_v25 = vadd.f32 %v1021_v3, %v8563_v40 }
 0x2dd   : > { %v1024_v50 = vadd.f32 %v1023_v47, %v8558_v1  ;;  %v1025_v51 = vpop.f32.mrb[19].mxu0 }
 0x2de   : > { %v1026_v4 = vadd.f32 %v1025_v51, %v8563_v40 }
 0x2df   : > { %v8659_v52 = vpack.c.bf16 %v1024_v50, %v1020_v10 }
 0x2e0   : > { %v8661_v54 = vpack.c.bf16 %v1026_v4, %v1022_v25 }
 0x2e2   : > { %v1029_v55 = vpop.f32.mrb[20].mxu0  ;;  %6831 = vmatmul.mubr.msk.bf16.vlgmr.msra.gmra.mrb[28].mxu1 %vm1179_vm1, %v8636_v31  ;;  %v1372_v58 = vsel %vm1179_vm1, %v8661_v54, 0 }
 0x2e3   : > { %v1031_v59 = vpop.f32.mrb[21].mxu0  ;;  %6835 = vmatpush3.bf16.xpose.msra.mxu0 %v1372_v58  ;;  %6842 = vmatprep.mubr.msk.bf16.mxu1 %vm8054_vm0, %v10462_v28  ;;  %v1030_v60 = vadd.f32 %v1029_v55, %v8558_v1 }
 0x2e4   : > { %v1033_v17 = vpop.f32.mrb[22].mxu0  ;;  %6846 = vmatprep.subr.bf16.mxu0 %v10462_v28  ;;  %v1032_v22 = vadd.f32 %v1031_v59, %v8563_v40 }
 0x2e5   : > { %v1034_v13 = vadd.f32 %v1033_v17, %v8558_v1  ;;  %v1035_v62 = vpop.f32.mrb[23].mxu0 }
 0x2e6   : > { %v1036_v2 = vadd.f32 %v1035_v62, %v8563_v40 }
 0x2e7   : > { %v8674_v5 = vpack.c.bf16 %v1034_v13, %v1030_v60 }
 0x2e8   : > { %v8676_v6 = vpack.c.bf16 %v1036_v2, %v1032_v22 }
 0x2ea   : > { %v1039_v7 = vpop.f32.mrb[24].mxu0  ;;  %6837 = vmatmul.mubr.msk.bf16.vlgmr.msra.gmra.mrb[32].mxu0 %vm1179_vm1, %v8659_v52  ;;  %v1419_v8 = vsel %vm1179_vm1, %v8676_v6, 0 }
 0x2eb   : > { %v1041_v9 = vpop.f32.mrb[25].mxu0  ;;  %6841 = vmatpush3.bf16.xpose.msra.mxu1 %v1419_v8  ;;  %6848 = vmatprep.mubr.msk.bf16.mxu0 %vm8054_vm0, %v10462_v28  ;;  %v1040_v41 = vadd.f32 %v1039_v7, %v8558_v1 }
 0x2ec   : > { %v1043_v16 = vpop.f32.mrb[26].mxu0  ;;  %6852 = vmatprep.subr.bf16.mxu1 %v10462_v28  ;;  %v1042_v26 = vadd.f32 %v1041_v9, %v8563_v40 }
 0x2ed   : > { %v1044_v21 = vadd.f32 %v1043_v16, %v8558_v1  ;;  %v1045_v23 = vpop.f32.mrb[27].mxu0 }
 0x2ee   : > { %v1046_v27 = vadd.f32 %v1045_v23, %v8563_v40 }
 0x2ef   : > { %v8689_v12 = vpack.c.bf16 %v1044_v21, %v1040_v41 }
 0x2f0   : > { %v8691_v29 = vpack.c.bf16 %v1046_v27, %v1042_v26 }
 0x2f2   : > { %v1049_v30 = vpop.f32.mrb[28].mxu0  ;;  %6843 = vmatmul.mubr.msk.bf16.vlgmr.msra.gmra.mrb[32].mxu1 %vm1179_vm1, %v8674_v5  ;;  %v1466_v34 = vsel %vm1179_vm1, %v8691_v29, 0 }
 0x2f3   : > { %v1051_v49 = vpop.f32.mrb[29].mxu0  ;;  %6847 = vmatpush3.bf16.xpose.msra.mxu0 %v1466_v34  ;;  %6854 = vmatprep.mubr.msk.bf16.mxu1 %vm8054_vm0, %v10462_v28  ;;  %v1050_v37 = vadd.f32 %v1049_v30, %v8558_v1 }
 0x2f4   : > { %v1053_v36 = vpop.f32.mrb[30].mxu0  ;;  %6858 = vmatprep.subr.bf16.mxu0 %v10462_v28  ;;  %v1052_v39 = vadd.f32 %v1051_v49, %v8563_v40 }
 0x2f5   : > { %v1054_v15 = vadd.f32 %v1053_v36, %v8558_v1  ;;  %v1055_v38 = vpop.f32.mrb[31].mxu0 }
 0x2f6   : > { %v1056_v32 = vadd.f32 %v1055_v38, %v8563_v40 }
 0x2f7   : > { %v8704_v42 = vpack.c.bf16 %v1054_v15, %v1050_v37 }
 0x2f8   : > { %v8706_v3 = vpack.c.bf16 %v1056_v32, %v1052_v39 }
 0x2fa   : > { %6849 = vmatmul.mubr.msk.bf16.vlgmr.msra.gmra.mrb[36].mxu0 %vm1179_vm1, %v8689_v12  ;;  %v1513_v47 = vsel %vm1179_vm1, %v8706_v3, 0 }
 0x2fb   : > { %6853 = vmatpush3.bf16.xpose.msra.mxu1 %v1513_v47  ;;  %6859 = vmatpush3.bf16.msra.mxu0 %v8583_v56 }
 0x2fc   : > { %6864 = vmatprep.subr.bf16.mxu1 %v10462_v28  ;;  %6860 = vmatprep.mubr.msk.bf16.mxu0 %vm8054_vm0, %v10462_v28 }
 0x2fd   : > { %6870 = vmatprep.subr.bf16.mxu0 %v10462_v28 }
 0x302   : > { %6855 = vmatmul.mubr.msk.bf16.vlgmr.msra.gmra.mrb[36].mxu1 %vm1179_vm1, %v8704_v42 }
 0x303   : > { %6865 = vmatpush3.bf16.msra.mxu1 %v8581_v24  ;;  %6866 = vmatprep.mubr.msk.bf16.mxu1 %vm8054_vm0, %v10462_v28 }
 0x304   : > { %6876 = vmatprep.subr.bf16.mxu1 %v10462_v28 }
 0x39d   : > { %v8723_v1 = vpop.f32.mrb[16].mxu1 }
 0x39e   : > { %v6814_v40 = vpop.f32.mrb[17].mxu1  ;;  %v1557_v10 = vsel %vm1556_vm2, %v8723_v1, -inf }
 0x39f   : > { %1558 = vmax.xlane.f32.xlu0 %v1557_v10  ;;  %v8727_v50 = vpop.f32.mrb[18].mxu1 }
 0x3a0   : > { %v6815_v51 = vpop.f32.mrb[19].mxu1  ;;  %v1560_v25 = vsel %vm1556_vm2, %v8727_v50, -inf }
 0x3a1   : > { %1561 = vmax.xlane.f32.xlu1 %v1560_v25 }
 0x3a5   : > { %v8731_v4 = vpop.f32.mrb[20].mxu1 }
 0x3a6   : > { %v6820_v55 = vpop.f32.mrb[21].mxu1  ;;  %v1563_v58 = vsel %vm1556_vm2, %v8731_v4, -inf }
 0x3a7   : > { %1564 = vmax.xlane.f32.xlu0 %v1563_v58  ;;  %v8735_v59 = vpop.f32.mrb[22].mxu1 }
 0x3a8   : > { %v6821_v17 = vpop.f32.mrb[23].mxu1  ;;  %v1566_v60 = vsel %vm1556_vm2, %v8735_v59, -inf }
 0x3a9   : > { %1567 = vmax.xlane.f32.xlu1 %v1566_v60 }
 0x3ad   : > { %v8739_v13 = vpop.f32.mrb[24].mxu1 }
 0x3ae   : > { %v6826_v62 = vpop.f32.mrb[25].mxu1  ;;  %v1569_v22 = vsel %vm1556_vm2, %v8739_v13, -inf }
 0x3af   : > { %1570 = vmax.xlane.f32.xlu0 %v1569_v22  ;;  %v8743_v2 = vpop.f32.mrb[26].mxu1 }
 0x3b0   : > { %v6827_v7 = vpop.f32.mrb[27].mxu1  ;;  %v1572_v8 = vsel %vm1556_vm2, %v8743_v2, -inf }
 0x3b1   : > { %1573 = vmax.xlane.f32.xlu1 %v1572_v8 }
 0x3b5   : > { %v8747_v9 = vpop.f32.mrb[28].mxu1 }
 0x3b6   : > { %v6832_v16 = vpop.f32.mrb[29].mxu1  ;;  %v1575_v41 = vsel %vm1556_vm2, %v8747_v9, -inf }
 0x3b7   : > { %1576 = vmax.xlane.f32.xlu0 %v1575_v41  ;;  %v8751_v21 = vpop.f32.mrb[30].mxu1 }
 0x3b8   : > { %v6833_v23 = vpop.f32.mrb[31].mxu1  ;;  %v1578_v26 = vsel %vm1556_vm2, %v8751_v21, -inf }
 0x3b9   : > { %1579 = vmax.xlane.f32.xlu1 %v1578_v26 }
 0x3bd   : > { %v8755_v27 = vpop.f32.mrb[32].mxu0 }
 0x3be   : > { %v6838_v30 = vpop.f32.mrb[33].mxu0  ;;  %v1581_v34 = vsel %vm1556_vm2, %v8755_v27, -inf }
 0x3bf   : > { %1582 = vmax.xlane.f32.xlu0 %v1581_v34  ;;  %v8759_v49 = vpop.f32.mrb[34].mxu0 }
 0x3c0   : > { %v6839_v36 = vpop.f32.mrb[35].mxu0  ;;  %v1584_v37 = vsel %vm1556_vm2, %v8759_v49, -inf }
 0x3c1   : > { %1585 = vmax.xlane.f32.xlu1 %v1584_v37 }
 0x3c5   : > { %v8763_v15 = vpop.f32.mrb[32].mxu1 }
 0x3c6   : > { %v6844_v38 = vpop.f32.mrb[33].mxu1  ;;  %v1587_v39 = vsel %vm1556_vm2, %v8763_v15, -inf }
 0x3c7   : > { %v8767_v32 = vpop.f32.mrb[34].mxu1  ;;  %1588 = vmax.xlane.f32.xlu0 %v1587_v39 }
 0x3c8   : > { %v6845_v47 = vpop.f32.mrb[35].mxu1  ;;  %v1590_v40 = vsel %vm1556_vm2, %v8767_v32, -inf }
 0x3c9   : > { %1591 = vmax.xlane.f32.xlu1 %v1590_v40 }
 0x3cd   : > { %v8771_v10 = vpop.f32.mrb[36].mxu0 }
 0x3ce   : > { %v6850_v51 = vpop.f32.mrb[37].mxu0  ;;  %v1593_v25 = vsel %vm1556_vm2, %v8771_v10, -inf }
 0x3cf   : > { %1594 = vmax.xlane.f32.xlu0 %v1593_v25  ;;  %v8775_v55 = vpop.f32.mrb[38].mxu0 }
 0x3d0   : > { %v6851_v58 = vpop.f32.mrb[39].mxu0  ;;  %v1596_v17 = vsel %vm1556_vm2, %v8775_v55, -inf }
 0x3d1   : > { %1597 = vmax.xlane.f32.xlu1 %v1596_v17 }
 0x3d5   : > { %v8779_v60 = vpop.f32.mrb[36].mxu1 }
 0x3d6   : > { %v6856_v62 = vpop.f32.mrb[37].mxu1  ;;  %v1599_v22 = vsel %vm1556_vm2, %v8779_v60, -inf }
 0x3d7   : > { %1600 = vmax.xlane.f32.xlu0 %v1599_v22  ;;  %v8783_v7 = vpop.f32.mrb[38].mxu1 }
 0x3d8   : > { %v6857_v8 = vpop.f32.mrb[39].mxu1  ;;  %v1602_v16 = vsel %vm1556_vm2, %v8783_v7, -inf }
 0x3d9   : > { %1603 = vmax.xlane.f32.xlu1 %v1602_v16 }
 0x42c   : > { %v1559_v41 = vpop.xlane.xlu0 %1558 }
 0x42d   : > { %v1605_v23 = vsub.f32 %v8723_v1, %v1559_v41 }
 0x42e   : > { %v1562_v26 = vpop.xlane.xlu1 %1561 }
 0x42f   : > { %v1621_v30 = vmul.f32 1.442695, %v1605_v23  ;;  %v1606_v34 = vsub.f32 %v8727_v50, %v1562_v26 }
 0x431   : > { %7455 = vpow2.f32 %v1621_v30  ;;  %v1623_v36 = vmul.f32 1.442695, %v1606_v34 }
 0x433   : > { %7457 = vpow2.f32 %v1623_v36 }
 0x434   : > { %v1565_v37 = vpop.xlane.xlu0 %1564 }
 0x435   : > { %v1607_v38 = vsub.f32 %v8731_v4, %v1565_v37 }
 0x436   : > { %v1568_v39 = vpop.xlane.xlu1 %1567 }
 0x437   : > { %v1625_v47 = vmul.f32 1.442695, %v1607_v38  ;;  %v1608_v40 = vsub.f32 %v8735_v59, %v1568_v39 }
 0x439   : > { %7459 = vpow2.f32 %v1625_v47  ;;  %v1627_v51 = vmul.f32 1.442695, %v1608_v40 }
 0x43b   : > { %v8791_v25 = vpop.eup %7455  ;;  %7461 = vpow2.f32 %v1627_v51 }
 0x43c   : > { %v1571_v1 = vpop.xlane.xlu0 %1570  ;;  %v1653_v58 = vsel %vm1556_vm2, %v8791_v25, 0.0 }
 0x43d   : > { %v8795_v50 = vpop.eup %7457  ;;  %v1609_v17 = vsub.f32 %v8739_v13, %v1571_v1  ;;  %1654 = vadd.xlane.f32.xlu0 %v1653_v58 }
 0x43e   : > { %v1574_v62 = vpop.xlane.xlu1 %1573  ;;  %v1656_v4 = vsel %vm1556_vm2, %v8795_v50, 0.0 }
 0x43f   : > { %v1629_v22 = vmul.f32 1.442695, %v1609_v17  ;;  %v1610_v59 = vsub.f32 %v8743_v2, %v1574_v62  ;;  %1657 = vadd.xlane.f32.xlu1 %v1656_v4 }
 0x441   : > { %7463 = vpow2.f32 %v1629_v22  ;;  %v1631_v8 = vmul.f32 1.442695, %v1610_v59 }
 0x443   : > { %v8801_v16 = vpop.eup %7459  ;;  %7465 = vpow2.f32 %v1631_v8 }
 0x444   : > { %v1577_v41 = vpop.xlane.xlu0 %1576  ;;  %v1659_v23 = vsel %vm1556_vm2, %v8801_v16, 0.0 }
 0x445   : > { %v8805_v26 = vpop.eup %7461  ;;  %v1611_v13 = vsub.f32 %v8747_v9, %v1577_v41  ;;  %1660 = vadd.xlane.f32.xlu0 %v1659_v23 }
 0x446   : > { %v1580_v30 = vpop.xlane.xlu1 %1579  ;;  %v1662_v34 = vsel %vm1556_vm2, %v8805_v26, 0.0 }
 0x447   : > { %v1633_v2 = vmul.f32 1.442695, %v1611_v13  ;;  %v1612_v36 = vsub.f32 %v8751_v21, %v1580_v30  ;;  %1663 = vadd.xlane.f32.xlu1 %v1662_v34 }
 0x449   : > { %7467 = vpow2.f32 %v1633_v2  ;;  %v1635_v37 = vmul.f32 1.442695, %v1612_v36 }
 0x44b   : > { %v8811_v38 = vpop.eup %7463  ;;  %7469 = vpow2.f32 %v1635_v37 }
 0x44c   : > { %v1583_v39 = vpop.xlane.xlu0 %1582  ;;  %v1665_v47 = vsel %vm1556_vm2, %v8811_v38, 0.0 }
 0x44d   : > { %v8815_v40 = vpop.eup %7465  ;;  %v1613_v9 = vsub.f32 %v8755_v27, %v1583_v39  ;;  %1666 = vadd.xlane.f32.xlu0 %v1665_v47 }
 0x44e   : > { %v1586_v51 = vpop.xlane.xlu1 %1585  ;;  %v1668_v1 = vsel %vm1556_vm2, %v8815_v40, 0.0 }
 0x44f   : > { %v1637_v21 = vmul.f32 1.442695, %v1613_v9  ;;  %v1614_v58 = vsub.f32 %v8759_v49, %v1586_v51  ;;  %1669 = vadd.xlane.f32.xlu1 %v1668_v1 }
 0x451   : > { %7471 = vpow2.f32 %v1637_v21  ;;  %v1639_v17 = vmul.f32 1.442695, %v1614_v58 }
 0x453   : > { %v8821_v62 = vpop.eup %7467  ;;  %7473 = vpow2.f32 %v1639_v17 }
 0x454   : > { %v1589_v4 = vpop.xlane.xlu0 %1588  ;;  %v1671_v22 = vsel %vm1556_vm2, %v8821_v62, 0.0 }
 0x455   : > { %v8825_v59 = vpop.eup %7469  ;;  %v1615_v27 = vsub.f32 %v8763_v15, %v1589_v4  ;;  %1672 = vadd.xlane.f32.xlu0 %v1671_v22 }
 0x456   : > { %v1592_v8 = vpop.xlane.xlu1 %1591  ;;  %v1674_v41 = vsel %vm1556_vm2, %v8825_v59, 0.0 }
 0x457   : > { %v1641_v49 = vmul.f32 1.442695, %v1615_v27  ;;  %v1616_v23 = vsub.f32 %v8767_v32, %v1592_v8  ;;  %1675 = vadd.xlane.f32.xlu1 %v1674_v41 }
 0x459   : > { %7475 = vpow2.f32 %v1641_v49  ;;  %v1643_v13 = vmul.f32 1.442695, %v1616_v23 }
 0x45b   : > { %v8831_v30 = vpop.eup %7471  ;;  %7477 = vpow2.f32 %v1643_v13 }
 0x45c   : > { %v1595_v34 = vpop.xlane.xlu0 %1594  ;;  %v1677_v2 = vsel %vm1556_vm2, %v8831_v30, 0.0 }
 0x45d   : > { %v8835_v36 = vpop.eup %7473  ;;  %v1617_v15 = vsub.f32 %v8771_v10, %v1595_v34  ;;  %1678 = vadd.xlane.f32.xlu0 %v1677_v2 }
 0x45e   : > { %v1598_v37 = vpop.xlane.xlu1 %1597  ;;  %v1680_v39 = vsel %vm1556_vm2, %v8835_v36, 0.0 }
 0x45f   : > { %v1645_v32 = vmul.f32 1.442695, %v1617_v15  ;;  %v1618_v47 = vsub.f32 %v8775_v55, %v1598_v37  ;;  %1681 = vadd.xlane.f32.xlu1 %v1680_v39 }
 0x461   : > { %7479 = vpow2.f32 %v1645_v32  ;;  %v1647_v9 = vmul.f32 1.442695, %v1618_v47 }
 0x463   : > { %v8841_v51 = vpop.eup %7475  ;;  %7481 = vpow2.f32 %v1647_v9 }
 0x464   : > { %v1601_v1 = vpop.xlane.xlu0 %1600  ;;  %v1683_v21 = vsel %vm1556_vm2, %v8841_v51, 0.0 }
 0x465   : > { %v8845_v58 = vpop.eup %7477  ;;  %v1619_v10 = vsub.f32 %v8779_v60, %v1601_v1  ;;  %1684 = vadd.xlane.f32.xlu0 %v1683_v21 }
 0x466   : > { %v1686_v17 = vsel %vm1556_vm2, %v8845_v58, 0.0  ;;  %v1604_v49 = vpop.xlane.xlu1 %1603 }
 0x467   : > { %v1649_v4 = vmul.f32 1.442695, %v1619_v10  ;;  %1687 = vadd.xlane.f32.xlu1 %v1686_v17  ;;  %v1620_v23 = vsub.f32 %v8783_v7, %v1604_v49 }
 0x469   : > { %7483 = vpow2.f32 %v1649_v4  ;;  %v1651_v13 = vmul.f32 1.442695, %v1620_v23 }
 0x46b   : > { %v8850_v55 = vpop.eup %7479  ;;  %7485 = vpow2.f32 %v1651_v13 }
 0x46c   : > { %v1689_v22 = vsel %vm1556_vm2, %v8850_v55, 0.0 }
 0x46d   : > { %v8854_v27 = vpop.eup %7481  ;;  %1690 = vadd.xlane.f32.xlu0 %v1689_v22 }
 0x46e   : > { %v1692_v8 = vsel %vm1556_vm2, %v8854_v27, 0.0 }
 0x46f   : > { %1693 = vadd.xlane.f32.xlu1 %v1692_v8 }
 0x473   : > { %v8858_v60 = vpop.eup %7483 }
 0x474   : > { %v1695_v41 = vsel %vm1556_vm2, %v8858_v60, 0.0 }
 0x475   : > { %1696 = vadd.xlane.f32.xlu0 %v1695_v41  ;;  %v8881_v34 = vpop.eup %7485 }
 0x476   : > { %v1698_v7 = vsel %vm1556_vm2, %v8881_v34, 0.0 }
 0x480   : > { %2158 = vrot.lane.b32.xlu1 %v8593_v44, %s8055_s24 }
 0x484   : > { %2102 = vrot.lane.b32.xlu1 %v8571_v20, %s8055_s24 }
 0x48b   : > { %2105 = vrot.lane.b32.xlu0 %v8573_v48, %s8055_s24 }
 0x48f   : > { %2155 = vrot.lane.b32.xlu0 %v8590_v57, %s8055_s24 }
 0x493   : > { %2208 = vrot.lane.b32.xlu0 %v8613_v61, %s8055_s24 }
 0x497   : > { %2261 = vrot.lane.b32.xlu0 %v8636_v31, %s8055_s24 }
 0x49b   : > { %2314 = vrot.lane.b32.xlu0 %v8659_v52, %s8055_s24 }
 0x49f   : > { %2367 = vrot.lane.b32.xlu0 %v8674_v5, %s8055_s24 }
 0x4a3   : > { %2420 = vrot.lane.b32.xlu0 %v8689_v12, %s8055_s24 }
 0x4a8   : > { %1699 = vadd.xlane.f32.xlu1 %v1698_v7 }
 0x4b9   : > { %2211 = vrot.lane.b32.xlu1 %v8616_v33, %s8055_s24 }
 0x4bd   : > { %2264 = vrot.lane.b32.xlu1 %v8639_v35, %s8055_s24 }
 0x4c1   : > { %2317 = vrot.lane.b32.xlu1 %v8661_v54, %s8055_s24 }
 0x4c5   : > { %2370 = vrot.lane.b32.xlu1 %v8676_v6, %s8055_s24 }
 0x4c9   : > { %2423 = vrot.lane.b32.xlu1 %v8691_v29, %s8055_s24 }
 0x4ca   : > { %v1655_v2 = vpop.xlane.xlu0 %1654 }
 0x4cb   : > { %7487 = vrcp.f32 %v1655_v2 }
 0x4cc   : > { %v1658_v15 = vpop.xlane.xlu1 %1657 }
 0x4cd   : > { %7489 = vrcp.f32 %v1658_v15  ;;  %2476 = vrot.lane.b32.xlu1 %v8706_v3, %s8055_s24 }
 0x4d1   : > { %2473 = vrot.lane.b32.xlu1 %v8704_v42, %s8055_s24 }
 0x4d2   : > { %v1661_v37 = vpop.xlane.xlu0 %1660 }
 0x4d3   : > { %7491 = vrcp.f32 %v1661_v37 }
 0x4d4   : > { %v1664_v39 = vpop.xlane.xlu1 %1663 }
 0x4d5   : > { %v7488_v32 = vpop.eup %7487  ;;  %7493 = vrcp.f32 %v1664_v39 }
 0x4d6   : > { %v1717_v9 = vmul.f32 %v7488_v32, %v8791_v25 }
 0x4d7   : > { %v7490_v47 = vpop.eup %7489 }
 0x4d8   : > { %v1718_v1 = vmul.f32 %v7490_v47, %v8795_v50 }
 0x4da   : > { %v1667_v21 = vpop.xlane.xlu0 %1666  ;;  %v1733_v10 = vpack.c.bf16 %v1718_v1, %v1717_v9 }
 0x4db   : > { %7495 = vrcp.f32 %v1667_v21 }
 0x4dc   : > { %6861 = vmatmul.mubr.msk.bf16.vlgmr.msra.gmra.mrb[40].mxu0 %vm1556_vm2, %v1733_v10  ;;  %v1670_v17 = vpop.xlane.xlu1 %1669 }
 0x4dd   : > { %v7492_v4 = vpop.eup %7491  ;;  %6871 = vmatpush3.bf16.msra.mxu0 %v8606_v53  ;;  %7497 = vrcp.f32 %v1670_v17  ;;  %6872 = vmatprep.mubr.msk.bf16.mxu0 %vm8054_vm0, %v10462_v28 }
 0x4de   : > { %6882 = vmatprep.subr.bf16.mxu0 %v10462_v28  ;;  %v1719_v25 = vmul.f32 %v7492_v4, %v8801_v16 }
 0x4df   : > { %v7494_v22 = vpop.eup %7493 }
 0x4e0   : > { %v1720_v50 = vmul.f32 %v7494_v22, %v8805_v26 }
 0x4e2   : > { %v1673_v8 = vpop.xlane.xlu0 %1672  ;;  %v1734_v41 = vpack.c.bf16 %v1720_v50, %v1719_v25 }
 0x4e3   : > { %7499 = vrcp.f32 %v1673_v8 }
 0x4e4   : > { %6867 = vmatmul.mubr.msk.bf16.vlgmr.msra.gmra.mrb[40].mxu1 %vm1556_vm2, %v1734_v41  ;;  %v1676_v49 = vpop.xlane.xlu1 %1675 }
 0x4e5   : > { %v7496_v23 = vpop.eup %7495  ;;  %6877 = vmatpush3.bf16.msra.mxu1 %v8602_v11  ;;  %7501 = vrcp.f32 %v1676_v49  ;;  %6878 = vmatprep.mubr.msk.bf16.mxu1 %vm8054_vm0, %v10462_v28 }
 0x4e6   : > { %6888 = vmatprep.subr.bf16.mxu1 %v10462_v28  ;;  %v1721_v16 = vmul.f32 %v7496_v23, %v8811_v38 }
 0x4e7   : > { %v7498_v13 = vpop.eup %7497 }
 0x4e8   : > { %v1722_v26 = vmul.f32 %v7498_v13, %v8815_v40 }
 0x4ea   : > { %v1679_v7 = vpop.xlane.xlu0 %1678  ;;  %v1735_v2 = vpack.c.bf16 %v1722_v26, %v1721_v16 }
 0x4eb   : > { %7503 = vrcp.f32 %v1679_v7 }
 0x4ec   : > { %6873 = vmatmul.mubr.msk.bf16.vlgmr.msra.gmra.mrb[44].mxu0 %vm1556_vm2, %v1735_v2  ;;  %v1682_v15 = vpop.xlane.xlu1 %1681 }
 0x4ed   : > { %v7500_v37 = vpop.eup %7499  ;;  %6883 = vmatpush3.bf16.msra.mxu0 %v8629_v19  ;;  %7505 = vrcp.f32 %v1682_v15  ;;  %6884 = vmatprep.mubr.msk.bf16.mxu0 %vm8054_vm0, %v10462_v28 }
 0x4ee   : > { %6894 = vmatprep.subr.bf16.mxu0 %v10462_v28  ;;  %v1723_v38 = vmul.f32 %v7500_v37, %v8821_v62 }
 0x4ef   : > { %v7502_v39 = vpop.eup %7501 }
 0x4f0   : > { %v1724_v40 = vmul.f32 %v7502_v39, %v8825_v59 }
 0x4f2   : > { %v1685_v32 = vpop.xlane.xlu0 %1684  ;;  %v1736_v47 = vpack.c.bf16 %v1724_v40, %v1723_v38 }
 0x4f3   : > { %7507 = vrcp.f32 %v1685_v32 }
 0x4f4   : > { %6879 = vmatmul.mubr.msk.bf16.vlgmr.msra.gmra.mrb[44].mxu1 %vm1556_vm2, %v1736_v47  ;;  %v1688_v9 = vpop.xlane.xlu1 %1687 }
 0x4f5   : > { %v7504_v1 = vpop.eup %7503  ;;  %6889 = vmatpush3.bf16.msra.mxu1 %v8625_v18  ;;  %7509 = vrcp.f32 %v1688_v9  ;;  %6890 = vmatprep.mubr.msk.bf16.mxu1 %vm8054_vm0, %v10462_v28 }
 0x4f6   : > { %6900 = vmatprep.subr.bf16.mxu1 %v10462_v28  ;;  %v1725_v62 = vmul.f32 %v7504_v1, %v8831_v30 }
 0x4f7   : > { %v7506_v21 = vpop.eup %7505 }
 0x4f8   : > { %v1726_v59 = vmul.f32 %v7506_v21, %v8835_v36 }
 0x4fa   : > { %v1691_v10 = vpop.xlane.xlu0 %1690  ;;  %v1737_v17 = vpack.c.bf16 %v1726_v59, %v1725_v62 }
 0x4fb   : > { %7511 = vrcp.f32 %v1691_v10 }
 0x4fc   : > { %6885 = vmatmul.mubr.msk.bf16.vlgmr.msra.gmra.mrb[48].mxu0 %vm1556_vm2, %v1737_v17  ;;  %v1694_v4 = vpop.xlane.xlu1 %1693 }
 0x4fd   : > { %v7508_v22 = vpop.eup %7507  ;;  %6895 = vmatpush3.bf16.msra.mxu0 %v8652_v45  ;;  %7513 = vrcp.f32 %v1694_v4  ;;  %6896 = vmatprep.mubr.msk.bf16.mxu0 %vm8054_vm0, %v10462_v28 }
 0x4fe   : > { %6906 = vmatprep.subr.bf16.mxu0 %v10462_v28  ;;  %v1727_v30 = vmul.f32 %v7508_v22, %v8841_v51 }
 0x4ff   : > { %v7510_v25 = vpop.eup %7509 }
 0x500   : > { %v1728_v36 = vmul.f32 %v7510_v25, %v8845_v58  ;;  %v2159_v26 = vpop.permute.xlu1 %2158 }
 0x501   : > { %v2164_v59 = vsel %vm1179_vm1, %v2159_v26, 0 }
 0x502   : > { %v1738_v50 = vpack.c.bf16 %v1728_v36, %v1727_v30  ;;  %v1697_v8 = vpop.xlane.xlu0 %1696 }
 0x503   : > { %7515 = vrcp.f32 %v1697_v8 }
 0x504   : > { %6891 = vmatmul.mubr.msk.bf16.vlgmr.msra.gmra.mrb[48].mxu1 %vm1556_vm2, %v1738_v50  ;;  %v2103_v7 = vpop.permute.xlu1 %2102 }
 0x505   : > { %v7512_v41 = vpop.eup %7511  ;;  %6901 = vmatpush3.bf16.msra.mxu1 %v8648_v43  ;;  %6902 = vmatprep.mubr.msk.bf16.mxu1 %vm8054_vm0, %v10462_v28 }
 0x506   : > { %6912 = vmatprep.subr.bf16.mxu1 %v10462_v28  ;;  %v1729_v23 = vmul.f32 %v7512_v41, %v8850_v55  ;;  %v2106_v51 = vpop.permute.xlu0 %2105 }
 0x507   : > { %v7514_v49 = vpop.eup %7513  ;;  %v2111_v58 = vsel %vm1179_vm1, %v2106_v51, 0 }
 0x508   : > { %v1730_v13 = vmul.f32 %v7514_v49, %v8854_v27 }
 0x50a   : > { %v1739_v16 = vpack.c.bf16 %v1730_v13, %v1729_v23  ;;  %v2156_v55 = vpop.permute.xlu0 %2155 }
 0x50c   : > { %6897 = vmatmul.mubr.msk.bf16.vlgmr.msra.gmra.mrb[52].mxu0 %vm1556_vm2, %v1739_v16 }
 0x50d   : > { %6907 = vmatpush3.bf16.xpose.msra.mxu0 %v2111_v58  ;;  %6908 = vmatprep.mubr.msk.bf16.mxu0 %vm8054_vm0, %v10462_v28  ;;  %v7516_v38 = vpop.eup %7515 }
 0x50e   : > { %6918 = vmatprep.subr.bf16.mxu0 %v10462_v28  ;;  %v2209_v2 = vpop.permute.xlu0 %2208  ;;  %v1731_v47 = vmul.f32 %v7516_v38, %v8858_v60 }
 0x512   : > { %v2262_v40 = vpop.permute.xlu0 %2261 }
 0x514   : > { %6909 = vmatmul.mubr.msk.bf16.vlgmr.msra.gmra.mrb[56].mxu0 %vm1179_vm1, %v2103_v7 }
 0x515   : > { %6920 = vmatprep.mubr.msk.bf16.mxu0 %vm8054_vm0, %v10462_v28 }
 0x516   : > { %v2315_v10 = vpop.permute.xlu0 %2314 }
 0x51a   : > { %v2368_v4 = vpop.permute.xlu0 %2367 }
 0x51e   : > { %v2421_v25 = vpop.permute.xlu0 %2420 }
 0x535   : > { %v1700_v27 = vpop.xlane.xlu1 %1699 }
 0x536   : > { %7517 = vrcp.f32 %v1700_v27 }
 0x539   : > { %v2212_v15 = vpop.permute.xlu1 %2211 }
 0x53a   : > { %v2217_v37 = vsel %vm1179_vm1, %v2212_v15, 0 }
 0x53b   : > { %6919 = vmatpush3.bf16.xpose.msra.mxu0 %v2217_v37 }
 0x53c   : > { %6930 = vmatprep.subr.bf16.mxu0 %v10462_v28 }
 0x53d   : > { %v2265_v39 = vpop.permute.xlu1 %2264 }
 0x53e   : > { %v2270_v22 = vsel %vm1179_vm1, %v2265_v39, 0 }
 0x540   : > { %v7518_v32 = vpop.eup %7517 }
 0x541   : > { %v1732_v9 = vmul.f32 %v7518_v32, %v8881_v34  ;;  %v2318_v1 = vpop.permute.xlu1 %2317 }
 0x542   : > { %v2323_v21 = vsel %vm1179_vm1, %v2318_v1, 0  ;;  %6921 = vmatmul.mubr.msk.bf16.vlgmr.msra.gmra.mrb[60].mxu0 %vm1179_vm1, %v2209_v2 }
 0x543   : > { %6931 = vmatpush3.bf16.xpose.msra.mxu0 %v2323_v21  ;;  %v1740_v62 = vpack.c.bf16 %v1732_v9, %v1731_v47  ;;  %6932 = vmatprep.mubr.msk.bf16.mxu0 %vm8054_vm0, %v10462_v28 }
 0x544   : > { %6942 = vmatprep.subr.bf16.mxu0 %v10462_v28 }
 0x545   : > { %6903 = vmatmul.mubr.msk.bf16.vlgmr.msra.gmra.mrb[52].mxu1 %vm1556_vm2, %v1740_v62  ;;  %v2371_v60 = vpop.permute.xlu1 %2370 }
 0x546   : > { %6913 = vmatpush3.bf16.xpose.msra.mxu1 %v2164_v59  ;;  %6914 = vmatprep.mubr.msk.bf16.mxu1 %vm8054_vm0, %v10462_v28  ;;  %v2376_v30 = vsel %vm1179_vm1, %v2371_v60, 0 }
 0x547   : > { %6924 = vmatprep.subr.bf16.mxu1 %v10462_v28 }
 0x549   : > { %v2424_v34 = vpop.permute.xlu1 %2423 }
 0x54a   : > { %v2429_v17 = vsel %vm1179_vm1, %v2424_v34, 0  ;;  %6933 = vmatmul.mubr.msk.bf16.vlgmr.msra.gmra.mrb[64].mxu0 %vm1179_vm1, %v2315_v10 }
 0x54b   : > { %6943 = vmatpush3.bf16.xpose.msra.mxu0 %v2429_v17  ;;  %6944 = vmatprep.mubr.msk.bf16.mxu0 %vm8054_vm0, %v10462_v28 }
 0x54c   : > { %6954 = vmatprep.subr.bf16.mxu0 %v10462_v28 }
 0x54d   : > { %6915 = vmatmul.mubr.msk.bf16.vlgmr.msra.gmra.mrb[56].mxu1 %vm1179_vm1, %v2156_v55  ;;  %v2477_v36 = vpop.permute.xlu1 %2476 }
 0x54e   : > { %6925 = vmatpush3.bf16.xpose.msra.mxu1 %v2270_v22  ;;  %6926 = vmatprep.mubr.msk.bf16.mxu1 %vm8054_vm0, %v10462_v28  ;;  %v2482_v50 = vsel %vm1179_vm1, %v2477_v36, 0 }
 0x54f   : > { %6936 = vmatprep.subr.bf16.mxu1 %v10462_v28 }
 0x551   : > { %v2474_v8 = vpop.permute.xlu1 %2473 }
 0x552   : > { %6945 = vmatmul.mubr.msk.bf16.vlgmr.msra.gmra.mrb[68].mxu0 %vm1179_vm1, %v2421_v25 }
 0x553   : > { %6956 = vmatprep.mubr.msk.bf16.mxu0 %vm8054_vm0, %v10462_v28 }
 0x555   : > { %6927 = vmatmul.mubr.msk.bf16.vlgmr.msra.gmra.mrb[60].mxu1 %vm1179_vm1, %v2262_v40 }
 0x556   : > { %6937 = vmatpush3.bf16.xpose.msra.mxu1 %v2376_v30  ;;  %6938 = vmatprep.mubr.msk.bf16.mxu1 %vm8054_vm0, %v10462_v28 }
 0x557   : > { %6948 = vmatprep.subr.bf16.mxu1 %v10462_v28 }
 0x55d   : > { %6939 = vmatmul.mubr.msk.bf16.vlgmr.msra.gmra.mrb[64].mxu1 %vm1179_vm1, %v2368_v4 }
 0x55e   : > { %6949 = vmatpush3.bf16.xpose.msra.mxu1 %v2482_v50  ;;  %6950 = vmatprep.mubr.msk.bf16.mxu1 %vm8054_vm0, %v10462_v28 }
 0x55f   : > { %6960 = vmatprep.subr.bf16.mxu1 %v10462_v28 }
 0x565   : > { %6951 = vmatmul.mubr.msk.bf16.vlgmr.msra.gmra.mrb[68].mxu1 %vm1179_vm1, %v2474_v8 }
 0x566   : > { %6962 = vmatprep.mubr.msk.bf16.mxu1 %vm8054_vm0, %v10462_v28 }
 0x5af   : > { %v8991_v41 = vpop.f32.mrb[40].mxu0 }
 0x5b0   : > { %10516 = vst [vmem:[#allocation19_spill] sm:$0xff] %v8991_v41  ;;  %v6862_v49 = vpop.f32.mrb[41].mxu0 }
 0x5b1   : > { %v8993_v23 = vpop.f32.mrb[42].mxu0 }
 0x5b2   : > { %10517 = vst [vmem:[#allocation20_spill] sm:$0xff] %v8993_v23  ;;  %v6863_v51 = vpop.f32.mrb[43].mxu0 }
 0x5b7   : > { %v8997_v16 = vpop.f32.mrb[40].mxu1 }
 0x5b8   : > { %10518 = vst [vmem:[#allocation21_spill] sm:$0xff] %v8997_v16  ;;  %v6868_v58 = vpop.f32.mrb[41].mxu1 }
 0x5b9   : > { %v8999_v26 = vpop.f32.mrb[42].mxu1 }
 0x5ba   : > { %10519 = vst [vmem:[#allocation22_spill] sm:$0xff] %v8999_v26  ;;  %v6869_v55 = vpop.f32.mrb[43].mxu1 }
 0x5bf   : > { %v9003_v27 = vpop.f32.mrb[44].mxu0 }
 0x5c0   : > { %10520 = vst [vmem:[#allocation23_spill] sm:$0xff] %v9003_v27  ;;  %v6874_v2 = vpop.f32.mrb[45].mxu0 }
 0x5c1   : > { %v9005_v15 = vpop.f32.mrb[46].mxu0 }
 0x5c2   : > { %10521 = vst [vmem:[#allocation24_spill] sm:$0xff] %v9005_v15  ;;  %v6875_v39 = vpop.f32.mrb[47].mxu0 }
 0x5c7   : > { %v9009_v38 = vpop.f32.mrb[44].mxu1 }
 0x5c8   : > { %10522 = vst [vmem:[#allocation25_spill] sm:$0xff] %v9009_v38  ;;  %v6880_v40 = vpop.f32.mrb[45].mxu1 }
 0x5c9   : > { %v9011_v32 = vpop.f32.mrb[46].mxu1 }
 0x5ca   : > { %10523 = vst [vmem:[#allocation26_spill] sm:$0xff] %v9011_v32  ;;  %v6881_v9 = vpop.f32.mrb[47].mxu1 }
 0x5cf   : > { %v9015_v1 = vpop.f32.mrb[48].mxu0 }
 0x5d0   : > { %10524 = vst [vmem:[#allocation27_spill] sm:$0xff] %v9015_v1  ;;  %v6886_v21 = vpop.f32.mrb[49].mxu0 }
 0x5d1   : > { %v9017_v62 = vpop.f32.mrb[50].mxu0 }
 0x5d2   : > { %10525 = vst [vmem:[#allocation28_spill] sm:$0xff] %v9017_v62  ;;  %v6887_v10 = vpop.f32.mrb[51].mxu0 }
 0x5d7   : > { %v9021_v60 = vpop.f32.mrb[48].mxu1 }
 0x5d8   : > { %10526 = vst [vmem:[#allocation29_spill] sm:$0xff] %v9021_v60  ;;  %v6892_v34 = vpop.f32.mrb[49].mxu1 }
 0x5d9   : > { %v9023_v17 = vpop.f32.mrb[50].mxu1 }
 0x5da   : > { %10527 = vst [vmem:[#allocation30_spill] sm:$0xff] %v9023_v17  ;;  %v6893_v22 = vpop.f32.mrb[51].mxu1 }
 0x5df   : > { %v9027_v25 = vpop.f32.mrb[52].mxu0 }
 0x5e0   : > { %10528 = vst [vmem:[#allocation31_spill] sm:$0xff] %v9027_v25  ;;  %v6898_v30 = vpop.f32.mrb[53].mxu0 }
 0x5e1   : > { %v9029_v36 = vpop.f32.mrb[54].mxu0 }
 0x5e2   : > { %10529 = vst [vmem:[#allocation32_spill] sm:$0xff] %v9029_v36  ;;  %v6899_v8 = vpop.f32.mrb[55].mxu0 }
 0x5e7   : > { %v9033_v49 = vpop.f32.mrb[56].mxu0 }
 0x5e8   : > { %v6910_v51 = vpop.f32.mrb[57].mxu0  ;;  %v2525_v58 = vsel %vm1556_vm2, %v9033_v49, -inf }
 0x5e9   : > { %2526 = vmax.xlane.f32.xlu0 %v2525_v58  ;;  %v9037_v55 = vpop.f32.mrb[58].mxu0 }
 0x5ea   : > { %v6911_v2 = vpop.f32.mrb[59].mxu0  ;;  %v2528_v39 = vsel %vm1556_vm2, %v9037_v55, -inf }
 0x5eb   : > { %2529 = vmax.xlane.f32.xlu1 %v2528_v39 }
 0x5fc   : > { %2758 = vrot.lane.b32.xlu1 %v8581_v24, %s8055_s24 }
 0x600   : > { %2806 = vrot.lane.b32.xlu1 %v8606_v53, %s8055_s24 }
 0x604   : > { %2854 = vrot.lane.b32.xlu1 %v8602_v11, %s8055_s24 }
 0x615   : > { %v9047_v40 = vpop.f32.mrb[60].mxu0 }
 0x616   : > { %v6922_v9 = vpop.f32.mrb[61].mxu0 }
 0x617   : > { %v9049_v21 = vpop.f32.mrb[62].mxu0 }
 0x618   : > { %v9051_v10 = vpop.f32.mrb[52].mxu1  ;;  %v6923_v34 = vpop.f32.mrb[63].mxu0 }
 0x619   : > { %10530 = vst [vmem:[#allocation33_spill] sm:$0xff] %v9051_v10  ;;  %v6904_v22 = vpop.f32.mrb[53].mxu1 }
 0x61a   : > { %v9053_v30 = vpop.f32.mrb[54].mxu1 }
 0x61b   : > { %10531 = vst [vmem:[#allocation34_spill] sm:$0xff] %v9053_v30  ;;  %v6905_v51 = vpop.f32.mrb[55].mxu1 }
 0x61c   : > { %v2537_v51 = vsel %vm1556_vm2, %v9047_v40, -inf }
 0x61d   : > { %v9057_v58 = vpop.f32.mrb[64].mxu0 }
 0x61e   : > { %v6934_v2 = vpop.f32.mrb[65].mxu0 }
 0x61f   : > { %v9059_v39 = vpop.f32.mrb[66].mxu0 }
 0x620   : > { %v9061_v0 = vpop.f32.mrb[56].mxu1  ;;  %v6935_v9 = vpop.f32.mrb[67].mxu0 }
 0x621   : > { %v6916_v63 = vpop.f32.mrb[57].mxu1  ;;  %v2531_v4 = vsel %vm1556_vm2, %v9061_v0, -inf  ;;  %v2540_v9 = vsel %vm1556_vm2, %v9049_v21, -inf }
 0x622   : > { %2532 = vmax.xlane.f32.xlu0 %v2531_v4  ;;  %v9065_v34 = vpop.f32.mrb[58].mxu1 }
 0x623   : > { %v6917_v22 = vpop.f32.mrb[59].mxu1 }
 0x624   : > { %v2534_v22 = vsel %vm1556_vm2, %v9065_v34, -inf }
 0x625   : > { %v9067_v50 = vpop.f32.mrb[68].mxu0 }
 0x626   : > { %v6946_v8 = vpop.f32.mrb[69].mxu0  ;;  %2538 = vmax.xlane.f32.xlu0 %v2537_v51  ;;  %v2552_v51 = vsel %vm1556_vm2, %v9059_v39, -inf }
 0x627   : > { %v9071_v2 = vpop.f32.mrb[70].mxu0 }
 0x628   : > { %2541 = vmax.xlane.f32.xlu1 %v2540_v9  ;;  %v9075_v63 = vpop.f32.mrb[60].mxu1  ;;  %v6947_v59 = vpop.f32.mrb[71].mxu0 }
 0x629   : > { %v6928_v4 = vpop.f32.mrb[61].mxu1 }
 0x62a   : > { %2535 = vmax.xlane.f32.xlu0 %v2534_v22  ;;  %v9079_v47 = vpop.f32.mrb[62].mxu1 }
 0x62b   : > { %v6929_v37 = vpop.f32.mrb[63].mxu1  ;;  %v2546_v8 = vsel %vm1556_vm2, %v9079_v47, -inf }
 0x62c   : > { %2547 = vmax.xlane.f32.xlu1 %v2546_v8  ;;  %v2564_v37 = vsel %vm1556_vm2, %v9071_v2, -inf }
 0x630   : > { %2553 = vmax.xlane.f32.xlu1 %v2552_v51  ;;  %v9085_v9 = vpop.f32.mrb[64].mxu1 }
 0x631   : > { %v6940_v7 = vpop.f32.mrb[65].mxu1 }
 0x632   : > { %v9087_v59 = vpop.f32.mrb[66].mxu1  ;;  %v2543_v7 = vsel %vm1556_vm2, %v9075_v63, -inf }
 0x633   : > { %v6941_v4 = vpop.f32.mrb[67].mxu1  ;;  %v2558_v22 = vsel %vm1556_vm2, %v9087_v59, -inf }
 0x634   : > { %2559 = vmax.xlane.f32.xlu1 %v2558_v22  ;;  %v2549_v4 = vsel %vm1556_vm2, %v9057_v58, -inf  ;;  %v2555_v22 = vsel %vm1556_vm2, %v9085_v9, -inf }
 0x638   : > { %2565 = vmax.xlane.f32.xlu1 %v2564_v37  ;;  %v9093_v13 = vpop.f32.mrb[68].mxu1  ;;  %v2561_v37 = vsel %vm1556_vm2, %v9067_v50, -inf }
 0x639   : > { %v6952_v8 = vpop.f32.mrb[69].mxu1 }
 0x63a   : > { %v9095_v46 = vpop.f32.mrb[70].mxu1 }
 0x63b   : > { %v6953_v51 = vpop.f32.mrb[71].mxu1  ;;  %v2570_v8 = vsel %vm1556_vm2, %v9095_v46, -inf }
 0x63c   : > { %v2567_v51 = vsel %vm1556_vm2, %v9093_v13, -inf }
 0x640   : > { %2710 = vrot.lane.b32.xlu0 %v8583_v56, %s8055_s24 }
 0x649   : > { %2950 = vrot.lane.b32.xlu1 %v8625_v18, %s8055_s24 }
 0x65f   : > { %2544 = vmax.xlane.f32.xlu0 %v2543_v7 }
 0x663   : > { %2550 = vmax.xlane.f32.xlu0 %v2549_v4  ;;  %v10532_v4 = vmov 0.0  }
 0x667   : > { %2556 = vmax.xlane.f32.xlu0 %v2555_v22 }
 0x66b   : > { %2562 = vmax.xlane.f32.xlu0 %v2561_v37 }
 0x66d   : > { %2571 = vmax.xlane.f32.xlu1 %v2570_v8 }
 0x66f   : > { %2568 = vmax.xlane.f32.xlu0 %v2567_v51 }
 0x676   : > { %v2527_v37 = vpop.xlane.xlu0 %2526 }
 0x677   : > { %v2573_v51 = vsub.f32 %v9033_v49, %v2527_v37 }
 0x678   : > { %v2530_v7 = vpop.xlane.xlu1 %2529 }
 0x679   : > { %v2574_v22 = vsub.f32 %v9037_v55, %v2530_v7  ;;  %v2589_v14 = vmul.f32 1.442695, %v2573_v51 }
 0x67b   : > { %v2591_v8 = vmul.f32 1.442695, %v2574_v22 }
 0x67c   : > { %v2759_v28 = vpop.permute.xlu1 %2758 }
 0x67d   : > { %6961 = vmatpush3.bf16.msra.mxu1 %v2759_v28  ;;  %7519 = vpow2.f32 %v2591_v8 }
 0x67e   : > { %3046 = vrot.lane.b32.xlu1 %v8648_v43, %s8055_s24  ;;  %6972 = vmatprep.subr.bf16.mxu1 %v10532_v4  ;;  %7521 = vpow2.f32 %v2589_v14 }
 0x680   : > { %v9130_v55 = vpop.permute.xlu1 %2806 }
 0x684   : > { %v9133_v22 = vpop.permute.xlu1 %2854 }
 0x685   : > { %2902 = vrot.lane.b32.xlu0 %v8629_v19, %s8055_s24 }
 0x687   : > { %v9122_v28 = vpop.eup %7519 }
 0x688   : > { %v2624_v10 = vsel %vm1556_vm2, %v9122_v28, 0.0  ;;  %v9126_v30 = vpop.eup %7521 }
 0x689   : > { %2998 = vrot.lane.b32.xlu0 %v8652_v45, %s8055_s24  ;;  %v2621_v60 = vsel %vm1556_vm2, %v9126_v30, 0.0 }
 0x6a2   : > { %2625 = vadd.xlane.f32.xlu1 %v2624_v10 }
 0x6a8   : > { %2622 = vadd.xlane.f32.xlu0 %v2621_v60 }
 0x6af   : > { %v2533_v7 = vpop.xlane.xlu0 %2532 }
 0x6b0   : > { %v2575_v49 = vsub.f32 %v9061_v0, %v2533_v7 }
 0x6b2   : > { %v2593_v14 = vmul.f32 1.442695, %v2575_v49 }
 0x6b3   : > { %v2539_v37 = vpop.xlane.xlu0 %2538 }
 0x6b4   : > { %7523 = vpow2.f32 %v2593_v14  ;;  %v2577_v8 = vsub.f32 %v9047_v40, %v2539_v37 }
 0x6b5   : > { %v2542_v51 = vpop.xlane.xlu1 %2541 }
 0x6b6   : > { %v2597_v10 = vmul.f32 1.442695, %v2577_v8  ;;  %v2578_v17 = vsub.f32 %v9049_v21, %v2542_v51 }
 0x6b7   : > { %v2536_v25 = vpop.xlane.xlu0 %2535 }
 0x6b8   : > { %7525 = vpow2.f32 %v2597_v10  ;;  %v2576_v60 = vsub.f32 %v9065_v34, %v2536_v25  ;;  %v2599_v1 = vmul.f32 1.442695, %v2578_v17 }
 0x6b9   : > { %v2548_v36 = vpop.xlane.xlu1 %2547 }
 0x6ba   : > { %v2595_v62 = vmul.f32 1.442695, %v2576_v60  ;;  %v2580_v0 = vsub.f32 %v9079_v47, %v2548_v36 }
 0x6bb   : > { %v2711_v7 = vpop.permute.xlu0 %2710 }
 0x6bc   : > { %7527 = vpow2.f32 %v2595_v62  ;;  %6955 = vmatpush3.bf16.msra.mxu0 %v2711_v7  ;;  %v2603_v14 = vmul.f32 1.442695, %v2580_v0 }
 0x6bd   : > { %v2554_v49 = vpop.xlane.xlu1 %2553  ;;  %6966 = vmatprep.subr.bf16.mxu0 %v10532_v4  ;;  %7529 = vpow2.f32 %v2599_v1 }
 0x6be   : > { %v9140_v40 = vpop.eup %7523  ;;  %v2582_v21 = vsub.f32 %v9059_v39, %v2554_v49  ;;  %7531 = vpow2.f32 %v2603_v14 }
 0x6bf   : > { %v2627_v25 = vsel %vm1556_vm2, %v9140_v40, 0.0 }
 0x6c0   : > { %2628 = vadd.xlane.f32.xlu0 %v2627_v25  ;;  %v2607_v47 = vmul.f32 1.442695, %v2582_v21 }
 0x6c1   : > { %v2560_v17 = vpop.xlane.xlu1 %2559 }
 0x6c2   : > { %v9145_v34 = vpop.eup %7525  ;;  %v2584_v62 = vsub.f32 %v9087_v59, %v2560_v17  ;;  %7533 = vpow2.f32 %v2607_v47 }
 0x6c3   : > { %v2633_v36 = vsel %vm1556_vm2, %v9145_v34, 0.0 }
 0x6c4   : > { %2634 = vadd.xlane.f32.xlu0 %v2633_v36  ;;  %v2611_v39 = vmul.f32 1.442695, %v2584_v62 }
 0x6c5   : > { %v2566_v37 = vpop.xlane.xlu1 %2565 }
 0x6c6   : > { %v9150_v1 = vpop.eup %7527  ;;  %v2586_v8 = vsub.f32 %v9071_v2, %v2566_v37  ;;  %7535 = vpow2.f32 %v2611_v39 }
 0x6c7   : > { %v2630_v51 = vsel %vm1556_vm2, %v9150_v1, 0.0  ;;  %v9155_v10 = vpop.eup %7529 }
 0x6c8   : > { %2631 = vadd.xlane.f32.xlu1 %v2630_v51  ;;  %v2615_v60 = vmul.f32 1.442695, %v2586_v8  ;;  %v2636_v59 = vsel %vm1556_vm2, %v9155_v10, 0.0  ;;  %v9159_v0 = vpop.eup %7531 }
 0x6c9   : > { %v2642_v7 = vsel %vm1556_vm2, %v9159_v0, 0.0 }
 0x6ca   : > { %7537 = vpow2.f32 %v2615_v60 }
 0x6cc   : > { %2637 = vadd.xlane.f32.xlu1 %v2636_v59  ;;  %v9163_v49 = vpop.eup %7533  ;;  %v9180_v59 = vpop.permute.xlu1 %2950 }
 0x6cd   : > { %v2648_v2 = vsel %vm1556_vm2, %v9163_v49, 0.0 }
 0x6d0   : > { %2643 = vadd.xlane.f32.xlu1 %v2642_v7  ;;  %v9167_v14 = vpop.eup %7535 }
 0x6d1   : > { %v2654_v21 = vsel %vm1556_vm2, %v9167_v14, 0.0 }
 0x6d4   : > { %2649 = vadd.xlane.f32.xlu1 %v2648_v2  ;;  %v9171_v25 = vpop.eup %7537 }
 0x6d5   : > { %v2660_v17 = vsel %vm1556_vm2, %v9171_v25, 0.0 }
 0x6d8   : > { %2655 = vadd.xlane.f32.xlu1 %v2654_v21 }
 0x6dc   : > { %2661 = vadd.xlane.f32.xlu1 %v2660_v17 }
 0x6ec   : > { %v2545_v47 = vpop.xlane.xlu0 %2544 }
 0x6ed   : > { %v2579_v62 = vsub.f32 %v9075_v63, %v2545_v47  ;;  %3154 = vrot.lane.b32.xlu1 %v8593_v44, %s8056_s18 }
 0x6ef   : > { %v2601_v36 = vmul.f32 1.442695, %v2579_v62 }
 0x6f0   : > { %v2551_v37 = vpop.xlane.xlu0 %2550 }
 0x6f1   : > { %7539 = vpow2.f32 %v2601_v36  ;;  %v2581_v39 = vsub.f32 %v9057_v58, %v2551_v37 }
 0x6f3   : > { %v2605_v8 = vmul.f32 1.442695, %v2581_v39 }
 0x6f4   : > { %v2557_v51 = vpop.xlane.xlu0 %2556 }
 0x6f5   : > { %7541 = vpow2.f32 %v2605_v8  ;;  %v2583_v60 = vsub.f32 %v9085_v9, %v2557_v51 }
 0x6f7   : > { %v2609_v7 = vmul.f32 1.442695, %v2583_v60 }
 0x6f8   : > { %v2563_v2 = vpop.xlane.xlu0 %2562 }
 0x6f9   : > { %7543 = vpow2.f32 %v2609_v7  ;;  %v2585_v63 = vsub.f32 %v9067_v50, %v2563_v2 }
 0x6fa   : > { %v2572_v21 = vpop.xlane.xlu1 %2571 }
 0x6fb   : > { %v9183_v17 = vpop.eup %7539  ;;  %v2613_v47 = vmul.f32 1.442695, %v2585_v63  ;;  %v2588_v62 = vsub.f32 %v9095_v46, %v2572_v21 }
 0x6fc   : > { %v2569_v36 = vpop.xlane.xlu0 %2568  ;;  %v2639_v58 = vsel %vm1556_vm2, %v9183_v17, 0.0 }
 0x6fd   : > { %7545 = vpow2.f32 %v2613_v47  ;;  %v2587_v9 = vsub.f32 %v9093_v13, %v2569_v36  ;;  %2640 = vadd.xlane.f32.xlu0 %v2639_v58  ;;  %v2619_v39 = vmul.f32 1.442695, %v2588_v62 }
 0x6fe   : > { %v9221_v62 = vpop.permute.xlu1 %3046 }
 0x6ff   : > { %v9189_v37 = vpop.eup %7541  ;;  %v2617_v8 = vmul.f32 1.442695, %v2587_v9 }
 0x700   : > { %v2645_v50 = vsel %vm1556_vm2, %v9189_v37, 0.0  ;;  %v2903_v47 = vpop.permute.xlu0 %2902 }
 0x701   : > { %7547 = vpow2.f32 %v2617_v8  ;;  %2646 = vadd.xlane.f32.xlu0 %v2645_v50 }
 0x702   : > { %7549 = vpow2.f32 %v2619_v39 }
 0x703   : > { %v9193_v51 = vpop.eup %7543 }
 0x704   : > { %v2651_v46 = vsel %vm1556_vm2, %v9193_v51, 0.0  ;;  %v9227_v36 = vpop.permute.xlu0 %2998 }
 0x705   : > { %2652 = vadd.xlane.f32.xlu0 %v2651_v46 }
 0x707   : > { %v9197_v60 = vpop.eup %7545 }
 0x708   : > { %v2657_v13 = vsel %vm1556_vm2, %v9197_v60, 0.0 }
 0x709   : > { %2658 = vadd.xlane.f32.xlu0 %v2657_v13 }
 0x70b   : > { %v9201_v7 = vpop.eup %7547 }
 0x70c   : > { %v2663_v2 = vsel %vm1556_vm2, %v9201_v7, 0.0  ;;  %v9205_v63 = vpop.eup %7549 }
 0x70d   : > { %2664 = vadd.xlane.f32.xlu0 %v2663_v2  ;;  %v2666_v21 = vsel %vm1556_vm2, %v9205_v63, 0.0 }
 0x711   : > { %2667 = vadd.xlane.f32.xlu1 %v2666_v21 }
 0x722   : > { %3205 = vrot.lane.b32.xlu1 %v8616_v33, %s8056_s18 }
 0x723   : > { %3103 = vrot.lane.b32.xlu0 %v8573_v48, %s8056_s18 }
 0x726   : > { %3256 = vrot.lane.b32.xlu1 %v8639_v35, %s8056_s18 }
 0x727   : > { %3101 = vrot.lane.b32.xlu0 %v8571_v20, %s8056_s18 }
 0x72a   : > { %3307 = vrot.lane.b32.xlu1 %v8661_v54, %s8056_s18 }
 0x72b   : > { %3152 = vrot.lane.b32.xlu0 %v8590_v57, %s8056_s18 }
 0x72e   : > { %3358 = vrot.lane.b32.xlu1 %v8676_v6, %s8056_s18 }
 0x72f   : > { %3203 = vrot.lane.b32.xlu0 %v8613_v61, %s8056_s18  ;;  %v2626_v58 = vpop.xlane.xlu1 %2625 }
 0x730   : > { %7551 = vrcp.f32 %v2626_v58 }
 0x732   : > { %3409 = vrot.lane.b32.xlu1 %v8691_v29, %s8056_s18 }
 0x733   : > { %3254 = vrot.lane.b32.xlu0 %v8636_v31, %s8056_s18 }
 0x735   : > { %v2623_v9 = vpop.xlane.xlu0 %2622 }
 0x736   : > { %7553 = vrcp.f32 %v2623_v9  ;;  %3460 = vrot.lane.b32.xlu1 %v8706_v3, %s8056_s18 }
 0x737   : > { %3305 = vrot.lane.b32.xlu0 %v8659_v52, %s8056_s18 }
 0x73a   : > { %3458 = vrot.lane.b32.xlu1 %v8704_v42, %s8056_s18  ;;  %v7552_v39 = vpop.eup %7551 }
 0x73b   : > { %3356 = vrot.lane.b32.xlu0 %v8674_v5, %s8056_s18  ;;  %v2686_v50 = vmul.f32 %v7552_v39, %v9122_v28 }
 0x73f   : > { %3407 = vrot.lane.b32.xlu0 %v8689_v12, %s8056_s18 }
 0x740   : > { %v7554_v8 = vpop.eup %7553 }
 0x741   : > { %v2685_v46 = vmul.f32 %v7554_v8, %v9126_v30 }
 0x743   : > { %v2701_v13 = vpack.c.bf16 %v2686_v50, %v2685_v46 }
 0x745   : > { %6957 = vmatmul.mubr.msk.bf16.vlgmr.msra.gmra.mrb[72].mxu0 %vm1556_vm2, %v2701_v13 }
 0x746   : > { %6967 = vmatpush3.bf16.msra.mxu0 %v9130_v55  ;;  %6968 = vmatprep.mubr.msk.bf16.mxu0 %vm8054_vm0, %v10532_v4 }
 0x747   : > { %6978 = vmatprep.subr.bf16.mxu0 %v10532_v4 }
 0x74d   : > { %v2629_v2 = vpop.xlane.xlu0 %2628 }
 0x74e   : > { %7555 = vrcp.f32 %v2629_v2 }
 0x751   : > { %v2635_v21 = vpop.xlane.xlu0 %2634 }
 0x755   : > { %v2632_v58 = vpop.xlane.xlu1 %2631 }
 0x756   : > { %7557 = vrcp.f32 %v2632_v58 }
 0x757   : > { %7559 = vrcp.f32 %v2635_v21 }
 0x758   : > { %v7556_v28 = vpop.eup %7555 }
 0x759   : > { %v2638_v9 = vpop.xlane.xlu1 %2637  ;;  %v2687_v39 = vmul.f32 %v7556_v28, %v9140_v40 }
 0x75a   : > { %7561 = vrcp.f32 %v2638_v9 }
 0x75d   : > { %v2644_v40 = vpop.xlane.xlu1 %2643 }
 0x75e   : > { %7563 = vrcp.f32 %v2644_v40 }
 0x760   : > { %v7558_v30 = vpop.eup %7557 }
 0x761   : > { %v2688_v8 = vmul.f32 %v7558_v30, %v9150_v1  ;;  %v7560_v55 = vpop.eup %7559 }
 0x762   : > { %v2689_v13 = vmul.f32 %v7560_v55, %v9145_v34  ;;  %v2650_v34 = vpop.xlane.xlu1 %2649 }
 0x763   : > { %v2702_v50 = vpack.c.bf16 %v2688_v8, %v2687_v39 }
 0x764   : > { %v7562_v46 = vpop.eup %7561 }
 0x765   : > { %v2690_v38 = vmul.f32 %v7562_v46, %v9155_v10  ;;  %6963 = vmatmul.mubr.msk.bf16.vlgmr.msra.gmra.mrb[72].mxu1 %vm1556_vm2, %v2702_v50 }
 0x766   : > { %6973 = vmatpush3.bf16.msra.mxu1 %v9133_v22  ;;  %6974 = vmatprep.mubr.msk.bf16.mxu1 %vm8054_vm0, %v10532_v4  ;;  %v2656_v22 = vpop.xlane.xlu1 %2655 }
 0x767   : > { %v2703_v2 = vpack.c.bf16 %v2690_v38, %v2689_v13  ;;  %6984 = vmatprep.subr.bf16.mxu1 %v10532_v4 }
 0x768   : > { %v7564_v58 = vpop.eup %7563 }
 0x769   : > { %6969 = vmatmul.mubr.msk.bf16.vlgmr.msra.gmra.mrb[76].mxu0 %vm1556_vm2, %v2703_v2  ;;  %v2692_v9 = vmul.f32 %v7564_v58, %v9159_v0 }
 0x76a   : > { %6979 = vmatpush3.bf16.msra.mxu0 %v2903_v47  ;;  %6980 = vmatprep.mubr.msk.bf16.mxu0 %vm8054_vm0, %v10532_v4  ;;  %v2662_v38 = vpop.xlane.xlu1 %2661 }
 0x76b   : > { %6990 = vmatprep.subr.bf16.mxu0 %v10532_v4 }
 0x76e   : > { %v3155_v46 = vpop.permute.xlu1 %3154 }
 0x78a   : > { %v2641_v1 = vpop.xlane.xlu0 %2640 }
 0x78b   : > { %7565 = vrcp.f32 %v2641_v1 }
 0x78c   : > { %7567 = vrcp.f32 %v2650_v34 }
 0x78e   : > { %v2647_v10 = vpop.xlane.xlu0 %2646 }
 0x78f   : > { %7569 = vrcp.f32 %v2647_v10 }
 0x790   : > { %7571 = vrcp.f32 %v2656_v22 }
 0x792   : > { %v2653_v21 = vpop.xlane.xlu0 %2652 }
 0x793   : > { %7573 = vrcp.f32 %v2653_v21 }
 0x794   : > { %7575 = vrcp.f32 %v2662_v38 }
 0x795   : > { %v7566_v47 = vpop.eup %7565 }
 0x796   : > { %v2691_v28 = vmul.f32 %v7566_v47, %v9183_v17  ;;  %v2659_v30 = vpop.xlane.xlu0 %2658  ;;  %v7568_v39 = vpop.eup %7567 }
 0x797   : > { %7577 = vrcp.f32 %v2659_v30  ;;  %v2694_v50 = vmul.f32 %v7568_v39, %v9163_v49  ;;  %v3160_v39 = vsel %vm1179_vm1, %v3155_v46, 0 }
 0x798   : > { %v2704_v8 = vpack.c.bf16 %v2692_v9, %v2691_v28 }
 0x799   : > { %v7570_v55 = vpop.eup %7569 }
 0x79a   : > { %v2693_v13 = vmul.f32 %v7570_v55, %v9189_v37  ;;  %v2665_v2 = vpop.xlane.xlu0 %2664  ;;  %6975 = vmatmul.mubr.msk.bf16.vlgmr.msra.gmra.mrb[76].mxu1 %vm1556_vm2, %v2704_v8  ;;  %v7572_v40 = vpop.eup %7571 }
 0x79b   : > { %6985 = vmatpush3.bf16.msra.mxu1 %v9180_v59  ;;  %6986 = vmatprep.mubr.msk.bf16.mxu1 %vm8054_vm0, %v10532_v4  ;;  %7579 = vrcp.f32 %v2665_v2  ;;  %v2696_v34 = vmul.f32 %v7572_v40, %v9167_v14 }
 0x79c   : > { %v2705_v0 = vpack.c.bf16 %v2694_v50, %v2693_v13  ;;  %6996 = vmatprep.subr.bf16.mxu1 %v10532_v4 }
 0x79d   : > { %v7574_v17 = vpop.eup %7573 }
 0x79e   : > { %v2695_v49 = vmul.f32 %v7574_v17, %v9193_v51  ;;  %v3104_v1 = vpop.permute.xlu0 %3103  ;;  %6981 = vmatmul.mubr.msk.bf16.vlgmr.msra.gmra.mrb[80].mxu0 %vm1556_vm2, %v2705_v0  ;;  %v2668_v37 = vpop.xlane.xlu1 %2667 }
 0x79f   : > { %v7576_v22 = vpop.eup %7575  ;;  %6991 = vmatpush3.bf16.msra.mxu0 %v9227_v36  ;;  %7581 = vrcp.f32 %v2668_v37  ;;  %6992 = vmatprep.mubr.msk.bf16.mxu0 %vm8054_vm0, %v10532_v4  ;;  %v3109_v47 = vsel %vm1179_vm1, %v3104_v1, 0 }
 0x7a0   : > { %v2706_v59 = vpack.c.bf16 %v2696_v34, %v2695_v49  ;;  %7002 = vmatprep.subr.bf16.mxu0 %v10532_v4  ;;  %v2698_v38 = vmul.f32 %v7576_v22, %v9171_v25 }
 0x7a1   : > { %v7578_v10 = vpop.eup %7577 }
 0x7a2   : > { %v2697_v14 = vmul.f32 %v7578_v10, %v9197_v60  ;;  %v3102_v51 = vpop.permute.xlu0 %3101  ;;  %6987 = vmatmul.mubr.msk.bf16.vlgmr.msra.gmra.mrb[80].mxu1 %vm1556_vm2, %v2706_v59  ;;  %v3206_v36 = vpop.permute.xlu1 %3205 }
 0x7a3   : > { %6997 = vmatpush3.bf16.msra.mxu1 %v9221_v62  ;;  %6998 = vmatprep.mubr.msk.bf16.mxu1 %vm8054_vm0, %v10532_v4  ;;  %v3211_v55 = vsel %vm1179_vm1, %v3206_v36, 0 }
 0x7a4   : > { %v2707_v21 = vpack.c.bf16 %v2698_v38, %v2697_v14  ;;  %7008 = vmatprep.subr.bf16.mxu1 %v10532_v4 }
 0x7a5   : > { %v7580_v58 = vpop.eup %7579 }
 0x7a6   : > { %6993 = vmatmul.mubr.msk.bf16.vlgmr.msra.gmra.mrb[84].mxu0 %vm1556_vm2, %v2707_v21  ;;  %v3153_v25 = vpop.permute.xlu0 %3152  ;;  %v2699_v62 = vmul.f32 %v7580_v58, %v9201_v7  ;;  %v3257_v28 = vpop.permute.xlu1 %3256 }
 0x7a7   : > { %7004 = vmatprep.mubr.msk.bf16.mxu0 %vm8054_vm0, %v10532_v4 }
 0x7a8   : > { %7003 = vmatpush3.bf16.xpose.msra.mxu0 %v3109_v47 }
 0x7a9   : > { %v7582_v60 = vpop.eup %7581  ;;  %7014 = vmatprep.subr.bf16.mxu0 %v10532_v4 }
 0x7aa   : > { %v2700_v9 = vmul.f32 %v7582_v60, %v9205_v63  ;;  %v3204_v8 = vpop.permute.xlu0 %3203  ;;  %v3308_v50 = vpop.permute.xlu1 %3307  ;;  %v3262_v63 = vsel %vm1179_vm1, %v3257_v28, 0 }
 0x7ab   : > { %v3313_v13 = vsel %vm1179_vm1, %v3308_v50, 0 }
 0x7ac   : > { %v2708_v30 = vpack.c.bf16 %v2700_v9, %v2699_v62 }
 0x7ae   : > { %6999 = vmatmul.mubr.msk.bf16.vlgmr.msra.gmra.mrb[84].mxu1 %vm1556_vm2, %v2708_v30  ;;  %v3255_v7 = vpop.permute.xlu0 %3254  ;;  %v3359_v46 = vpop.permute.xlu1 %3358 }
 0x7af   : > { %7005 = vmatmul.mubr.msk.bf16.vlgmr.msra.gmra.mrb[88].mxu0 %vm1179_vm1, %v3102_v51  ;;  %7009 = vmatpush3.bf16.xpose.msra.mxu1 %v3160_v39  ;;  %v3364_v0 = vsel %vm1179_vm1, %v3359_v46, 0 }
 0x7b0   : > { %7015 = vmatpush3.bf16.xpose.msra.mxu0 %v3211_v55  ;;  %7010 = vmatprep.mubr.msk.bf16.mxu1 %vm8054_vm0, %v10532_v4 }
 0x7b1   : > { %7016 = vmatprep.mubr.msk.bf16.mxu0 %vm8054_vm0, %v10532_v4  ;;  %7020 = vmatprep.subr.bf16.mxu1 %v10532_v4 }
 0x7b2   : > { %7026 = vmatprep.subr.bf16.mxu0 %v10532_v4  ;;  %v3306_v2 = vpop.permute.xlu0 %3305  ;;  %v3410_v40 = vpop.permute.xlu1 %3409 }
 0x7b3   : > { %v3415_v17 = vsel %vm1179_vm1, %v3410_v40, 0 }
 0x7b6   : > { %7011 = vmatmul.mubr.msk.bf16.vlgmr.msra.gmra.mrb[88].mxu1 %vm1179_vm1, %v3153_v25  ;;  %v3357_v34 = vpop.permute.xlu0 %3356  ;;  %v3461_v49 = vpop.permute.xlu1 %3460 }
 0x7b7   : > { %7017 = vmatmul.mubr.msk.bf16.vlgmr.msra.gmra.mrb[92].mxu0 %vm1179_vm1, %v3204_v8  ;;  %7021 = vmatpush3.bf16.xpose.msra.mxu1 %v3262_v63  ;;  %v3466_v1 = vsel %vm1179_vm1, %v3461_v49, 0 }
 0x7b8   : > { %7027 = vmatpush3.bf16.xpose.msra.mxu0 %v3313_v13  ;;  %7022 = vmatprep.mubr.msk.bf16.mxu1 %vm8054_vm0, %v10532_v4 }
 0x7b9   : > { %7028 = vmatprep.mubr.msk.bf16.mxu0 %vm8054_vm0, %v10532_v4  ;;  %7032 = vmatprep.subr.bf16.mxu1 %v10532_v4 }
 0x7ba   : > { %7038 = vmatprep.subr.bf16.mxu0 %v10532_v4  ;;  %v3408_v37 = vpop.permute.xlu0 %3407  ;;  %v3459_v22 = vpop.permute.xlu1 %3458 }
 0x7be   : > { %7023 = vmatmul.mubr.msk.bf16.vlgmr.msra.gmra.mrb[92].mxu1 %vm1179_vm1, %v3255_v7 }
 0x7bf   : > { %7029 = vmatmul.mubr.msk.bf16.vlgmr.msra.gmra.mrb[96].mxu0 %vm1179_vm1, %v3306_v2  ;;  %7033 = vmatpush3.bf16.xpose.msra.mxu1 %v3364_v0 }
 0x7c0   : > { %7039 = vmatpush3.bf16.xpose.msra.mxu0 %v3415_v17  ;;  %7034 = vmatprep.mubr.msk.bf16.mxu1 %vm8054_vm0, %v10532_v4 }
 0x7c1   : > { %7040 = vmatprep.mubr.msk.bf16.mxu0 %vm8054_vm0, %v10532_v4  ;;  %7044 = vmatprep.subr.bf16.mxu1 %v10532_v4 }
 0x7c2   : > { %7050 = vmatprep.subr.bf16.mxu0 %v10532_v4 }
 0x7c6   : > { %7035 = vmatmul.mubr.msk.bf16.vlgmr.msra.gmra.mrb[96].mxu1 %vm1179_vm1, %v3357_v34 }
 0x7c7   : > { %7041 = vmatmul.mubr.msk.bf16.vlgmr.msra.gmra.mrb[100].mxu0 %vm1179_vm1, %v3408_v37  ;;  %7045 = vmatpush3.bf16.xpose.msra.mxu1 %v3466_v1 }
 0x7c8   : > { %7046 = vmatprep.mubr.msk.bf16.mxu1 %vm8054_vm0, %v10532_v4  ;;  %7056 = vmatprep.subr.bf16.mxu1 %v10532_v4 }
 0x7c9   : > { %7052 = vmatprep.mubr.msk.bf16.mxu0 %vm8054_vm0, %v10532_v4 }
 0x7ce   : > { %7047 = vmatmul.mubr.msk.bf16.vlgmr.msra.gmra.mrb[100].mxu1 %vm1179_vm1, %v3459_v22 }
 0x7cf   : > { %7058 = vmatprep.mubr.msk.bf16.mxu1 %vm8054_vm0, %v10532_v4 }
 0x818   : > { %v9334_v59 = vpop.f32.mrb[72].mxu0 }
 0x819   : > { %v6958_v10 = vpop.f32.mrb[73].mxu0 }
 0x81a   : > { %v9336_v38 = vpop.f32.mrb[74].mxu0 }
 0x81b   : > { %v6959_v51 = vpop.f32.mrb[75].mxu0 }
 0x838   : > { %v9340_v36 = vpop.f32.mrb[72].mxu1 }
 0x839   : > { %v6964_v21 = vpop.f32.mrb[73].mxu1 }
 0x83a   : > { %v9342_v58 = vpop.f32.mrb[74].mxu1 }
 0x83b   : > { %v6965_v25 = vpop.f32.mrb[75].mxu1 }
 0x83c   : > { %v9346_v60 = vpop.f32.mrb[76].mxu0 }
 0x83d   : > { %v6970_v62 = vpop.f32.mrb[77].mxu0 }
 0x83e   : > { %v9348_v9 = vpop.f32.mrb[78].mxu0 }
 0x83f   : > { %v6971_v30 = vpop.f32.mrb[79].mxu0 }
 0x86d   : > { %v9352_v39 = vpop.f32.mrb[76].mxu1 }
 0x86e   : > { %10533 = vst [vmem:[#allocation35_spill] sm:$0xff] %v9352_v39  ;;  %v6976_v8 = vpop.f32.mrb[77].mxu1 }
 0x86f   : > { %v9354_v55 = vpop.f32.mrb[78].mxu1 }
 0x870   : > { %v6977_v7 = vpop.f32.mrb[79].mxu1 }
 0x871   : > { %v9358_v63 = vpop.f32.mrb[80].mxu0 }
 0x872   : > { %10534 = vst [vmem:[#allocation36_spill] sm:$0xff] %v9358_v63  ;;  %v6982_v46 = vpop.f32.mrb[81].mxu0 }
 0x873   : > { %v9360_v13 = vpop.f32.mrb[82].mxu0 }
 0x874   : > { %10535 = vst [vmem:[#allocation37_spill] sm:$0xff] %v9360_v13  ;;  %v6983_v40 = vpop.f32.mrb[83].mxu0 }
 0x875   : > { %v9364_v0 = vpop.f32.mrb[80].mxu1 }
 0x876   : > { %10536 = vst [vmem:[#allocation38_spill] sm:$0xff] %v9364_v0  ;;  %v6988_v17 = vpop.f32.mrb[81].mxu1 }
 0x877   : > { %v9366_v34 = vpop.f32.mrb[82].mxu1 }
 0x878   : > { %10537 = vst [vmem:[#allocation39_spill] sm:$0xff] %v9366_v34  ;;  %v6989_v1 = vpop.f32.mrb[83].mxu1 }
 0x879   : > { %v9370_v37 = vpop.f32.mrb[84].mxu0 }
 0x87a   : > { %10538 = vst [vmem:[#allocation40_spill] sm:$0xff] %v9370_v37  ;;  %v6994_v22 = vpop.f32.mrb[85].mxu0 }
 0x87b   : > { %v9372_v10 = vpop.f32.mrb[86].mxu0 }
 0x87c   : > { %10539 = vst [vmem:[#allocation41_spill] sm:$0xff] %v9372_v10  ;;  %v6995_v21 = vpop.f32.mrb[87].mxu0 }
 0x881   : > { %v9376_v25 = vpop.f32.mrb[84].mxu1 }
 0x882   : > { %10540 = vst [vmem:[#allocation42_spill] sm:$0xff] %v9376_v25  ;;  %v9378_v62 = vpop.f32.mrb[88].mxu0  ;;  %v7000_v30 = vpop.f32.mrb[85].mxu1 }
 0x883   : > { %v7006_v8 = vpop.f32.mrb[89].mxu0  ;;  %v3509_v7 = vsel %vm1556_vm2, %v9378_v62, -inf  ;;  %v9382_v46 = vpop.f32.mrb[86].mxu1 }
 0x884   : > { %10541 = vst [vmem:[#allocation43_spill] sm:$0xff] %v9382_v46  ;;  %3510 = vmax.xlane.f32.xlu0 %v3509_v7  ;;  %v9386_v17 = vpop.f32.mrb[90].mxu0  ;;  %v7001_v1 = vpop.f32.mrb[87].mxu1 }
 0x885   : > { %v7007_v22 = vpop.f32.mrb[91].mxu0  ;;  %v3512_v21 = vsel %vm1556_vm2, %v9386_v17, -inf }
 0x886   : > { %3513 = vmax.xlane.f32.xlu1 %v3512_v21 }
 0x889   : > { %v9390_v49 = vpop.f32.mrb[88].mxu1 }
 0x88a   : > { %v9392_v30 = vpop.f32.mrb[92].mxu0  ;;  %v7012_v8 = vpop.f32.mrb[89].mxu1  ;;  %v3515_v51 = vsel %vm1556_vm2, %v9390_v49, -inf }
 0x88b   : > { %v7018_v7 = vpop.f32.mrb[93].mxu0  ;;  %3516 = vmax.xlane.f32.xlu0 %v3515_v51  ;;  %v9396_v2 = vpop.f32.mrb[90].mxu1  ;;  %v3521_v50 = vsel %vm1556_vm2, %v9392_v30, -inf }
 0x88c   : > { %v9398_v40 = vpop.f32.mrb[94].mxu0  ;;  %v7013_v1 = vpop.f32.mrb[91].mxu1  ;;  %v3518_v47 = vsel %vm1556_vm2, %v9396_v2, -inf }
 0x88d   : > { %v7019_v22 = vpop.f32.mrb[95].mxu0 }
 0x88f   : > { %3522 = vmax.xlane.f32.xlu0 %v3521_v50 }
 0x891   : > { %v9402_v21 = vpop.f32.mrb[92].mxu1 }
 0x892   : > { %v9404_v28 = vpop.f32.mrb[96].mxu0  ;;  %v7024_v8 = vpop.f32.mrb[93].mxu1 }
 0x893   : > { %v7030_v7 = vpop.f32.mrb[97].mxu0  ;;  %3519 = vmax.xlane.f32.xlu0 %v3518_v47  ;;  %v9408_v51 = vpop.f32.mrb[94].mxu1 }
 0x894   : > { %v9410_v14 = vpop.f32.mrb[98].mxu0  ;;  %v7025_v1 = vpop.f32.mrb[95].mxu1 }
 0x895   : > { %v7031_v22 = vpop.f32.mrb[99].mxu0 }
 0x897   : > { %3740 = vrot.lane.b32.xlu1 %v8581_v24, %s8056_s18 }
 0x899   : > { %v9414_v50 = vpop.f32.mrb[96].mxu1 }
 0x89a   : > { %v9416_v32 = vpop.f32.mrb[100].mxu0  ;;  %v7036_v27 = vpop.f32.mrb[97].mxu1 }
 0x89b   : > { %3787 = vrot.lane.b32.xlu1 %v8606_v53, %s8056_s18  ;;  %v7042_v8 = vpop.f32.mrb[101].mxu0  ;;  %v9420_v7 = vpop.f32.mrb[98].mxu1  ;;  %v3524_v27 = vsel %vm1556_vm2, %v9398_v40, -inf }
 0x89c   : > { %v9422_v47 = vpop.f32.mrb[102].mxu0  ;;  %v7037_v15 = vpop.f32.mrb[99].mxu1  ;;  %v3536_v8 = vsel %vm1556_vm2, %v9410_v14, -inf }
 0x89d   : > { %v7043_v16 = vpop.f32.mrb[103].mxu0  ;;  %v3530_v15 = vsel %vm1556_vm2, %v9408_v51, -inf }
 0x89e   : > { %v3527_v16 = vsel %vm1556_vm2, %v9402_v21, -inf }
 0x89f   : > { %3834 = vrot.lane.b32.xlu1 %v8602_v11, %s8056_s18 }
 0x8a1   : > { %v9426_v1 = vpop.f32.mrb[100].mxu1 }
 0x8a2   : > { %v7048_v22 = vpop.f32.mrb[101].mxu1 }
 0x8a3   : > { %v9428_v26 = vpop.f32.mrb[102].mxu1  ;;  %v3542_v22 = vsel %vm1556_vm2, %v9420_v7, -inf }
 0x8a4   : > { %v7049_v25 = vpop.f32.mrb[103].mxu1 }
 0x8a5   : > { %v3533_v25 = vsel %vm1556_vm2, %v9404_v28, -inf }
 0x8a9   : > { %3693 = vrot.lane.b32.xlu0 %v8583_v56, %s8056_s18 }
 0x8c3   : > { %3525 = vmax.xlane.f32.xlu1 %v3524_v27  ;;  %v3539_v27 = vsel %vm1556_vm2, %v9414_v50, -inf }
 0x8c7   : > { %3531 = vmax.xlane.f32.xlu1 %v3530_v15  ;;  %v3548_v15 = vsel %vm1556_vm2, %v9422_v47, -inf }
 0x8c8   : > { %3528 = vmax.xlane.f32.xlu0 %v3527_v16  ;;  %v3545_v16 = vsel %vm1556_vm2, %v9416_v32, -inf }
 0x8cb   : > { %3537 = vmax.xlane.f32.xlu1 %v3536_v8  ;;  %v3551_v8 = vsel %vm1556_vm2, %v9426_v1, -inf }
 0x8cc   : > { %3534 = vmax.xlane.f32.xlu0 %v3533_v25  ;;  %v3554_v25 = vsel %vm1556_vm2, %v9428_v26, -inf }
 0x8cf   : > { %3543 = vmax.xlane.f32.xlu1 %v3542_v22 }
 0x8d0   : > { %3540 = vmax.xlane.f32.xlu0 %v3539_v27 }
 0x8d3   : > { %3549 = vmax.xlane.f32.xlu1 %v3548_v15 }
 0x8d4   : > { %3546 = vmax.xlane.f32.xlu0 %v3545_v16 }
 0x8d8   : > { %3552 = vmax.xlane.f32.xlu0 %v3551_v8 }
 0x8e4   : > { %3928 = vrot.lane.b32.xlu1 %v8625_v18, %s8056_s18 }
 0x8ee   : > { %3881 = vrot.lane.b32.xlu0 %v8629_v19, %s8056_s18 }
 0x8f2   : > { %3975 = vrot.lane.b32.xlu0 %v8652_v45, %s8056_s18 }
 0x908   : > { %3555 = vmax.xlane.f32.xlu1 %v3554_v25 }
 0x911   : > { %v3511_v22 = vpop.xlane.xlu0 %3510 }
 0x912   : > { %v3557_v27 = vsub.f32 %v9378_v62, %v3511_v22 }
 0x913   : > { %v3514_v15 = vpop.xlane.xlu1 %3513 }
 0x914   : > { %v3573_v16 = vmul.f32 1.442695, %v3557_v27 }
 0x916   : > { %7583 = vpow2.f32 %v3573_v16 }
 0x917   : > { %v3741_v8 = vpop.permute.xlu1 %3740 }
 0x918   : > { %7057 = vmatpush3.bf16.msra.mxu1 %v3741_v8  ;;  %v3517_v46 = vpop.xlane.xlu0 %3516 }
 0x919   : > { %v3559_v0 = vsub.f32 %v9390_v49, %v3517_v46  ;;  %4022 = vrot.lane.b32.xlu1 %v8648_v43, %s8056_s18  ;;  %7068 = vmatprep.subr.bf16.mxu1 %v10532_v4 }
 0x91b   : > { %v3577_v34 = vmul.f32 1.442695, %v3559_v0  ;;  %v3558_v0 = vsub.f32 %v9386_v17, %v3514_v15 }
 0x91c   : > { %v3523_v37 = vpop.xlane.xlu0 %3522 }
 0x91d   : > { %7585 = vpow2.f32 %v3577_v34  ;;  %v3561_v25 = vsub.f32 %v9392_v30, %v3523_v37  ;;  %v3575_v30 = vmul.f32 1.442695, %v3558_v0 }
 0x91f   : > { %v3581_v10 = vmul.f32 1.442695, %v3561_v25 }
 0x920   : > { %v9466_v62 = vpop.eup %7583  ;;  %v3520_v22 = vpop.xlane.xlu0 %3519 }
 0x921   : > { %7587 = vpow2.f32 %v3581_v10  ;;  %v3605_v27 = vsel %vm1556_vm2, %v9466_v62, 0.0  ;;  %v3560_v10 = vsub.f32 %v9396_v2, %v3520_v22  ;;  %v9489_v2 = vpop.permute.xlu1 %3787 }
 0x922   : > { %3606 = vadd.xlane.f32.xlu0 %v3605_v27  ;;  %7589 = vpow2.f32 %v3575_v30 }
 0x923   : > { %v3579_v8 = vmul.f32 1.442695, %v3560_v10 }
 0x924   : > { %v3694_v49 = vpop.permute.xlu0 %3693 }
 0x925   : > { %7051 = vmatpush3.bf16.msra.mxu0 %v3694_v49  ;;  %7591 = vpow2.f32 %v3579_v8  ;;  %v9491_v22 = vpop.permute.xlu1 %3834 }
 0x926   : > { %7062 = vmatprep.subr.bf16.mxu0 %v10532_v4 }
 0x927   : > { %v9471_v46 = vpop.eup %7585 }
 0x928   : > { %v3611_v34 = vsel %vm1556_vm2, %v9471_v46, 0.0 }
 0x929   : > { %3612 = vadd.xlane.f32.xlu0 %v3611_v34 }
 0x92b   : > { %v9476_v37 = vpop.eup %7587 }
 0x92c   : > { %v3617_v16 = vsel %vm1556_vm2, %v9476_v37, 0.0  ;;  %v9481_v25 = vpop.eup %7589 }
 0x92d   : > { %3618 = vadd.xlane.f32.xlu0 %v3617_v16  ;;  %v3608_v17 = vsel %vm1556_vm2, %v9481_v25, 0.0 }
 0x92f   : > { %v9485_v15 = vpop.eup %7591 }
 0x930   : > { %v3614_v27 = vsel %vm1556_vm2, %v9485_v15, 0.0 }
 0x93d   : > { %3609 = vadd.xlane.f32.xlu1 %v3608_v17 }
 0x941   : > { %3615 = vadd.xlane.f32.xlu1 %v3614_v27 }
 0x950   : > { %v3526_v49 = vpop.xlane.xlu1 %3525 }
 0x951   : > { %v3562_v0 = vsub.f32 %v9398_v40, %v3526_v49 }
 0x953   : > { %v3583_v34 = vmul.f32 1.442695, %v3562_v0 }
 0x954   : > { %v3532_v30 = vpop.xlane.xlu1 %3531 }
 0x955   : > { %7593 = vpow2.f32 %v3583_v34  ;;  %v3564_v10 = vsub.f32 %v9408_v51, %v3532_v30  ;;  %v3529_v16 = vpop.xlane.xlu0 %3528 }
 0x956   : > { %v3563_v8 = vsub.f32 %v9402_v21, %v3529_v16 }
 0x957   : > { %v3587_v17 = vmul.f32 1.442695, %v3564_v10 }
 0x958   : > { %v3585_v41 = vmul.f32 1.442695, %v3563_v8  ;;  %v3538_v23 = vpop.xlane.xlu1 %3537 }
 0x959   : > { %7595 = vpow2.f32 %v3587_v17  ;;  %v3566_v27 = vsub.f32 %v9410_v14, %v3538_v23  ;;  %v3535_v63 = vpop.xlane.xlu0 %3534 }
 0x95a   : > { %7597 = vpow2.f32 %v3585_v41  ;;  %v3565_v13 = vsub.f32 %v9404_v28, %v3535_v63 }
 0x95b   : > { %v3591_v39 = vmul.f32 1.442695, %v3566_v27 }
 0x95c   : > { %v3589_v40 = vmul.f32 1.442695, %v3565_v13  ;;  %v3544_v49 = vpop.xlane.xlu1 %3543 }
 0x95d   : > { %7599 = vpow2.f32 %v3591_v39  ;;  %v3568_v0 = vsub.f32 %v9420_v7, %v3544_v49  ;;  %v3541_v51 = vpop.xlane.xlu0 %3540 }
 0x95e   : > { %7601 = vpow2.f32 %v3589_v40  ;;  %v3567_v21 = vsub.f32 %v9414_v50, %v3541_v51 }
 0x95f   : > { %v9500_v34 = vpop.eup %7593  ;;  %v3595_v30 = vmul.f32 1.442695, %v3568_v0 }
 0x960   : > { %v3593_v10 = vmul.f32 1.442695, %v3567_v21  ;;  %v3550_v16 = vpop.xlane.xlu1 %3549  ;;  %v3620_v41 = vsel %vm1556_vm2, %v9500_v34, 0.0 }
 0x961   : > { %7603 = vpow2.f32 %v3595_v30  ;;  %v3570_v23 = vsub.f32 %v9422_v47, %v3550_v16  ;;  %3621 = vadd.xlane.f32.xlu1 %v3620_v41  ;;  %v3547_v14 = vpop.xlane.xlu0 %3546 }
 0x962   : > { %7605 = vpow2.f32 %v3593_v10  ;;  %v3569_v28 = vsub.f32 %v9416_v32, %v3547_v14 }
 0x963   : > { %v9506_v39 = vpop.eup %7595  ;;  %v3599_v63 = vmul.f32 1.442695, %v3570_v23 }
 0x964   : > { %v9508_v13 = vpop.eup %7597  ;;  %v3597_v50 = vmul.f32 1.442695, %v3569_v28  ;;  %v3626_v7 = vsel %vm1556_vm2, %v9506_v39, 0.0 }
 0x965   : > { %7607 = vpow2.f32 %v3599_v63  ;;  %3627 = vadd.xlane.f32.xlu1 %v3626_v7  ;;  %v3553_v8 = vpop.xlane.xlu0 %3552  ;;  %v3623_v47 = vsel %vm1556_vm2, %v9508_v13, 0.0  ;;  %v9547_v63 = vpop.permute.xlu1 %3928 }
 0x966   : > { %7609 = vpow2.f32 %v3597_v50  ;;  %v3571_v17 = vsub.f32 %v9426_v1, %v3553_v8  ;;  %3624 = vadd.xlane.f32.xlu0 %v3623_v47 }
 0x967   : > { %v9515_v32 = vpop.eup %7599 }
 0x968   : > { %v9517_v27 = vpop.eup %7601  ;;  %v3601_v40 = vmul.f32 1.442695, %v3571_v17  ;;  %v3632_v49 = vsel %vm1556_vm2, %v9515_v32, 0.0 }
 0x969   : > { %3633 = vadd.xlane.f32.xlu1 %v3632_v49  ;;  %v3629_v0 = vsel %vm1556_vm2, %v9517_v27, 0.0 }
 0x96a   : > { %7611 = vpow2.f32 %v3601_v40  ;;  %3630 = vadd.xlane.f32.xlu0 %v3629_v0 }
 0x96b   : > { %v9523_v51 = vpop.eup %7603 }
 0x96c   : > { %v9525_v21 = vpop.eup %7605  ;;  %v3638_v1 = vsel %vm1556_vm2, %v9523_v51, 0.0 }
 0x96d   : > { %3639 = vadd.xlane.f32.xlu1 %v3638_v1  ;;  %v3635_v30 = vsel %vm1556_vm2, %v9525_v21, 0.0 }
 0x96e   : > { %3636 = vadd.xlane.f32.xlu0 %v3635_v30 }
 0x96f   : > { %v9531_v10 = vpop.eup %7607 }
 0x970   : > { %v9533_v16 = vpop.eup %7609  ;;  %v3644_v41 = vsel %vm1556_vm2, %v9531_v10, 0.0 }
 0x971   : > { %3645 = vadd.xlane.f32.xlu1 %v3644_v41  ;;  %v3641_v23 = vsel %vm1556_vm2, %v9533_v16, 0.0 }
 0x972   : > { %3642 = vadd.xlane.f32.xlu0 %v3641_v23 }
 0x974   : > { %v9539_v14 = vpop.eup %7611 }
 0x975   : > { %v3647_v28 = vsel %vm1556_vm2, %v9539_v14, 0.0 }
 0x976   : > { %3648 = vadd.xlane.f32.xlu0 %v3647_v28 }
 0x98c   : > { %4079 = vrot.lane.b32.xlu0 %v8573_v48, %s8057_s10 }
 0x990   : > { %4077 = vrot.lane.b32.xlu0 %v8571_v20, %s8057_s10 }
 0x994   : > { %4181 = vrot.lane.b32.xlu0 %v8616_v33, %s8057_s10 }
 0x995   : > { %v3556_v50 = vpop.xlane.xlu1 %3555 }
 0x996   : > { %v3572_v7 = vsub.f32 %v9428_v26, %v3556_v50 }
 0x998   : > { %v3603_v8 = vmul.f32 1.442695, %v3572_v7  ;;  %4179 = vrot.lane.b32.xlu0 %v8613_v61, %s8057_s10  ;;  %v3882_v61 = vpop.permute.xlu0 %3881 }
 0x99a   : > { %7613 = vpow2.f32 %v3603_v8 }
 0x99c   : > { %4283 = vrot.lane.b32.xlu0 %v8661_v54, %s8057_s10  ;;  %v9572_v33 = vpop.permute.xlu0 %3975 }
 0x9a0   : > { %4281 = vrot.lane.b32.xlu0 %v8659_v52, %s8057_s10  ;;  %v9576_v52 = vpop.permute.xlu1 %4022 }
 0x9a4   : > { %v9558_v20 = vpop.eup %7613  ;;  %4385 = vrot.lane.b32.xlu0 %v8691_v29, %s8057_s10 }
 0x9a5   : > { %v3650_v48 = vsel %vm1556_vm2, %v9558_v20, 0.0 }
 0x9a6   : > { %3651 = vadd.xlane.f32.xlu1 %v3650_v48 }
 0x9a8   : > { %4383 = vrot.lane.b32.xlu0 %v8689_v12, %s8057_s10 }
 0x9af   : > { %v3607_v54 = vpop.xlane.xlu0 %3606 }
 0x9b0   : > { %7615 = vrcp.f32 %v3607_v54 }
 0x9b7   : > { %4130 = vrot.lane.b32.xlu1 %v8593_v44, %s8057_s10  ;;  %v3613_v44 = vpop.xlane.xlu0 %3612 }
 0x9bb   : > { %4128 = vrot.lane.b32.xlu1 %v8590_v57, %s8057_s10 }
 0x9bf   : > { %4232 = vrot.lane.b32.xlu1 %v8639_v35, %s8057_s10 }
 0x9c3   : > { %4230 = vrot.lane.b32.xlu1 %v8636_v31, %s8057_s10  ;;  %v7616_v31 = vpop.eup %7615 }
 0x9c7   : > { %4334 = vrot.lane.b32.xlu1 %v8676_v6, %s8057_s10  ;;  %v3669_v6 = vmul.f32 %v7616_v31, %v9466_v62 }
 0x9ca   : > { %v3610_v12 = vpop.xlane.xlu1 %3609 }
 0x9cb   : > { %7617 = vrcp.f32 %v3610_v12  ;;  %4332 = vrot.lane.b32.xlu1 %v8674_v5, %s8057_s10 }
 0x9cc   : > { %7619 = vrcp.f32 %v3613_v44 }
 0x9ce   : > { %v3616_v57 = vpop.xlane.xlu1 %3615 }
 0x9cf   : > { %7621 = vrcp.f32 %v3616_v57  ;;  %4436 = vrot.lane.b32.xlu1 %v8706_v3, %s8057_s10  ;;  %v3619_v3 = vpop.xlane.xlu0 %3618 }
 0x9d0   : > { %7623 = vrcp.f32 %v3619_v3 }
 0x9d3   : > { %4434 = vrot.lane.b32.xlu1 %v8704_v42, %s8057_s10 }
 0x9d5   : > { %v7618_v35 = vpop.eup %7617 }
 0x9d6   : > { %v3670_v29 = vmul.f32 %v7618_v35, %v9481_v25  ;;  %v7620_v26 = vpop.eup %7619 }
 0x9d7   : > { %v3671_v5 = vmul.f32 %v7620_v26, %v9471_v46 }
 0x9d8   : > { %v3685_v47 = vpack.c.bf16 %v3670_v29, %v3669_v6 }
 0x9d9   : > { %v7622_v17 = vpop.eup %7621 }
 0x9da   : > { %v3672_v40 = vmul.f32 %v7622_v17, %v9485_v15  ;;  %7053 = vmatmul.mubr.msk.bf16.vlgmr.msra.gmra.mrb[104].mxu0 %vm1556_vm2, %v3685_v47 }
 0x9db   : > { %7063 = vmatpush3.bf16.msra.mxu0 %v9489_v2  ;;  %7064 = vmatprep.mubr.msk.bf16.mxu0 %vm8054_vm0, %v10532_v4  ;;  %v7624_v2 = vpop.eup %7623 }
 0x9dc   : > { %v3686_v42 = vpack.c.bf16 %v3672_v40, %v3671_v5  ;;  %7074 = vmatprep.subr.bf16.mxu0 %v10532_v4 }
 0x9de   : > { %7059 = vmatmul.mubr.msk.bf16.vlgmr.msra.gmra.mrb[104].mxu1 %vm1556_vm2, %v3686_v42 }
 0x9df   : > { %7069 = vmatpush3.bf16.msra.mxu1 %v9491_v22  ;;  %7070 = vmatprep.mubr.msk.bf16.mxu1 %vm8054_vm0, %v10532_v4  ;;  %v3673_v22 = vmul.f32 %v7624_v2, %v9476_v37 }
 0x9e0   : > { %7080 = vmatprep.subr.bf16.mxu1 %v10532_v4 }
 0x9ee   : > { %v3622_v62 = vpop.xlane.xlu1 %3621 }
 0x9ef   : > { %7625 = vrcp.f32 %v3622_v62 }
 0x9f2   : > { %v3628_v46 = vpop.xlane.xlu1 %3627 }
 0x9f3   : > { %7627 = vrcp.f32 %v3628_v46  ;;  %v3625_v25 = vpop.xlane.xlu0 %3624 }
 0x9f4   : > { %7629 = vrcp.f32 %v3625_v25 }
 0x9f6   : > { %v3634_v15 = vpop.xlane.xlu1 %3633 }
 0x9f7   : > { %7631 = vrcp.f32 %v3634_v15  ;;  %v3631_v49 = vpop.xlane.xlu0 %3630 }
 0x9f8   : > { %7633 = vrcp.f32 %v3631_v49 }
 0x9f9   : > { %v7626_v0 = vpop.eup %7625 }
 0x9fa   : > { %v3674_v1 = vmul.f32 %v7626_v0, %v9500_v34  ;;  %v3640_v30 = vpop.xlane.xlu1 %3639 }
 0x9fb   : > { %7635 = vrcp.f32 %v3640_v30  ;;  %v3637_v41 = vpop.xlane.xlu0 %3636 }
 0x9fc   : > { %7637 = vrcp.f32 %v3637_v41  ;;  %v3687_v23 = vpack.c.bf16 %v3674_v1, %v3673_v22 }
 0x9fd   : > { %v7628_v28 = vpop.eup %7627 }
 0x9fe   : > { %v7630_v50 = vpop.eup %7629  ;;  %7065 = vmatmul.mubr.msk.bf16.vlgmr.msra.gmra.mrb[108].mxu0 %vm1556_vm2, %v3687_v23  ;;  %v3646_v7 = vpop.xlane.xlu1 %3645  ;;  %v3676_v8 = vmul.f32 %v7628_v28, %v9506_v39 }
 0x9ff   : > { %v3675_v48 = vmul.f32 %v7630_v50, %v9508_v13  ;;  %7075 = vmatpush3.bf16.msra.mxu0 %v3882_v61  ;;  %7639 = vrcp.f32 %v3646_v7  ;;  %v3643_v54 = vpop.xlane.xlu0 %3642  ;;  %7076 = vmatprep.mubr.msk.bf16.mxu0 %vm8054_vm0, %v10532_v4 }
 0xa00   : > { %7641 = vrcp.f32 %v3643_v54  ;;  %7086 = vmatprep.subr.bf16.mxu0 %v10532_v4 }
 0xa01   : > { %v7632_v37 = vpop.eup %7631  ;;  %v3688_v34 = vpack.c.bf16 %v3676_v8, %v3675_v48 }
 0xa02   : > { %v7634_v44 = vpop.eup %7633  ;;  %v3678_v12 = vmul.f32 %v7632_v37, %v9515_v32 }
 0xa03   : > { %v3677_v57 = vmul.f32 %v7634_v44, %v9517_v27  ;;  %v3649_v31 = vpop.xlane.xlu0 %3648  ;;  %7071 = vmatmul.mubr.msk.bf16.vlgmr.msra.gmra.mrb[108].mxu1 %vm1556_vm2, %v3688_v34 }
 0xa04   : > { %7081 = vmatpush3.bf16.msra.mxu1 %v9547_v63  ;;  %7082 = vmatprep.mubr.msk.bf16.mxu1 %vm8054_vm0, %v10532_v4  ;;  %7643 = vrcp.f32 %v3649_v31 }
 0xa05   : > { %v7636_v39 = vpop.eup %7635  ;;  %v3689_v13 = vpack.c.bf16 %v3678_v12, %v3677_v57  ;;  %7092 = vmatprep.subr.bf16.mxu1 %v10532_v4 }
 0xa06   : > { %v7638_v61 = vpop.eup %7637  ;;  %v3680_v35 = vmul.f32 %v7636_v39, %v9523_v51 }
 0xa07   : > { %v3679_v6 = vmul.f32 %v7638_v61, %v9525_v21  ;;  %v4080_v32 = vpop.permute.xlu0 %4079  ;;  %7077 = vmatmul.mubr.msk.bf16.vlgmr.msra.gmra.mrb[112].mxu0 %vm1556_vm2, %v3689_v13 }
 0xa08   : > { %7087 = vmatpush3.bf16.msra.mxu0 %v9572_v33  ;;  %7088 = vmatprep.mubr.msk.bf16.mxu0 %vm8054_vm0, %v10532_v4  ;;  %v4085_v17 = vsel %vm1179_vm1, %v4080_v32, 0 }
 0xa09   : > { %v7640_v27 = vpop.eup %7639  ;;  %v3690_v63 = vpack.c.bf16 %v3680_v35, %v3679_v6  ;;  %7098 = vmatprep.subr.bf16.mxu0 %v10532_v4 }
 0xa0a   : > { %v7642_v29 = vpop.eup %7641  ;;  %v3682_v26 = vmul.f32 %v7640_v27, %v9531_v10 }
 0xa0b   : > { %v3681_v47 = vmul.f32 %v7642_v29, %v9533_v16  ;;  %v4078_v51 = vpop.permute.xlu0 %4077  ;;  %7083 = vmatmul.mubr.msk.bf16.vlgmr.msra.gmra.mrb[112].mxu1 %vm1556_vm2, %v3690_v63 }
 0xa0c   : > { %7093 = vmatpush3.bf16.msra.mxu1 %v9576_v52  ;;  %7094 = vmatprep.mubr.msk.bf16.mxu1 %vm8054_vm0, %v10532_v4 }
 0xa0d   : > { %v3691_v21 = vpack.c.bf16 %v3682_v26, %v3681_v47  ;;  %7104 = vmatprep.subr.bf16.mxu1 %v10532_v4 }
 0xa0e   : > { %v7644_v2 = vpop.eup %7643 }
 0xa0f   : > { %v4182_v33 = vpop.permute.xlu0 %4181  ;;  %7089 = vmatmul.mubr.msk.bf16.vlgmr.msra.gmra.mrb[116].mxu0 %vm1556_vm2, %v3691_v21  ;;  %v3683_v0 = vmul.f32 %v7644_v2, %v9539_v14 }
 0xa10   : > { %7100 = vmatprep.mubr.msk.bf16.mxu0 %vm8054_vm0, %v10532_v4  ;;  %v4187_v16 = vsel %vm1179_vm1, %v4182_v33, 0 }
 0xa11   : > { %7099 = vmatpush3.bf16.xpose.msra.mxu0 %v4085_v17 }
 0xa12   : > { %7110 = vmatprep.subr.bf16.mxu0 %v10532_v4 }
 0xa13   : > { %v4180_v10 = vpop.permute.xlu0 %4179 }
 0xa17   : > { %v4284_v52 = vpop.permute.xlu0 %4283 }
 0xa18   : > { %7101 = vmatmul.mubr.msk.bf16.vlgmr.msra.gmra.mrb[120].mxu0 %vm1179_vm1, %v4078_v51  ;;  %v4289_v40 = vsel %vm1179_vm1, %v4284_v52, 0 }
 0xa19   : > { %7111 = vmatpush3.bf16.xpose.msra.mxu0 %v4187_v16  ;;  %7112 = vmatprep.mubr.msk.bf16.mxu0 %vm8054_vm0, %v10532_v4 }
 0xa1a   : > { %7122 = vmatprep.subr.bf16.mxu0 %v10532_v4 }
 0xa1b   : > { %v4282_v5 = vpop.permute.xlu0 %4281 }
 0xa1f   : > { %v4386_v42 = vpop.permute.xlu0 %4385 }
 0xa20   : > { %7113 = vmatmul.mubr.msk.bf16.vlgmr.msra.gmra.mrb[124].mxu0 %vm1179_vm1, %v4180_v10  ;;  %v4391_v3 = vsel %vm1179_vm1, %v4386_v42, 0 }
 0xa21   : > { %7123 = vmatpush3.bf16.xpose.msra.mxu0 %v4289_v40  ;;  %7124 = vmatprep.mubr.msk.bf16.mxu0 %vm8054_vm0, %v10532_v4 }
 0xa22   : > { %7134 = vmatprep.subr.bf16.mxu0 %v10532_v4 }
 0xa23   : > { %v4384_v62 = vpop.permute.xlu0 %4383 }
 0xa28   : > { %7125 = vmatmul.mubr.msk.bf16.vlgmr.msra.gmra.mrb[128].mxu0 %vm1179_vm1, %v4282_v5 }
 0xa29   : > { %7135 = vmatpush3.bf16.xpose.msra.mxu0 %v4391_v3  ;;  %7136 = vmatprep.mubr.msk.bf16.mxu0 %vm8054_vm0, %v10532_v4 }
 0xa2a   : > { %7146 = vmatprep.subr.bf16.mxu0 %v10532_v4 }
 0xa30   : > { %7137 = vmatmul.mubr.msk.bf16.vlgmr.msra.gmra.mrb[132].mxu0 %vm1179_vm1, %v4384_v62 }
 0xa31   : > { %7148 = vmatprep.mubr.msk.bf16.mxu0 %vm8054_vm0, %v10532_v4 }
 0xa33   : > { %v3652_v46 = vpop.xlane.xlu1 %3651 }
 0xa34   : > { %7645 = vrcp.f32 %v3652_v46 }
 0xa37   : > { %v4131_v25 = vpop.permute.xlu1 %4130 }
 0xa38   : > { %v4136_v41 = vsel %vm1179_vm1, %v4131_v25, 0 }
 0xa3b   : > { %v4129_v15 = vpop.permute.xlu1 %4128 }
 0xa3e   : > { %v7646_v49 = vpop.eup %7645 }
 0xa3f   : > { %v3684_v22 = vmul.f32 %v7646_v49, %v9558_v20  ;;  %v4233_v1 = vpop.permute.xlu1 %4232 }
 0xa40   : > { %v4238_v28 = vsel %vm1179_vm1, %v4233_v1, 0 }
 0xa41   : > { %v3692_v30 = vpack.c.bf16 %v3684_v22, %v3683_v0 }
 0xa43   : > { %7095 = vmatmul.mubr.msk.bf16.vlgmr.msra.gmra.mrb[116].mxu1 %vm1556_vm2, %v3692_v30  ;;  %v4231_v23 = vpop.permute.xlu1 %4230 }
 0xa44   : > { %7105 = vmatpush3.bf16.xpose.msra.mxu1 %v4136_v41  ;;  %7106 = vmatprep.mubr.msk.bf16.mxu1 %vm8054_vm0, %v10532_v4 }
 0xa45   : > { %7116 = vmatprep.subr.bf16.mxu1 %v10532_v4 }
 0xa47   : > { %v4335_v14 = vpop.permute.xlu1 %4334 }
 0xa48   : > { %v4340_v50 = vsel %vm1179_vm1, %v4335_v14, 0 }
 0xa4b   : > { %7107 = vmatmul.mubr.msk.bf16.vlgmr.msra.gmra.mrb[120].mxu1 %vm1179_vm1, %v4129_v15  ;;  %v4333_v20 = vpop.permute.xlu1 %4332 }
 0xa4c   : > { %7117 = vmatpush3.bf16.xpose.msra.mxu1 %v4238_v28  ;;  %7118 = vmatprep.mubr.msk.bf16.mxu1 %vm8054_vm0, %v10532_v4 }
 0xa4d   : > { %7128 = vmatprep.subr.bf16.mxu1 %v10532_v4 }
 0xa4f   : > { %v4437_v7 = vpop.permute.xlu1 %4436 }
 0xa50   : > { %v4442_v8 = vsel %vm1179_vm1, %v4437_v7, 0 }
 0xa53   : > { %7119 = vmatmul.mubr.msk.bf16.vlgmr.msra.gmra.mrb[124].mxu1 %vm1179_vm1, %v4231_v23  ;;  %v4435_v48 = vpop.permute.xlu1 %4434 }
 0xa54   : > { %7129 = vmatpush3.bf16.xpose.msra.mxu1 %v4340_v50  ;;  %7130 = vmatprep.mubr.msk.bf16.mxu1 %vm8054_vm0, %v10532_v4 }
 0xa55   : > { %7140 = vmatprep.subr.bf16.mxu1 %v10532_v4 }
 0xa5b   : > { %7131 = vmatmul.mubr.msk.bf16.vlgmr.msra.gmra.mrb[128].mxu1 %vm1179_vm1, %v4333_v20 }
 0xa5c   : > { %7141 = vmatpush3.bf16.xpose.msra.mxu1 %v4442_v8  ;;  %7142 = vmatprep.mubr.msk.bf16.mxu1 %vm8054_vm0, %v10532_v4 }
 0xa5d   : > { %7152 = vmatprep.subr.bf16.mxu1 %v10532_v4 }
 0xa63   : > { %7143 = vmatmul.mubr.msk.bf16.vlgmr.msra.gmra.mrb[132].mxu1 %vm1179_vm1, %v4435_v48 }
 0xa64   : > { %7154 = vmatprep.mubr.msk.bf16.mxu1 %vm8054_vm0, %v10532_v4 }
 0xaad   : > { %v9677_v54 = vpop.f32.mrb[104].mxu0 }
 0xaae   : > { %v7054_v37 = vpop.f32.mrb[105].mxu0 }
 0xaaf   : > { %v9679_v34 = vpop.f32.mrb[106].mxu0 }
 0xab0   : > { %v4069_v44 = vpack.c.bf16 %v9679_v34, %v9677_v54  ;;  %v7055_v12 = vpop.f32.mrb[107].mxu0  ;;  %v10543_v34 = vpack.c.bf16 %v9342_v58, %v9340_v36 }
 0xab1   : > { %v9683_v57 = vpop.f32.mrb[104].mxu1 }
 0xab2   : > { %v7060_v31 = vpop.f32.mrb[105].mxu1 }
 0xab3   : > { %v9685_v39 = vpop.f32.mrb[106].mxu1 }
 0xab4   : > { %v4070_v13 = vpack.c.bf16 %v9685_v39, %v9683_v57  ;;  %v7061_v61 = vpop.f32.mrb[107].mxu1 }
 0xad1   : > { %v9689_v35 = vpop.f32.mrb[108].mxu0 }
 0xad2   : > { %v7066_v6 = vpop.f32.mrb[109].mxu0 }
 0xad3   : > { %v9691_v32 = vpop.f32.mrb[110].mxu0 }
 0xad4   : > { %v4071_v27 = vpack.c.bf16 %v9691_v32, %v9689_v35  ;;  %v7067_v63 = vpop.f32.mrb[111].mxu0  ;;  %v7382_v35 = vld [vmem:[#allocation7 + $0x38] sm:$0xff]  }
 0xad6   : > { %v9695_v29 = vpop.f32.mrb[108].mxu1 }
 0xad7   : > { %v7072_v26 = vpop.f32.mrb[109].mxu1 }
 0xad8   : > { %v9697_v47 = vpop.f32.mrb[110].mxu1 }
 0xad9   : > { %v4072_v51 = vpack.c.bf16 %v9697_v47, %v9695_v29  ;;  %v7073_v21 = vpop.f32.mrb[111].mxu1  ;;  %v10551_v29 = vld [vmem:[#allocation20_spill] sm:$0xff]  ;;  %v10552_v47 = vld [vmem:[#allocation19_spill] sm:$0xff] }
 0xada   : > { %v9701_v33 = vpop.f32.mrb[112].mxu0 }
 0xadb   : > { %v7078_v17 = vpop.f32.mrb[113].mxu0 }
 0xadc   : > { %v9703_v10 = vpop.f32.mrb[114].mxu0 }
 0xadd   : > { %v4073_v16 = vpack.c.bf16 %v9703_v10, %v9701_v33  ;;  %v7079_v52 = vpop.f32.mrb[115].mxu0 }
 0xade   : > { %v9707_v5 = vpop.f32.mrb[112].mxu1 }
 0xadf   : > { %v7084_v40 = vpop.f32.mrb[113].mxu1 }
 0xae0   : > { %v9709_v42 = vpop.f32.mrb[114].mxu1 }
 0xae1   : > { %v7085_v62 = vpop.f32.mrb[115].mxu1 }
 0xae2   : > { %v9713_v46 = vpop.f32.mrb[116].mxu0 }
 0xae3   : > { %v7090_v25 = vpop.f32.mrb[117].mxu0 }
 0xae4   : > { %v9715_v15 = vpop.f32.mrb[118].mxu0 }
 0xae5   : > { %v7091_v49 = vpop.f32.mrb[119].mxu0 }
 0xaeb   : > { %v9719_v0 = vpop.f32.mrb[120].mxu0 }
 0xaec   : > { %v7102_v22 = vpop.f32.mrb[121].mxu0  ;;  %v4485_v1 = vsel %vm1556_vm2, %v9719_v0, -inf }
 0xaed   : > { %4486 = vmax.xlane.f32.xlu0 %v4485_v1  ;;  %v9723_v30 = vpop.f32.mrb[122].mxu0 }
 0xaee   : > { %v7103_v41 = vpop.f32.mrb[123].mxu0  ;;  %v4488_v23 = vsel %vm1556_vm2, %v9723_v30, -inf }
 0xaef   : > { %4489 = vmax.xlane.f32.xlu1 %v4488_v23 }
 0xaf3   : > { %v9727_v28 = vpop.f32.mrb[124].mxu0 }
 0xaf4   : > { %v7114_v14 = vpop.f32.mrb[125].mxu0 }
 0xaf5   : > { %v9729_v20 = vpop.f32.mrb[126].mxu0 }
 0xaf6   : > { %v7115_v50 = vpop.f32.mrb[127].mxu0  ;;  %v4500_v7 = vsel %vm1556_vm2, %v9729_v20, -inf }
 0xaf7   : > { %4501 = vmax.xlane.f32.xlu1 %v4500_v7 }
 0xafb   : > { %v9733_v8 = vpop.f32.mrb[128].mxu0 }
 0xafc   : > { %v7126_v48 = vpop.f32.mrb[129].mxu0 }
 0xafd   : > { %v9735_v37 = vpop.f32.mrb[130].mxu0 }
 0xafe   : > { %v7127_v12 = vpop.f32.mrb[131].mxu0 }
 0xb03   : > { %v9737_v31 = vpop.f32.mrb[132].mxu0 }
 0xb04   : > { %v7138_v61 = vpop.f32.mrb[133].mxu0 }
 0xb05   : > { %v9739_v6 = vpop.f32.mrb[134].mxu0 }
 0xb06   : > { %v7139_v63 = vpop.f32.mrb[135].mxu0 }
 0xb08   : > { %4716 = vrot.lane.b32.xlu1 %v8581_v24, %s8057_s10  ;;  %v4497_v24 = vsel %vm1556_vm2, %v9727_v28, -inf }
 0xb16   : > { %v9743_v26 = vpop.f32.mrb[116].mxu1 }
 0xb17   : > { %v7096_v21 = vpop.f32.mrb[117].mxu1 }
 0xb18   : > { %v9745_v17 = vpop.f32.mrb[118].mxu1  ;;  %v4512_v21 = vsel %vm1556_vm2, %v9735_v37, -inf }
 0xb19   : > { %v7097_v40 = vpop.f32.mrb[119].mxu1 }
 0xb1e   : > { %v9749_v62 = vpop.f32.mrb[120].mxu1 }
 0xb1f   : > { %v7108_v25 = vpop.f32.mrb[121].mxu1  ;;  %v4491_v49 = vsel %vm1556_vm2, %v9749_v62, -inf }
 0xb20   : > { %4492 = vmax.xlane.f32.xlu0 %v4491_v49  ;;  %v9753_v22 = vpop.f32.mrb[122].mxu1 }
 0xb21   : > { %v7109_v1 = vpop.f32.mrb[123].mxu1  ;;  %v4494_v14 = vsel %vm1556_vm2, %v9753_v22, -inf }
 0xb24   : > { %4498 = vmax.xlane.f32.xlu0 %v4497_v24 }
 0xb26   : > { %v9757_v41 = vpop.f32.mrb[124].mxu1 }
 0xb27   : > { %v7120_v23 = vpop.f32.mrb[125].mxu1  ;;  %v4503_v48 = vsel %vm1556_vm2, %v9757_v41, -inf }
 0xb28   : > { %4495 = vmax.xlane.f32.xlu0 %v4494_v14  ;;  %v9761_v50 = vpop.f32.mrb[126].mxu1  ;;  %v4524_v23 = vsel %vm1556_vm2, %v9739_v6, -inf }
 0xb29   : > { %v7121_v7 = vpop.f32.mrb[127].mxu1  ;;  %v4506_v12 = vsel %vm1556_vm2, %v9761_v50, -inf }
 0xb2c   : > { %4504 = vmax.xlane.f32.xlu0 %v4503_v48  ;;  %4507 = vmax.xlane.f32.xlu1 %v4506_v12  ;;  %v4509_v12 = vsel %vm1556_vm2, %v9733_v8, -inf }
 0xb2e   : > { %v9767_v61 = vpop.f32.mrb[128].mxu1 }
 0xb2f   : > { %v7132_v63 = vpop.f32.mrb[129].mxu1 }
 0xb30   : > { %4513 = vmax.xlane.f32.xlu1 %v4512_v21  ;;  %v9771_v40 = vpop.f32.mrb[130].mxu1  ;;  %v4515_v63 = vsel %vm1556_vm2, %v9767_v61, -inf  ;;  %v4521_v21 = vsel %vm1556_vm2, %v9737_v31, -inf }
 0xb31   : > { %v7133_v25 = vpop.f32.mrb[131].mxu1  ;;  %v4518_v49 = vsel %vm1556_vm2, %v9771_v40, -inf }
 0xb34   : > { %4519 = vmax.xlane.f32.xlu1 %v4518_v49 }
 0xb36   : > { %v9775_v1 = vpop.f32.mrb[132].mxu1 }
 0xb37   : > { %v7144_v24 = vpop.f32.mrb[133].mxu1  ;;  %v4527_v25 = vsel %vm1556_vm2, %v9775_v1, -inf }
 0xb38   : > { %4525 = vmax.xlane.f32.xlu1 %v4524_v23  ;;  %v9779_v14 = vpop.f32.mrb[134].mxu1 }
 0xb39   : > { %v7145_v7 = vpop.f32.mrb[135].mxu1  ;;  %v4530_v48 = vsel %vm1556_vm2, %v9779_v14, -inf }
 0xb3c   : > { %4531 = vmax.xlane.f32.xlu1 %v4530_v48 }
 0xb42   : > { %4669 = vrot.lane.b32.xlu0 %v8583_v56, %s8057_s10 }
 0xb61   : > { %4510 = vmax.xlane.f32.xlu0 %v4509_v12 }
 0xb65   : > { %4516 = vmax.xlane.f32.xlu0 %v4515_v63 }
 0xb69   : > { %4522 = vmax.xlane.f32.xlu0 %v4521_v21 }
 0xb6d   : > { %4528 = vmax.xlane.f32.xlu0 %v4527_v25 }
 0xb7a   : > { %v4487_v49 = vpop.xlane.xlu0 %4486 }
 0xb7b   : > { %v4533_v24 = vsub.f32 %v9719_v0, %v4487_v49 }
 0xb7c   : > { %v4490_v56 = vpop.xlane.xlu1 %4489 }
 0xb7d   : > { %v4549_v23 = vmul.f32 1.442695, %v4533_v24  ;;  %v4534_v7 = vsub.f32 %v9723_v30, %v4490_v56 }
 0xb7f   : > { %7647 = vpow2.f32 %v4549_v23  ;;  %v4551_v48 = vmul.f32 1.442695, %v4534_v7 }
 0xb81   : > { %7649 = vpow2.f32 %v4551_v48 }
 0xb84   : > { %v4502_v12 = vpop.xlane.xlu1 %4501 }
 0xb85   : > { %v4538_v23 = vsub.f32 %v9729_v20, %v4502_v12 }
 0xb88   : > { %v4717_v63 = vpop.permute.xlu1 %4716 }
 0xb89   : > { %v9795_v52 = vpop.eup %7647  ;;  %7153 = vmatpush3.bf16.msra.mxu1 %v4717_v63  ;;  %v4559_v63 = vmul.f32 1.442695, %v4538_v23 }
 0xb8a   : > { %v4581_v21 = vsel %vm1556_vm2, %v9795_v52, 0.0  ;;  %7164 = vmatprep.subr.bf16.mxu1 %v10532_v4 }
 0xb8b   : > { %v9800_v25 = vpop.eup %7649  ;;  %4582 = vadd.xlane.f32.xlu0 %v4581_v21 }
 0xb8c   : > { %v4584_v0 = vsel %vm1556_vm2, %v9800_v25, 0.0 }
 0xb8d   : > { %4585 = vadd.xlane.f32.xlu1 %v4584_v0 }
 0xb9e   : > { %4810 = vrot.lane.b32.xlu1 %v8602_v11, %s8057_s10 }
 0xbad   : > { %v4493_v30 = vpop.xlane.xlu0 %4492 }
 0xbae   : > { %v4535_v49 = vsub.f32 %v9749_v62, %v4493_v30 }
 0xbb0   : > { %v4553_v24 = vmul.f32 1.442695, %v4535_v49 }
 0xbb1   : > { %v4499_v56 = vpop.xlane.xlu0 %4498 }
 0xbb2   : > { %7651 = vpow2.f32 %v4553_v24  ;;  %v4537_v49 = vsub.f32 %v9727_v28, %v4499_v56 }
 0xbb4   : > { %v4557_v24 = vmul.f32 1.442695, %v4537_v49 }
 0xbb5   : > { %v4496_v7 = vpop.xlane.xlu0 %4495 }
 0xbb6   : > { %v4536_v48 = vsub.f32 %v9753_v22, %v4496_v7 }
 0xbb8   : > { %v4555_v21 = vmul.f32 1.442695, %v4536_v48 }
 0xbb9   : > { %v4505_v3 = vpop.xlane.xlu0 %4504  ;;  %v4508_v30 = vpop.xlane.xlu1 %4507 }
 0xbba   : > { %7653 = vpow2.f32 %v4555_v21  ;;  %v4539_v23 = vsub.f32 %v9757_v41, %v4505_v3 }
 0xbbb   : > { %7655 = vpow2.f32 %v4559_v63 }
 0xbbc   : > { %v9809_v2 = vpop.eup %7651  ;;  %7657 = vpow2.f32 %v4557_v24  ;;  %v4561_v48 = vmul.f32 1.442695, %v4539_v23 }
 0xbbd   : > { %v4670_v0 = vpop.permute.xlu0 %4669  ;;  %v4587_v11 = vsel %vm1556_vm2, %v9809_v2, 0.0  ;;  %v4514_v7 = vpop.xlane.xlu1 %4513 }
 0xbbe   : > { %7147 = vmatpush3.bf16.msra.mxu0 %v4670_v0  ;;  %4588 = vadd.xlane.f32.xlu0 %v4587_v11  ;;  %v4542_v63 = vsub.f32 %v9735_v37, %v4514_v7  ;;  %7659 = vpow2.f32 %v4561_v48  ;;  %v4540_v11 = vsub.f32 %v9761_v50, %v4508_v30 }
 0xbbf   : > { %7158 = vmatprep.subr.bf16.mxu0 %v10532_v4 }
 0xbc0   : > { %v4567_v0 = vmul.f32 1.442695, %v4542_v63  ;;  %v4563_v56 = vmul.f32 1.442695, %v4540_v11 }
 0xbc1   : > { %v4520_v21 = vpop.xlane.xlu1 %4519 }
 0xbc2   : > { %7661 = vpow2.f32 %v4567_v0  ;;  %v4544_v30 = vsub.f32 %v9771_v40, %v4520_v21 }
 0xbc4   : > { %v9814_v62 = vpop.eup %7653  ;;  %v4571_v0 = vmul.f32 1.442695, %v4544_v30 }
 0xbc5   : > { %v4590_v20 = vsel %vm1556_vm2, %v9814_v62, 0.0  ;;  %v9818_v22 = vpop.eup %7655 }
 0xbc6   : > { %4591 = vadd.xlane.f32.xlu1 %v4590_v20  ;;  %v4596_v12 = vsel %vm1556_vm2, %v9818_v22, 0.0  ;;  %v4526_v20 = vpop.xlane.xlu1 %4525 }
 0xbc7   : > { %v4546_v3 = vsub.f32 %v9739_v6, %v4526_v20 }
 0xbc9   : > { %v4575_v23 = vmul.f32 1.442695, %v4546_v3 }
 0xbca   : > { %4597 = vadd.xlane.f32.xlu1 %v4596_v12 }
 0xbd4   : > { %4763 = vrot.lane.b32.xlu0 %v8606_v53, %s8057_s10  ;;  %v9828_v53 = vpop.eup %7657 }
 0xbd5   : > { %v4593_v37 = vsel %vm1556_vm2, %v9828_v53, 0.0  ;;  %v9834_v24 = vpop.eup %7659 }
 0xbd6   : > { %v4599_v6 = vsel %vm1556_vm2, %v9834_v24, 0.0  ;;  %v9840_v48 = vpop.eup %7661 }
 0xbd7   : > { %v4608_v20 = vsel %vm1556_vm2, %v9840_v48, 0.0 }
 0xbee   : > { %v4511_v12 = vpop.xlane.xlu0 %4510 }
 0xbef   : > { %v4541_v28 = vsub.f32 %v9733_v8, %v4511_v12 }
 0xbf1   : > { %v4565_v41 = vmul.f32 1.442695, %v4541_v28 }
 0xbf2   : > { %v4517_v49 = vpop.xlane.xlu0 %4516 }
 0xbf3   : > { %7663 = vpow2.f32 %v4565_v41  ;;  %v4543_v50 = vsub.f32 %v9767_v61, %v4517_v49  ;;  %4594 = vadd.xlane.f32.xlu0 %v4593_v37 }
 0xbf4   : > { %7665 = vpow2.f32 %v4563_v56 }
 0xbf5   : > { %v4569_v7 = vmul.f32 1.442695, %v4543_v50 }
 0xbf6   : > { %v4523_v8 = vpop.xlane.xlu0 %4522 }
 0xbf7   : > { %7667 = vpow2.f32 %v4569_v7  ;;  %v4545_v63 = vsub.f32 %v9737_v31, %v4523_v8  ;;  %4600 = vadd.xlane.f32.xlu0 %v4599_v6  ;;  %v4532_v6 = vpop.xlane.xlu1 %4531 }
 0xbf8   : > { %7669 = vpow2.f32 %v4575_v23 }
 0xbf9   : > { %v4573_v11 = vmul.f32 1.442695, %v4545_v63 }
 0xbfa   : > { %v4529_v61 = vpop.xlane.xlu0 %4528 }
 0xbfb   : > { %7671 = vpow2.f32 %v4573_v11  ;;  %v4547_v40 = vsub.f32 %v9775_v1, %v4529_v61  ;;  %4609 = vadd.xlane.f32.xlu0 %v4608_v20  ;;  %v10542_v20 = vpack.c.bf16 %v9336_v38, %v9334_v59 }
 0xbfc   : > { %7673 = vpow2.f32 %v4571_v0 }
 0xbfd   : > { %v9846_v21 = vpop.eup %7663  ;;  %v4577_v12 = vmul.f32 1.442695, %v4547_v40 }
 0xbfe   : > { %v4605_v28 = vsel %vm1556_vm2, %v9846_v21, 0.0  ;;  %v9850_v31 = vpop.eup %7665 }
 0xbff   : > { %7675 = vpow2.f32 %v4577_v12  ;;  %4606 = vadd.xlane.f32.xlu1 %v4605_v28  ;;  %v4602_v1 = vsel %vm1556_vm2, %v9850_v31, 0.0 }
 0xc01   : > { %v9852_v56 = vpop.eup %7667 }
 0xc02   : > { %v4611_v3 = vsel %vm1556_vm2, %v9852_v56, 0.0  ;;  %v9858_v41 = vpop.eup %7669 }
 0xc03   : > { %4612 = vadd.xlane.f32.xlu0 %v4611_v3  ;;  %4603 = vadd.xlane.f32.xlu1 %v4602_v1  ;;  %v4620_v37 = vsel %vm1556_vm2, %v9858_v41, 0.0 }
 0xc05   : > { %v9860_v49 = vpop.eup %7671 }
 0xc06   : > { %v4617_v50 = vsel %vm1556_vm2, %v9860_v49, 0.0  ;;  %v9866_v30 = vpop.eup %7673 }
 0xc07   : > { %4621 = vadd.xlane.f32.xlu0 %v4620_v37  ;;  %4618 = vadd.xlane.f32.xlu1 %v4617_v50  ;;  %v4614_v8 = vsel %vm1556_vm2, %v9866_v30, 0.0 }
 0xc09   : > { %v9868_v23 = vpop.eup %7675 }
 0xc0a   : > { %v4623_v7 = vsel %vm1556_vm2, %v9868_v23, 0.0 }
 0xc0b   : > { %4624 = vadd.xlane.f32.xlu0 %v4623_v7  ;;  %4615 = vadd.xlane.f32.xlu1 %v4614_v8 }
 0xc18   : > { %v4583_v63 = vpop.xlane.xlu0 %4582 }
 0xc19   : > { %7677 = vrcp.f32 %v4583_v63 }
 0xc1a   : > { %v4586_v0 = vpop.xlane.xlu1 %4585 }
 0xc1b   : > { %7679 = vrcp.f32 %v4586_v0 }
 0xc1c   : > { %4904 = vrot.lane.b32.xlu1 %v8625_v18, %s8057_s10  ;;  %v4548_v18 = vsub.f32 %v9779_v14, %v4532_v6 }
 0xc20   : > { %4951 = vrot.lane.b32.xlu1 %v8652_v45, %s8057_s10 }
 0xc21   : > { %4857 = vrot.lane.b32.xlu0 %v8629_v19, %s8057_s10  ;;  %v4579_v19 = vmul.f32 1.442695, %v4548_v18 }
 0xc23   : > { %v7678_v11 = vpop.eup %7677  ;;  %7681 = vpow2.f32 %v4579_v19 }
 0xc24   : > { %v4645_v40 = vmul.f32 %v7678_v11, %v9795_v52  ;;  %v4811_v52 = vpop.permute.xlu1 %4810 }
 0xc25   : > { %v7680_v61 = vpop.eup %7679  ;;  %5061 = vrot.lane.b32.xlu0 %v10542_v20, %s8057_s10 }
 0xc26   : > { %v4646_v12 = vmul.f32 %v7680_v61, %v9800_v25 }
 0xc28   : > { %v4661_v28 = vpack.c.bf16 %v4646_v12, %v4645_v40 }
 0xc29   : > { %5085 = vrot.lane.b32.xlu0 %v4069_v44, %s8056_s18 }
 0xc2a   : > { %7149 = vmatmul.mubr.msk.bf16.vlgmr.msra.gmra.mrb[136].mxu0 %vm1556_vm2, %v4661_v28 }
 0xc2b   : > { %7160 = vmatprep.mubr.msk.bf16.mxu0 %vm8054_vm0, %v10532_v4 }
 0xc2d   : > { %v9894_v45 = vpop.eup %7681 }
 0xc2e   : > { %v4626_v59 = vsel %vm1556_vm2, %v9894_v45, 0.0 }
 0xc44   : > { %4627 = vadd.xlane.f32.xlu1 %v4626_v59 }
 0xc4b   : > { %v4589_v38 = vpop.xlane.xlu0 %4588 }
 0xc4c   : > { %7683 = vrcp.f32 %v4589_v38 }
 0xc4f   : > { %v4764_v25 = vpop.permute.xlu0 %4763 }
 0xc50   : > { %7159 = vmatpush3.bf16.msra.mxu0 %v4764_v25 }
 0xc51   : > { %7170 = vmatprep.subr.bf16.mxu0 %v10532_v4 }
 0xc53   : > { %v4592_v54 = vpop.xlane.xlu1 %4591 }
 0xc54   : > { %7685 = vrcp.f32 %v4592_v54 }
 0xc55   : > { %4998 = vrot.lane.b32.xlu1 %v8648_v43, %s8057_s10 }
 0xc56   : > { %v7684_v44 = vpop.eup %7683 }
 0xc57   : > { %v4647_v3 = vmul.f32 %v7684_v44, %v9809_v2  ;;  %v4598_v43 = vpop.xlane.xlu1 %4597 }
 0xc58   : > { %7687 = vrcp.f32 %v4598_v43 }
 0xc59   : > { %5063 = vrot.lane.b32.xlu1 %v10543_v34, %s8057_s10 }
 0xc5d   : > { %5087 = vrot.lane.b32.xlu1 %v4070_v13, %s8056_s18 }
 0xc5e   : > { %v7686_v14 = vpop.eup %7685 }
 0xc5f   : > { %v4648_v1 = vmul.f32 %v7686_v14, %v9814_v62 }
 0xc61   : > { %v4662_v37 = vpack.c.bf16 %v4648_v1, %v4647_v3 }
 0xc62   : > { %v7688_v57 = vpop.eup %7687 }
 0xc63   : > { %7155 = vmatmul.mubr.msk.bf16.vlgmr.msra.gmra.mrb[136].mxu1 %vm1556_vm2, %v4662_v37  ;;  %v4650_v13 = vmul.f32 %v7688_v57, %v9818_v22  ;;  %v10544_v57 = vmov 0  }
 0xc64   : > { %7165 = vmatpush3.bf16.msra.mxu1 %v4811_v52  ;;  %7166 = vmatprep.mubr.msk.bf16.mxu1 %vm8054_vm0, %v10532_v4 }
 0xc65   : > { %7176 = vmatprep.subr.bf16.mxu1 %v10532_v4 }
 0xc80   : > { %v4595_v36 = vpop.xlane.xlu0 %4594 }
 0xc81   : > { %7689 = vrcp.f32 %v4595_v36 }
 0xc84   : > { %v4601_v58 = vpop.xlane.xlu0 %4600 }
 0xc88   : > { %v4610_v62 = vpop.xlane.xlu0 %4609 }
 0xc8b   : > { %v7690_v39 = vpop.eup %7689 }
 0xc8c   : > { %v4649_v2 = vmul.f32 %v7690_v39, %v9828_v53  ;;  %v4607_v50 = vpop.xlane.xlu1 %4606 }
 0xc8d   : > { %7691 = vrcp.f32 %v4607_v50  ;;  %v10545_v50 = vpack.c.bf16 %v9348_v9, %v9346_v60  ;;  %v7380_v60 = vld [vmem:[#allocation7 + $0x28] sm:$0xff]   ;;  %v7381_v9 = vld [vmem:[#allocation7 + $0x30] sm:$0xff]  }
 0xc8e   : > { %v4663_v7 = vpack.c.bf16 %v4650_v13, %v4649_v2  ;;  %7693 = vrcp.f32 %v4610_v62 }
 0xc8f   : > { %7695 = vrcp.f32 %v4601_v58 }
 0xc90   : > { %v4613_v8 = vpop.xlane.xlu0 %4612  ;;  %7161 = vmatmul.mubr.msk.bf16.vlgmr.msra.gmra.mrb[140].mxu0 %vm1556_vm2, %v4663_v7  ;;  %v4604_v6 = vpop.xlane.xlu1 %4603  ;;  %v7377_v7 = vld [vmem:[#allocation7 + $0x10] sm:$0xff]  }
 0xc91   : > { %7172 = vmatprep.mubr.msk.bf16.mxu0 %vm8054_vm0, %v10532_v4  ;;  %7697 = vrcp.f32 %v4604_v6  ;;  %v7379_v6 = vld [vmem:[#allocation7 + $0x20] sm:$0xff]  }
 0xc94   : > { %v4622_v63 = vpop.xlane.xlu0 %4621  ;;  %v4619_v0 = vpop.xlane.xlu1 %4618 }
 0xc95   : > { %7699 = vrcp.f32 %v4622_v63 }
 0xc96   : > { %7701 = vrcp.f32 %v4619_v0 }
 0xc97   : > { %v7692_v22 = vpop.eup %7691  ;;  %7703 = vrcp.f32 %v4613_v8  ;;  %v7378_v8 = vld [vmem:[#allocation7 + $0x18] sm:$0xff]  }
 0xc98   : > { %v4625_v53 = vpop.xlane.xlu0 %4624  ;;  %v4616_v11 = vpop.xlane.xlu1 %4615  ;;  %v4653_v40 = vmul.f32 %v7692_v22, %v9846_v21 }
 0xc99   : > { %v7694_v61 = vpop.eup %7693  ;;  %7705 = vrcp.f32 %v4616_v11 }
 0xc9a   : > { %v7696_v20 = vpop.eup %7695  ;;  %v4654_v28 = vmul.f32 %v7694_v61, %v9840_v48  ;;  %7707 = vrcp.f32 %v4625_v53  ;;  %v10546_v53 = vld [vmem:[#allocation35_spill] sm:$0xff] }
 0xc9b   : > { %v7698_v12 = vpop.eup %7697  ;;  %v4651_v59 = vmul.f32 %v7696_v20, %v9834_v24  ;;  %v10547_v11 = vpack.c.bf16 %v9354_v55, %v10546_v53 }
 0xc9c   : > { %v4858_v18 = vpop.permute.xlu0 %4857  ;;  %v4905_v19 = vpop.permute.xlu1 %4904  ;;  %v4652_v38 = vmul.f32 %v7698_v12, %v9850_v31  ;;  %v4665_v52 = vpack.c.bf16 %v4654_v28, %v4653_v40 }
 0xc9d   : > { %7171 = vmatpush3.bf16.msra.mxu0 %v4858_v18 }
 0xc9e   : > { %7182 = vmatprep.subr.bf16.mxu0 %v10532_v4  ;;  %v4664_v54 = vpack.c.bf16 %v4652_v38, %v4651_v59  ;;  %v10549_v59 = vld [vmem:[#allocation36_spill] sm:$0xff] }
 0xc9f   : > { %v7700_v25 = vpop.eup %7699 }
 0xca0   : > { %v7702_v34 = vpop.eup %7701  ;;  %7173 = vmatmul.mubr.msk.bf16.vlgmr.msra.gmra.mrb[144].mxu0 %vm1556_vm2, %v4665_v52  ;;  %v4952_v21 = vpop.permute.xlu1 %4951  ;;  %7167 = vmatmul.mubr.msk.bf16.vlgmr.msra.gmra.mrb[140].mxu1 %vm1556_vm2, %v4664_v54  ;;  %v4658_v44 = vmul.f32 %v7700_v25, %v9858_v41 }
 0xca1   : > { %7183 = vmatpush3.bf16.msra.mxu0 %v4952_v21  ;;  %v7704_v48 = vpop.eup %7703  ;;  %v4657_v24 = vmul.f32 %v7702_v34, %v9860_v49  ;;  %7177 = vmatpush3.bf16.msra.mxu1 %v4905_v19  ;;  %v5062_v18 = vpop.permute.xlu0 %5061  ;;  %v10548_v19 = vld [vmem:[#allocation37_spill] sm:$0xff] }
 0xca2   : > { %7178 = vmatprep.mubr.msk.bf16.mxu1 %vm8054_vm0, %v10532_v4  ;;  %7184 = vmatprep.mubr.msk.bf16.mxu0 %vm8054_vm0, %v10532_v4  ;;  %v4655_v14 = vmul.f32 %v7704_v48, %v9852_v56  ;;  %v10550_v38 = vpack.c.bf16 %v10548_v19, %v10549_v59 }
 0xca3   : > { %7188 = vmatprep.subr.bf16.mxu1 %v10532_v4  ;;  %v7706_v31 = vpop.eup %7705  ;;  %v4667_v1 = vpack.c.bf16 %v4658_v44, %v4657_v24 }
 0xca4   : > { %v4656_v3 = vmul.f32 %v7706_v31, %v9866_v30  ;;  %v7708_v43 = vpop.eup %7707 }
 0xca5   : > { %v4659_v56 = vmul.f32 %v7708_v43, %v9868_v23  ;;  %v7375_v23 = vld [vmem:[#allocation7] sm:$0xff]   ;;  %v5086_v55 = vpop.permute.xlu0 %5085 }
 0xca6   : > { %v4666_v37 = vpack.c.bf16 %v4656_v3, %v4655_v14  ;;  %7194 = vmatprep.subr.bf16.mxu0 %v7375_v23 }
 0xca8   : > { %7185 = vmatmul.mubr.msk.bf16.vlgmr.msra.gmra.mrb[148].mxu0 %vm1556_vm2, %v4667_v1  ;;  %7179 = vmatmul.mubr.msk.bf16.vlgmr.msra.gmra.mrb[144].mxu1 %vm1556_vm2, %v4666_v37 }
 0xca9   : > { %7190 = vmatprep.mubr.msk.bf16.mxu1 %vm8054_vm0, %v10532_v4  ;;  %7195 = vmatpush3.bf16.msra.mxu0 %v7375_v23 }
 0xcd1   : > { %v4628_v41 = vpop.xlane.xlu1 %4627 }
 0xcd2   : > { %7709 = vrcp.f32 %v4628_v41  ;;  %v10554_v41 = vld [vmem:[#allocation41_spill] sm:$0xff] }
 0xcd5   : > { %v4999_v49 = vpop.permute.xlu1 %4998 }
 0xcd6   : > { %7189 = vmatpush3.bf16.msra.mxu1 %v4999_v49  ;;  %v10555_v49 = vld [vmem:[#allocation40_spill] sm:$0xff] }
 0xcd7   : > { %v10556_v43 = vpack.c.bf16 %v10554_v41, %v10555_v49 }
 0xcdc   : > { %v7710_v36 = vpop.eup %7709 }
 0xcdd   : > { %v4660_v30 = vmul.f32 %v7710_v36, %v9894_v45  ;;  %v7376_v45 = vld [vmem:[#allocation7 + $0x8] sm:$0xff]  }
 0xcde   : > { %7196 = vmatprep.subr.bf16.mxu0 %v7376_v45 }
 0xcdf   : > { %v4668_v58 = vpack.c.bf16 %v4660_v30, %v4659_v56  ;;  %7197 = vmatpush3.bf16.msra.mxu0 %v7376_v45  ;;  %v10557_v56 = vld [vmem:[#allocation39_spill] sm:$0xff]  ;;  %v10558_v30 = vld [vmem:[#allocation38_spill] sm:$0xff]  ;;  %v10560_v45 = vpack.c.bf16 %v9715_v15, %v9713_v46  ;;  %v5064_v46 = vpop.permute.xlu1 %5063 }
 0xce0   : > { %7198 = vmatprep.subr.bf16.mxu0 %v7377_v7 }
 0xce1   : > { %7191 = vmatmul.mubr.msk.bf16.vlgmr.msra.gmra.mrb[148].mxu1 %vm1556_vm2, %v4668_v58  ;;  %v10559_v58 = vpack.c.bf16 %v10557_v56, %v10558_v30 }
 0xce2   : > { %5745 = vmatprep.mubr.bf16.mxu1 %v10544_v57 }
 0xce3   : > { %7199 = vmatpush3.bf16.msra.mxu0 %v7377_v7  ;;  %v10561_v7 = vpack.c.bf16 %v9709_v42, %v9707_v5  ;;  %v5088_v15 = vpop.permute.xlu1 %5087 }
 0xce4   : > { %7200 = vmatprep.subr.bf16.mxu0 %v7378_v8 }
 0xce7   : > { %7201 = vmatpush3.bf16.msra.mxu0 %v7378_v8  ;;  %v10562_v8 = vld [vmem:[#allocation43_spill] sm:$0xff] }
 0xce8   : > { %7202 = vmatprep.subr.bf16.mxu0 %v7379_v6 }
 0xceb   : > { %7203 = vmatpush3.bf16.msra.mxu0 %v7379_v6  ;;  %v10563_v6 = vld [vmem:[#allocation42_spill] sm:$0xff] }
 0xcec   : > { %7204 = vmatprep.subr.bf16.mxu0 %v7380_v60 }
 0xcef   : > { %7205 = vmatpush3.bf16.msra.mxu0 %v7380_v60  ;;  %v10564_v60 = vpack.c.bf16 %v10562_v8, %v10563_v6 }
 0xcf0   : > { %7206 = vmatprep.subr.bf16.mxu0 %v7381_v9 }
 0xcf3   : > { %7207 = vmatpush3.bf16.msra.mxu0 %v7381_v9  ;;  %v10565_v9 = vpack.c.bf16 %v9745_v17, %v9743_v26 }
 0xcf4   : > { %7208 = vmatprep.subr.bf16.mxu0 %v7382_v35 }
 0xcf7   : > { %7209 = vmatpush3.bf16.msra.mxu0 %v7382_v35  ;;  %v10566_v35 = vld [vmem:[#allocation22_spill] sm:$0xff] }
 0xcfd   : > { %v4709_v39 = vpop.f32.mrb[136].mxu0 }
 0xcfe   : > { %v7150_v13 = vpop.f32.mrb[137].mxu0 }
 0xcff   : > { %v4712_v2 = vpop.f32.mrb[138].mxu0 }
 0xd00   : > { %v5045_v4 = vpack.c.bf16 %v4712_v2, %v4709_v39  ;;  %v7151_v62 = vpop.f32.mrb[139].mxu0 }
 0xd02   : > { %5109 = vrot.lane.b32.xlu0 %v5045_v4, %s8055_s24 }
 0xd06   : > { %5065 = vrot.lane.b32.xlu0 %v10545_v50, %s8057_s10 }
 0xd0a   : > { %5089 = vrot.lane.b32.xlu0 %v4071_v27, %s8056_s18 }
 0xd36   : > { %v4756_v32 = vpop.f32.mrb[136].mxu1 }
 0xd37   : > { %v7156_v27 = vpop.f32.mrb[137].mxu1 }
 0xd38   : > { %v4759_v63 = vpop.f32.mrb[138].mxu1 }
 0xd39   : > { %v5046_v0 = vpack.c.bf16 %v4759_v63, %v4756_v32  ;;  %v7157_v22 = vpop.f32.mrb[139].mxu1  ;;  %v10567_v32 = vld [vmem:[#allocation21_spill] sm:$0xff] }
 0xd3a   : > { %v10568_v5 = vpack.c.bf16 %v10566_v35, %v10567_v32 }
 0xd3b   : > { %5111 = vrot.lane.b32.xlu1 %v5046_v0, %s8055_s24 }
 0xd3c   : > { %v5130_v42 = vsel %vm1179_vm1, %v10568_v5, %v5064_v46 }
 0xd3d   : > { %v5153_v27 = vsel %vm5149_vm3, %v5130_v42, %v5088_v15  ;;  %v10051_v42 = vld [vmem:[%s10442_s6] ss:$0 sm:$0xff] }
 0xd3f   : > { %5067 = vrot.lane.b32.xlu1 %v10547_v11, %s8057_s10 }
 0xd43   : > { %5091 = vrot.lane.b32.xlu1 %v4072_v51, %s8056_s18  ;;  %v10553_v51 = vpack.c.bf16 %v10551_v29, %v10552_v47 }
 0xd45   : > { %v5127_v52 = vsel %vm1179_vm1, %v10553_v51, %v5062_v18 }
 0xd46   : > { %v5151_v54 = vsel %vm5149_vm3, %v5127_v52, %v5086_v55  ;;  %v10572_v52 = vld [vmem:[#allocation26_spill] sm:$0xff] }
 0xd63   : > { %v4803_v61 = vpop.f32.mrb[140].mxu0 }
 0xd64   : > { %v7162_v20 = vpop.f32.mrb[141].mxu0 }
 0xd65   : > { %v4806_v40 = vpop.f32.mrb[142].mxu0 }
 0xd66   : > { %v5047_v12 = vpack.c.bf16 %v4806_v40, %v4803_v61  ;;  %v7163_v28 = vpop.f32.mrb[143].mxu0  ;;  %v10569_v40 = vld [vmem:[#allocation24_spill] sm:$0xff] }
 0xd68   : > { %5113 = vrot.lane.b32.xlu0 %v5047_v12, %s8055_s24  ;;  %v10570_v12 = vld [vmem:[#allocation23_spill] sm:$0xff] }
 0xd69   : > { %v10571_v28 = vpack.c.bf16 %v10569_v40, %v10570_v12  ;;  %v7809_v12 = vld [vmem:[%s8343_s23 + $0x10] sm:$0xff] }
 0xd6c   : > { %5069 = vrot.lane.b32.xlu0 %v10550_v38, %s8057_s10 }
 0xd70   : > { %5093 = vrot.lane.b32.xlu0 %v4073_v16, %s8056_s18 }
 0xd73   : > { %v4897_v25 = vpop.f32.mrb[144].mxu0  ;;  %v4850_v34 = vpop.f32.mrb[140].mxu1 }
 0xd74   : > { %v5110_v21 = vpop.permute.xlu0 %5109  ;;  %v7168_v48 = vpop.f32.mrb[141].mxu1 }
 0xd75   : > { %v7174_v44 = vpop.f32.mrb[145].mxu0  ;;  %v5168_v24 = vsel %vm5166_vm4, %v5151_v54, %v5110_v21  ;;  %v4853_v31 = vpop.f32.mrb[142].mxu1  ;;  %v10575_v21 = vld [vmem:[#allocation28_spill] sm:$0xff]  ;;  %v10576_v48 = vld [vmem:[#allocation27_spill] sm:$0xff] }
 0xd76   : > { %v4900_v14 = vpop.f32.mrb[146].mxu0  ;;  %7210 = vmatprep.mubr.bf16.mxu0 %v5168_v24  ;;  %v5048_v33 = vpack.c.bf16 %v4853_v31, %v4850_v34  ;;  %v7169_v16 = vpop.f32.mrb[143].mxu1  ;;  %v10577_v44 = vpack.c.bf16 %v10575_v21, %v10576_v48  ;;  %v7812_v48 = vld [vmem:[%s8343_s23 + $0x28] sm:$0xff] }
 0xd77   : > { %v5049_v10 = vpack.c.bf16 %v4900_v14, %v4897_v25  ;;  %v7175_v3 = vpop.f32.mrb[147].mxu0  ;;  %v10573_v25 = vld [vmem:[#allocation25_spill] sm:$0xff] }
 0xd78   : > { %5115 = vrot.lane.b32.xlu1 %v5048_v33, %s8055_s24  ;;  %v5066_v26 = vpop.permute.xlu0 %5065  ;;  %v10574_v54 = vpack.c.bf16 %v10572_v52, %v10573_v25  ;;  %v7811_v25 = vld [vmem:[%s8343_s23 + $0x20] sm:$0xff] }
 0xd79   : > { %5117 = vrot.lane.b32.xlu0 %v5049_v10, %s8055_s24  ;;  %v5133_v18 = vsel %vm1179_vm1, %v10571_v28, %v5066_v26 }
 0xd7b   : > { %v4991_v1 = vpop.f32.mrb[148].mxu0  ;;  %v4944_v37 = vpop.f32.mrb[144].mxu1 }
 0xd7c   : > { %v7186_v36 = vpop.f32.mrb[149].mxu0  ;;  %5071 = vrot.lane.b32.xlu1 %v10559_v58, %s8057_s10  ;;  %v7180_v39 = vpop.f32.mrb[145].mxu1  ;;  %v10581_v58 = vld [vmem:[#allocation30_spill] sm:$0xff] }
 0xd7d   : > { %5073 = vrot.lane.b32.xlu0 %v10556_v43, %s8057_s10  ;;  %v4947_v13 = vpop.f32.mrb[146].mxu1  ;;  %v4994_v2 = vpop.f32.mrb[150].mxu0  ;;  %v10578_v43 = vld [vmem:[#allocation32_spill] sm:$0xff]  ;;  %v10579_v36 = vld [vmem:[#allocation31_spill] sm:$0xff]  ;;  %v10582_v39 = vld [vmem:[#allocation29_spill] sm:$0xff] }
 0xd7e   : > { %v5050_v4 = vpack.c.bf16 %v4947_v13, %v4944_v37  ;;  %v5051_v62 = vpack.c.bf16 %v4994_v2, %v4991_v1  ;;  %v7181_v50 = vpop.f32.mrb[147].mxu1  ;;  %v7187_v23 = vpop.f32.mrb[151].mxu0  ;;  %v10580_v56 = vpack.c.bf16 %v10578_v43, %v10579_v36  ;;  %v10583_v13 = vpack.c.bf16 %v10581_v58, %v10582_v39  ;;  %v7817_v39 = vld [vmem:[%s8343_s23 + $0x50] sm:$0xff] }
 0xd7f   : > { %v5090_v17 = vpop.permute.xlu0 %5089 }
 0xd80   : > { %5095 = vrot.lane.b32.xlu1 %v10561_v7, %s8056_s18  ;;  %v5155_v19 = vsel %vm5149_vm3, %v5133_v18, %v5090_v17  ;;  %v7808_v17 = vld [vmem:[%s8343_s23 + $0x8] sm:$0xff] }
 0xd81   : > { %5097 = vrot.lane.b32.xlu0 %v10560_v45, %s8056_s18 }
 0xd84   : > { %5119 = vrot.lane.b32.xlu1 %v5050_v4, %s8055_s24 }
 0xd85   : > { %5121 = vrot.lane.b32.xlu0 %v5051_v62, %s8055_s24 }
 0xd88   : > { %5075 = vrot.lane.b32.xlu1 %v10564_v60, %s8057_s10  ;;  %v10584_v60 = vld [vmem:[#allocation34_spill] sm:$0xff]  ;;  %s10592_s10 = sld [smem:[#allocation47_spill]] }
 0xd8c   : > { %5099 = vrot.lane.b32.xlu1 %v10565_v9, %s8056_s18  ;;  %v10585_v9 = vld [vmem:[#allocation33_spill] sm:$0xff] }
 0xd8d   : > { %v10586_v46 = vpack.c.bf16 %v10584_v60, %v10585_v9 }
 0xdad   : > { %v5112_v63 = vpop.permute.xlu1 %5111 }
 0xdae   : > { %v5171_v0 = vsel %vm5166_vm4, %v5153_v27, %v5112_v63 }
 0xdaf   : > { %7211 = vmatmul.mubr.bf16.vlgmr.msra.gmra.mrb[152].mxu0 %v5171_v0 }
 0xdb1   : > { %v5068_v55 = vpop.permute.xlu1 %5067 }
 0xdb2   : > { %v5136_v34 = vsel %vm1179_vm1, %v10574_v54, %v5068_v55 }
 0xdb4   : > { %v5038_v22 = vpop.f32.mrb[148].mxu1 }
 0xdb5   : > { %v7192_v53 = vpop.f32.mrb[149].mxu1  ;;  %v5092_v47 = vpop.permute.xlu1 %5091 }
 0xdb6   : > { %v5041_v11 = vpop.f32.mrb[150].mxu1  ;;  %v5157_v31 = vsel %vm5149_vm3, %v5136_v34, %v5092_v47 }
 0xdb7   : > { %v5052_v61 = vpack.c.bf16 %v5041_v11, %v5038_v22  ;;  %v7193_v20 = vpop.f32.mrb[151].mxu1 }
 0xdb9   : > { %5123 = vrot.lane.b32.xlu1 %v5052_v61, %s8055_s24  ;;  %v7807_v61 = vld [vmem:[%s8343_s23] sm:$0xff] }
 0xdda   : > { %v5114_v59 = vpop.permute.xlu0 %5113 }
 0xddb   : > { %v5174_v38 = vsel %vm5166_vm4, %v5155_v19, %v5114_v59  ;;  %v7810_v19 = vld [vmem:[%s8343_s23 + $0x18] sm:$0xff] }
 0xddc   : > { %7214 = vmatprep.mubr.bf16.mxu0 %v5174_v38 }
 0xdde   : > { %v5070_v29 = vpop.permute.xlu0 %5069 }
 0xddf   : > { %v5139_v24 = vsel %vm1179_vm1, %v10577_v44, %v5070_v29 }
 0xde2   : > { %v5094_v51 = vpop.permute.xlu0 %5093 }
 0xde3   : > { %v5159_v14 = vsel %vm5149_vm3, %v5139_v24, %v5094_v51  ;;  %v7813_v24 = vld [vmem:[%s8343_s23 + $0x30] sm:$0xff] }
 0xdea   : > { %v5116_v10 = vpop.permute.xlu1 %5115 }
 0xdeb   : > { %v5118_v33 = vpop.permute.xlu0 %5117  ;;  %v5177_v16 = vsel %vm5166_vm4, %v5157_v31, %v5116_v10 }
 0xdec   : > { %v5180_v3 = vsel %vm5166_vm4, %v5159_v14, %v5118_v33  ;;  %7215 = vmatmul.mubr.bf16.gmra.mrb[156].mxu0 %v5177_v16  ;;  %v7814_v14 = vld [vmem:[%s8343_s23 + $0x38] sm:$0xff] }
 0xded   : > { %7218 = vmatprep.mubr.bf16.mxu0 %v5180_v3 }
 0xdee   : > { %v5072_v37 = vpop.permute.xlu1 %5071 }
 0xdef   : > { %v5074_v1 = vpop.permute.xlu0 %5073  ;;  %v5142_v2 = vsel %vm1179_vm1, %v10583_v13, %v5072_v37 }
 0xdf0   : > { %v5145_v30 = vsel %vm1179_vm1, %v10580_v56, %v5074_v1 }
 0xdf2   : > { %v5096_v49 = vpop.permute.xlu1 %5095 }
 0xdf3   : > { %v5098_v41 = vpop.permute.xlu0 %5097  ;;  %v5161_v62 = vsel %vm5149_vm3, %v5142_v2, %v5096_v49  ;;  %v7815_v49 = vld [vmem:[%s8343_s23 + $0x40] sm:$0xff]  ;;  %v7818_v2 = vld [vmem:[%s8343_s23 + $0x58] sm:$0xff] }
 0xdf4   : > { %v5163_v4 = vsel %vm5149_vm3, %v5145_v30, %v5098_v41  ;;  %v7816_v30 = vld [vmem:[%s8343_s23 + $0x48] sm:$0xff] }
 0xdf6   : > { %v5120_v23 = vpop.permute.xlu1 %5119 }
 0xdf7   : > { %v5122_v50 = vpop.permute.xlu0 %5121  ;;  %v5183_v45 = vsel %vm5166_vm4, %v5161_v62, %v5120_v23 }
 0xdf8   : > { %v5186_v7 = vsel %vm5166_vm4, %v5163_v4, %v5122_v50  ;;  %7219 = vmatmul.mubr.bf16.gmra.mrb[160].mxu0 %v5183_v45 }
 0xdf9   : > { %7222 = vmatprep.mubr.bf16.mxu0 %v5186_v7 }
 0xdfa   : > { %v5076_v8 = vpop.permute.xlu1 %5075 }
 0xdfb   : > { %v5148_v15 = vsel %vm1179_vm1, %v10586_v46, %v5076_v8 }
 0xdfe   : > { %v5100_v6 = vpop.permute.xlu1 %5099 }
 0xdff   : > { %v5165_v35 = vsel %vm5149_vm3, %v5148_v15, %v5100_v6  ;;  %v7819_v6 = vld [vmem:[%s8343_s23 + $0x60] sm:$0xff]  ;;  %v7820_v15 = vld [vmem:[%s8343_s23 + $0x68] sm:$0xff] }
 0xe2b   : > { %v5124_v32 = vpop.permute.xlu1 %5123 }
 0xe2c   : > { %v5189_v5 = vsel %vm5166_vm4, %v5165_v35, %v5124_v32  ;;  %v7821_v32 = vld [vmem:[%s8343_s23 + $0x70] sm:$0xff] }
 0xe2d   : > { %7223 = vmatmul.mubr.bf16.gmra.mrb[164].mxu0 %v5189_v5 }
 0xe82   : > { %v7212_v27 = vpop.f32.mrb[152].mxu0 }
 0xe83   : > { %v5296_v63 = vpop.f32.mrb[153].mxu0  ;;  %v5305_v11 = vadd.f32 %v7212_v27, %v10051_v42  ;;  %v7822_v27 = vld [vmem:[%s8343_s23 + $0x78] sm:$0xff] }
 0xe84   : > { %v5297_v0 = vadd.f32 %v10051_v42, %v5296_v63  ;;  %v7213_v22 = vpop.f32.mrb[154].mxu0 }
 0xe85   : > { %v5299_v53 = vpop.f32.mrb[155].mxu0  ;;  %v10064_v28 = vadd.f32 %v7809_v12, %v5305_v11  ;;  %v5308_v18 = vadd.f32 %v7213_v22, %v10051_v42 }
 0xe86   : > { %v10056_v20 = vadd.f32 %v7807_v61, %v5297_v0  ;;  %v5300_v26 = vadd.f32 %v10051_v42, %v5299_v53 }
 0xe87   : > { %v10070_v59 = vadd.f32 %v7810_v19, %v5308_v18 }
 0xe88   : > { %v10060_v40 = vadd.f32 %v7808_v17, %v5300_v26  ;;  %5377 = vadd.xlane.f32.xlu0 %v10056_v20 }
 0xe8a   : > { %5379 = vadd.xlane.f32.xlu1 %v10060_v40 }
 0xe8c   : > { %5381 = vadd.xlane.f32.xlu0 %v10064_v28 }
 0xe90   : > { %5383 = vadd.xlane.f32.xlu0 %v10070_v59 }
 0xebf   : > { %v7216_v38 = vpop.f32.mrb[156].mxu0 }
 0xec0   : > { %v5312_v55 = vpop.f32.mrb[157].mxu0  ;;  %v5321_v52 = vadd.f32 %v7216_v38, %v10051_v42 }
 0xec1   : > { %v5313_v29 = vadd.f32 %v10051_v42, %v5312_v55  ;;  %v7217_v47 = vpop.f32.mrb[158].mxu0 }
 0xec2   : > { %v5315_v51 = vpop.f32.mrb[159].mxu0  ;;  %v5324_v21 = vadd.f32 %v7217_v47, %v10051_v42  ;;  %v10085_v31 = vadd.f32 %v7813_v24, %v5321_v52  ;;  %v7385_v52 = vld [vmem:[#allocation8 + $0x4] ss:$8 sps:$4 sm:$0xff]   ;;  %v7389_v24 = vld [vmem:[#allocation8 + $0x20] ss:$8 sps:$4 sm:$0xff]  }
 0xec3   : > { %v10076_v54 = vadd.f32 %v7811_v25, %v5313_v29  ;;  %v5316_v34 = vadd.f32 %v10051_v42, %v5315_v51  ;;  %v7383_v51 = vld [vmem:[#allocation8] ss:$8 sps:$4 sm:$0xff]   ;;  %v7388_v25 = vld [vmem:[#allocation8 + $0x14] ss:$8 sps:$4 sm:$0xff]   ;;  %5713 = vmatprep.subr.bf16.mxu1 %v7385_v52 }
 0xec4   : > { %v10089_v33 = vadd.f32 %v7814_v14, %v5324_v21  ;;  %5714 = vmatpush1.bf16.msra.mxu1 %v7383_v51  ;;  %v7386_v21 = vld [vmem:[#allocation8 + $0x10] ss:$8 sps:$4 sm:$0xff]   ;;  %v7394_v14 = vld [vmem:[#allocation8 + $0x34] ss:$8 sps:$4 sm:$0xff]  }
 0xec5   : > { %v10081_v44 = vadd.f32 %v7812_v48, %v5316_v34  ;;  %5385 = vadd.xlane.f32.xlu0 %v10076_v54  ;;  %5715 = vmatprep.subr.bf16.mxu1 %v7388_v25  ;;  %v7391_v48 = vld [vmem:[#allocation8 + $0x24] ss:$8 sps:$4 sm:$0xff]  }
 0xec7   : > { %5387 = vadd.xlane.f32.xlu1 %v10081_v44 }
 0xec8   : > { %5716 = vmatpush1.bf16.msra.mxu1 %v7386_v21 }
 0xec9   : > { %5389 = vadd.xlane.f32.xlu0 %v10085_v31  ;;  %5717 = vmatprep.subr.bf16.mxu1 %v7391_v48 }
 0xecb   : > { %v7220_v10 = vpop.f32.mrb[160].mxu0  ;;  %5391 = vadd.xlane.f32.xlu1 %v10089_v33 }
 0xecc   : > { %v5328_v16 = vpop.f32.mrb[161].mxu0  ;;  %v5337_v41 = vadd.f32 %v7220_v10, %v10051_v42  ;;  %5718 = vmatpush1.bf16.msra.mxu1 %v7389_v24  ;;  %v7392_v10 = vld [vmem:[#allocation8 + $0x30] ss:$8 sps:$4 sm:$0xff]  }
 0xecd   : > { %v5329_v3 = vadd.f32 %v10051_v42, %v5328_v16  ;;  %v7221_v1 = vpop.f32.mrb[162].mxu0  ;;  %5719 = vmatprep.subr.bf16.mxu1 %v7394_v14  ;;  %v7397_v16 = vld [vmem:[#allocation8 + $0x44] ss:$8 sps:$4 sm:$0xff]  }
 0xece   : > { %v5331_v37 = vpop.f32.mrb[163].mxu0  ;;  %v5340_v56 = vadd.f32 %v7221_v1, %v10051_v42  ;;  %v10105_v13 = vadd.f32 %v7817_v39, %v5337_v41  ;;  %v7400_v1 = vld [vmem:[#allocation8 + $0x54] ss:$8 sps:$4 sm:$0xff]   ;;  %v7401_v41 = vld [vmem:[#allocation8 + $0x60] ss:$8 sps:$4 sm:$0xff]  }
 0xecf   : > { %v10096_v43 = vadd.f32 %v7815_v49, %v5329_v3  ;;  %v5332_v36 = vadd.f32 %v10051_v42, %v5331_v37  ;;  %v7395_v3 = vld [vmem:[#allocation8 + $0x40] ss:$8 sps:$4 sm:$0xff]   ;;  %v7398_v37 = vld [vmem:[#allocation8 + $0x50] ss:$8 sps:$4 sm:$0xff]   ;;  %v7403_v49 = vld [vmem:[#allocation8 + $0x64] ss:$8 sps:$4 sm:$0xff]  }
 0xed0   : > { %v10109_v4 = vadd.f32 %v7818_v2, %v5340_v56  ;;  %5720 = vmatpush1.bf16.msra.mxu1 %v7392_v10  ;;  %v7404_v56 = vld [vmem:[#allocation8 + $0x70] ss:$8 sps:$4 sm:$0xff]  }
 0xed1   : > { %v10101_v58 = vadd.f32 %v7816_v30, %v5332_v36  ;;  %5393 = vadd.xlane.f32.xlu0 %v10096_v43  ;;  %5721 = vmatprep.subr.bf16.mxu1 %v7397_v16  ;;  %v7406_v36 = vld [vmem:[#allocation8 + $0x74] ss:$8 sps:$4 sm:$0xff]  }
 0xed3   : > { %5395 = vadd.xlane.f32.xlu1 %v10101_v58 }
 0xed4   : > { %5722 = vmatpush1.bf16.msra.mxu1 %v7395_v3 }
 0xed5   : > { %5397 = vadd.xlane.f32.xlu0 %v10105_v13  ;;  %5723 = vmatprep.subr.bf16.mxu1 %v7400_v1 }
 0xed7   : > { %5399 = vadd.xlane.f32.xlu1 %v10109_v4 }
 0xed8   : > { %5724 = vmatpush1.bf16.msra.mxu1 %v7398_v37 }
 0xed9   : > { %5725 = vmatprep.subr.bf16.mxu1 %v7403_v49 }
 0xedc   : > { %5726 = vmatpush1.bf16.msra.mxu1 %v7401_v41 }
 0xedd   : > { %5727 = vmatprep.subr.bf16.mxu1 %v7406_v36 }
 0xee0   : > { %5728 = vmatpush1.bf16.msra.mxu1 %v7404_v56 }
 0xf00   : > { %v7224_v62 = vpop.f32.mrb[164].mxu0 }
 0xf01   : > { %v5344_v50 = vpop.f32.mrb[165].mxu0  ;;  %v5353_v8 = vadd.f32 %v7224_v62, %v10051_v42 }
 0xf02   : > { %v5345_v23 = vadd.f32 %v10051_v42, %v5344_v50  ;;  %v7225_v45 = vpop.f32.mrb[166].mxu0 }
 0xf03   : > { %v5347_v7 = vpop.f32.mrb[167].mxu0  ;;  %v5356_v46 = vadd.f32 %v7225_v45, %v10051_v42  ;;  %v10125_v5 = vadd.f32 %v7821_v32, %v5353_v8 }
 0xf04   : > { %v10116_v60 = vadd.f32 %v7819_v6, %v5345_v23  ;;  %v5348_v9 = vadd.f32 %v10051_v42, %v5347_v7 }
 0xf05   : > { %v10129_v63 = vadd.f32 %v7822_v27, %v5356_v46 }
 0xf06   : > { %v10121_v35 = vadd.f32 %v7820_v15, %v5348_v9  ;;  %5401 = vadd.xlane.f32.xlu0 %v10116_v60 }
 0xf08   : > { %5403 = vadd.xlane.f32.xlu1 %v10121_v35 }
 0xf0a   : > { %5405 = vadd.xlane.f32.xlu0 %v10125_v5 }
 0xf0c   : > { %5407 = vadd.xlane.f32.xlu1 %v10129_v63 }
 0xf15   : > { %v5378_v0 = vpop.xlane.xlu0 %5377 }
 0xf16   : > { %v5409_v22 = vmul.f32 0.0078125, %v5378_v0 }
 0xf17   : > { %v5380_v42 = vpop.xlane.xlu1 %5379 }
 0xf18   : > { %v10134_v53 = vsub.f32 %v10056_v20, %v5409_v22  ;;  %v5410_v11 = vmul.f32 0.0078125, %v5380_v42 }
 0xf19   : > { %v5382_v61 = vpop.xlane.xlu0 %5381 }
 0xf1a   : > { %v10137_v26 = vsub.f32 %v10060_v40, %v5410_v11  ;;  %v5411_v17 = vmul.f32 0.0078125, %v5382_v61  ;;  %v5441_v12 = vmul.f32 %v10134_v53, %v10134_v53 }
 0xf1c   : > { %v10142_v18 = vsub.f32 %v10064_v28, %v5411_v17  ;;  %5457 = vadd.xlane.f32.xlu0 %v5441_v12  ;;  %v5442_v19 = vmul.f32 %v10137_v26, %v10137_v26 }
 0xf1d   : > { %v5384_v38 = vpop.xlane.xlu0 %5383 }
 0xf1e   : > { %v5412_v55 = vmul.f32 0.0078125, %v5384_v38  ;;  %5459 = vadd.xlane.f32.xlu1 %v5442_v19  ;;  %v5443_v29 = vmul.f32 %v10142_v18, %v10142_v18 }
 0xf20   : > { %v10149_v47 = vsub.f32 %v10070_v59, %v5412_v55  ;;  %5461 = vadd.xlane.f32.xlu0 %v5443_v29 }
 0xf22   : > { %v5444_v34 = vmul.f32 %v10149_v47, %v10149_v47 }
 0xf24   : > { %5463 = vadd.xlane.f32.xlu1 %v5444_v34 }
 0xf52   : > { %v5386_v30 = vpop.xlane.xlu0 %5385 }
 0xf53   : > { %v5413_v39 = vmul.f32 0.0078125, %v5386_v30 }
 0xf54   : > { %v5388_v2 = vpop.xlane.xlu1 %5387 }
 0xf55   : > { %v10154_v62 = vsub.f32 %v10076_v54, %v5413_v39  ;;  %v5414_v50 = vmul.f32 0.0078125, %v5388_v2 }
 0xf56   : > { %v5390_v23 = vpop.xlane.xlu0 %5389 }
 0xf57   : > { %v10157_v45 = vsub.f32 %v10081_v44, %v5414_v50  ;;  %v5415_v7 = vmul.f32 0.0078125, %v5390_v23  ;;  %v5445_v8 = vmul.f32 %v10154_v62, %v10154_v62 }
 0xf58   : > { %v5392_v6 = vpop.xlane.xlu1 %5391 }
 0xf59   : > { %v10162_v9 = vsub.f32 %v10085_v31, %v5415_v7  ;;  %v5416_v46 = vmul.f32 0.0078125, %v5392_v6  ;;  %5465 = vadd.xlane.f32.xlu0 %v5445_v8  ;;  %v5446_v15 = vmul.f32 %v10157_v45, %v10157_v45 }
 0xf5b   : > { %v10167_v32 = vsub.f32 %v10089_v33, %v5416_v46  ;;  %5467 = vadd.xlane.f32.xlu1 %v5446_v15  ;;  %v5447_v27 = vmul.f32 %v10162_v9, %v10162_v9 }
 0xf5d   : > { %5469 = vadd.xlane.f32.xlu0 %v5447_v27  ;;  %v5448_v0 = vmul.f32 %v10167_v32, %v10167_v32 }
 0xf5e   : > { %v5394_v22 = vpop.xlane.xlu0 %5393 }
 0xf5f   : > { %v5417_v42 = vmul.f32 0.0078125, %v5394_v22  ;;  %5471 = vadd.xlane.f32.xlu1 %v5448_v0 }
 0xf60   : > { %v5396_v11 = vpop.xlane.xlu1 %5395 }
 0xf61   : > { %v10174_v61 = vsub.f32 %v10096_v43, %v5417_v42  ;;  %v5418_v17 = vmul.f32 0.0078125, %v5396_v11 }
 0xf62   : > { %v5398_v12 = vpop.xlane.xlu0 %5397 }
 0xf63   : > { %v10177_v19 = vsub.f32 %v10101_v58, %v5418_v17  ;;  %v5419_v38 = vmul.f32 0.0078125, %v5398_v12  ;;  %v5449_v55 = vmul.f32 %v10174_v61, %v10174_v61 }
 0xf64   : > { %v5400_v29 = vpop.xlane.xlu1 %5399 }
 0xf65   : > { %v10182_v51 = vsub.f32 %v10105_v13, %v5419_v38  ;;  %v5420_v52 = vmul.f32 0.0078125, %v5400_v29  ;;  %5473 = vadd.xlane.f32.xlu0 %v5449_v55  ;;  %v5450_v25 = vmul.f32 %v10177_v19, %v10177_v19  ;;  %v10216_v55 = vld [vmem:[%s10443_s7] ss:$0 sm:$0xff] }
 0xf67   : > { %v10187_v34 = vsub.f32 %v10109_v4, %v5420_v52  ;;  %5475 = vadd.xlane.f32.xlu1 %v5450_v25  ;;  %v5451_v21 = vmul.f32 %v10182_v51, %v10182_v51 }
 0xf69   : > { %5477 = vadd.xlane.f32.xlu0 %v5451_v21  ;;  %v5452_v48 = vmul.f32 %v10187_v34, %v10187_v34 }
 0xf6b   : > { %5479 = vadd.xlane.f32.xlu1 %v5452_v48 }
 0xf93   : > { %v5402_v24 = vpop.xlane.xlu0 %5401 }
 0xf94   : > { %v5421_v14 = vmul.f32 0.0078125, %v5402_v24  ;;  %v10224_v24 = vld [vmem:[%s10587_s22] ss:$0 sm:$0xff]  ;;  %s7965_s22 = scalar_lea.vmem %s10390_s19, 2048 }
 0xf95   : > { %v5404_v10 = vpop.xlane.xlu1 %5403  ;;  %p7966_p6 = scmp.ne.s32.totalorder %s10390_s19, %s7965_s22 }
 0xf96   : > { %v10194_v16 = vsub.f32 %v10116_v60, %v5421_v14  ;;  %v5422_v3 = vmul.f32 0.0078125, %v5404_v10 }
 0xf97   : > { %v5406_v1 = vpop.xlane.xlu0 %5405  ;;  %p7967_p8 = pnand %p7966_p6, %p8282_p4 }
 0xf98   : > { %v10197_v37 = vsub.f32 %v10121_v35, %v5422_v3  ;;  %v5423_v41 = vmul.f32 0.0078125, %v5406_v1  ;;  %v5453_v49 = vmul.f32 %v10194_v16, %v10194_v16 }
 0xf99   : > { %v5408_v36 = vpop.xlane.xlu1 %5407  ;;  %p7968_p13 = pneg %p7967_p8 }
 0xf9a   : > { %v10202_v56 = vsub.f32 %v10125_v5, %v5423_v41  ;;  %v5424_v30 = vmul.f32 0.0078125, %v5408_v36  ;;  %5481 = vadd.xlane.f32.xlu0 %v5453_v49  ;;  %v5454_v39 = vmul.f32 %v10197_v37, %v10197_v37 }
 0xf9c   : > { %v10207_v2 = vsub.f32 %v10129_v63, %v5424_v30  ;;  %5483 = vadd.xlane.f32.xlu1 %v5454_v39  ;;  %v5455_v50 = vmul.f32 %v10202_v56, %v10202_v56 }
 0xf9e   : > { %5485 = vadd.xlane.f32.xlu0 %v5455_v50  ;;  %v5456_v23 = vmul.f32 %v10207_v2, %v10207_v2 }
 0xfa0   : > { %5487 = vadd.xlane.f32.xlu1 %v5456_v23  ;;  %v7407_v23 = vld [vmem:[#allocation10 + $0x40] sm:$0xff]  }
 0xfa1   : > { %6714 = vmatprep.subr.bf16.mxu0 %v7407_v23  ;;  %7226 = vmatprep.subr.bf16.mxu1 %v7407_v23 }
 0xfa9   : > { %v5458_v7 = vpop.xlane.xlu0 %5457 }
 0xfaa   : > { %v5489_v8 = vmul.f32 0.0078125, %v5458_v7  ;;  %v7408_v7 = vld [vmem:[#allocation10] sm:$0xff]  }
 0xfab   : > { %v5460_v6 = vpop.xlane.xlu1 %5459  ;;  %6715 = vmatpush3.bf16.msra.mxu0 %v7408_v7 }
 0xfac   : > { %v5505_v46 = vadd.f32 1e-05, %v5489_v8  ;;  %v5490_v15 = vmul.f32 0.0078125, %v5460_v6  ;;  %v7409_v8 = vld [vmem:[#allocation10 + $0x48] sm:$0xff]  }
 0xfad   : > { %v5462_v27 = vpop.xlane.xlu0 %5461  ;;  %6716 = vmatprep.subr.bf16.mxu0 %v7409_v8 }
 0xfae   : > { %7711 = vrsqrt.f32 %v5505_v46  ;;  %v5506_v0 = vadd.f32 1e-05, %v5490_v15  ;;  %v5491_v22 = vmul.f32 0.0078125, %v5462_v27 }
 0xfb0   : > { %7713 = vrsqrt.f32 %v5506_v0  ;;  %v5507_v42 = vadd.f32 1e-05, %v5491_v22 }
 0xfb1   : > { %v5464_v11 = vpop.xlane.xlu1 %5463 }
 0xfb2   : > { %7715 = vrsqrt.f32 %v5507_v42  ;;  %v5492_v17 = vmul.f32 0.0078125, %v5464_v11 }
 0xfb4   : > { %v5508_v12 = vadd.f32 1e-05, %v5492_v17 }
 0xfb6   : > { %7717 = vrsqrt.f32 %v5508_v12 }
 0xfb8   : > { %v7712_v38 = vpop.eup %7711 }
 0xfb9   : > { %v5537_v29 = vmul.f32 %v7712_v38, %v10134_v53 }
 0xfba   : > { %v7714_v52 = vpop.eup %7713 }
 0xfbb   : > { %v5538_v25 = vmul.f32 %v7714_v52, %v10137_v26  ;;  %v5559_v21 = vmul.f32 %v10216_v55, %v5537_v29 }
 0xfbc   : > { %v7716_v48 = vpop.eup %7715 }
 0xfbd   : > { %v5560_v14 = vmul.f32 %v10216_v55, %v5538_v25  ;;  %v5581_v10 = vadd.f32 %v10224_v24, %v5559_v21  ;;  %v5539_v1 = vmul.f32 %v7716_v48, %v10142_v18  ;;  %v7410_v18 = vld [vmem:[#allocation10 + $0x8] sm:$0xff]  }
 0xfbe   : > { %6717 = vmatpush3.bf16.msra.mxu0 %v7410_v18 }
 0xfbf   : > { %v5582_v3 = vadd.f32 %v10224_v24, %v5560_v14  ;;  %v5561_v49 = vmul.f32 %v10216_v55, %v5539_v1 }
 0xfc0   : > { %v7718_v53 = vpop.eup %7717 }
 0xfc1   : > { %v5597_v41 = vpack.c.bf16 %v5582_v3, %v5581_v10  ;;  %v5540_v26 = vmul.f32 %v7718_v53, %v10149_v47  ;;  %v5583_v39 = vadd.f32 %v10224_v24, %v5561_v49 }
 0xfc3   : > { %5746 = vmatmul.mubr.bf16.vlgmr.msra.gmra.mrb[152].mxu1 %v5597_v41  ;;  %v5562_v36 = vmul.f32 %v10216_v55, %v5540_v26 }
 0xfc4   : > { %5755 = vmatprep.mubr.bf16.mxu1 %v10544_v57  ;;  %7234 = vmatpush3.bf16.msra.mxu1 %v7408_v7 }
 0xfc5   : > { %v5584_v30 = vadd.f32 %v10224_v24, %v5562_v36  ;;  %7227 = vmatprep.subr.bf16.mxu1 %v7409_v8 }
 0xfc7   : > { %v5598_v50 = vpack.c.bf16 %v5584_v30, %v5583_v39 }
 0xfc8   : > { %7235 = vmatpush3.bf16.msra.mxu1 %v7410_v18 }
 0xfcb   : > { %5756 = vmatmul.mubr.bf16.gmra.mrb[156].mxu1 %v5598_v50 }
 0xfcc   : > { %5765 = vmatprep.mubr.bf16.mxu1 %v10544_v57 }
 0xfe6   : > { %v5466_v47 = vpop.xlane.xlu0 %5465 }
 0xfe7   : > { %v5493_v6 = vmul.f32 0.0078125, %v5466_v47 }
 0xfe8   : > { %v5468_v46 = vpop.xlane.xlu1 %5467 }
 0xfe9   : > { %v5509_v15 = vadd.f32 1e-05, %v5493_v6  ;;  %v5494_v27 = vmul.f32 0.0078125, %v5468_v46 }
 0xfea   : > { %v5470_v0 = vpop.xlane.xlu0 %5469 }
 0xfeb   : > { %7719 = vrsqrt.f32 %v5509_v15  ;;  %v5510_v22 = vadd.f32 1e-05, %v5494_v27  ;;  %v5495_v42 = vmul.f32 0.0078125, %v5470_v0 }
 0xfec   : > { %v5472_v11 = vpop.xlane.xlu1 %5471 }
 0xfed   : > { %7721 = vrsqrt.f32 %v5510_v22  ;;  %v5511_v17 = vadd.f32 1e-05, %v5495_v42  ;;  %v5496_v12 = vmul.f32 0.0078125, %v5472_v11 }
 0xfef   : > { %7723 = vrsqrt.f32 %v5511_v17  ;;  %v5512_v38 = vadd.f32 1e-05, %v5496_v12 }
 0xff1   : > { %7725 = vrsqrt.f32 %v5512_v38 }
 0xff2   : > { %v5474_v29 = vpop.xlane.xlu0 %5473 }
 0xff3   : > { %v5497_v52 = vmul.f32 0.0078125, %v5474_v29 }
 0xff4   : > { %v5476_v25 = vpop.xlane.xlu1 %5475 }
 0xff5   : > { %v7720_v21 = vpop.eup %7719  ;;  %v5513_v48 = vadd.f32 1e-05, %v5497_v52  ;;  %v5498_v14 = vmul.f32 0.0078125, %v5476_v25 }
 0xff6   : > { %v5478_v10 = vpop.xlane.xlu0 %5477  ;;  %v5541_v3 = vmul.f32 %v7720_v21, %v10154_v62 }
 0xff7   : > { %v7722_v1 = vpop.eup %7721  ;;  %7727 = vrsqrt.f32 %v5513_v48  ;;  %v5514_v53 = vadd.f32 1e-05, %v5498_v14  ;;  %v5499_v41 = vmul.f32 0.0078125, %v5478_v10 }
 0xff8   : > { %v5480_v26 = vpop.xlane.xlu1 %5479  ;;  %v5542_v49 = vmul.f32 %v7722_v1, %v10157_v45  ;;  %v5563_v36 = vmul.f32 %v10216_v55, %v5541_v3 }
 0xff9   : > { %v7724_v30 = vpop.eup %7723  ;;  %7729 = vrsqrt.f32 %v5514_v53  ;;  %v5500_v39 = vmul.f32 0.0078125, %v5480_v26  ;;  %v5515_v7 = vadd.f32 1e-05, %v5499_v41  ;;  %v7411_v53 = vld [vmem:[#allocation10 + $0x50] sm:$0xff]   ;;  %v7414_v41 = vld [vmem:[#allocation10 + $0x18] sm:$0xff]   ;;  %v7415_v26 = vld [vmem:[#allocation10 + $0x60] sm:$0xff]  }
 0xffa   : > { %v5564_v50 = vmul.f32 %v10216_v55, %v5542_v49  ;;  %v5585_v18 = vadd.f32 %v10224_v24, %v5563_v36  ;;  %v5543_v47 = vmul.f32 %v7724_v30, %v10162_v9  ;;  %6718 = vmatprep.subr.bf16.mxu0 %v7411_v53  ;;  %7228 = vmatprep.subr.bf16.mxu1 %v7411_v53  ;;  %v7416_v49 = vld [vmem:[#allocation10 + $0x20] sm:$0xff]   ;;  %v7417_v36 = vld [vmem:[#allocation10 + $0x68] sm:$0xff]  }
 0xffb   : > { %v7726_v23 = vpop.eup %7725  ;;  %v5516_v8 = vadd.f32 1e-05, %v5500_v39  ;;  %v7418_v30 = vld [vmem:[#allocation10 + $0x28] sm:$0xff]  }
 0xffc   : > { %v5586_v62 = vadd.f32 %v10224_v24, %v5564_v50  ;;  %v5544_v6 = vmul.f32 %v7726_v23, %v10167_v32  ;;  %v5565_v15 = vmul.f32 %v10216_v55, %v5543_v47  ;;  %v7419_v23 = vld [vmem:[#allocation10 + $0x70] sm:$0xff]  }
 0xffd   : > { %7731 = vrsqrt.f32 %v5516_v8  ;;  %v7420_v8 = vld [vmem:[#allocation10 + $0x30] sm:$0xff]  }
 0xffe   : > { %v5599_v45 = vpack.c.bf16 %v5586_v62, %v5585_v18  ;;  %v5566_v46 = vmul.f32 %v10216_v55, %v5544_v6  ;;  %7733 = vrsqrt.f32 %v5515_v7  ;;  %v5587_v42 = vadd.f32 %v10224_v24, %v5565_v15 }
0x1000   : > { %5766 = vmatmul.mubr.bf16.gmra.mrb[160].mxu1 %v5599_v45  ;;  %v5588_v0 = vadd.f32 %v10224_v24, %v5566_v46  ;;  %v7421_v46 = vld [vmem:[#allocation10 + $0x78] sm:$0xff]  }
0x1001   : > { %v7728_v27 = vpop.eup %7727  ;;  %5775 = vmatprep.mubr.bf16.mxu1 %v10544_v57 }
0x1002   : > { %v5545_v9 = vmul.f32 %v7728_v27, %v10174_v61  ;;  %v5600_v11 = vpack.c.bf16 %v5588_v0, %v5587_v42  ;;  %v7422_v27 = vld [vmem:[#allocation10 + $0x38] sm:$0xff]  }
0x1003   : > { %v7730_v22 = vpop.eup %7729 }
0x1004   : > { %v5546_v32 = vmul.f32 %v7730_v22, %v10177_v19  ;;  %v5567_v38 = vmul.f32 %v10216_v55, %v5545_v9 }
0x1006   : > { %v5568_v17 = vmul.f32 %v10216_v55, %v5546_v32  ;;  %v5589_v21 = vadd.f32 %v10224_v24, %v5567_v38 }
0x1007   : > { %v7732_v12 = vpop.eup %7731 }
0x1008   : > { %5776 = vmatmul.mubr.bf16.gmra.mrb[164].mxu1 %v5600_v11  ;;  %v7734_v29 = vpop.eup %7733  ;;  %v5590_v52 = vadd.f32 %v10224_v24, %v5568_v17  ;;  %v5548_v25 = vmul.f32 %v7732_v12, %v10187_v34  ;;  %v7412_v34 = vld [vmem:[#allocation10 + $0x10] sm:$0xff]  }
0x1009   : > { %5785 = vmatprep.mubr.bf16.mxu1 %v10544_v57  ;;  %v5547_v61 = vmul.f32 %v7734_v29, %v10182_v51  ;;  %6719 = vmatpush3.bf16.msra.mxu0 %v7412_v34  ;;  %v7413_v51 = vld [vmem:[#allocation10 + $0x58] sm:$0xff]  }
0x100a   : > { %v5601_v48 = vpack.c.bf16 %v5590_v52, %v5589_v21  ;;  %v5570_v19 = vmul.f32 %v10216_v55, %v5548_v25  ;;  %7236 = vmatpush3.bf16.msra.mxu1 %v7412_v34  ;;  %6720 = vmatprep.subr.bf16.mxu0 %v7413_v51 }
0x100b   : > { %v5569_v14 = vmul.f32 %v10216_v55, %v5547_v61  ;;  %7229 = vmatprep.subr.bf16.mxu1 %v7413_v51 }
0x100c   : > { %v5592_v10 = vadd.f32 %v10224_v24, %v5570_v19 }
0x100d   : > { %v5591_v3 = vadd.f32 %v10224_v24, %v5569_v14  ;;  %6721 = vmatpush3.bf16.msra.mxu0 %v7414_v41 }
0x100e   : > { %7237 = vmatpush3.bf16.msra.mxu1 %v7414_v41  ;;  %6722 = vmatprep.subr.bf16.mxu0 %v7415_v26 }
0x100f   : > { %v5602_v1 = vpack.c.bf16 %v5592_v10, %v5591_v3  ;;  %7230 = vmatprep.subr.bf16.mxu1 %v7415_v26 }
0x1010   : > { %5786 = vmatmul.mubr.bf16.gmra.mrb[168].mxu1 %v5601_v48 }
0x1011   : > { %5795 = vmatprep.mubr.bf16.mxu1 %v10544_v57  ;;  %6723 = vmatpush3.bf16.msra.mxu0 %v7416_v49 }
0x1012   : > { %7238 = vmatpush3.bf16.msra.mxu1 %v7416_v49  ;;  %6724 = vmatprep.subr.bf16.mxu0 %v7417_v36 }
0x1013   : > { %7231 = vmatprep.subr.bf16.mxu1 %v7417_v36 }
0x1015   : > { %6725 = vmatpush3.bf16.msra.mxu0 %v7418_v30 }
0x1016   : > { %7239 = vmatpush3.bf16.msra.mxu1 %v7418_v30  ;;  %6726 = vmatprep.subr.bf16.mxu0 %v7419_v23 }
0x1017   : > { %7232 = vmatprep.subr.bf16.mxu1 %v7419_v23 }
0x1018   : > { %5796 = vmatmul.mubr.bf16.gmra.mrb[172].mxu1 %v5602_v1  ;;  %v10589_v1 = vld [vmem:[#allocation18_spill] sm:$0xff] }
0x1019   : > { %5805 = vmatprep.mubr.bf16.mxu1 %v10544_v57  ;;  %6727 = vmatpush3.bf16.msra.mxu0 %v7420_v8  ;;  %v10591_v34 = vsub.s32 1, %v10589_v1 }
0x101a   : > { %7240 = vmatpush3.bf16.msra.mxu1 %v7420_v8  ;;  %6728 = vmatprep.subr.bf16.mxu0 %v7421_v46 }
0x101b   : > { %7233 = vmatprep.subr.bf16.mxu1 %v7421_v46 }
0x101d   : > { %6729 = vmatpush3.bf16.msra.mxu0 %v7422_v27 }
0x101e   : > { %7241 = vmatpush3.bf16.msra.mxu1 %v7422_v27 }
0x1027   : > { %v5482_v39 = vpop.xlane.xlu0 %5481 }
0x1028   : > { %v5501_v50 = vmul.f32 0.0078125, %v5482_v39 }
0x1029   : > { %v5484_v7 = vpop.xlane.xlu1 %5483 }
0x102a   : > { %v5517_v18 = vadd.f32 1e-05, %v5501_v50  ;;  %v5502_v62 = vmul.f32 0.0078125, %v5484_v7 }
0x102b   : > { %v5486_v47 = vpop.xlane.xlu0 %5485 }
0x102c   : > { %7735 = vrsqrt.f32 %v5517_v18  ;;  %v5518_v6 = vadd.f32 1e-05, %v5502_v62  ;;  %v5503_v45 = vmul.f32 0.0078125, %v5486_v47 }
0x102d   : > { %v5488_v15 = vpop.xlane.xlu1 %5487 }
0x102e   : > { %7737 = vrsqrt.f32 %v5518_v6  ;;  %v5519_v0 = vadd.f32 1e-05, %v5503_v45  ;;  %v5504_v22 = vmul.f32 0.0078125, %v5488_v15 }
0x1030   : > { %7739 = vrsqrt.f32 %v5519_v0  ;;  %v5520_v42 = vadd.f32 1e-05, %v5504_v22 }
0x1032   : > { %7741 = vrsqrt.f32 %v5520_v42 }
0x1036   : > { %v7736_v9 = vpop.eup %7735 }
0x1037   : > { %v5549_v32 = vmul.f32 %v7736_v9, %v10194_v16 }
0x1038   : > { %v7738_v11 = vpop.eup %7737 }
0x1039   : > { %v5550_v17 = vmul.f32 %v7738_v11, %v10197_v37  ;;  %v5571_v12 = vmul.f32 %v10216_v55, %v5549_v32 }
0x103a   : > { %v7740_v38 = vpop.eup %7739 }
0x103b   : > { %v5572_v29 = vmul.f32 %v10216_v55, %v5550_v17  ;;  %v5593_v25 = vadd.f32 %v10224_v24, %v5571_v12  ;;  %v5551_v61 = vmul.f32 %v7740_v38, %v10202_v56  ;;  %v5621_v56 = vld [vmem:[%s10588_s30] sm:$0x3]  ;;  %s7971_s30 = scalar_lea.vmem %s7970_s3, 4096 }
0x103c   : > { %v7742_v52 = vpop.eup %7741  ;;  %v10287_v51 = vrot.slane %v5621_v56, %v10591_v34  ;;  %p7973_p7 = scmp.lt.s32.totalorder %s7971_s30, %s7965_s22 }
0x103d   : > { %v5594_v21 = vadd.f32 %v10224_v24, %v5572_v29  ;;  %v5552_v48 = vmul.f32 %v7742_v52, %v10207_v2  ;;  %v5573_v37 = vmul.f32 %v10216_v55, %v5551_v61  ;;  %v10590_v2 = vsub.s32 0, %v10589_v1 }
0x103e   : > { %p7974_p9 = por %p7973_p7, %p7972_p3 }
0x103f   : > { %v5603_v19 = vpack.c.bf16 %v5594_v21, %v5593_v25  ;;  %v5574_v16 = vmul.f32 %v10216_v55, %v5552_v48  ;;  %v5595_v10 = vadd.f32 %v10224_v24, %v5573_v37  ;;  %v10283_v53 = vrot.slane %v5621_v56, %v10590_v2 }
0x1040   : > { %p7975_p12 = pnand %p7974_p9, %p7968_p13 }
0x1041   : > { %5806 = vmatmul.mubr.bf16.gmra.mrb[176].mxu1 %v5603_v19  ;;  %v5596_v14 = vadd.f32 %v10224_v24, %v5574_v16 }
0x1042   : > { %5815 = vmatprep.mubr.bf16.mxu1 %v10544_v57 }
0x1043   : > { %v5604_v3 = vpack.c.bf16 %v5596_v14, %v5595_v10 }
0x1049   : > { %5816 = vmatmul.mubr.bf16.gmra.mrb[180].mxu1 %v5604_v3 }
0x1096   : > { %v5747_v55 = vpop.f32.mrb[152].mxu1 }
0x1097   : > { %v5748_v57 = vadd.f32 %v5747_v55, %v10283_v53  ;;  %v5749_v41 = vpop.f32.mrb[153].mxu1 }
0x1098   : > { %v5750_v24 = vadd.f32 %v5749_v41, %v10287_v51  ;;  %v5751_v26 = vpop.f32.mrb[154].mxu1 }
0x1099   : > { %v5858_v49 = vmul.f32 0.70710677, %v5748_v57  ;;  %v5752_v36 = vadd.f32 %v5751_v26, %v10283_v53  ;;  %v5753_v30 = vpop.f32.mrb[155].mxu1  ;;  %v5826_v29 = vmul.f32 0.5, %v5748_v57 }
0x109a   : > { %v5859_v39 = vmul.f32 0.70710677, %v5750_v24  ;;  %v5754_v50 = vadd.f32 %v5753_v30, %v10287_v51  ;;  %v5827_v21 = vmul.f32 0.5, %v5750_v24 }
0x109b   : > { %7743 = verf.f32 %v5858_v49  ;;  %v5860_v23 = vmul.f32 0.70710677, %v5752_v36  ;;  %v5828_v52 = vmul.f32 0.5, %v5752_v36 }
0x109c   : > { %7745 = verf.f32 %v5859_v39  ;;  %v5861_v7 = vmul.f32 0.70710677, %v5754_v50  ;;  %v5829_v61 = vmul.f32 0.5, %v5754_v50 }
0x109d   : > { %7747 = verf.f32 %v5860_v23 }
0x109e   : > { %7749 = verf.f32 %v5861_v7  ;;  %v5757_v8 = vpop.f32.mrb[156].mxu1 }
0x109f   : > { %v5758_v18 = vadd.f32 %v5757_v8, %v10283_v53  ;;  %v5759_v62 = vpop.f32.mrb[157].mxu1 }
0x10a0   : > { %v5760_v47 = vadd.f32 %v5759_v62, %v10287_v51  ;;  %v5761_v6 = vpop.f32.mrb[158].mxu1 }
0x10a1   : > { %v5862_v45 = vmul.f32 0.70710677, %v5758_v18  ;;  %v5762_v46 = vadd.f32 %v5761_v6, %v10283_v53  ;;  %v5763_v15 = vpop.f32.mrb[159].mxu1  ;;  %v5830_v26 = vmul.f32 0.5, %v5758_v18 }
0x10a2   : > { %v5863_v27 = vmul.f32 0.70710677, %v5760_v47  ;;  %v5764_v0 = vadd.f32 %v5763_v15, %v10287_v51  ;;  %v5831_v24 = vmul.f32 0.5, %v5760_v47 }
0x10a3   : > { %7751 = verf.f32 %v5862_v45  ;;  %v5864_v22 = vmul.f32 0.70710677, %v5762_v46  ;;  %v5832_v57 = vmul.f32 0.5, %v5762_v46 }
0x10a4   : > { %7753 = verf.f32 %v5863_v27  ;;  %v5865_v42 = vmul.f32 0.70710677, %v5764_v0  ;;  %v5833_v36 = vmul.f32 0.5, %v5764_v0 }
0x10a5   : > { %v7744_v9 = vpop.eup %7743  ;;  %7755 = verf.f32 %v5864_v22 }
0x10a6   : > { %v7746_v32 = vpop.eup %7745  ;;  %v5922_v11 = vadd.f32 1.0, %v7744_v9  ;;  %7757 = verf.f32 %v5865_v42 }
0x10a7   : > { %v7748_v17 = vpop.eup %7747  ;;  %v5923_v12 = vadd.f32 1.0, %v7746_v32 }
0x10a8   : > { %v7750_v38 = vpop.eup %7749  ;;  %v5924_v25 = vadd.f32 1.0, %v7748_v17  ;;  %v5954_v19 = vmul.f32 %v5922_v11, %v5826_v29 }
0x10a9   : > { %v5925_v48 = vadd.f32 1.0, %v7750_v38  ;;  %v5955_v37 = vmul.f32 %v5923_v12, %v5827_v21 }
0x10aa   : > { %v5956_v16 = vmul.f32 %v5924_v25, %v5828_v52 }
0x10ab   : > { %v5957_v14 = vmul.f32 %v5925_v48, %v5829_v61 }
0x10ac   : > { %v5986_v10 = vpack.c.bf16 %v5956_v16, %v5954_v19 }
0x10ad   : > { %v7752_v3 = vpop.eup %7751  ;;  %v5987_v56 = vpack.c.bf16 %v5957_v14, %v5955_v37 }
0x10ae   : > { %v7754_v1 = vpop.eup %7753  ;;  %v5926_v2 = vadd.f32 1.0, %v7752_v3 }
0x10af   : > { %v7756_v34 = vpop.eup %7755  ;;  %v5927_v55 = vadd.f32 1.0, %v7754_v1  ;;  %6169 = vmatprep.mubr.bf16.mxu0 %v5987_v56 }
0x10b0   : > { %v7758_v41 = vpop.eup %7757  ;;  %v5928_v49 = vadd.f32 1.0, %v7756_v34  ;;  %6170 = vmatmul.mubr.bf16.vlgmr.msra.gmra.mrb[168].mxu0 %v5986_v10  ;;  %v5958_v39 = vmul.f32 %v5926_v2, %v5830_v26 }
0x10b1   : > { %v5929_v30 = vadd.f32 1.0, %v7758_v41  ;;  %v5959_v23 = vmul.f32 %v5927_v55, %v5831_v24 }
0x10b2   : > { %v5960_v50 = vmul.f32 %v5928_v49, %v5832_v57 }
0x10b3   : > { %v5961_v7 = vmul.f32 %v5929_v30, %v5833_v36 }
0x10b4   : > { %v5988_v8 = vpack.c.bf16 %v5960_v50, %v5958_v39 }
0x10b5   : > { %v5989_v62 = vpack.c.bf16 %v5961_v7, %v5959_v23 }
0x10b7   : > { %6177 = vmatprep.mubr.bf16.mxu0 %v5989_v62 }
0x10b8   : > { %6178 = vmatmul.mubr.bf16.gmra.mrb[172].mxu0 %v5988_v8 }
0x10d3   : > { %v5767_v6 = vpop.f32.mrb[160].mxu1 }
0x10d4   : > { %v5768_v45 = vadd.f32 %v5767_v6, %v10283_v53  ;;  %v5769_v15 = vpop.f32.mrb[161].mxu1 }
0x10d5   : > { %v5770_v18 = vadd.f32 %v5769_v15, %v10287_v51  ;;  %v5771_v46 = vpop.f32.mrb[162].mxu1 }
0x10d6   : > { %v5866_v27 = vmul.f32 0.70710677, %v5768_v45  ;;  %v5772_v47 = vadd.f32 %v5771_v46, %v10283_v53  ;;  %v5773_v0 = vpop.f32.mrb[163].mxu1  ;;  %v5834_v41 = vmul.f32 0.5, %v5768_v45 }
0x10d7   : > { %v5867_v22 = vmul.f32 0.70710677, %v5770_v18  ;;  %v5774_v42 = vadd.f32 %v5773_v0, %v10287_v51  ;;  %v5835_v36 = vmul.f32 0.5, %v5770_v18 }
0x10d8   : > { %7759 = verf.f32 %v5866_v27  ;;  %v5868_v9 = vmul.f32 0.70710677, %v5772_v47  ;;  %v5836_v26 = vmul.f32 0.5, %v5772_v47 }
0x10d9   : > { %7761 = verf.f32 %v5867_v22  ;;  %v5869_v32 = vmul.f32 0.70710677, %v5774_v42  ;;  %v5837_v30 = vmul.f32 0.5, %v5774_v42 }
0x10da   : > { %7763 = verf.f32 %v5868_v9 }
0x10db   : > { %7765 = verf.f32 %v5869_v32  ;;  %v5777_v11 = vpop.f32.mrb[164].mxu1 }
0x10dc   : > { %v5778_v17 = vadd.f32 %v5777_v11, %v10283_v53  ;;  %v5779_v12 = vpop.f32.mrb[165].mxu1 }
0x10dd   : > { %v5780_v38 = vadd.f32 %v5779_v12, %v10287_v51  ;;  %v5781_v29 = vpop.f32.mrb[166].mxu1 }
0x10de   : > { %v5870_v52 = vmul.f32 0.70710677, %v5778_v17  ;;  %v5782_v25 = vadd.f32 %v5781_v29, %v10283_v53  ;;  %v5783_v21 = vpop.f32.mrb[167].mxu1 }
0x10df   : > { %v5871_v61 = vmul.f32 0.70710677, %v5780_v38  ;;  %v5784_v48 = vadd.f32 %v5783_v21, %v10287_v51 }
0x10e0   : > { %7767 = verf.f32 %v5870_v52  ;;  %v5872_v19 = vmul.f32 0.70710677, %v5782_v25 }
0x10e1   : > { %7769 = verf.f32 %v5871_v61  ;;  %v5873_v16 = vmul.f32 0.70710677, %v5784_v48  ;;  %v5838_v61 = vmul.f32 0.5, %v5778_v17 }
0x10e2   : > { %v7760_v37 = vpop.eup %7759  ;;  %7771 = verf.f32 %v5872_v19  ;;  %v5840_v19 = vmul.f32 0.5, %v5782_v25 }
0x10e3   : > { %v7762_v14 = vpop.eup %7761  ;;  %v5930_v10 = vadd.f32 1.0, %v7760_v37  ;;  %7773 = verf.f32 %v5873_v16  ;;  %v5787_v3 = vpop.f32.mrb[168].mxu1 }
0x10e4   : > { %v7764_v56 = vpop.eup %7763  ;;  %v5931_v1 = vadd.f32 1.0, %v7762_v14  ;;  %v10306_v2 = vadd.f32 %v5787_v3, %v10283_v53  ;;  %v5789_v34 = vpop.f32.mrb[169].mxu1  ;;  %v5841_v3 = vmul.f32 0.5, %v5784_v48 }
0x10e5   : > { %v7766_v55 = vpop.eup %7765  ;;  %v5932_v57 = vadd.f32 1.0, %v7764_v56  ;;  %v10309_v49 = vadd.f32 %v5789_v34, %v10287_v51  ;;  %v5791_v24 = vpop.f32.mrb[170].mxu1  ;;  %v5962_v7 = vmul.f32 %v5930_v10, %v5834_v41  ;;  %v5839_v10 = vmul.f32 0.5, %v5780_v38 }
0x10e6   : > { %v5933_v39 = vadd.f32 1.0, %v7766_v55  ;;  %v5874_v50 = vmul.f32 0.70710677, %v10306_v2  ;;  %v5793_v23 = vpop.f32.mrb[171].mxu1  ;;  %v5792_v6 = vadd.f32 %v5791_v24, %v10283_v53  ;;  %v5963_v15 = vmul.f32 %v5931_v1, %v5835_v36 }
0x10e7   : > { %v5964_v8 = vmul.f32 %v5932_v57, %v5836_v26  ;;  %v5875_v62 = vmul.f32 0.70710677, %v10309_v49  ;;  %v5794_v46 = vadd.f32 %v5793_v23, %v10287_v51 }
0x10e8   : > { %v5965_v45 = vmul.f32 %v5933_v39, %v5837_v30  ;;  %7775 = verf.f32 %v5874_v50  ;;  %v5876_v27 = vmul.f32 0.70710677, %v5792_v6 }
0x10e9   : > { %7777 = verf.f32 %v5875_v62  ;;  %v5990_v47 = vpack.c.bf16 %v5964_v8, %v5962_v7  ;;  %v5877_v0 = vmul.f32 0.70710677, %v5794_v46 }
0x10ea   : > { %v7768_v18 = vpop.eup %7767  ;;  %v5991_v22 = vpack.c.bf16 %v5965_v45, %v5963_v15  ;;  %7779 = verf.f32 %v5876_v27  ;;  %v5842_v15 = vmul.f32 0.5, %v10306_v2  ;;  %v5844_v45 = vmul.f32 0.5, %v5792_v6 }
0x10eb   : > { %v7770_v42 = vpop.eup %7769  ;;  %v5934_v9 = vadd.f32 1.0, %v7768_v18  ;;  %v5797_v32 = vpop.f32.mrb[172].mxu1  ;;  %7781 = verf.f32 %v5877_v0  ;;  %v5845_v18 = vmul.f32 0.5, %v5794_v46 }
0x10ec   : > { %v7772_v11 = vpop.eup %7771  ;;  %v5935_v12 = vadd.f32 1.0, %v7770_v42  ;;  %v5798_v29 = vadd.f32 %v5797_v32, %v10283_v53  ;;  %v5799_v52 = vpop.f32.mrb[173].mxu1  ;;  %6185 = vmatprep.mubr.bf16.mxu0 %v5991_v22 }
0x10ed   : > { %v7774_v21 = vpop.eup %7773  ;;  %v5936_v16 = vadd.f32 1.0, %v7772_v11  ;;  %v5800_v37 = vadd.f32 %v5799_v52, %v10287_v51  ;;  %v5801_v14 = vpop.f32.mrb[174].mxu1  ;;  %6186 = vmatmul.mubr.bf16.gmra.mrb[176].mxu0 %v5990_v47  ;;  %v5966_v55 = vmul.f32 %v5934_v9, %v5838_v61  ;;  %v5843_v47 = vmul.f32 0.5, %v10309_v49 }
0x10ee   : > { %v5937_v56 = vadd.f32 1.0, %v7774_v21  ;;  %v5878_v1 = vmul.f32 0.70710677, %v5798_v29  ;;  %v5803_v34 = vpop.f32.mrb[175].mxu1  ;;  %v5802_v57 = vadd.f32 %v5801_v14, %v10283_v53  ;;  %v5967_v24 = vmul.f32 %v5935_v12, %v5839_v10 }
0x10ef   : > { %v5968_v41 = vmul.f32 %v5936_v16, %v5840_v19  ;;  %v5879_v26 = vmul.f32 0.70710677, %v5800_v37  ;;  %v5804_v17 = vadd.f32 %v5803_v34, %v10287_v51  ;;  %v5846_v2 = vmul.f32 0.5, %v5798_v29 }
0x10f0   : > { %v5969_v36 = vmul.f32 %v5937_v56, %v5841_v3  ;;  %7783 = verf.f32 %v5878_v1  ;;  %v5880_v25 = vmul.f32 0.70710677, %v5802_v57  ;;  %v5848_v6 = vmul.f32 0.5, %v5802_v57 }
0x10f1   : > { %7785 = verf.f32 %v5879_v26  ;;  %v5992_v30 = vpack.c.bf16 %v5968_v41, %v5966_v55  ;;  %v5881_v50 = vmul.f32 0.70710677, %v5804_v17  ;;  %v5847_v49 = vmul.f32 0.5, %v5800_v37 }
0x10f2   : > { %v7776_v39 = vpop.eup %7775  ;;  %v5993_v38 = vpack.c.bf16 %v5969_v36, %v5967_v24  ;;  %7787 = verf.f32 %v5880_v25  ;;  %v5849_v46 = vmul.f32 0.5, %v5804_v17 }
0x10f3   : > { %v7778_v48 = vpop.eup %7777  ;;  %v5938_v23 = vadd.f32 1.0, %v7776_v39  ;;  %7789 = verf.f32 %v5881_v50 }
0x10f4   : > { %6193 = vmatprep.mubr.bf16.mxu0 %v5993_v38  ;;  %v7780_v7 = vpop.eup %7779  ;;  %v5939_v8 = vadd.f32 1.0, %v7778_v48 }
0x10f5   : > { %6194 = vmatmul.mubr.bf16.gmra.mrb[180].mxu0 %v5992_v30  ;;  %v7782_v62 = vpop.eup %7781  ;;  %v5940_v27 = vadd.f32 1.0, %v7780_v7  ;;  %v5970_v22 = vmul.f32 %v5938_v23, %v5842_v15 }
0x10f6   : > { %v5941_v0 = vadd.f32 1.0, %v7782_v62  ;;  %v5971_v9 = vmul.f32 %v5939_v8, %v5843_v47 }
0x10f7   : > { %v5972_v42 = vmul.f32 %v5940_v27, %v5844_v45 }
0x10f8   : > { %v5973_v32 = vmul.f32 %v5941_v0, %v5845_v18 }
0x10f9   : > { %v5994_v12 = vpack.c.bf16 %v5972_v42, %v5970_v22 }
0x10fa   : > { %v7784_v11 = vpop.eup %7783  ;;  %v5995_v21 = vpack.c.bf16 %v5973_v32, %v5971_v9 }
0x10fb   : > { %v7786_v52 = vpop.eup %7785  ;;  %v5942_v61 = vadd.f32 1.0, %v7784_v11 }
0x10fc   : > { %v7788_v19 = vpop.eup %7787  ;;  %v5943_v16 = vadd.f32 1.0, %v7786_v52  ;;  %6201 = vmatprep.mubr.bf16.mxu0 %v5995_v21 }
0x10fd   : > { %v7790_v14 = vpop.eup %7789  ;;  %v5944_v10 = vadd.f32 1.0, %v7788_v19  ;;  %6202 = vmatmul.mubr.bf16.gmra.mrb[184].mxu0 %v5994_v12  ;;  %v5974_v56 = vmul.f32 %v5942_v61, %v5846_v2 }
0x10fe   : > { %v5945_v3 = vadd.f32 1.0, %v7790_v14  ;;  %v5975_v34 = vmul.f32 %v5943_v16, %v5847_v49 }
0x10ff   : > { %v5976_v1 = vmul.f32 %v5944_v10, %v5848_v6 }
0x1100   : > { %v5977_v55 = vmul.f32 %v5945_v3, %v5849_v46 }
0x1101   : > { %v5996_v41 = vpack.c.bf16 %v5976_v1, %v5974_v56 }
0x1102   : > { %v5997_v26 = vpack.c.bf16 %v5977_v55, %v5975_v34 }
0x1104   : > { %6209 = vmatprep.mubr.bf16.mxu0 %v5997_v26 }
0x1105   : > { %6210 = vmatmul.mubr.bf16.gmra.mrb[188].mxu0 %v5996_v41 }
0x1114   : > { %v5807_v24 = vpop.f32.mrb[176].mxu1 }
0x1115   : > { %v5808_v36 = vadd.f32 %v5807_v24, %v10283_v53  ;;  %v5809_v25 = vpop.f32.mrb[177].mxu1 }
0x1116   : > { %v5810_v29 = vadd.f32 %v5809_v25, %v10287_v51  ;;  %v5811_v57 = vpop.f32.mrb[178].mxu1 }
0x1117   : > { %v5882_v30 = vmul.f32 0.70710677, %v5808_v36  ;;  %v5812_v37 = vadd.f32 %v5811_v57, %v10283_v53  ;;  %v5813_v17 = vpop.f32.mrb[179].mxu1  ;;  %v5850_v61 = vmul.f32 0.5, %v5808_v36 }
0x1118   : > { %v5883_v39 = vmul.f32 0.70710677, %v5810_v29  ;;  %v5814_v50 = vadd.f32 %v5813_v17, %v10287_v51 }
0x1119   : > { %7791 = verf.f32 %v5882_v30  ;;  %v5884_v38 = vmul.f32 0.70710677, %v5812_v37  ;;  %v5852_v19 = vmul.f32 0.5, %v5812_v37 }
0x111a   : > { %7793 = verf.f32 %v5883_v39  ;;  %v5885_v48 = vmul.f32 0.70710677, %v5814_v50  ;;  %v5853_v14 = vmul.f32 0.5, %v5814_v50 }
0x111b   : > { %7795 = verf.f32 %v5884_v38 }
0x111c   : > { %7797 = verf.f32 %v5885_v48  ;;  %v5817_v23 = vpop.f32.mrb[180].mxu1 }
0x111d   : > { %v5818_v7 = vadd.f32 %v5817_v23, %v10283_v53  ;;  %v5819_v8 = vpop.f32.mrb[181].mxu1 }
0x111e   : > { %v5820_v62 = vadd.f32 %v5819_v8, %v10287_v51  ;;  %v5821_v15 = vpop.f32.mrb[182].mxu1 }
0x111f   : > { %v5886_v45 = vmul.f32 0.70710677, %v5818_v7  ;;  %v5822_v27 = vadd.f32 %v5821_v15, %v10283_v53  ;;  %v5823_v47 = vpop.f32.mrb[183].mxu1  ;;  %v5851_v53 = vmul.f32 0.5, %v5810_v29  ;;  %v5854_v24 = vmul.f32 0.5, %v5818_v7 }
0x1120   : > { %v5887_v18 = vmul.f32 0.70710677, %v5820_v62  ;;  %v5824_v0 = vadd.f32 %v5823_v47, %v10287_v51  ;;  %v5855_v29 = vmul.f32 0.5, %v5820_v62  ;;  %v10332_v7 = vld [vmem:[%s10592_s10] ss:$0 sm:$0xff] }
0x1121   : > { %7799 = verf.f32 %v5886_v45  ;;  %v5888_v22 = vmul.f32 0.70710677, %v5822_v27  ;;  %v5856_v36 = vmul.f32 0.5, %v5822_v27 }
0x1122   : > { %7801 = verf.f32 %v5887_v18  ;;  %v5889_v42 = vmul.f32 0.70710677, %v5824_v0  ;;  %v5857_v57 = vmul.f32 0.5, %v5824_v0 }
0x1123   : > { %v7792_v9 = vpop.eup %7791  ;;  %7803 = verf.f32 %v5888_v22 }
0x1124   : > { %v7794_v32 = vpop.eup %7793  ;;  %v5946_v11 = vadd.f32 1.0, %v7792_v9  ;;  %7805 = verf.f32 %v5889_v42 }
0x1125   : > { %v7796_v12 = vpop.eup %7795  ;;  %v5947_v52 = vadd.f32 1.0, %v7794_v32 }
0x1126   : > { %v7798_v21 = vpop.eup %7797  ;;  %v5948_v16 = vadd.f32 1.0, %v7796_v12  ;;  %v5978_v6 = vmul.f32 %v5946_v11, %v5850_v61 }
0x1127   : > { %v5949_v2 = vadd.f32 1.0, %v7798_v21  ;;  %v5979_v10 = vmul.f32 %v5947_v52, %v5851_v53 }
0x1128   : > { %v5980_v51 = vmul.f32 %v5948_v16, %v5852_v19 }
0x1129   : > { %v5981_v49 = vmul.f32 %v5949_v2, %v5853_v14 }
0x112a   : > { %v5998_v46 = vpack.c.bf16 %v5980_v51, %v5978_v6 }
0x112b   : > { %v7800_v3 = vpop.eup %7799  ;;  %v5999_v56 = vpack.c.bf16 %v5981_v49, %v5979_v10 }
0x112c   : > { %v7802_v1 = vpop.eup %7801  ;;  %v5950_v34 = vadd.f32 1.0, %v7800_v3 }
0x112d   : > { %v7804_v55 = vpop.eup %7803  ;;  %v5951_v41 = vadd.f32 1.0, %v7802_v1  ;;  %6217 = vmatprep.mubr.bf16.mxu1 %v5999_v56 }
0x112e   : > { %v7806_v26 = vpop.eup %7805  ;;  %v5952_v25 = vadd.f32 1.0, %v7804_v55  ;;  %6218 = vmatmul.mubr.bf16.vlgmr.msra.gmra.mrb[184].mxu1 %v5998_v46  ;;  %v5982_v37 = vmul.f32 %v5950_v34, %v5854_v24 }
0x112f   : > { %v5953_v30 = vadd.f32 1.0, %v7806_v26  ;;  %v5983_v39 = vmul.f32 %v5951_v41, %v5855_v29 }
0x1130   : > { %v5984_v17 = vmul.f32 %v5952_v25, %v5856_v36 }
0x1131   : > { %v5985_v50 = vmul.f32 %v5953_v30, %v5857_v57 }
0x1132   : > { %v6000_v38 = vpack.c.bf16 %v5984_v17, %v5982_v37 }
0x1133   : > { %v6001_v48 = vpack.c.bf16 %v5985_v50, %v5983_v39 }
0x1135   : > { %6225 = vmatprep.mubr.bf16.mxu1 %v6001_v48 }
0x1136   : > { %6226 = vmatmul.mubr.bf16.gmra.mrb[188].mxu1 %v6000_v38 }
0x1183   : > { %v6730_v23 = vpop.f32.mrb[168].mxu0 }
0x1184   : > { %v6731_v8 = vpop.f32.mrb[169].mxu0 }
0x1185   : > { %v6732_v15 = vadd.f32 %v6731_v8, %v6730_v23  ;;  %v6733_v62 = vpop.f32.mrb[170].mxu0 }
0x1186   : > { %v6734_v45 = vpop.f32.mrb[171].mxu0 }
0x1187   : > { %v6172_v27 = vadd.f32 %v6732_v15, %v10332_v7  ;;  %v6735_v47 = vadd.f32 %v6734_v45, %v6733_v62 }
0x1189   : > { %v6234_v18 = vadd.f32 %v6172_v27, %v10056_v20  ;;  %v6175_v0 = vadd.f32 %v6735_v47, %v10332_v7 }
0x118b   : > { %6250 = vst [vmem:[%s10339_s15] sm:$0xff] %v6234_v18  ;;  %v6235_v22 = vadd.f32 %v6175_v0, %v10060_v40  ;;  %v6736_v42 = vpop.f32.mrb[172].mxu0 }
0x118c   : > { %v6737_v9 = vpop.f32.mrb[173].mxu0 }
0x118d   : > { %6251 = vst [vmem:[%s10339_s15 + $0x8] sm:$0xff] %v6235_v22  ;;  %v6738_v32 = vadd.f32 %v6737_v9, %v6736_v42  ;;  %v6739_v11 = vpop.f32.mrb[174].mxu0 }
0x118e   : > { %v6740_v12 = vpop.f32.mrb[175].mxu0 }
0x118f   : > { %v6180_v20 = vadd.f32 %v6738_v32, %v10332_v7  ;;  %v6741_v52 = vadd.f32 %v6740_v12, %v6739_v11 }
0x1191   : > { %v6236_v21 = vadd.f32 %v6180_v20, %v10064_v28  ;;  %v6183_v61 = vadd.f32 %v6741_v52, %v10332_v7 }
0x1193   : > { %6252 = vst [vmem:[%s10339_s15 + $0x10] sm:$0xff] %v6236_v21  ;;  %v6237_v19 = vadd.f32 %v6183_v61, %v10070_v59 }
0x1195   : > { %6253 = vst [vmem:[%s10339_s15 + $0x18] sm:$0xff] %v6237_v19 }
0x11c0   : > { %v6742_v40 = vpop.f32.mrb[176].mxu0 }
0x11c1   : > { %v6743_v16 = vpop.f32.mrb[177].mxu0 }
0x11c2   : > { %v6744_v53 = vadd.f32 %v6743_v16, %v6742_v40  ;;  %v6745_v14 = vpop.f32.mrb[178].mxu0 }
0x11c3   : > { %v6746_v2 = vpop.f32.mrb[179].mxu0 }
0x11c4   : > { %v6188_v6 = vadd.f32 %v6744_v53, %v10332_v7  ;;  %v6747_v51 = vadd.f32 %v6746_v2, %v6745_v14 }
0x11c6   : > { %v6238_v10 = vadd.f32 %v6188_v6, %v10076_v54  ;;  %v6191_v28 = vadd.f32 %v6747_v51, %v10332_v7 }
0x11c8   : > { %6254 = vst [vmem:[%s10339_s15 + $0x20] sm:$0xff] %v6238_v10  ;;  %v6239_v49 = vadd.f32 %v6191_v28, %v10081_v44  ;;  %v6748_v46 = vpop.f32.mrb[180].mxu0 }
0x11c9   : > { %v6749_v59 = vpop.f32.mrb[181].mxu0 }
0x11ca   : > { %6255 = vst [vmem:[%s10339_s15 + $0x28] sm:$0xff] %v6239_v49  ;;  %v6750_v3 = vadd.f32 %v6749_v59, %v6748_v46  ;;  %v6751_v56 = vpop.f32.mrb[182].mxu0 }
0x11cb   : > { %v6752_v1 = vpop.f32.mrb[183].mxu0 }
0x11cc   : > { %v6196_v34 = vadd.f32 %v6750_v3, %v10332_v7  ;;  %v6753_v55 = vadd.f32 %v6752_v1, %v6751_v56 }
0x11ce   : > { %v6240_v41 = vadd.f32 %v6196_v34, %v10085_v31  ;;  %v6199_v54 = vadd.f32 %v6753_v55, %v10332_v7 }
0x11d0   : > { %6256 = vst [vmem:[%s10339_s15 + $0x30] sm:$0xff] %v6240_v41  ;;  %v6241_v26 = vadd.f32 %v6199_v54, %v10089_v33  ;;  %v6754_v24 = vpop.f32.mrb[184].mxu0 }
0x11d1   : > { %v6755_v44 = vpop.f32.mrb[185].mxu0 }
0x11d2   : > { %6257 = vst [vmem:[%s10339_s15 + $0x38] sm:$0xff] %v6241_v26  ;;  %v6756_v36 = vadd.f32 %v6755_v44, %v6754_v24  ;;  %v6757_v25 = vpop.f32.mrb[186].mxu0 }
0x11d3   : > { %v6758_v29 = vpop.f32.mrb[187].mxu0 }
0x11d4   : > { %v6204_v57 = vadd.f32 %v6756_v36, %v10332_v7  ;;  %v6759_v30 = vadd.f32 %v6758_v29, %v6757_v25 }
0x11d6   : > { %v6242_v37 = vadd.f32 %v6204_v57, %v10096_v43  ;;  %v6207_v31 = vadd.f32 %v6759_v30, %v10332_v7 }
0x11d8   : > { %6258 = vst [vmem:[%s10339_s15 + $0x40] sm:$0xff] %v6242_v37  ;;  %v6243_v17 = vadd.f32 %v6207_v31, %v10101_v58  ;;  %v6760_v39 = vpop.f32.mrb[188].mxu0 }
0x11d9   : > { %v6761_v33 = vpop.f32.mrb[189].mxu0 }
0x11da   : > { %6259 = vst [vmem:[%s10339_s15 + $0x48] sm:$0xff] %v6243_v17  ;;  %v6762_v50 = vadd.f32 %v6761_v33, %v6760_v39  ;;  %v6763_v38 = vpop.f32.mrb[190].mxu0 }
0x11db   : > { %v6764_v48 = vpop.f32.mrb[191].mxu0 }
0x11dc   : > { %v6212_v23 = vadd.f32 %v6762_v50, %v10332_v7  ;;  %v6765_v8 = vadd.f32 %v6764_v48, %v6763_v38 }
0x11de   : > { %v6244_v15 = vadd.f32 %v6212_v23, %v10105_v13  ;;  %v6215_v43 = vadd.f32 %v6765_v8, %v10332_v7 }
0x11e0   : > { %6260 = vst [vmem:[%s10339_s15 + $0x50] sm:$0xff] %v6244_v15  ;;  %v6245_v62 = vadd.f32 %v6215_v43, %v10109_v4 }
0x11e2   : > { %6261 = vst [vmem:[%s10339_s15 + $0x58] sm:$0xff] %v6245_v62 }
0x1201   : > { %v6766_v58 = vpop.f32.mrb[184].mxu1 }
0x1202   : > { %v6767_v45 = vpop.f32.mrb[185].mxu1 }
0x1203   : > { %v6768_v27 = vadd.f32 %v6767_v45, %v6766_v58  ;;  %v6769_v47 = vpop.f32.mrb[186].mxu1 }
0x1204   : > { %v6770_v18 = vpop.f32.mrb[187].mxu1 }
0x1205   : > { %v6220_v0 = vadd.f32 %v6768_v27, %v10332_v7  ;;  %v6771_v22 = vadd.f32 %v6770_v18, %v6769_v47 }
0x1207   : > { %v6246_v42 = vadd.f32 %v6220_v0, %v10116_v60  ;;  %v6223_v13 = vadd.f32 %v6771_v22, %v10332_v7 }
0x1209   : > { %6262 = vst [vmem:[%s10339_s15 + $0x60] sm:$0xff] %v6246_v42  ;;  %v6247_v9 = vadd.f32 %v6223_v13, %v10121_v35  ;;  %v6772_v4 = vpop.f32.mrb[188].mxu1 }
0x120a   : > { %v6773_v32 = vpop.f32.mrb[189].mxu1 }
0x120b   : > { %6263 = vst [vmem:[%s10339_s15 + $0x68] sm:$0xff] %v6247_v9  ;;  %v6774_v11 = vadd.f32 %v6773_v32, %v6772_v4  ;;  %v6775_v12 = vpop.f32.mrb[190].mxu1 }
0x120c   : > { %v6776_v20 = vpop.f32.mrb[191].mxu1 }
0x120d   : > { %v6228_v52 = vadd.f32 %v6774_v11, %v10332_v7  ;;  %v6777_v21 = vadd.f32 %v6776_v20, %v6775_v12 }
0x120f   : > { %v6248_v60 = vadd.f32 %v6228_v52, %v10125_v5  ;;  %v6231_v61 = vadd.f32 %v6777_v21, %v10332_v7 }
0x1211   : > { %6264 = vst [vmem:[%s10339_s15 + $0x70] sm:$0xff] %v6248_v60  ;;  %v6249_v35 = vadd.f32 %v6231_v61, %v10129_v63 }
0x1213   : > { %6265 = vst [vmem:[%s10339_s15 + $0x78] sm:$0xff] %v6249_v35 }
0x1214   : > { %7978 = shalt.err (!%p7975_p12)
}
0x1215   : > { %s7979_s24 = scalar_lea.hbm %s10388_s16, 2048  ;;  %s7983_s15 = scalar_lea.hbm %s10593_s14, 8192 }
0x1216   : > { %p7980_p0 = scmp.ne.s32.totalorder %s10388_s16, %s7979_s24  ;;  %p7984_p11 = scmp.lt.u32.totalorder %s10388_s16, %s10593_s14 }
0x1217   : > { %p7985_p1 = scmp.lt.u32.totalorder %s7983_s15, %s7979_s24  ;;  %p7987_p6 = scmp.lt.u32.totalorder %s7979_s24, %s10388_s16 }
0x1218   : > { %p7981_p5 = pnand %p7980_p0, %p8282_p4 }
0x1219   : > { %p7986_p2 = por %p7985_p1, %p7984_p11 }
0x121a   : > { %p7982_p10 = pneg %p7981_p5 }
0x121b   : > { %p7988_p8 = por %p7987_p6, %p7986_p2 }
0x121d   : > { %p7989_p13 = pnand %p7988_p8, %p7982_p10 }
0x121f   : > { %7992 = shalt.err (!%p7989_p13)
}
0x1220   : > { %s8059_s23 = smov 128   ;;  %s8060_s22 = smov 8  }
0x1221   : > { %7260 = dma.vmem_to_hbm [thread:$0]  (%p8282_p4), %s10390_s19, 2048, %s10388_s16, %s6267_s29, %s8059_s23, %s8059_s23, %s8060_s22  }
0x1222 PF: > { %s10594_s21 = sld [smem:[#allocation16_spill]]  ;;  %s10595_s3 = sld [smem:[#allocation17_spill]] }
0x1223   : > { %p7292_p3 = scmp.ge.s32.totalorder %s8039_s28, 2 }
0x1228   : > { %s6296_s30 = sand.u32 1, %s10594_s21   ;;  %p10596_p7 = scmp.ne.s32.totalorder %s10595_s3, 0 }
0x1229   : > { %s6297_s24 = scalar_lea.sflag [#allocation4], %s6296_s30 }
0x122a   : > { %p7280_p9 = pnand %p7292_p3, %p10596_p7 }
0x122c   : > { %8022 = dma.done.wait (!%p7280_p9), %s6297_s24, 2048  }
0x122d   : > { %8024 = vsyncadd (!%p7280_p9), %s6297_s24, 4294965248  ;;  %s10597_s18 = smov %s8288_s25  ;;  %p28_p12 = scmp.ge.s32.totalorder %s8272_s17, 6  }
0x122e   : > { %s10598_s25 = smov %s8031_s26  ;;  %s10599_s26 = smov %s8035_s27 }
0x122f   : > { %s10600_s27 = smov %s10597_s18  ;;  %s10601_s28 = smov %s8272_s17 }
0x1230   :  { %30 = sbr.rel (!%p28_p12) target bundleno = 13 (0xd), region = 133 }
0x1237   :  { %6302 = vsyncpa [#allocation3], 1 }
0x1238   :  { %6304 = vsyncpa [#allocation3 + $0x1], 1 }
0x1239   :  { %6305 = vsyncpa [#allocation6], 1 }
0x123a   :  { %6306 = vsyncpa [#allocation9], 1 }
0x123b   :  { %6307 = vsyncpa [#allocation4], 1 }
0x123c   :  { %6309 = vsyncpa [#allocation4 + $0x1], 1 }

// kernel: tpu_custom_call.1
= control target key start
LH: loop header
LB: loop body
LE: loop exit
PB: predicated region body
PF: predicated region fallthrough
CT: control target
= control target key end

     0   :  { %s10436_s0 = inlined_call_operand.hbm [shape: f32[32,16,128], index: 0, kind: input, shape index: {}]   ;;  %s10437_s1 = inlined_call_operand.vmem [shape: f32[1,128], index: 1, kind: input, shape index: {}]   ;;  %s10438_s2 = inlined_call_operand.vmem [shape: f32[1,128], index: 2, kind: input, shape index: {}]   ;;  %s10439_s3 = inlined_call_operand.hbm [shape: bf16[128,384], index: 3, kind: input, shape index: {}]   ;;  %s10440_s4 = inlined_call_operand.vmem [shape: f32[1,384], index: 4, kind: input, shape index: {}]   ;;  %s10441_s5 = inlined_call_operand.hbm [shape: bf16[128,128], index: 5, kind: input, shape index: {}]   ;;  %s10442_s6 = inlined_call_operand.vmem [shape: f32[1,128], index: 6, kind: input, shape index: {}]   ;;  %s10443_s7 = inlined_call_operand.vmem [shape: f32[1,128], index: 7, kind: input, shape index: {}]   ;;  %s10444_s8 = inlined_call_operand.vmem [shape: f32[1,128], index: 8, kind: input, shape index: {}]   ;;  %s10445_s9 = inlined_call_operand.hbm [shape: bf16[128,256], index: 9, kind: input, shape index: {}]   ;;  %s10446_s10 = inlined_call_operand.vmem [shape: f32[1,256], index: 10, kind: input, shape index: {}]   ;;  %s10447_s11 = inlined_call_operand.hbm [shape: bf16[256,128], index: 11, kind: input, shape index: {}]   ;;  %s10448_s12 = inlined_call_operand.vmem [shape: f32[1,128], index: 12, kind: input, shape index: {}]   ;;  %s10449_s13 = inlined_call_operand.hbm [shape: f32[32,16,128], index: 13, kind: output, shape index: {}]  }
   0x1   :  { %10491 = sst [smem:[#allocation44_spill]] %s10439_s3 }
   0x2   :  { %10492 = sst [smem:[#allocation45_spill]] %s10444_s8 }
   0x3   :  { %10493 = sst [smem:[#allocation46_spill]] %s10446_s10 }
   0x4   :  { %10494 = sst [smem:[#allocation47_spill]] %s10448_s12 }
   0x5   :  { %10495 = sst [smem:[#allocation48_spill]] %s10449_s13 }
   0x6   :  { %18 = vsyncpa [#allocation3], 0 }
   0x7   :  { %20 = vsyncpa [#allocation3 + $0x1], 0 }
   0x8   :  { %21 = vsyncpa [#allocation6], 0 }
   0x9   :  { %22 = vsyncpa [#allocation9], 0 }
   0xa   :  { %23 = vsyncpa [#allocation4], 0 }
   0xb   :  { %25 = vsyncpa [#allocation4 + $0x1], 0  ;;  %s8131_s25 = smov 0   ;;  %s8133_s26 = smov 0  }
   0xc   :  { %s8135_s27 = smov 0   ;;  %s8137_s28 = smov 0  }
   0xd LB: > { %10496 = sst [smem:[#allocation16_spill]] %s8027_s25  ;;  %s8152_s29 = sadd.s32 4294967295, %s8039_s28   ;;  %s8039_s28 = sphi %s8137_s28, %s10601_s28   ;;  %s8035_s27 = sphi %s8135_s27, %s10600_s27   ;;  %s8031_s26 = sphi %s8133_s26, %s10599_s26   ;;  %s8027_s25 = sphi %s8131_s25, %s10598_s25  }
   0xe   : > { %s6392_s30 = sadd.s32 4294967294, %s8039_s28   ;;  %p51_p0 = scmp.ne.s32.totalorder %s8031_s26, %s8027_s25 }
   0xf   : > { %p10452_p1 = scmp.eq.s32.totalorder %s8152_s29, 0  ;;  %p333_p3 = scmp.eq.s32.totalorder %s6392_s30, 3 }
  0x10   : > { %p6393_p5 = scmp.ge.s32.totalorder %s8039_s28, 1  ;;  %p340_p7 = scmp.lt.s32.totalorder %s8039_s28, 5 }
  0x11   : > { %p8161_p4 = por %p10452_p1, %p51_p0  ;;  %p8166_p6 = por %p333_p3, %p51_p0 }
  0x12   : > { %p8171_p8 = pnand %p6393_p5, %p340_p7  ;;  %s8041_s17 = smov [#allocation5]  }
  0x13   : > { %s10497_s14 = scalar_select %p8161_p4, 1, 0 }
  0x14   : > { %s10498_s15 = scalar_select %p8166_p6, 1, 0 }
  0x15   : > { %s10500_s16 = scalar_select %p8171_p8, 1, 0 }
  0x16   : > { %10499 = sst [smem:[#allocation17_spill]] %s10498_s15  ;;  %s358_s18 = sshll.u32 %s8041_s17, 4  ;;  %s359_s18 = int_to_ptr.vmem [resolvable:$true] %s358_s18 }
  0x17   : > { %p7262_p9 = pneg %p8171_p8  ;;  %s8042_s20 = smov [#allocation8]  }
  0x18   : > { %s396_s21 = sshll.u32 %s8042_s20, 4  ;;  %s10502_s3 = sld [smem:[#allocation44_spill]]  ;;  %s8183_s21 = int_to_ptr.vmem [resolvable:$true] %s396_s21 }
  0x19   : > { %p8179_p10 = pnand %p7262_p9, %p10452_p1 }
  0x1b   : > { %p8193_p12 = pneg %p8179_p10 }
  0x1e   : > { %s7823_s24 = scalar_lea.hbm %s10502_s3, 3072 }
  0x1f   : > { %p7824_p11 = scmp.ne.s32.totalorder %s10502_s3, %s7823_s24  ;;  %p7830_p3 = scmp.lt.u32.totalorder %s7823_s24, %s10502_s3 }
  0x21   : > { %p7826_p13 = pnand %p8193_p12, %p7824_p11 }
  0x23   : > { %p7827_p0 = pneg %p7826_p13 }
  0x25   : > { %p7832_p5 = pnand %p7830_p3, %p7827_p0 }
  0x27   : > { %7835 = shalt.err (!%p7832_p5)
}
  0x28   : > { %s7836_s22 = scalar_lea.vmem %s359_s18, 3072  ;;  %p7844_p2 = scmp.lt.s32.totalorder %s359_s18, %s359_s18 }
  0x29   : > { %p7837_p7 = scmp.ne.s32.totalorder %s359_s18, %s7836_s22  ;;  %p7845_p6 = scmp.lt.s32.totalorder %s7836_s22, %s7836_s22 }
  0x2b   : > { %p7839_p9 = pnand %p7837_p7, %p8193_p12  ;;  %p7846_p4 = por %p7845_p6, %p7844_p2 }
  0x2d   : > { %p7840_p1 = pneg %p7839_p9 }
  0x2f   : > { %p7847_p8 = pnand %p7846_p4, %p7840_p1 }
  0x31   : > { %7850 = shalt.err (!%p7847_p8)
}
  0x32   : > { %s8043_s15 = smov 192   ;;  %s8044_s23 = smov 12  }
  0x33   : > { %7265 = dma.hbm_to_vmem [thread:$0]  (!%p8179_p10), %s10502_s3, 3072, %s359_s18, [#allocation6], %s8043_s15, %s8043_s15, %s8044_s23  }
  0x34   : > { %s7851_s13 = scalar_lea.hbm %s10445_s9, 2048 }
  0x35   : > { %p7852_p11 = scmp.ne.s32.totalorder %s10445_s9, %s7851_s13  ;;  %p7858_p4 = scmp.lt.u32.totalorder %s7851_s13, %s10445_s9 }
  0x37   : > { %p7854_p1 = pnand %p7852_p11, %p8193_p12 }
  0x39   : > { %p7855_p2 = pneg %p7854_p1 }
  0x3b   : > { %p7860_p6 = pnand %p7858_p4, %p7855_p2 }
  0x3d   : > { %7863 = shalt.err (!%p7860_p6)
}
  0x3e   : > { %s7864_s18 = scalar_lea.vmem %s8183_s21, 2048  ;;  %p7872_p3 = scmp.lt.s32.totalorder %s8183_s21, %s8183_s21 }
  0x3f   : > { %p7865_p8 = scmp.ne.s32.totalorder %s8183_s21, %s7864_s18  ;;  %p7873_p5 = scmp.lt.s32.totalorder %s7864_s18, %s7864_s18 }
  0x41   : > { %p7867_p13 = pnand %p7865_p8, %p8193_p12  ;;  %p7874_p7 = por %p7873_p5, %p7872_p3 }
  0x43   : > { %p7868_p0 = pneg %p7867_p13 }
  0x45   : > { %p7875_p9 = pnand %p7874_p7, %p7868_p0 }
  0x47   : > { %7878 = shalt.err (!%p7875_p9)
}
  0x48   : > { %s10456_s10 = smov 128   ;;  %s10457_s8 = smov 8  }
  0x49   : > { %7271 = dma.hbm_to_vmem [thread:$0]  (!%p8179_p10), %s10445_s9, 2048, %s8183_s21, [#allocation9], %s10456_s10, %s10456_s10, %s10457_s8  }
  0x4a   : > { %s8047_s15 = smov [#allocation7]   ;;  %s7879_s30 = scalar_lea.hbm %s10441_s5, 1024 }
  0x4b   : > { %s374_s23 = sshll.u32 %s8047_s15, 4  ;;  %p7880_p11 = scmp.ne.s32.totalorder %s10441_s5, %s7879_s30  ;;  %s375_s23 = int_to_ptr.vmem [resolvable:$true] %s374_s23 }
  0x4c   : > { %p7886_p4 = scmp.lt.u32.totalorder %s7879_s30, %s10441_s5 }
  0x4d   : > { %p7882_p1 = pnand %p7880_p11, %p8193_p12 }
  0x4f   : > { %p7883_p2 = pneg %p7882_p1 }
  0x51   : > { %p7888_p6 = pnand %p7886_p4, %p7883_p2 }
  0x53   : > { %7891 = shalt.err (!%p7888_p6)
}
  0x54   : > { %s7892_s21 = scalar_lea.vmem %s375_s23, 1024  ;;  %p7900_p3 = scmp.lt.s32.totalorder %s375_s23, %s375_s23 }
  0x55   : > { %p7893_p8 = scmp.ne.s32.totalorder %s375_s23, %s7892_s21  ;;  %p7901_p5 = scmp.lt.s32.totalorder %s7892_s21, %s7892_s21 }
  0x57   : > { %p7895_p13 = pnand %p7893_p8, %p8193_p12  ;;  %p7902_p7 = por %p7901_p5, %p7900_p3 }
  0x59   : > { %p7896_p0 = pneg %p7895_p13 }
  0x5b   : > { %p7903_p9 = pnand %p7902_p7, %p7896_p0 }
  0x5d   : > { %7906 = shalt.err (!%p7903_p9)
}
  0x5e   : > { %s8048_s12 = smov 64   ;;  %s8049_s13 = smov 4  }
  0x5f   : > { %7268 = dma.hbm_to_vmem [thread:$0]  (!%p8179_p10), %s10441_s5, 1024, %s375_s23, [#allocation6], %s8048_s12, %s8048_s12, %s8049_s13  }
  0x60   : > { %s8050_s25 = smov [#allocation10]   ;;  %s7907_s22 = scalar_lea.hbm %s10447_s11, 2048 }
  0x61   : > { %s412_s24 = sshll.u32 %s8050_s25, 4  ;;  %p7908_p11 = scmp.ne.s32.totalorder %s10447_s11, %s7907_s22  ;;  %s413_s24 = int_to_ptr.vmem [resolvable:$true] %s412_s24 }
  0x62   : > { %p7914_p4 = scmp.lt.u32.totalorder %s7907_s22, %s10447_s11 }
  0x63   : > { %p7910_p1 = pnand %p7908_p11, %p8193_p12 }
  0x65   : > { %p7911_p2 = pneg %p7910_p1 }
  0x67   : > { %p7916_p6 = pnand %p7914_p4, %p7911_p2 }
  0x69   : > { %7919 = shalt.err (!%p7916_p6)
}
  0x6a   : > { %s7920_s23 = scalar_lea.vmem %s413_s24, 2048  ;;  %p7928_p3 = scmp.lt.s32.totalorder %s413_s24, %s413_s24 }
  0x6b   : > { %p7921_p8 = scmp.ne.s32.totalorder %s413_s24, %s7920_s23  ;;  %p7929_p5 = scmp.lt.s32.totalorder %s7920_s23, %s7920_s23 }
  0x6d   : > { %p7923_p13 = pnand %p7921_p8, %p8193_p12  ;;  %p7930_p7 = por %p7929_p5, %p7928_p3 }
  0x6f   : > { %p7924_p0 = pneg %p7923_p13 }
  0x71   : > { %p7931_p9 = pnand %p7930_p7, %p7924_p0 }
  0x73   : > { %7934 = shalt.err (!%p7931_p9)
}
  0x74   : > { %7274 = dma.hbm_to_vmem [thread:$0]  (!%p8179_p10), %s10447_s11, 2048, %s413_s24, [#allocation9], %s8048_s12, %s8048_s12, %s8049_s13  }
  0x75   : > { %s8272_s17 = sadd.s32 1, %s8039_s28   ;;  %s38_s10 = sadd.s32 1, %s8035_s27 }
  0x76   : > { %s35_s19 = ssub.s32 %s8039_s28, %s8272_s17  ;;  %p45_p12 = scmp.ne.s32.totalorder %s8035_s27, %s8031_s26 }
  0x77   : > { %p36_p11 = scmp.eq.s32.totalorder %s35_s19, 0  ;;  %p46_p1 = scmp.eq.s32.totalorder %s8039_s28, 0 }
  0x78   : > { %p10504_p2 = scmp.eq.s32.totalorder %s8152_s29, 3  ;;  %p7287_p6 = scmp.lt.s32.totalorder %s8039_s28, 4 }
  0x79   : > { %s8288_s25 = scalar_select %p36_p11, %s8035_s27, %s38_s10  }
  0x7a   : > { %p8282_p4 = por %p10504_p2, %p45_p12  ;;  %p47_p8 = por %p46_p1, %p45_p12 }
  0x7b   : > { %s429_s30 = sand.u32 1, %s8035_s27   ;;  %s6551_s12 = sshll.u32 %s8039_s28, 11 }
  0x7c   : > { %s6399_s20 = sshll.u32 %s429_s30, 7  ;;  %s8295_s22 = scalar_lea.hbm %s10436_s0, %s6551_s12 }
  0x7d   : > { %s433_s18 = scalar_lea.vmem [#allocation2], %s6399_s20  ;;  %p8299_p10 = pnand %p7287_p6, %p47_p8 }
  0x7e   : > { %s441_s21 = sshll.u32 %s433_s18, 4  ;;  %s8303_s3 = scalar_lea.sflag [#allocation3], %s429_s30  ;;  %s8297_s21 = int_to_ptr.vmem [resolvable:$true] %s441_s21 }
  0x7f   : > { %s7935_s15 = scalar_lea.hbm %s8295_s22, 2048  ;;  %p7937_p0 = pneg %p8299_p10 }
  0x80   : > { %p7936_p13 = scmp.ne.s32.totalorder %s8295_s22, %s7935_s15  ;;  %s7940_s20 = scalar_lea.hbm %s10436_s0, 8192 }
  0x81   : > { %p7941_p7 = scmp.lt.u32.totalorder %s8295_s22, %s10436_s0  ;;  %p7942_p9 = scmp.lt.u32.totalorder %s7940_s20, %s7935_s15 }
  0x82   : > { %p7938_p3 = pnand %p7937_p0, %p7936_p13  ;;  %p7944_p11 = scmp.lt.u32.totalorder %s7935_s15, %s8295_s22 }
  0x83   : > { %p7943_p12 = por %p7942_p9, %p7941_p7 }
  0x84   : > { %p7939_p5 = pneg %p7938_p3 }
  0x85   : > { %p7945_p1 = por %p7944_p11, %p7943_p12 }
  0x87   : > { %p7946_p2 = pnand %p7945_p1, %p7939_p5 }
  0x89   : > { %7949 = shalt.err (!%p7946_p2)
}
  0x8a   : > { %s7950_s30 = scalar_lea.vmem %s8297_s21, 2048  ;;  %s8051_s24 = smov [#allocation2]  }
  0x8b   : > { %p7951_p6 = scmp.ne.s32.totalorder %s8297_s21, %s7950_s30  ;;  %s7955_s18 = sshll.u32 %s8051_s24, 4  ;;  %s7956_s18 = int_to_ptr.vmem [resolvable:$false] %s7955_s18 }
  0x8c   : > { %s7957_s10 = scalar_lea.vmem %s7956_s18, 4096  ;;  %p7958_p3 = scmp.lt.s32.totalorder %s8297_s21, %s7956_s18 }
  0x8d   : > { %p7953_p8 = pnand %p7951_p6, %p7937_p0  ;;  %p7959_p7 = scmp.lt.s32.totalorder %s7957_s10, %s7950_s30 }
  0x8f   : > { %p7954_p13 = pneg %p7953_p8  ;;  %p7960_p9 = por %p7959_p7, %p7958_p3 }
  0x91   : > { %p7961_p12 = pnand %p7960_p9, %p7954_p13 }
  0x93   : > { %7964 = shalt.err (!%p7961_p12)
}
  0x94   : > { %s10507_s15 = smov 8   ;;  %s10508_s19 = smov 128  }
  0x95   : > { %7278 = dma.hbm_to_vmem [thread:$0]  (!%p8299_p10), %s8295_s22, 2048, %s8297_s21, %s8303_s3, %s10508_s19, %s10508_s19, %s10507_s15  }
  0x96   : > { %p10509_p0 = scmp.ne.s32.totalorder %s10500_s16, 0 }
  0x98   : > { %453 = sbr.rel (%p10509_p0) target bundleno = 4642 (0x1222), region = 72 }
  0x9f   : > { %s8337_s20 = sand.u32 1, %s8031_s26   ;;  %p10510_p5 = scmp.ne.s32.totalorder %s10497_s14, 0 }
  0xa0   : > { %s6404_s12 = sshll.u32 %s8337_s20, 7  ;;  %s456_s13 = scalar_lea.sflag [#allocation3], %s8337_s20 }
  0xa1   : > { %s8343_s23 = scalar_lea.vmem [#allocation2], %s6404_s12 }
  0xa2   : > { %8010 = dma.done.wait (%p10510_p5), %s456_s13, 2048  }
  0xa3   : > { %8012 = vsyncadd (%p10510_p5), %s456_s13, 4294965248  ;;  %p10511_p10 = scmp.eq.s32.totalorder %s8152_s29, 0 }
  0xa5   : > { %8014 = dma.done.wait (%p10511_p10), [#allocation6], 4096   ;;  %p10512_p11 = pmov %p10511_p10 }
  0xa6   : > { %p10513_p1 = pmov %p10511_p10 }
  0xa7   : > { %8016 = vsyncadd (%p10512_p11), [#allocation6], 4294963200 }
  0xa8   : > { %8018 = dma.done.wait (%p10513_p1), [#allocation9], 4096   ;;  %p10514_p2 = pmov %p10513_p1 }
  0xa9   : > { %v521_v0 = vld [vmem:[%s8343_s23] sm:$0xff]  ;;  %v523_v1 = vld [vmem:[%s8343_s23 + $0x10] sm:$0xff]  ;;  %v522_v2 = vld [vmem:[%s8343_s23 + $0x8] sm:$0xff]  ;;  %vm8054_vm0 = vmmov 0   ;;  %vm1179_vm1 = vcmask 261120   ;;  %vm1556_vm2 = vcmask 130048  }
  0xaa   : > { %8020 = vsyncadd (%p10514_p2), [#allocation9], 4294963200  ;;  %539 = vadd.xlane.f32.xlu0 %v521_v0  ;;  %543 = vadd.xlane.f32.xlu1 %v523_v1  ;;  %v524_v3 = vld [vmem:[%s8343_s23 + $0x18] sm:$0xff]  ;;  %v525_v4 = vld [vmem:[%s8343_s23 + $0x20] sm:$0xff]  ;;  %s8055_s24 = smov 96   ;;  %s8056_s18 = smov 64  }
  0xab   : > { %v526_v5 = vld [vmem:[%s8343_s23 + $0x28] sm:$0xff]  ;;  %v8364_v6 = vld [vmem:[%s8343_s23 + $0x30] sm:$0xff]  ;;  %v8367_v7 = vld [vmem:[%s8343_s23 + $0x38] sm:$0xff]  ;;  %s8057_s10 = smov 32   ;;  %vm5149_vm3 = vcmask 523264   ;;  %vm5166_vm4 = vcmask 785408  }
  0xac   : > { %v8370_v8 = vld [vmem:[%s8343_s23 + $0x40] sm:$0xff]  ;;  %v8373_v9 = vld [vmem:[%s8343_s23 + $0x48] sm:$0xff]  ;;  %v8378_v10 = vld [vmem:[%s8343_s23 + $0x50] sm:$0xff]  ;;  %s10587_s22 = sld [smem:[#allocation45_spill]]  ;;  %s10588_s30 = sld [smem:[#allocation46_spill]] }
  0xad   : > { %v8381_v11 = vld [vmem:[%s8343_s23 + $0x58] sm:$0xff]  ;;  %v8386_v12 = vld [vmem:[%s8343_s23 + $0x60] sm:$0xff]  ;;  %v8389_v13 = vld [vmem:[%s8343_s23 + $0x68] sm:$0xff]  ;;  %s10339_s15 = scalar_lea.vmem [#allocation11], %s6404_s12  ;;  %s6553_s12 = sshll.u32 %s8152_s29, 11 }
  0xae   : > { %541 = vadd.xlane.f32.xlu0 %v522_v2  ;;  %545 = vadd.xlane.f32.xlu1 %v524_v3  ;;  %v8394_v14 = vld [vmem:[%s8343_s23 + $0x70] sm:$0xff]  ;;  %v8397_v15 = vld [vmem:[%s8343_s23 + $0x78] sm:$0xff]  ;;  %v7345_v17 = vld [vmem:[#allocation5] ss:$12 sps:$4 sm:$0xff]   ;;  %s6281_s19 = sshll.u32 %s10339_s15, 4  ;;  %s10593_s14 = sld [smem:[#allocation48_spill]]  ;;  %s10390_s19 = int_to_ptr.vmem [resolvable:$true] %s6281_s19 }
  0xaf   : > { %v7343_v16 = vld [vmem:[#allocation5 + $0x4] ss:$12 sps:$4 sm:$0xff]   ;;  %v7346_v18 = vld [vmem:[#allocation5 + $0x1c] ss:$12 sps:$4 sm:$0xff]   ;;  %s6267_s29 = scalar_lea.sflag [#allocation4], %s8337_s20  ;;  %s8058_s21 = smov [#allocation11]  }
  0xb0   : > { %v7348_v19 = vld [vmem:[#allocation5 + $0x8] ss:$12 sps:$4 sm:$0xff]   ;;  %945 = vmatprep.subr.bf16.mxu0 %v7343_v16  ;;  %v7349_v58 = vld [vmem:[#allocation5 + $0x18] ss:$12 sps:$4 sm:$0xff]   ;;  %s7969_s3 = sshll.u32 %s8058_s21, 4  ;;  %s7970_s3 = int_to_ptr.vmem [resolvable:$false] %s7969_s3 }
  0xb1   : > { %946 = vmatpush1.bf16.msra.mxu0 %v7345_v17  ;;  %6778 = vmatprep.subr.bf16.mxu1 %v7348_v19  ;;  %p7972_p3 = scmp.lt.s32.totalorder %s10390_s19, %s7970_s3 }
  0xb2   : > { %547 = vadd.xlane.f32.xlu0 %v525_v4  ;;  %549 = vadd.xlane.f32.xlu1 %v526_v5 }
  0xb3   : > { %947 = vmatprep.subr.bf16.mxu0 %v7346_v18  ;;  %6779 = vmatpush3.bf16.msra.mxu1 %v7348_v19  ;;  %v7354_v18 = vld [vmem:[#allocation5 + $0x4c] ss:$12 sps:$4 sm:$0xff]  }
  0xb4   : > { %v7356_v19 = vld [vmem:[#allocation5 + $0x38] ss:$12 sps:$4 sm:$0xff]   ;;  %s10388_s16 = scalar_lea.hbm %s10593_s14, %s6553_s12 }
  0xb5   : > { %948 = vmatpush1.bf16.msra.mxu0 %v7349_v58 }
  0xb6   : > { %551 = vadd.xlane.f32.xlu0 %v8364_v6  ;;  %553 = vadd.xlane.f32.xlu1 %v8367_v7 }
  0xba   : > { %555 = vadd.xlane.f32.xlu0 %v8370_v8  ;;  %557 = vadd.xlane.f32.xlu1 %v8373_v9 }
  0xbe   : > { %559 = vadd.xlane.f32.xlu0 %v8378_v10  ;;  %561 = vadd.xlane.f32.xlu1 %v8381_v11 }
  0xc2   : > { %563 = vadd.xlane.f32.xlu0 %v8386_v12  ;;  %565 = vadd.xlane.f32.xlu1 %v8389_v13 }
  0xc6   : > { %567 = vadd.xlane.f32.xlu0 %v8394_v14  ;;  %569 = vadd.xlane.f32.xlu1 %v8397_v15 }
 0x137   : > { %v540_v20 = vpop.xlane.xlu0 %539  ;;  %v544_v21 = vpop.xlane.xlu1 %543 }
 0x138   : > { %v572_v22 = vmul.f32 0.0078125, %v540_v20  ;;  %v574_v23 = vmul.f32 0.0078125, %v544_v21 }
 0x13a   : > { %v8403_v24 = vsub.f32 %v521_v0, %v572_v22  ;;  %v8405_v25 = vsub.f32 %v523_v1, %v574_v23  ;;  %v7350_v0 = vld [vmem:[#allocation5 + $0x34] ss:$12 sps:$4 sm:$0xff]  }
 0x13b   : > { %v542_v26 = vpop.xlane.xlu0 %541  ;;  %v546_v27 = vpop.xlane.xlu1 %545  ;;  %v7352_v1 = vld [vmem:[#allocation5 + $0x20] ss:$12 sps:$4 sm:$0xff]   ;;  %949 = vmatprep.subr.bf16.mxu0 %v7350_v0  ;;  %v7357_v22 = vld [vmem:[#allocation5 + $0x48] ss:$12 sps:$4 sm:$0xff]  }
 0x13c   : > { %v573_v28 = vmul.f32 0.0078125, %v542_v26  ;;  %v604_v29 = vmul.f32 %v8403_v24, %v8403_v24  ;;  %v575_v30 = vmul.f32 0.0078125, %v546_v27  ;;  %v606_v31 = vmul.f32 %v8405_v25, %v8405_v25  ;;  %6780 = vmatprep.subr.bf16.mxu1 %v7352_v1 }
 0x13d   : > { %6781 = vmatpush3.bf16.msra.mxu1 %v7352_v1 }
 0x13e   : > { %620 = vadd.xlane.f32.xlu0 %v604_v29  ;;  %v8411_v32 = vsub.f32 %v522_v2, %v573_v28  ;;  %v8413_v33 = vsub.f32 %v524_v3, %v575_v30  ;;  %6782 = vmatprep.subr.bf16.mxu1 %v7356_v19  ;;  %v7358_v29 = vld [vmem:[#allocation5 + $0x64] ss:$12 sps:$4 sm:$0xff]  }
 0x13f   : > { %v548_v34 = vpop.xlane.xlu0 %547  ;;  %v550_v35 = vpop.xlane.xlu1 %549  ;;  %v7360_v30 = vld [vmem:[#allocation5 + $0x50] ss:$12 sps:$4 sm:$0xff]  }
 0x140   : > { %v576_v36 = vmul.f32 0.0078125, %v548_v34  ;;  %v605_v37 = vmul.f32 %v8411_v32, %v8411_v32  ;;  %v577_v38 = vmul.f32 0.0078125, %v550_v35  ;;  %v607_v39 = vmul.f32 %v8413_v33, %v8413_v33 }
 0x141   : > { %6783 = vmatpush3.bf16.msra.mxu1 %v7356_v19 }
 0x142   : > { %624 = vadd.xlane.f32.xlu0 %v606_v31  ;;  %622 = vadd.xlane.f32.xlu1 %v605_v37  ;;  %v8419_v40 = vsub.f32 %v525_v4, %v576_v36  ;;  %v8421_v41 = vsub.f32 %v526_v5, %v577_v38  ;;  %v7361_v31 = vld [vmem:[#allocation5 + $0x60] ss:$12 sps:$4 sm:$0xff]   ;;  %v7364_v36 = vld [vmem:[#allocation5 + $0x68] ss:$12 sps:$4 sm:$0xff]   ;;  %v7365_v37 = vld [vmem:[#allocation5 + $0x78] ss:$12 sps:$4 sm:$0xff]  }
 0x143   : > { %v552_v42 = vpop.xlane.xlu0 %551  ;;  %v554_v43 = vpop.xlane.xlu1 %553  ;;  %6784 = vmatprep.subr.bf16.mxu1 %v7360_v30  ;;  %v7368_v38 = vld [vmem:[#allocation5 + $0x80] ss:$12 sps:$4 sm:$0xff]  }
 0x144   : > { %v578_v44 = vmul.f32 0.0078125, %v552_v42  ;;  %v608_v45 = vmul.f32 %v8419_v40, %v8419_v40  ;;  %v579_v46 = vmul.f32 0.0078125, %v554_v43  ;;  %v609_v47 = vmul.f32 %v8421_v41, %v8421_v41  ;;  %v7370_v42 = vld [vmem:[#allocation5 + $0xac] ss:$12 sps:$4 sm:$0xff]  }
 0x145   : > { %6785 = vmatpush3.bf16.msra.mxu1 %v7360_v30  ;;  %v7372_v43 = vld [vmem:[#allocation5 + $0x98] ss:$12 sps:$4 sm:$0xff]  }
 0x146   : > { %626 = vadd.xlane.f32.xlu1 %v607_v39  ;;  %628 = vadd.xlane.f32.xlu0 %v608_v45  ;;  %v8428_v48 = vsub.f32 %v8364_v6, %v578_v44  ;;  %v8431_v49 = vsub.f32 %v8367_v7, %v579_v46  ;;  %v7353_v7 = vld [vmem:[#allocation5 + $0x30] ss:$12 sps:$4 sm:$0xff]   ;;  %v7373_v44 = vld [vmem:[#allocation5 + $0xa8] ss:$12 sps:$4 sm:$0xff]   ;;  %v10460_v46 = vmov 0  }
 0x147   : > { %v556_v50 = vpop.xlane.xlu0 %555  ;;  %v558_v51 = vpop.xlane.xlu1 %557  ;;  %950 = vmatpush1.bf16.msra.mxu0 %v7353_v7  ;;  %6786 = vmatprep.subr.bf16.mxu1 %v7364_v36  ;;  %v7369_v39 = vld [vmem:[#allocation5 + $0x90] ss:$12 sps:$4 sm:$0xff]  }
 0x148   : > { %v580_v52 = vmul.f32 0.0078125, %v556_v50  ;;  %v610_v53 = vmul.f32 %v8428_v48, %v8428_v48  ;;  %v581_v54 = vmul.f32 0.0078125, %v558_v51  ;;  %v611_v55 = vmul.f32 %v8431_v49, %v8431_v49  ;;  %951 = vmatprep.subr.bf16.mxu0 %v7354_v18  ;;  %v7374_v45 = vld [vmem:[#allocation5 + $0xb0] ss:$12 sps:$4 sm:$0xff]   ;;  %977 = vmatprep.mubr.bf16.mxu0 %v10460_v46 }
 0x149   : > { %6787 = vmatpush3.bf16.msra.mxu1 %v7364_v36 }
 0x14a   : > { %630 = vadd.xlane.f32.xlu1 %v609_v47  ;;  %632 = vadd.xlane.f32.xlu0 %v610_v53  ;;  %v8438_v56 = vsub.f32 %v8370_v8, %v580_v52  ;;  %v8441_v57 = vsub.f32 %v8373_v9, %v581_v54 }
 0x14b   : > { %v560_v59 = vpop.xlane.xlu0 %559  ;;  %v562_v60 = vpop.xlane.xlu1 %561  ;;  %952 = vmatpush1.bf16.msra.mxu0 %v7357_v22  ;;  %6788 = vmatprep.subr.bf16.mxu1 %v7368_v38  ;;  %v8482_v22 = vld [vmem:[%s10437_s1] ss:$0 sm:$0xff] }
 0x14c   : > { %v582_v61 = vmul.f32 0.0078125, %v560_v59  ;;  %v612_v62 = vmul.f32 %v8438_v56, %v8438_v56  ;;  %v583_v63 = vmul.f32 0.0078125, %v562_v60  ;;  %v613_v2 = vmul.f32 %v8441_v57, %v8441_v57  ;;  %953 = vmatprep.subr.bf16.mxu0 %v7358_v29 }
 0x14d   : > { %6789 = vmatpush3.bf16.msra.mxu1 %v7368_v38 }
 0x14e   : > { %634 = vadd.xlane.f32.xlu1 %v611_v55  ;;  %636 = vadd.xlane.f32.xlu0 %v612_v62  ;;  %v8448_v3 = vsub.f32 %v8378_v10, %v582_v61  ;;  %v8451_v4 = vsub.f32 %v8381_v11, %v583_v63 }
 0x14f   : > { %v564_v5 = vpop.xlane.xlu0 %563  ;;  %v566_v6 = vpop.xlane.xlu1 %565  ;;  %954 = vmatpush1.bf16.msra.mxu0 %v7361_v31  ;;  %6790 = vmatprep.subr.bf16.mxu1 %v7372_v43 }
 0x150   : > { %v584_v8 = vmul.f32 0.0078125, %v564_v5  ;;  %v614_v9 = vmul.f32 %v8448_v3, %v8448_v3  ;;  %v585_v16 = vmul.f32 0.0078125, %v566_v6  ;;  %v615_v10 = vmul.f32 %v8451_v4, %v8451_v4 }
 0x151   : > { %6791 = vmatpush3.bf16.msra.mxu1 %v7372_v43 }
 0x152   : > { %638 = vadd.xlane.f32.xlu1 %v613_v2  ;;  %640 = vadd.xlane.f32.xlu0 %v614_v9  ;;  %v8458_v11 = vsub.f32 %v8386_v12, %v584_v8  ;;  %v8461_v17 = vsub.f32 %v8389_v13, %v585_v16 }
 0x153   : > { %v568_v20 = vpop.xlane.xlu0 %567  ;;  %v570_v21 = vpop.xlane.xlu1 %569  ;;  %6792 = vmatprep.subr.bf16.mxu1 %v7374_v45 }
 0x154   : > { %v586_v23 = vmul.f32 0.0078125, %v568_v20  ;;  %v616_v26 = vmul.f32 %v8458_v11, %v8458_v11  ;;  %v587_v27 = vmul.f32 0.0078125, %v570_v21  ;;  %v617_v12 = vmul.f32 %v8461_v17, %v8461_v17 }
 0x155   : > { %6793 = vmatpush3.bf16.msra.mxu1 %v7374_v45 }
 0x156   : > { %642 = vadd.xlane.f32.xlu1 %v615_v10  ;;  %644 = vadd.xlane.f32.xlu0 %v616_v26  ;;  %v8468_v13 = vsub.f32 %v8394_v14, %v586_v23  ;;  %v8471_v28 = vsub.f32 %v8397_v15, %v587_v27  ;;  %v7362_v14 = vld [vmem:[#allocation5 + $0x7c] ss:$12 sps:$4 sm:$0xff]   ;;  %v7366_v15 = vld [vmem:[#allocation5 + $0x94] ss:$12 sps:$4 sm:$0xff]  }
 0x157   : > { %955 = vmatprep.subr.bf16.mxu0 %v7362_v14  ;;  %v8489_v14 = vld [vmem:[%s10438_s2] ss:$0 sm:$0xff] }
 0x158   : > { %v618_v34 = vmul.f32 %v8468_v13, %v8468_v13  ;;  %v619_v35 = vmul.f32 %v8471_v28, %v8471_v28  ;;  %956 = vmatpush1.bf16.msra.mxu0 %v7365_v37 }
 0x159   : > { %957 = vmatprep.subr.bf16.mxu0 %v7366_v15 }
 0x15a   : > { %646 = vadd.xlane.f32.xlu1 %v617_v12  ;;  %648 = vadd.xlane.f32.xlu0 %v618_v34 }
 0x15c   : > { %958 = vmatpush1.bf16.msra.mxu0 %v7369_v39 }
 0x15d   : > { %959 = vmatprep.subr.bf16.mxu0 %v7370_v42 }
 0x15e   : > { %650 = vadd.xlane.f32.xlu1 %v619_v35 }
 0x160   : > { %960 = vmatpush1.bf16.msra.mxu0 %v7373_v44 }
 0x1cb   : > { %v621_v47 = vpop.xlane.xlu0 %620 }
 0x1cc   : > { %v652_v50 = vmul.f32 0.0078125, %v621_v47 }
 0x1ce   : > { %v668_v51 = vadd.f32 1e-05, %v652_v50 }
 0x1cf   : > { %v623_v52 = vpop.xlane.xlu1 %622  ;;  %v625_v53 = vpop.xlane.xlu0 %624 }
 0x1d0   : > { %7423 = vrsqrt.f32 %v668_v51  ;;  %v653_v54 = vmul.f32 0.0078125, %v623_v52  ;;  %v654_v55 = vmul.f32 0.0078125, %v625_v53 }
 0x1d2   : > { %v669_v58 = vadd.f32 1e-05, %v653_v54  ;;  %v670_v59 = vadd.f32 1e-05, %v654_v55 }
 0x1d3   : > { %v627_v60 = vpop.xlane.xlu1 %626  ;;  %v629_v61 = vpop.xlane.xlu0 %628 }
 0x1d4   : > { %7425 = vrsqrt.f32 %v669_v58  ;;  %v655_v62 = vmul.f32 0.0078125, %v627_v60  ;;  %v656_v63 = vmul.f32 0.0078125, %v629_v61 }
 0x1d5   : > { %7427 = vrsqrt.f32 %v670_v59 }
 0x1d6   : > { %v671_v0 = vadd.f32 1e-05, %v655_v62  ;;  %v672_v1 = vadd.f32 1e-05, %v656_v63 }
 0x1d7   : > { %v631_v2 = vpop.xlane.xlu1 %630  ;;  %v633_v5 = vpop.xlane.xlu0 %632 }
 0x1d8   : > { %7429 = vrsqrt.f32 %v671_v0  ;;  %v657_v6 = vmul.f32 0.0078125, %v631_v2  ;;  %v658_v7 = vmul.f32 0.0078125, %v633_v5 }
 0x1d9   : > { %7431 = vrsqrt.f32 %v672_v1 }
 0x1da   : > { %v7424_v8 = vpop.eup %7423  ;;  %v673_v9 = vadd.f32 1e-05, %v657_v6  ;;  %v674_v16 = vadd.f32 1e-05, %v658_v7 }
 0x1db   : > { %v635_v10 = vpop.xlane.xlu1 %634  ;;  %v637_v18 = vpop.xlane.xlu0 %636  ;;  %v700_v19 = vmul.f32 %v7424_v8, %v8403_v24 }
 0x1dc   : > { %7433 = vrsqrt.f32 %v673_v9  ;;  %v659_v20 = vmul.f32 0.0078125, %v635_v10  ;;  %v660_v21 = vmul.f32 0.0078125, %v637_v18 }
 0x1dd   : > { %7435 = vrsqrt.f32 %v674_v16  ;;  %v722_v34 = vmul.f32 %v8482_v22, %v700_v19 }
 0x1de   : > { %v7426_v23 = vpop.eup %7425  ;;  %v675_v26 = vadd.f32 1e-05, %v659_v20  ;;  %v676_v27 = vadd.f32 1e-05, %v660_v21 }
 0x1df   : > { %v7428_v12 = vpop.eup %7427  ;;  %v639_v29 = vpop.xlane.xlu1 %638  ;;  %v701_v31 = vmul.f32 %v7426_v23, %v8411_v32  ;;  %v744_v45 = vadd.f32 %v8489_v14, %v722_v34 }
 0x1e0   : > { %v641_v30 = vpop.xlane.xlu0 %640  ;;  %7437 = vrsqrt.f32 %v675_v26  ;;  %v661_v24 = vmul.f32 0.0078125, %v639_v29  ;;  %v702_v36 = vmul.f32 %v7428_v12, %v8405_v25 }
 0x1e1   : > { %v662_v35 = vmul.f32 0.0078125, %v641_v30  ;;  %7439 = vrsqrt.f32 %v676_v27  ;;  %v723_v37 = vmul.f32 %v8482_v22, %v701_v31 }
 0x1e2   : > { %v7430_v15 = vpop.eup %7429  ;;  %v677_v38 = vadd.f32 1e-05, %v661_v24  ;;  %v724_v32 = vmul.f32 %v8482_v22, %v702_v36 }
 0x1e3   : > { %v678_v39 = vadd.f32 1e-05, %v662_v35  ;;  %v7432_v42 = vpop.eup %7431  ;;  %v643_v43 = vpop.xlane.xlu1 %642  ;;  %v745_v47 = vadd.f32 %v8489_v14, %v723_v37  ;;  %v703_v50 = vmul.f32 %v7430_v15, %v8413_v33 }
 0x1e4   : > { %v645_v44 = vpop.xlane.xlu0 %644  ;;  %7441 = vrsqrt.f32 %v677_v38  ;;  %v663_v51 = vmul.f32 0.0078125, %v643_v43  ;;  %v704_v54 = vmul.f32 %v7432_v42, %v8419_v40  ;;  %v746_v60 = vadd.f32 %v8489_v14, %v724_v32 }
 0x1e5   : > { %v664_v25 = vmul.f32 0.0078125, %v645_v44  ;;  %7443 = vrsqrt.f32 %v678_v39  ;;  %v760_v52 = vpack.c.bf16 %v745_v47, %v744_v45  ;;  %v725_v53 = vmul.f32 %v8482_v22, %v703_v50 }
 0x1e6   : > { %v7434_v55 = vpop.eup %7433  ;;  %v679_v58 = vadd.f32 1e-05, %v663_v51  ;;  %v726_v1 = vmul.f32 %v8482_v22, %v704_v54 }
 0x1e7   : > { %v680_v59 = vadd.f32 1e-05, %v664_v25  ;;  %v7436_v61 = vpop.eup %7435  ;;  %v647_v62 = vpop.xlane.xlu1 %646  ;;  %978 = vmatmul.mubr.bf16.vlgmr.msra.gmra.mrb[0].mxu0 %v760_v52  ;;  %6794 = vmatprep.mubr.bf16.mxu1 %v760_v52  ;;  %v747_v33 = vadd.f32 %v8489_v14, %v725_v53  ;;  %v705_v0 = vmul.f32 %v7434_v55, %v8421_v41 }
 0x1e8   : > { %v649_v63 = vpop.xlane.xlu0 %648  ;;  %7445 = vrsqrt.f32 %v679_v58  ;;  %v665_v2 = vmul.f32 0.0078125, %v647_v62  ;;  %987 = vmatprep.mubr.bf16.mxu0 %v10460_v46  ;;  %v706_v40 = vmul.f32 %v7436_v61, %v8428_v48  ;;  %v748_v19 = vadd.f32 %v8489_v14, %v726_v1 }
 0x1e9   : > { %v666_v5 = vmul.f32 0.0078125, %v649_v63  ;;  %7447 = vrsqrt.f32 %v680_v59  ;;  %v761_v6 = vpack.c.bf16 %v747_v33, %v746_v60  ;;  %v727_v7 = vmul.f32 %v8482_v22, %v705_v0  ;;  %v800_v33 = vld [vmem:[%s10440_s4] sm:$0x7] }
 0x1ea   : > { %v7438_v8 = vpop.eup %7437  ;;  %v681_v9 = vadd.f32 1e-05, %v665_v2  ;;  %v728_v10 = vmul.f32 %v8482_v22, %v706_v40 }
 0x1eb   : > { %v682_v16 = vadd.f32 1e-05, %v666_v5  ;;  %v7440_v18 = vpop.eup %7439  ;;  %v651_v41 = vpop.xlane.xlu1 %650  ;;  %6795 = vmatmul.mubr.bf16.vlgmr.msra.gmra.mrb[0].mxu1 %v761_v6  ;;  %v749_v20 = vadd.f32 %v8489_v14, %v727_v7  ;;  %v707_v21 = vmul.f32 %v7438_v8, %v8431_v49 }
 0x1ec   : > { %7449 = vrsqrt.f32 %v681_v9  ;;  %v667_v48 = vmul.f32 0.0078125, %v651_v41  ;;  %v708_v23 = vmul.f32 %v7440_v18, %v8438_v56  ;;  %v750_v30 = vadd.f32 %v8489_v14, %v728_v10 }
 0x1ed   : > { %7451 = vrsqrt.f32 %v682_v16  ;;  %v762_v26 = vpack.c.bf16 %v749_v20, %v748_v19  ;;  %v729_v27 = vmul.f32 %v8482_v22, %v707_v21 }
 0x1ee   : > { %v7442_v12 = vpop.eup %7441  ;;  %v683_v29 = vadd.f32 1e-05, %v667_v48  ;;  %v730_v49 = vmul.f32 %v8482_v22, %v708_v23 }
 0x1ef   : > { %v7444_v31 = vpop.eup %7443  ;;  %988 = vmatmul.mubr.bf16.gmra.mrb[4].mxu0 %v761_v6  ;;  %6798 = vmatprep.mubr.bf16.mxu1 %v762_v26  ;;  %v751_v34 = vadd.f32 %v8489_v14, %v729_v27  ;;  %v709_v24 = vmul.f32 %v7442_v12, %v8441_v57 }
 0x1f0   : > { %7453 = vrsqrt.f32 %v683_v29  ;;  %997 = vmatprep.mubr.bf16.mxu0 %v10460_v46  ;;  %v710_v56 = vmul.f32 %v7444_v31, %v8448_v3  ;;  %v752_v39 = vadd.f32 %v8489_v14, %v730_v49 }
 0x1f1   : > { %v763_v35 = vpack.c.bf16 %v751_v34, %v750_v30  ;;  %v731_v36 = vmul.f32 %v8482_v22, %v709_v24 }
 0x1f2   : > { %v7446_v37 = vpop.eup %7445  ;;  %v732_v15 = vmul.f32 %v8482_v22, %v710_v56 }
 0x1f3   : > { %v7448_v38 = vpop.eup %7447  ;;  %6799 = vmatmul.mubr.bf16.gmra.mrb[4].mxu1 %v763_v35  ;;  %v753_v32 = vadd.f32 %v8489_v14, %v731_v36  ;;  %v711_v57 = vmul.f32 %v7446_v37, %v8451_v4 }
 0x1f4   : > { %v712_v42 = vmul.f32 %v7448_v38, %v8458_v11  ;;  %v754_v45 = vadd.f32 %v8489_v14, %v732_v15 }
 0x1f5   : > { %v764_v43 = vpack.c.bf16 %v753_v32, %v752_v39  ;;  %v733_v44 = vmul.f32 %v8482_v22, %v711_v57 }
 0x1f6   : > { %v7450_v3 = vpop.eup %7449  ;;  %v734_v25 = vmul.f32 %v8482_v22, %v712_v42 }
 0x1f7   : > { %v7452_v47 = vpop.eup %7451  ;;  %998 = vmatmul.mubr.bf16.gmra.mrb[8].mxu0 %v762_v26  ;;  %6802 = vmatprep.mubr.bf16.mxu1 %v764_v43  ;;  %v755_v50 = vadd.f32 %v8489_v14, %v733_v44  ;;  %v713_v51 = vmul.f32 %v7450_v3, %v8461_v17 }
 0x1f8   : > { %1007 = vmatprep.mubr.bf16.mxu0 %v10460_v46  ;;  %v714_v4 = vmul.f32 %v7452_v47, %v8468_v13  ;;  %v756_v54 = vadd.f32 %v8489_v14, %v734_v25 }
 0x1f9   : > { %v765_v11 = vpack.c.bf16 %v755_v50, %v754_v45  ;;  %v735_v52 = vmul.f32 %v8482_v22, %v713_v51 }
 0x1fa   : > { %v7454_v53 = vpop.eup %7453  ;;  %v736_v59 = vmul.f32 %v8482_v22, %v714_v4 }
 0x1fb   : > { %6803 = vmatmul.mubr.bf16.gmra.mrb[8].mxu1 %v765_v11  ;;  %v757_v55 = vadd.f32 %v8489_v14, %v735_v52  ;;  %v715_v58 = vmul.f32 %v7454_v53, %v8471_v28  ;;  %v10462_v28 = vmov 0.0  }
 0x1fc   : > { %v758_v13 = vadd.f32 %v8489_v14, %v736_v59  ;;  %6810 = vmatprep.subr.bf16.mxu1 %v10462_v28  ;;  %6834 = vmatprep.subr.bf16.mxu0 %v10462_v28 }
 0x1fd   : > { %v766_v17 = vpack.c.bf16 %v757_v55, %v756_v54  ;;  %v737_v60 = vmul.f32 %v8482_v22, %v715_v58  ;;  %v802_v22 = vlaneseq }
 0x1ff   : > { %1008 = vmatmul.mubr.bf16.gmra.mrb[12].mxu0 %v763_v35  ;;  %6806 = vmatprep.mubr.bf16.mxu1 %v766_v17  ;;  %v759_v61 = vadd.f32 %v8489_v14, %v737_v60  ;;  %v8549_v14 = vshrl.u32 %v802_v22, 7 }
 0x200   : > { %1017 = vmatprep.mubr.bf16.mxu0 %v10460_v46 }
 0x201   : > { %v767_v62 = vpack.c.bf16 %v759_v61, %v758_v13  ;;  %10515 = vst [vmem:[#allocation18_spill] sm:$0xff] %v8549_v14  ;;  %v10459_v63 = vsub.s32 0, %v8549_v14  ;;  %v10458_v0 = vsub.s32 1, %v8549_v14  ;;  %v812_v2 = vsub.s32 2, %v8549_v14 }
 0x203   : > { %6807 = vmatmul.mubr.bf16.gmra.mrb[12].mxu1 %v767_v62  ;;  %v8558_v1 = vrot.slane %v800_v33, %v10459_v63  ;;  %v8563_v40 = vrot.slane %v800_v33, %v10458_v0  ;;  %v8567_v10 = vrot.slane %v800_v33, %v812_v2 }
 0x204   : > { %6812 = vmatprep.mubr.msk.bf16.mxu1 %vm8054_vm0, %v10462_v28 }
 0x207   : > { %1018 = vmatmul.mubr.bf16.gmra.mrb[16].mxu0 %v764_v43 }
 0x208   : > { %1027 = vmatprep.mubr.bf16.mxu0 %v10460_v46 }
 0x20f   : > { %1028 = vmatmul.mubr.bf16.gmra.mrb[20].mxu0 %v765_v11 }
 0x210   : > { %1037 = vmatprep.mubr.bf16.mxu0 %v10460_v46 }
 0x217   : > { %1038 = vmatmul.mubr.bf16.gmra.mrb[24].mxu0 %v766_v17 }
 0x218   : > { %1047 = vmatprep.mubr.bf16.mxu0 %v10460_v46 }
 0x21f   : > { %1048 = vmatmul.mubr.bf16.gmra.mrb[28].mxu0 %v767_v62 }
 0x220   : > { %6836 = vmatprep.mubr.msk.bf16.mxu0 %vm8054_vm0, %v10462_v28 }
 0x2ba   : > { %v979_v5 = vpop.f32.mrb[0].mxu0 }
 0x2bb   : > { %v981_v6 = vpop.f32.mrb[1].mxu0  ;;  %v980_v8 = vadd.f32 %v979_v5, %v8558_v1 }
 0x2bc   : > { %v983_v7 = vpop.f32.mrb[2].mxu0  ;;  %v982_v18 = vadd.f32 %v981_v6, %v8563_v40 }
 0x2bd   : > { %v984_v9 = vadd.f32 %v983_v7, %v8558_v1  ;;  %v985_v16 = vpop.f32.mrb[3].mxu0 }
 0x2be   : > { %v986_v41 = vadd.f32 %v985_v16, %v8563_v40  ;;  %v6796_v19 = vpop.f32.mrb[0].mxu1 }
 0x2bf   : > { %v8571_v20 = vpack.c.bf16 %v984_v9, %v980_v8  ;;  %v1092_v21 = vpop.f32.mrb[1].mxu1  ;;  %v1101_v26 = vadd.f32 %v6796_v19, %v8567_v10 }
 0x2c0   : > { %v8573_v48 = vpack.c.bf16 %v986_v41, %v982_v18  ;;  %v6797_v23 = vpop.f32.mrb[2].mxu1  ;;  %v1093_v29 = vadd.f32 %v1092_v21, %v8567_v10 }
 0x2c1   : > { %v1104_v27 = vadd.f32 %v6797_v23, %v8567_v10  ;;  %v1095_v12 = vpop.f32.mrb[3].mxu1 }
 0x2c2   : > { %v1096_v30 = vadd.f32 %v1095_v12, %v8567_v10  ;;  %v989_v31 = vpop.f32.mrb[4].mxu0  ;;  %v1184_v34 = vsel %vm1179_vm1, %v8573_v48, 0 }
 0x2c3   : > { %v8581_v24 = vpack.c.bf16 %v1104_v27, %v1101_v26  ;;  %v991_v49 = vpop.f32.mrb[5].mxu0  ;;  %6811 = vmatpush3.bf16.xpose.msra.mxu1 %v1184_v34  ;;  %v990_v36 = vadd.f32 %v989_v31, %v8558_v1 }
 0x2c4   : > { %v8583_v56 = vpack.c.bf16 %v1096_v30, %v1093_v29  ;;  %v993_v35 = vpop.f32.mrb[6].mxu0  ;;  %6816 = vmatprep.subr.bf16.mxu1 %v10462_v28  ;;  %v992_v38 = vadd.f32 %v991_v49, %v8563_v40 }
 0x2c5   : > { %v994_v37 = vadd.f32 %v993_v35, %v8558_v1  ;;  %v995_v15 = vpop.f32.mrb[7].mxu0 }
 0x2c6   : > { %v996_v39 = vadd.f32 %v995_v15, %v8563_v40  ;;  %v6800_v32 = vpop.f32.mrb[4].mxu1 }
 0x2c7   : > { %v8590_v57 = vpack.c.bf16 %v994_v37, %v990_v36  ;;  %v1117_v42 = vadd.f32 %v6800_v32, %v8567_v10  ;;  %v1108_v43 = vpop.f32.mrb[5].mxu1 }
 0x2c8   : > { %v8593_v44 = vpack.c.bf16 %v996_v39, %v992_v38  ;;  %v1109_v3 = vadd.f32 %v1108_v43, %v8567_v10  ;;  %v6801_v45 = vpop.f32.mrb[6].mxu1 }
 0x2c9   : > { %v1120_v47 = vadd.f32 %v6801_v45, %v8567_v10  ;;  %v1111_v50 = vpop.f32.mrb[7].mxu1 }
 0x2ca   : > { %v1112_v51 = vadd.f32 %v1111_v50, %v8567_v10  ;;  %v999_v25 = vpop.f32.mrb[8].mxu0  ;;  %6813 = vmatmul.mubr.msk.bf16.vlgmr.msra.gmra.mrb[16].mxu1 %vm1179_vm1, %v8571_v20  ;;  %v1231_v4 = vsel %vm1179_vm1, %v8593_v44, 0 }
 0x2cb   : > { %v8602_v11 = vpack.c.bf16 %v1120_v47, %v1117_v42  ;;  %v1001_v52 = vpop.f32.mrb[9].mxu0  ;;  %6817 = vmatpush3.bf16.xpose.msra.mxu1 %v1231_v4  ;;  %6818 = vmatprep.mubr.msk.bf16.mxu1 %vm8054_vm0, %v10462_v28  ;;  %v1000_v55 = vadd.f32 %v999_v25, %v8558_v1 }
 0x2cc   : > { %v8606_v53 = vpack.c.bf16 %v1112_v51, %v1109_v3  ;;  %v1003_v54 = vpop.f32.mrb[10].mxu0  ;;  %6822 = vmatprep.subr.bf16.mxu1 %v10462_v28  ;;  %v1002_v17 = vadd.f32 %v1001_v52, %v8563_v40 }
 0x2cd   : > { %v1004_v58 = vadd.f32 %v1003_v54, %v8558_v1  ;;  %v1005_v59 = vpop.f32.mrb[11].mxu0 }
 0x2ce   : > { %v1006_v60 = vadd.f32 %v1005_v59, %v8563_v40  ;;  %v6804_v13 = vpop.f32.mrb[8].mxu1 }
 0x2cf   : > { %v8613_v61 = vpack.c.bf16 %v1004_v58, %v1000_v55  ;;  %v1133_v62 = vadd.f32 %v6804_v13, %v8567_v10  ;;  %v1124_v22 = vpop.f32.mrb[9].mxu1 }
 0x2d0   : > { %v8616_v33 = vpack.c.bf16 %v1006_v60, %v1002_v17  ;;  %v1125_v2 = vadd.f32 %v1124_v22, %v8567_v10  ;;  %v6805_v5 = vpop.f32.mrb[10].mxu1 }
 0x2d1   : > { %v1136_v6 = vadd.f32 %v6805_v5, %v8567_v10  ;;  %v1127_v7 = vpop.f32.mrb[11].mxu1 }
 0x2d2   : > { %v1128_v8 = vadd.f32 %v1127_v7, %v8567_v10  ;;  %v1009_v9 = vpop.f32.mrb[12].mxu0  ;;  %6819 = vmatmul.mubr.msk.bf16.vlgmr.msra.gmra.mrb[20].mxu1 %vm1179_vm1, %v8590_v57  ;;  %v1278_v16 = vsel %vm1179_vm1, %v8616_v33, 0 }
 0x2d3   : > { %v8625_v18 = vpack.c.bf16 %v1136_v6, %v1133_v62  ;;  %v1011_v41 = vpop.f32.mrb[13].mxu0  ;;  %6823 = vmatpush3.bf16.xpose.msra.mxu1 %v1278_v16  ;;  %6824 = vmatprep.mubr.msk.bf16.mxu1 %vm8054_vm0, %v10462_v28  ;;  %v1010_v23 = vadd.f32 %v1009_v9, %v8558_v1 }
 0x2d4   : > { %v8629_v19 = vpack.c.bf16 %v1128_v8, %v1125_v2  ;;  %v1013_v21 = vpop.f32.mrb[14].mxu0  ;;  %6828 = vmatprep.subr.bf16.mxu1 %v10462_v28  ;;  %v1012_v12 = vadd.f32 %v1011_v41, %v8563_v40 }
 0x2d5   : > { %v1014_v26 = vadd.f32 %v1013_v21, %v8558_v1  ;;  %v1015_v27 = vpop.f32.mrb[15].mxu0 }
 0x2d6   : > { %v1016_v29 = vadd.f32 %v1015_v27, %v8563_v40  ;;  %v6808_v30 = vpop.f32.mrb[12].mxu1 }
 0x2d7   : > { %v8636_v31 = vpack.c.bf16 %v1014_v26, %v1010_v23  ;;  %v1149_v34 = vadd.f32 %v6808_v30, %v8567_v10  ;;  %v1140_v49 = vpop.f32.mrb[13].mxu1 }
 0x2d8   : > { %v8639_v35 = vpack.c.bf16 %v1016_v29, %v1012_v12  ;;  %v1141_v36 = vadd.f32 %v1140_v49, %v8567_v10  ;;  %v6809_v37 = vpop.f32.mrb[14].mxu1 }
 0x2d9   : > { %v1152_v15 = vadd.f32 %v6809_v37, %v8567_v10  ;;  %v1143_v38 = vpop.f32.mrb[15].mxu1 }
 0x2da   : > { %v1144_v39 = vadd.f32 %v1143_v38, %v8567_v10  ;;  %v1019_v32 = vpop.f32.mrb[16].mxu0  ;;  %6825 = vmatmul.mubr.msk.bf16.vlgmr.msra.gmra.mrb[24].mxu1 %vm1179_vm1, %v8613_v61  ;;  %v1325_v42 = vsel %vm1179_vm1, %v8639_v35, 0 }
 0x2db   : > { %v8648_v43 = vpack.c.bf16 %v1152_v15, %v1149_v34  ;;  %v1021_v3 = vpop.f32.mrb[17].mxu0  ;;  %6829 = vmatpush3.bf16.xpose.msra.mxu1 %v1325_v42  ;;  %6830 = vmatprep.mubr.msk.bf16.mxu1 %vm8054_vm0, %v10462_v28  ;;  %v1020_v10 = vadd.f32 %v1019_v32, %v8558_v1 }
 0x2dc   : > { %v8652_v45 = vpack.c.bf16 %v1144_v39, %v1141_v36  ;;  %v1023_v47 = vpop.f32.mrb[18].mxu0  ;;  %6840 = vmatprep.subr.bf16.mxu1 %v10462_v28  ;;  %v1022_v25 = vadd.f32 %v1021_v3, %v8563_v40 }
 0x2dd   : > { %v1024_v50 = vadd.f32 %v1023_v47, %v8558_v1  ;;  %v1025_v51 = vpop.f32.mrb[19].mxu0 }
 0x2de   : > { %v1026_v4 = vadd.f32 %v1025_v51, %v8563_v40 }
 0x2df   : > { %v8659_v52 = vpack.c.bf16 %v1024_v50, %v1020_v10 }
 0x2e0   : > { %v8661_v54 = vpack.c.bf16 %v1026_v4, %v1022_v25 }
 0x2e2   : > { %v1029_v55 = vpop.f32.mrb[20].mxu0  ;;  %6831 = vmatmul.mubr.msk.bf16.vlgmr.msra.gmra.mrb[28].mxu1 %vm1179_vm1, %v8636_v31  ;;  %v1372_v58 = vsel %vm1179_vm1, %v8661_v54, 0 }
 0x2e3   : > { %v1031_v59 = vpop.f32.mrb[21].mxu0  ;;  %6835 = vmatpush3.bf16.xpose.msra.mxu0 %v1372_v58  ;;  %6842 = vmatprep.mubr.msk.bf16.mxu1 %vm8054_vm0, %v10462_v28  ;;  %v1030_v60 = vadd.f32 %v1029_v55, %v8558_v1 }
 0x2e4   : > { %v1033_v17 = vpop.f32.mrb[22].mxu0  ;;  %6846 = vmatprep.subr.bf16.mxu0 %v10462_v28  ;;  %v1032_v22 = vadd.f32 %v1031_v59, %v8563_v40 }
 0x2e5   : > { %v1034_v13 = vadd.f32 %v1033_v17, %v8558_v1  ;;  %v1035_v62 = vpop.f32.mrb[23].mxu0 }
 0x2e6   : > { %v1036_v2 = vadd.f32 %v1035_v62, %v8563_v40 }
 0x2e7   : > { %v8674_v5 = vpack.c.bf16 %v1034_v13, %v1030_v60 }
 0x2e8   : > { %v8676_v6 = vpack.c.bf16 %v1036_v2, %v1032_v22 }
 0x2ea   : > { %v1039_v7 = vpop.f32.mrb[24].mxu0  ;;  %6837 = vmatmul.mubr.msk.bf16.vlgmr.msra.gmra.mrb[32].mxu0 %vm1179_vm1, %v8659_v52  ;;  %v1419_v8 = vsel %vm1179_vm1, %v8676_v6, 0 }
 0x2eb   : > { %v1041_v9 = vpop.f32.mrb[25].mxu0  ;;  %6841 = vmatpush3.bf16.xpose.msra.mxu1 %v1419_v8  ;;  %6848 = vmatprep.mubr.msk.bf16.mxu0 %vm8054_vm0, %v10462_v28  ;;  %v1040_v41 = vadd.f32 %v1039_v7, %v8558_v1 }
 0x2ec   : > { %v1043_v16 = vpop.f32.mrb[26].mxu0  ;;  %6852 = vmatprep.subr.bf16.mxu1 %v10462_v28  ;;  %v1042_v26 = vadd.f32 %v1041_v9, %v8563_v40 }
 0x2ed   : > { %v1044_v21 = vadd.f32 %v1043_v16, %v8558_v1  ;;  %v1045_v23 = vpop.f32.mrb[27].mxu0 }
 0x2ee   : > { %v1046_v27 = vadd.f32 %v1045_v23, %v8563_v40 }
 0x2ef   : > { %v8689_v12 = vpack.c.bf16 %v1044_v21, %v1040_v41 }
 0x2f0   : > { %v8691_v29 = vpack.c.bf16 %v1046_v27, %v1042_v26 }
 0x2f2   : > { %v1049_v30 = vpop.f32.mrb[28].mxu0  ;;  %6843 = vmatmul.mubr.msk.bf16.vlgmr.msra.gmra.mrb[32].mxu1 %vm1179_vm1, %v8674_v5  ;;  %v1466_v34 = vsel %vm1179_vm1, %v8691_v29, 0 }
 0x2f3   : > { %v1051_v49 = vpop.f32.mrb[29].mxu0  ;;  %6847 = vmatpush3.bf16.xpose.msra.mxu0 %v1466_v34  ;;  %6854 = vmatprep.mubr.msk.bf16.mxu1 %vm8054_vm0, %v10462_v28  ;;  %v1050_v37 = vadd.f32 %v1049_v30, %v8558_v1 }
 0x2f4   : > { %v1053_v36 = vpop.f32.mrb[30].mxu0  ;;  %6858 = vmatprep.subr.bf16.mxu0 %v10462_v28  ;;  %v1052_v39 = vadd.f32 %v1051_v49, %v8563_v40 }
 0x2f5   : > { %v1054_v15 = vadd.f32 %v1053_v36, %v8558_v1  ;;  %v1055_v38 = vpop.f32.mrb[31].mxu0 }
 0x2f6   : > { %v1056_v32 = vadd.f32 %v1055_v38, %v8563_v40 }
 0x2f7   : > { %v8704_v42 = vpack.c.bf16 %v1054_v15, %v1050_v37 }
 0x2f8   : > { %v8706_v3 = vpack.c.bf16 %v1056_v32, %v1052_v39 }
 0x2fa   : > { %6849 = vmatmul.mubr.msk.bf16.vlgmr.msra.gmra.mrb[36].mxu0 %vm1179_vm1, %v8689_v12  ;;  %v1513_v47 = vsel %vm1179_vm1, %v8706_v3, 0 }
 0x2fb   : > { %6853 = vmatpush3.bf16.xpose.msra.mxu1 %v1513_v47  ;;  %6859 = vmatpush3.bf16.msra.mxu0 %v8583_v56 }
 0x2fc   : > { %6864 = vmatprep.subr.bf16.mxu1 %v10462_v28  ;;  %6860 = vmatprep.mubr.msk.bf16.mxu0 %vm8054_vm0, %v10462_v28 }
 0x2fd   : > { %6870 = vmatprep.subr.bf16.mxu0 %v10462_v28 }
 0x302   : > { %6855 = vmatmul.mubr.msk.bf16.vlgmr.msra.gmra.mrb[36].mxu1 %vm1179_vm1, %v8704_v42 }
 0x303   : > { %6865 = vmatpush3.bf16.msra.mxu1 %v8581_v24  ;;  %6866 = vmatprep.mubr.msk.bf16.mxu1 %vm8054_vm0, %v10462_v28 }
 0x304   : > { %6876 = vmatprep.subr.bf16.mxu1 %v10462_v28 }
 0x39d   : > { %v8723_v1 = vpop.f32.mrb[16].mxu1 }
 0x39e   : > { %v6814_v40 = vpop.f32.mrb[17].mxu1  ;;  %v1557_v10 = vsel %vm1556_vm2, %v8723_v1, -inf }
 0x39f   : > { %1558 = vmax.xlane.f32.xlu0 %v1557_v10  ;;  %v8727_v50 = vpop.f32.mrb[18].mxu1 }
 0x3a0   : > { %v6815_v51 = vpop.f32.mrb[19].mxu1  ;;  %v1560_v25 = vsel %vm1556_vm2, %v8727_v50, -inf }
 0x3a1   : > { %1561 = vmax.xlane.f32.xlu1 %v1560_v25 }
 0x3a5   : > { %v8731_v4 = vpop.f32.mrb[20].mxu1 }
 0x3a6   : > { %v6820_v55 = vpop.f32.mrb[21].mxu1  ;;  %v1563_v58 = vsel %vm1556_vm2, %v8731_v4, -inf }
 0x3a7   : > { %1564 = vmax.xlane.f32.xlu0 %v1563_v58  ;;  %v8735_v59 = vpop.f32.mrb[22].mxu1 }
 0x3a8   : > { %v6821_v17 = vpop.f32.mrb[23].mxu1  ;;  %v1566_v60 = vsel %vm1556_vm2, %v8735_v59, -inf }
 0x3a9   : > { %1567 = vmax.xlane.f32.xlu1 %v1566_v60 }
 0x3ad   : > { %v8739_v13 = vpop.f32.mrb[24].mxu1 }
 0x3ae   : > { %v6826_v62 = vpop.f32.mrb[25].mxu1  ;;  %v1569_v22 = vsel %vm1556_vm2, %v8739_v13, -inf }
 0x3af   : > { %1570 = vmax.xlane.f32.xlu0 %v1569_v22  ;;  %v8743_v2 = vpop.f32.mrb[26].mxu1 }
 0x3b0   : > { %v6827_v7 = vpop.f32.mrb[27].mxu1  ;;  %v1572_v8 = vsel %vm1556_vm2, %v8743_v2, -inf }
 0x3b1   : > { %1573 = vmax.xlane.f32.xlu1 %v1572_v8 }
 0x3b5   : > { %v8747_v9 = vpop.f32.mrb[28].mxu1 }
 0x3b6   : > { %v6832_v16 = vpop.f32.mrb[29].mxu1  ;;  %v1575_v41 = vsel %vm1556_vm2, %v8747_v9, -inf }
 0x3b7   : > { %1576 = vmax.xlane.f32.xlu0 %v1575_v41  ;;  %v8751_v21 = vpop.f32.mrb[30].mxu1 }
 0x3b8   : > { %v6833_v23 = vpop.f32.mrb[31].mxu1  ;;  %v1578_v26 = vsel %vm1556_vm2, %v8751_v21, -inf }
 0x3b9   : > { %1579 = vmax.xlane.f32.xlu1 %v1578_v26 }
 0x3bd   : > { %v8755_v27 = vpop.f32.mrb[32].mxu0 }
 0x3be   : > { %v6838_v30 = vpop.f32.mrb[33].mxu0  ;;  %v1581_v34 = vsel %vm1556_vm2, %v8755_v27, -inf }
 0x3bf   : > { %1582 = vmax.xlane.f32.xlu0 %v1581_v34  ;;  %v8759_v49 = vpop.f32.mrb[34].mxu0 }
 0x3c0   : > { %v6839_v36 = vpop.f32.mrb[35].mxu0  ;;  %v1584_v37 = vsel %vm1556_vm2, %v8759_v49, -inf }
 0x3c1   : > { %1585 = vmax.xlane.f32.xlu1 %v1584_v37 }
 0x3c5   : > { %v8763_v15 = vpop.f32.mrb[32].mxu1 }
 0x3c6   : > { %v6844_v38 = vpop.f32.mrb[33].mxu1  ;;  %v1587_v39 = vsel %vm1556_vm2, %v8763_v15, -inf }
 0x3c7   : > { %v8767_v32 = vpop.f32.mrb[34].mxu1  ;;  %1588 = vmax.xlane.f32.xlu0 %v1587_v39 }
 0x3c8   : > { %v6845_v47 = vpop.f32.mrb[35].mxu1  ;;  %v1590_v40 = vsel %vm1556_vm2, %v8767_v32, -inf }
 0x3c9   : > { %1591 = vmax.xlane.f32.xlu1 %v1590_v40 }
 0x3cd   : > { %v8771_v10 = vpop.f32.mrb[36].mxu0 }
 0x3ce   : > { %v6850_v51 = vpop.f32.mrb[37].mxu0  ;;  %v1593_v25 = vsel %vm1556_vm2, %v8771_v10, -inf }
 0x3cf   : > { %1594 = vmax.xlane.f32.xlu0 %v1593_v25  ;;  %v8775_v55 = vpop.f32.mrb[38].mxu0 }
 0x3d0   : > { %v6851_v58 = vpop.f32.mrb[39].mxu0  ;;  %v1596_v17 = vsel %vm1556_vm2, %v8775_v55, -inf }
 0x3d1   : > { %1597 = vmax.xlane.f32.xlu1 %v1596_v17 }
 0x3d5   : > { %v8779_v60 = vpop.f32.mrb[36].mxu1 }
 0x3d6   : > { %v6856_v62 = vpop.f32.mrb[37].mxu1  ;;  %v1599_v22 = vsel %vm1556_vm2, %v8779_v60, -inf }
 0x3d7   : > { %1600 = vmax.xlane.f32.xlu0 %v1599_v22  ;;  %v8783_v7 = vpop.f32.mrb[38].mxu1 }
 0x3d8   : > { %v6857_v8 = vpop.f32.mrb[39].mxu1  ;;  %v1602_v16 = vsel %vm1556_vm2, %v8783_v7, -inf }
 0x3d9   : > { %1603 = vmax.xlane.f32.xlu1 %v1602_v16 }
 0x42c   : > { %v1559_v41 = vpop.xlane.xlu0 %1558 }
 0x42d   : > { %v1605_v23 = vsub.f32 %v8723_v1, %v1559_v41 }
 0x42e   : > { %v1562_v26 = vpop.xlane.xlu1 %1561 }
 0x42f   : > { %v1621_v30 = vmul.f32 1.442695, %v1605_v23  ;;  %v1606_v34 = vsub.f32 %v8727_v50, %v1562_v26 }
 0x431   : > { %7455 = vpow2.f32 %v1621_v30  ;;  %v1623_v36 = vmul.f32 1.442695, %v1606_v34 }
 0x433   : > { %7457 = vpow2.f32 %v1623_v36 }
 0x434   : > { %v1565_v37 = vpop.xlane.xlu0 %1564 }
 0x435   : > { %v1607_v38 = vsub.f32 %v8731_v4, %v1565_v37 }
 0x436   : > { %v1568_v39 = vpop.xlane.xlu1 %1567 }
 0x437   : > { %v1625_v47 = vmul.f32 1.442695, %v1607_v38  ;;  %v1608_v40 = vsub.f32 %v8735_v59, %v1568_v39 }
 0x439   : > { %7459 = vpow2.f32 %v1625_v47  ;;  %v1627_v51 = vmul.f32 1.442695, %v1608_v40 }
 0x43b   : > { %v8791_v25 = vpop.eup %7455  ;;  %7461 = vpow2.f32 %v1627_v51 }
 0x43c   : > { %v1571_v1 = vpop.xlane.xlu0 %1570  ;;  %v1653_v58 = vsel %vm1556_vm2, %v8791_v25, 0.0 }
 0x43d   : > { %v8795_v50 = vpop.eup %7457  ;;  %v1609_v17 = vsub.f32 %v8739_v13, %v1571_v1  ;;  %1654 = vadd.xlane.f32.xlu0 %v1653_v58 }
 0x43e   : > { %v1574_v62 = vpop.xlane.xlu1 %1573  ;;  %v1656_v4 = vsel %vm1556_vm2, %v8795_v50, 0.0 }
 0x43f   : > { %v1629_v22 = vmul.f32 1.442695, %v1609_v17  ;;  %v1610_v59 = vsub.f32 %v8743_v2, %v1574_v62  ;;  %1657 = vadd.xlane.f32.xlu1 %v1656_v4 }
 0x441   : > { %7463 = vpow2.f32 %v1629_v22  ;;  %v1631_v8 = vmul.f32 1.442695, %v1610_v59 }
 0x443   : > { %v8801_v16 = vpop.eup %7459  ;;  %7465 = vpow2.f32 %v1631_v8 }
 0x444   : > { %v1577_v41 = vpop.xlane.xlu0 %1576  ;;  %v1659_v23 = vsel %vm1556_vm2, %v8801_v16, 0.0 }
 0x445   : > { %v8805_v26 = vpop.eup %7461  ;;  %v1611_v13 = vsub.f32 %v8747_v9, %v1577_v41  ;;  %1660 = vadd.xlane.f32.xlu0 %v1659_v23 }
 0x446   : > { %v1580_v30 = vpop.xlane.xlu1 %1579  ;;  %v1662_v34 = vsel %vm1556_vm2, %v8805_v26, 0.0 }
 0x447   : > { %v1633_v2 = vmul.f32 1.442695, %v1611_v13  ;;  %v1612_v36 = vsub.f32 %v8751_v21, %v1580_v30  ;;  %1663 = vadd.xlane.f32.xlu1 %v1662_v34 }
 0x449   : > { %7467 = vpow2.f32 %v1633_v2  ;;  %v1635_v37 = vmul.f32 1.442695, %v1612_v36 }
 0x44b   : > { %v8811_v38 = vpop.eup %7463  ;;  %7469 = vpow2.f32 %v1635_v37 }
 0x44c   : > { %v1583_v39 = vpop.xlane.xlu0 %1582  ;;  %v1665_v47 = vsel %vm1556_vm2, %v8811_v38, 0.0 }
 0x44d   : > { %v8815_v40 = vpop.eup %7465  ;;  %v1613_v9 = vsub.f32 %v8755_v27, %v1583_v39  ;;  %1666 = vadd.xlane.f32.xlu0 %v1665_v47 }
 0x44e   : > { %v1586_v51 = vpop.xlane.xlu1 %1585  ;;  %v1668_v1 = vsel %vm1556_vm2, %v8815_v40, 0.0 }
 0x44f   : > { %v1637_v21 = vmul.f32 1.442695, %v1613_v9  ;;  %v1614_v58 = vsub.f32 %v8759_v49, %v1586_v51  ;;  %1669 = vadd.xlane.f32.xlu1 %v1668_v1 }
 0x451   : > { %7471 = vpow2.f32 %v1637_v21  ;;  %v1639_v17 = vmul.f32 1.442695, %v1614_v58 }
 0x453   : > { %v8821_v62 = vpop.eup %7467  ;;  %7473 = vpow2.f32 %v1639_v17 }
 0x454   : > { %v1589_v4 = vpop.xlane.xlu0 %1588  ;;  %v1671_v22 = vsel %vm1556_vm2, %v8821_v62, 0.0 }
 0x455   : > { %v8825_v59 = vpop.eup %7469  ;;  %v1615_v27 = vsub.f32 %v8763_v15, %v1589_v4  ;;  %1672 = vadd.xlane.f32.xlu0 %v1671_v22 }
 0x456   : > { %v1592_v8 = vpop.xlane.xlu1 %1591  ;;  %v1674_v41 = vsel %vm1556_vm2, %v8825_v59, 0.0 }
 0x457   : > { %v1641_v49 = vmul.f32 1.442695, %v1615_v27  ;;  %v1616_v23 = vsub.f32 %v8767_v32, %v1592_v8  ;;  %1675 = vadd.xlane.f32.xlu1 %v1674_v41 }
 0x459   : > { %7475 = vpow2.f32 %v1641_v49  ;;  %v1643_v13 = vmul.f32 1.442695, %v1616_v23 }
 0x45b   : > { %v8831_v30 = vpop.eup %7471  ;;  %7477 = vpow2.f32 %v1643_v13 }
 0x45c   : > { %v1595_v34 = vpop.xlane.xlu0 %1594  ;;  %v1677_v2 = vsel %vm1556_vm2, %v8831_v30, 0.0 }
 0x45d   : > { %v8835_v36 = vpop.eup %7473  ;;  %v1617_v15 = vsub.f32 %v8771_v10, %v1595_v34  ;;  %1678 = vadd.xlane.f32.xlu0 %v1677_v2 }
 0x45e   : > { %v1598_v37 = vpop.xlane.xlu1 %1597  ;;  %v1680_v39 = vsel %vm1556_vm2, %v8835_v36, 0.0 }
 0x45f   : > { %v1645_v32 = vmul.f32 1.442695, %v1617_v15  ;;  %v1618_v47 = vsub.f32 %v8775_v55, %v1598_v37  ;;  %1681 = vadd.xlane.f32.xlu1 %v1680_v39 }
 0x461   : > { %7479 = vpow2.f32 %v1645_v32  ;;  %v1647_v9 = vmul.f32 1.442695, %v1618_v47 }
 0x463   : > { %v8841_v51 = vpop.eup %7475  ;;  %7481 = vpow2.f32 %v1647_v9 }
 0x464   : > { %v1601_v1 = vpop.xlane.xlu0 %1600  ;;  %v1683_v21 = vsel %vm1556_vm2, %v8841_v51, 0.0 }
 0x465   : > { %v8845_v58 = vpop.eup %7477  ;;  %v1619_v10 = vsub.f32 %v8779_v60, %v1601_v1  ;;  %1684 = vadd.xlane.f32.xlu0 %v1683_v21 }
 0x466   : > { %v1686_v17 = vsel %vm1556_vm2, %v8845_v58, 0.0  ;;  %v1604_v49 = vpop.xlane.xlu1 %1603 }
 0x467   : > { %v1649_v4 = vmul.f32 1.442695, %v1619_v10  ;;  %1687 = vadd.xlane.f32.xlu1 %v1686_v17  ;;  %v1620_v23 = vsub.f32 %v8783_v7, %v1604_v49 }
 0x469   : > { %7483 = vpow2.f32 %v1649_v4  ;;  %v1651_v13 = vmul.f32 1.442695, %v1620_v23 }
 0x46b   : > { %v8850_v55 = vpop.eup %7479  ;;  %7485 = vpow2.f32 %v1651_v13 }
 0x46c   : > { %v1689_v22 = vsel %vm1556_vm2, %v8850_v55, 0.0 }
 0x46d   : > { %v8854_v27 = vpop.eup %7481  ;;  %1690 = vadd.xlane.f32.xlu0 %v1689_v22 }
 0x46e   : > { %v1692_v8 = vsel %vm1556_vm2, %v8854_v27, 0.0 }
 0x46f   : > { %1693 = vadd.xlane.f32.xlu1 %v1692_v8 }
 0x473   : > { %v8858_v60 = vpop.eup %7483 }
 0x474   : > { %v1695_v41 = vsel %vm1556_vm2, %v8858_v60, 0.0 }
 0x475   : > { %1696 = vadd.xlane.f32.xlu0 %v1695_v41  ;;  %v8881_v34 = vpop.eup %7485 }
 0x476   : > { %v1698_v7 = vsel %vm1556_vm2, %v8881_v34, 0.0 }
 0x480   : > { %2158 = vrot.lane.b32.xlu1 %v8593_v44, %s8055_s24 }
 0x484   : > { %2102 = vrot.lane.b32.xlu1 %v8571_v20, %s8055_s24 }
 0x48b   : > { %2105 = vrot.lane.b32.xlu0 %v8573_v48, %s8055_s24 }
 0x48f   : > { %2155 = vrot.lane.b32.xlu0 %v8590_v57, %s8055_s24 }
 0x493   : > { %2208 = vrot.lane.b32.xlu0 %v8613_v61, %s8055_s24 }
 0x497   : > { %2261 = vrot.lane.b32.xlu0 %v8636_v31, %s8055_s24 }
 0x49b   : > { %2314 = vrot.lane.b32.xlu0 %v8659_v52, %s8055_s24 }
 0x49f   : > { %2367 = vrot.lane.b32.xlu0 %v8674_v5, %s8055_s24 }
 0x4a3   : > { %2420 = vrot.lane.b32.xlu0 %v8689_v12, %s8055_s24 }
 0x4a8   : > { %1699 = vadd.xlane.f32.xlu1 %v1698_v7 }
 0x4b9   : > { %2211 = vrot.lane.b32.xlu1 %v8616_v33, %s8055_s24 }
 0x4bd   : > { %2264 = vrot.lane.b32.xlu1 %v8639_v35, %s8055_s24 }
 0x4c1   : > { %2317 = vrot.lane.b32.xlu1 %v8661_v54, %s8055_s24 }
 0x4c5   : > { %2370 = vrot.lane.b32.xlu1 %v8676_v6, %s8055_s24 }
 0x4c9   : > { %2423 = vrot.lane.b32.xlu1 %v8691_v29, %s8055_s24 }
 0x4ca   : > { %v1655_v2 = vpop.xlane.xlu0 %1654 }
 0x4cb   : > { %7487 = vrcp.f32 %v1655_v2 }
 0x4cc   : > { %v1658_v15 = vpop.xlane.xlu1 %1657 }
 0x4cd   : > { %7489 = vrcp.f32 %v1658_v15  ;;  %2476 = vrot.lane.b32.xlu1 %v8706_v3, %s8055_s24 }
 0x4d1   : > { %2473 = vrot.lane.b32.xlu1 %v8704_v42, %s8055_s24 }
 0x4d2   : > { %v1661_v37 = vpop.xlane.xlu0 %1660 }
 0x4d3   : > { %7491 = vrcp.f32 %v1661_v37 }
 0x4d4   : > { %v1664_v39 = vpop.xlane.xlu1 %1663 }
 0x4d5   : > { %v7488_v32 = vpop.eup %7487  ;;  %7493 = vrcp.f32 %v1664_v39 }
 0x4d6   : > { %v1717_v9 = vmul.f32 %v7488_v32, %v8791_v25 }
 0x4d7   : > { %v7490_v47 = vpop.eup %7489 }
 0x4d8   : > { %v1718_v1 = vmul.f32 %v7490_v47, %v8795_v50 }
 0x4da   : > { %v1667_v21 = vpop.xlane.xlu0 %1666  ;;  %v1733_v10 = vpack.c.bf16 %v1718_v1, %v1717_v9 }
 0x4db   : > { %7495 = vrcp.f32 %v1667_v21 }
 0x4dc   : > { %6861 = vmatmul.mubr.msk.bf16.vlgmr.msra.gmra.mrb[40].mxu0 %vm1556_vm2, %v1733_v10  ;;  %v1670_v17 = vpop.xlane.xlu1 %1669 }
 0x4dd   : > { %v7492_v4 = vpop.eup %7491  ;;  %6871 = vmatpush3.bf16.msra.mxu0 %v8606_v53  ;;  %7497 = vrcp.f32 %v1670_v17  ;;  %6872 = vmatprep.mubr.msk.bf16.mxu0 %vm8054_vm0, %v10462_v28 }
 0x4de   : > { %6882 = vmatprep.subr.bf16.mxu0 %v10462_v28  ;;  %v1719_v25 = vmul.f32 %v7492_v4, %v8801_v16 }
 0x4df   : > { %v7494_v22 = vpop.eup %7493 }
 0x4e0   : > { %v1720_v50 = vmul.f32 %v7494_v22, %v8805_v26 }
 0x4e2   : > { %v1673_v8 = vpop.xlane.xlu0 %1672  ;;  %v1734_v41 = vpack.c.bf16 %v1720_v50, %v1719_v25 }
 0x4e3   : > { %7499 = vrcp.f32 %v1673_v8 }
 0x4e4   : > { %6867 = vmatmul.mubr.msk.bf16.vlgmr.msra.gmra.mrb[40].mxu1 %vm1556_vm2, %v1734_v41  ;;  %v1676_v49 = vpop.xlane.xlu1 %1675 }
 0x4e5   : > { %v7496_v23 = vpop.eup %7495  ;;  %6877 = vmatpush3.bf16.msra.mxu1 %v8602_v11  ;;  %7501 = vrcp.f32 %v1676_v49  ;;  %6878 = vmatprep.mubr.msk.bf16.mxu1 %vm8054_vm0, %v10462_v28 }
 0x4e6   : > { %6888 = vmatprep.subr.bf16.mxu1 %v10462_v28  ;;  %v1721_v16 = vmul.f32 %v7496_v23, %v8811_v38 }
 0x4e7   : > { %v7498_v13 = vpop.eup %7497 }
 0x4e8   : > { %v1722_v26 = vmul.f32 %v7498_v13, %v8815_v40 }
 0x4ea   : > { %v1679_v7 = vpop.xlane.xlu0 %1678  ;;  %v1735_v2 = vpack.c.bf16 %v1722_v26, %v1721_v16 }
 0x4eb   : > { %7503 = vrcp.f32 %v1679_v7 }
 0x4ec   : > { %6873 = vmatmul.mubr.msk.bf16.vlgmr.msra.gmra.mrb[44].mxu0 %vm1556_vm2, %v1735_v2  ;;  %v1682_v15 = vpop.xlane.xlu1 %1681 }
 0x4ed   : > { %v7500_v37 = vpop.eup %7499  ;;  %6883 = vmatpush3.bf16.msra.mxu0 %v8629_v19  ;;  %7505 = vrcp.f32 %v1682_v15  ;;  %6884 = vmatprep.mubr.msk.bf16.mxu0 %vm8054_vm0, %v10462_v28 }
 0x4ee   : > { %6894 = vmatprep.subr.bf16.mxu0 %v10462_v28  ;;  %v1723_v38 = vmul.f32 %v7500_v37, %v8821_v62 }
 0x4ef   : > { %v7502_v39 = vpop.eup %7501 }
 0x4f0   : > { %v1724_v40 = vmul.f32 %v7502_v39, %v8825_v59 }
 0x4f2   : > { %v1685_v32 = vpop.xlane.xlu0 %1684  ;;  %v1736_v47 = vpack.c.bf16 %v1724_v40, %v1723_v38 }
 0x4f3   : > { %7507 = vrcp.f32 %v1685_v32 }
 0x4f4   : > { %6879 = vmatmul.mubr.msk.bf16.vlgmr.msra.gmra.mrb[44].mxu1 %vm1556_vm2, %v1736_v47  ;;  %v1688_v9 = vpop.xlane.xlu1 %1687 }
 0x4f5   : > { %v7504_v1 = vpop.eup %7503  ;;  %6889 = vmatpush3.bf16.msra.mxu1 %v8625_v18  ;;  %7509 = vrcp.f32 %v1688_v9  ;;  %6890 = vmatprep.mubr.msk.bf16.mxu1 %vm8054_vm0, %v10462_v28 }
 0x4f6   : > { %6900 = vmatprep.subr.bf16.mxu1 %v10462_v28  ;;  %v1725_v62 = vmul.f32 %v7504_v1, %v8831_v30 }
 0x4f7   : > { %v7506_v21 = vpop.eup %7505 }
 0x4f8   : > { %v1726_v59 = vmul.f32 %v7506_v21, %v8835_v36 }
 0x4fa   : > { %v1691_v10 = vpop.xlane.xlu0 %1690  ;;  %v1737_v17 = vpack.c.bf16 %v1726_v59, %v1725_v62 }
 0x4fb   : > { %7511 = vrcp.f32 %v1691_v10 }
 0x4fc   : > { %6885 = vmatmul.mubr.msk.bf16.vlgmr.msra.gmra.mrb[48].mxu0 %vm1556_vm2, %v1737_v17  ;;  %v1694_v4 = vpop.xlane.xlu1 %1693 }
 0x4fd   : > { %v7508_v22 = vpop.eup %7507  ;;  %6895 = vmatpush3.bf16.msra.mxu0 %v8652_v45  ;;  %7513 = vrcp.f32 %v1694_v4  ;;  %6896 = vmatprep.mubr.msk.bf16.mxu0 %vm8054_vm0, %v10462_v28 }
 0x4fe   : > { %6906 = vmatprep.subr.bf16.mxu0 %v10462_v28  ;;  %v1727_v30 = vmul.f32 %v7508_v22, %v8841_v51 }
 0x4ff   : > { %v7510_v25 = vpop.eup %7509 }
 0x500   : > { %v1728_v36 = vmul.f32 %v7510_v25, %v8845_v58  ;;  %v2159_v26 = vpop.permute.xlu1 %2158 }
 0x501   : > { %v2164_v59 = vsel %vm1179_vm1, %v2159_v26, 0 }
 0x502   : > { %v1738_v50 = vpack.c.bf16 %v1728_v36, %v1727_v30  ;;  %v1697_v8 = vpop.xlane.xlu0 %1696 }
 0x503   : > { %7515 = vrcp.f32 %v1697_v8 }
 0x504   : > { %6891 = vmatmul.mubr.msk.bf16.vlgmr.msra.gmra.mrb[48].mxu1 %vm1556_vm2, %v1738_v50  ;;  %v2103_v7 = vpop.permute.xlu1 %2102 }
 0x505   : > { %v7512_v41 = vpop.eup %7511  ;;  %6901 = vmatpush3.bf16.msra.mxu1 %v8648_v43  ;;  %6902 = vmatprep.mubr.msk.bf16.mxu1 %vm8054_vm0, %v10462_v28 }
 0x506   : > { %6912 = vmatprep.subr.bf16.mxu1 %v10462_v28  ;;  %v1729_v23 = vmul.f32 %v7512_v41, %v8850_v55  ;;  %v2106_v51 = vpop.permute.xlu0 %2105 }
 0x507   : > { %v7514_v49 = vpop.eup %7513  ;;  %v2111_v58 = vsel %vm1179_vm1, %v2106_v51, 0 }
 0x508   : > { %v1730_v13 = vmul.f32 %v7514_v49, %v8854_v27 }
 0x50a   : > { %v1739_v16 = vpack.c.bf16 %v1730_v13, %v1729_v23  ;;  %v2156_v55 = vpop.permute.xlu0 %2155 }
 0x50c   : > { %6897 = vmatmul.mubr.msk.bf16.vlgmr.msra.gmra.mrb[52].mxu0 %vm1556_vm2, %v1739_v16 }
 0x50d   : > { %6907 = vmatpush3.bf16.xpose.msra.mxu0 %v2111_v58  ;;  %6908 = vmatprep.mubr.msk.bf16.mxu0 %vm8054_vm0, %v10462_v28  ;;  %v7516_v38 = vpop.eup %7515 }
 0x50e   : > { %6918 = vmatprep.subr.bf16.mxu0 %v10462_v28  ;;  %v2209_v2 = vpop.permute.xlu0 %2208  ;;  %v1731_v47 = vmul.f32 %v7516_v38, %v8858_v60 }
 0x512   : > { %v2262_v40 = vpop.permute.xlu0 %2261 }
 0x514   : > { %6909 = vmatmul.mubr.msk.bf16.vlgmr.msra.gmra.mrb[56].mxu0 %vm1179_vm1, %v2103_v7 }
 0x515   : > { %6920 = vmatprep.mubr.msk.bf16.mxu0 %vm8054_vm0, %v10462_v28 }
 0x516   : > { %v2315_v10 = vpop.permute.xlu0 %2314 }
 0x51a   : > { %v2368_v4 = vpop.permute.xlu0 %2367 }
 0x51e   : > { %v2421_v25 = vpop.permute.xlu0 %2420 }
 0x535   : > { %v1700_v27 = vpop.xlane.xlu1 %1699 }
 0x536   : > { %7517 = vrcp.f32 %v1700_v27 }
 0x539   : > { %v2212_v15 = vpop.permute.xlu1 %2211 }
 0x53a   : > { %v2217_v37 = vsel %vm1179_vm1, %v2212_v15, 0 }
 0x53b   : > { %6919 = vmatpush3.bf16.xpose.msra.mxu0 %v2217_v37 }
 0x53c   : > { %6930 = vmatprep.subr.bf16.mxu0 %v10462_v28 }
 0x53d   : > { %v2265_v39 = vpop.permute.xlu1 %2264 }
 0x53e   : > { %v2270_v22 = vsel %vm1179_vm1, %v2265_v39, 0 }
 0x540   : > { %v7518_v32 = vpop.eup %7517 }
 0x541   : > { %v1732_v9 = vmul.f32 %v7518_v32, %v8881_v34  ;;  %v2318_v1 = vpop.permute.xlu1 %2317 }
 0x542   : > { %v2323_v21 = vsel %vm1179_vm1, %v2318_v1, 0  ;;  %6921 = vmatmul.mubr.msk.bf16.vlgmr.msra.gmra.mrb[60].mxu0 %vm1179_vm1, %v2209_v2 }
 0x543   : > { %6931 = vmatpush3.bf16.xpose.msra.mxu0 %v2323_v21  ;;  %v1740_v62 = vpack.c.bf16 %v1732_v9, %v1731_v47  ;;  %6932 = vmatprep.mubr.msk.bf16.mxu0 %vm8054_vm0, %v10462_v28 }
 0x544   : > { %6942 = vmatprep.subr.bf16.mxu0 %v10462_v28 }
 0x545   : > { %6903 = vmatmul.mubr.msk.bf16.vlgmr.msra.gmra.mrb[52].mxu1 %vm1556_vm2, %v1740_v62  ;;  %v2371_v60 = vpop.permute.xlu1 %2370 }
 0x546   : > { %6913 = vmatpush3.bf16.xpose.msra.mxu1 %v2164_v59  ;;  %6914 = vmatprep.mubr.msk.bf16.mxu1 %vm8054_vm0, %v10462_v28  ;;  %v2376_v30 = vsel %vm1179_vm1, %v2371_v60, 0 }
 0x547   : > { %6924 = vmatprep.subr.bf16.mxu1 %v10462_v28 }
 0x549   : > { %v2424_v34 = vpop.permute.xlu1 %2423 }
 0x54a   : > { %v2429_v17 = vsel %vm1179_vm1, %v2424_v34, 0  ;;  %6933 = vmatmul.mubr.msk.bf16.vlgmr.msra.gmra.mrb[64].mxu0 %vm1179_vm1, %v2315_v10 }
 0x54b   : > { %6943 = vmatpush3.bf16.xpose.msra.mxu0 %v2429_v17  ;;  %6944 = vmatprep.mubr.msk.bf16.mxu0 %vm8054_vm0, %v10462_v28 }
 0x54c   : > { %6954 = vmatprep.subr.bf16.mxu0 %v10462_v28 }
 0x54d   : > { %6915 = vmatmul.mubr.msk.bf16.vlgmr.msra.gmra.mrb[56].mxu1 %vm1179_vm1, %v2156_v55  ;;  %v2477_v36 = vpop.permute.xlu1 %2476 }
 0x54e   : > { %6925 = vmatpush3.bf16.xpose.msra.mxu1 %v2270_v22  ;;  %6926 = vmatprep.mubr.msk.bf16.mxu1 %vm8054_vm0, %v10462_v28  ;;  %v2482_v50 = vsel %vm1179_vm1, %v2477_v36, 0 }
 0x54f   : > { %6936 = vmatprep.subr.bf16.mxu1 %v10462_v28 }
 0x551   : > { %v2474_v8 = vpop.permute.xlu1 %2473 }
 0x552   : > { %6945 = vmatmul.mubr.msk.bf16.vlgmr.msra.gmra.mrb[68].mxu0 %vm1179_vm1, %v2421_v25 }
 0x553   : > { %6956 = vmatprep.mubr.msk.bf16.mxu0 %vm8054_vm0, %v10462_v28 }
 0x555   : > { %6927 = vmatmul.mubr.msk.bf16.vlgmr.msra.gmra.mrb[60].mxu1 %vm1179_vm1, %v2262_v40 }
 0x556   : > { %6937 = vmatpush3.bf16.xpose.msra.mxu1 %v2376_v30  ;;  %6938 = vmatprep.mubr.msk.bf16.mxu1 %vm8054_vm0, %v10462_v28 }
 0x557   : > { %6948 = vmatprep.subr.bf16.mxu1 %v10462_v28 }
 0x55d   : > { %6939 = vmatmul.mubr.msk.bf16.vlgmr.msra.gmra.mrb[64].mxu1 %vm1179_vm1, %v2368_v4 }
 0x55e   : > { %6949 = vmatpush3.bf16.xpose.msra.mxu1 %v2482_v50  ;;  %6950 = vmatprep.mubr.msk.bf16.mxu1 %vm8054_vm0, %v10462_v28 }
 0x55f   : > { %6960 = vmatprep.subr.bf16.mxu1 %v10462_v28 }
 0x565   : > { %6951 = vmatmul.mubr.msk.bf16.vlgmr.msra.gmra.mrb[68].mxu1 %vm1179_vm1, %v2474_v8 }
 0x566   : > { %6962 = vmatprep.mubr.msk.bf16.mxu1 %vm8054_vm0, %v10462_v28 }
 0x5af   : > { %v8991_v41 = vpop.f32.mrb[40].mxu0 }
 0x5b0   : > { %10516 = vst [vmem:[#allocation19_spill] sm:$0xff] %v8991_v41  ;;  %v6862_v49 = vpop.f32.mrb[41].mxu0 }
 0x5b1   : > { %v8993_v23 = vpop.f32.mrb[42].mxu0 }
 0x5b2   : > { %10517 = vst [vmem:[#allocation20_spill] sm:$0xff] %v8993_v23  ;;  %v6863_v51 = vpop.f32.mrb[43].mxu0 }
 0x5b7   : > { %v8997_v16 = vpop.f32.mrb[40].mxu1 }
 0x5b8   : > { %10518 = vst [vmem:[#allocation21_spill] sm:$0xff] %v8997_v16  ;;  %v6868_v58 = vpop.f32.mrb[41].mxu1 }
 0x5b9   : > { %v8999_v26 = vpop.f32.mrb[42].mxu1 }
 0x5ba   : > { %10519 = vst [vmem:[#allocation22_spill] sm:$0xff] %v8999_v26  ;;  %v6869_v55 = vpop.f32.mrb[43].mxu1 }
 0x5bf   : > { %v9003_v27 = vpop.f32.mrb[44].mxu0 }
 0x5c0   : > { %10520 = vst [vmem:[#allocation23_spill] sm:$0xff] %v9003_v27  ;;  %v6874_v2 = vpop.f32.mrb[45].mxu0 }
 0x5c1   : > { %v9005_v15 = vpop.f32.mrb[46].mxu0 }
 0x5c2   : > { %10521 = vst [vmem:[#allocation24_spill] sm:$0xff] %v9005_v15  ;;  %v6875_v39 = vpop.f32.mrb[47].mxu0 }
 0x5c7   : > { %v9009_v38 = vpop.f32.mrb[44].mxu1 }
 0x5c8   : > { %10522 = vst [vmem:[#allocation25_spill] sm:$0xff] %v9009_v38  ;;  %v6880_v40 = vpop.f32.mrb[45].mxu1 }
 0x5c9   : > { %v9011_v32 = vpop.f32.mrb[46].mxu1 }
 0x5ca   : > { %10523 = vst [vmem:[#allocation26_spill] sm:$0xff] %v9011_v32  ;;  %v6881_v9 = vpop.f32.mrb[47].mxu1 }
 0x5cf   : > { %v9015_v1 = vpop.f32.mrb[48].mxu0 }
 0x5d0   : > { %10524 = vst [vmem:[#allocation27_spill] sm:$0xff] %v9015_v1  ;;  %v6886_v21 = vpop.f32.mrb[49].mxu0 }
 0x5d1   : > { %v9017_v62 = vpop.f32.mrb[50].mxu0 }
 0x5d2   : > { %10525 = vst [vmem:[#allocation28_spill] sm:$0xff] %v9017_v62  ;;  %v6887_v10 = vpop.f32.mrb[51].mxu0 }
 0x5d7   : > { %v9021_v60 = vpop.f32.mrb[48].mxu1 }
 0x5d8   : > { %10526 = vst [vmem:[#allocation29_spill] sm:$0xff] %v9021_v60  ;;  %v6892_v34 = vpop.f32.mrb[49].mxu1 }
 0x5d9   : > { %v9023_v17 = vpop.f32.mrb[50].mxu1 }
 0x5da   : > { %10527 = vst [vmem:[#allocation30_spill] sm:$0xff] %v9023_v17  ;;  %v6893_v22 = vpop.f32.mrb[51].mxu1 }
 0x5df   : > { %v9027_v25 = vpop.f32.mrb[52].mxu0 }
 0x5e0   : > { %10528 = vst [vmem:[#allocation31_spill] sm:$0xff] %v9027_v25  ;;  %v6898_v30 = vpop.f32.mrb[53].mxu0 }
 0x5e1   : > { %v9029_v36 = vpop.f32.mrb[54].mxu0 }
 0x5e2   : > { %10529 = vst [vmem:[#allocation32_spill] sm:$0xff] %v9029_v36  ;;  %v6899_v8 = vpop.f32.mrb[55].mxu0 }
 0x5e7   : > { %v9033_v49 = vpop.f32.mrb[56].mxu0 }
 0x5e8   : > { %v6910_v51 = vpop.f32.mrb[57].mxu0  ;;  %v2525_v58 = vsel %vm1556_vm2, %v9033_v49, -inf }
 0x5e9   : > { %2526 = vmax.xlane.f32.xlu0 %v2525_v58  ;;  %v9037_v55 = vpop.f32.mrb[58].mxu0 }
 0x5ea   : > { %v6911_v2 = vpop.f32.mrb[59].mxu0  ;;  %v2528_v39 = vsel %vm1556_vm2, %v9037_v55, -inf }
 0x5eb   : > { %2529 = vmax.xlane.f32.xlu1 %v2528_v39 }
 0x5fc   : > { %2758 = vrot.lane.b32.xlu1 %v8581_v24, %s8055_s24 }
 0x600   : > { %2806 = vrot.lane.b32.xlu1 %v8606_v53, %s8055_s24 }
 0x604   : > { %2854 = vrot.lane.b32.xlu1 %v8602_v11, %s8055_s24 }
 0x615   : > { %v9047_v40 = vpop.f32.mrb[60].mxu0 }
 0x616   : > { %v6922_v9 = vpop.f32.mrb[61].mxu0 }
 0x617   : > { %v9049_v21 = vpop.f32.mrb[62].mxu0 }
 0x618   : > { %v9051_v10 = vpop.f32.mrb[52].mxu1  ;;  %v6923_v34 = vpop.f32.mrb[63].mxu0 }
 0x619   : > { %10530 = vst [vmem:[#allocation33_spill] sm:$0xff] %v9051_v10  ;;  %v6904_v22 = vpop.f32.mrb[53].mxu1 }
 0x61a   : > { %v9053_v30 = vpop.f32.mrb[54].mxu1 }
 0x61b   : > { %10531 = vst [vmem:[#allocation34_spill] sm:$0xff] %v9053_v30  ;;  %v6905_v51 = vpop.f32.mrb[55].mxu1 }
 0x61c   : > { %v2537_v51 = vsel %vm1556_vm2, %v9047_v40, -inf }
 0x61d   : > { %v9057_v58 = vpop.f32.mrb[64].mxu0 }
 0x61e   : > { %v6934_v2 = vpop.f32.mrb[65].mxu0 }
 0x61f   : > { %v9059_v39 = vpop.f32.mrb[66].mxu0 }
 0x620   : > { %v9061_v0 = vpop.f32.mrb[56].mxu1  ;;  %v6935_v9 = vpop.f32.mrb[67].mxu0 }
 0x621   : > { %v6916_v63 = vpop.f32.mrb[57].mxu1  ;;  %v2531_v4 = vsel %vm1556_vm2, %v9061_v0, -inf  ;;  %v2540_v9 = vsel %vm1556_vm2, %v9049_v21, -inf }
 0x622   : > { %2532 = vmax.xlane.f32.xlu0 %v2531_v4  ;;  %v9065_v34 = vpop.f32.mrb[58].mxu1 }
 0x623   : > { %v6917_v22 = vpop.f32.mrb[59].mxu1 }
 0x624   : > { %v2534_v22 = vsel %vm1556_vm2, %v9065_v34, -inf }
 0x625   : > { %v9067_v50 = vpop.f32.mrb[68].mxu0 }
 0x626   : > { %v6946_v8 = vpop.f32.mrb[69].mxu0  ;;  %2538 = vmax.xlane.f32.xlu0 %v2537_v51  ;;  %v2552_v51 = vsel %vm1556_vm2, %v9059_v39, -inf }
 0x627   : > { %v9071_v2 = vpop.f32.mrb[70].mxu0 }
 0x628   : > { %2541 = vmax.xlane.f32.xlu1 %v2540_v9  ;;  %v9075_v63 = vpop.f32.mrb[60].mxu1  ;;  %v6947_v59 = vpop.f32.mrb[71].mxu0 }
 0x629   : > { %v6928_v4 = vpop.f32.mrb[61].mxu1 }
 0x62a   : > { %2535 = vmax.xlane.f32.xlu0 %v2534_v22  ;;  %v9079_v47 = vpop.f32.mrb[62].mxu1 }
 0x62b   : > { %v6929_v37 = vpop.f32.mrb[63].mxu1  ;;  %v2546_v8 = vsel %vm1556_vm2, %v9079_v47, -inf }
 0x62c   : > { %2547 = vmax.xlane.f32.xlu1 %v2546_v8  ;;  %v2564_v37 = vsel %vm1556_vm2, %v9071_v2, -inf }
 0x630   : > { %2553 = vmax.xlane.f32.xlu1 %v2552_v51  ;;  %v9085_v9 = vpop.f32.mrb[64].mxu1 }
 0x631   : > { %v6940_v7 = vpop.f32.mrb[65].mxu1 }
 0x632   : > { %v9087_v59 = vpop.f32.mrb[66].mxu1  ;;  %v2543_v7 = vsel %vm1556_vm2, %v9075_v63, -inf }
 0x633   : > { %v6941_v4 = vpop.f32.mrb[67].mxu1  ;;  %v2558_v22 = vsel %vm1556_vm2, %v9087_v59, -inf }
 0x634   : > { %2559 = vmax.xlane.f32.xlu1 %v2558_v22  ;;  %v2549_v4 = vsel %vm1556_vm2, %v9057_v58, -inf  ;;  %v2555_v22 = vsel %vm1556_vm2, %v9085_v9, -inf }
 0x638   : > { %2565 = vmax.xlane.f32.xlu1 %v2564_v37  ;;  %v9093_v13 = vpop.f32.mrb[68].mxu1  ;;  %v2561_v37 = vsel %vm1556_vm2, %v9067_v50, -inf }
 0x639   : > { %v6952_v8 = vpop.f32.mrb[69].mxu1 }
 0x63a   : > { %v9095_v46 = vpop.f32.mrb[70].mxu1 }
 0x63b   : > { %v6953_v51 = vpop.f32.mrb[71].mxu1  ;;  %v2570_v8 = vsel %vm1556_vm2, %v9095_v46, -inf }
 0x63c   : > { %v2567_v51 = vsel %vm1556_vm2, %v9093_v13, -inf }
 0x640   : > { %2710 = vrot.lane.b32.xlu0 %v8583_v56, %s8055_s24 }
 0x649   : > { %2950 = vrot.lane.b32.xlu1 %v8625_v18, %s8055_s24 }
 0x65f   : > { %2544 = vmax.xlane.f32.xlu0 %v2543_v7 }
 0x663   : > { %2550 = vmax.xlane.f32.xlu0 %v2549_v4  ;;  %v10532_v4 = vmov 0.0  }
 0x667   : > { %2556 = vmax.xlane.f32.xlu0 %v2555_v22 }
 0x66b   : > { %2562 = vmax.xlane.f32.xlu0 %v2561_v37 }
 0x66d   : > { %2571 = vmax.xlane.f32.xlu1 %v2570_v8 }
 0x66f   : > { %2568 = vmax.xlane.f32.xlu0 %v2567_v51 }
 0x676   : > { %v2527_v37 = vpop.xlane.xlu0 %2526 }
 0x677   : > { %v2573_v51 = vsub.f32 %v9033_v49, %v2527_v37 }
 0x678   : > { %v2530_v7 = vpop.xlane.xlu1 %2529 }
 0x679   : > { %v2574_v22 = vsub.f32 %v9037_v55, %v2530_v7  ;;  %v2589_v14 = vmul.f32 1.442695, %v2573_v51 }
 0x67b   : > { %v2591_v8 = vmul.f32 1.442695, %v2574_v22 }
 0x67c   : > { %v2759_v28 = vpop.permute.xlu1 %2758 }
 0x67d   : > { %6961 = vmatpush3.bf16.msra.mxu1 %v2759_v28  ;;  %7519 = vpow2.f32 %v2591_v8 }
 0x67e   : > { %3046 = vrot.lane.b32.xlu1 %v8648_v43, %s8055_s24  ;;  %6972 = vmatprep.subr.bf16.mxu1 %v10532_v4  ;;  %7521 = vpow2.f32 %v2589_v14 }
 0x680   : > { %v9130_v55 = vpop.permute.xlu1 %2806 }
 0x684   : > { %v9133_v22 = vpop.permute.xlu1 %2854 }
 0x685   : > { %2902 = vrot.lane.b32.xlu0 %v8629_v19, %s8055_s24 }
 0x687   : > { %v9122_v28 = vpop.eup %7519 }
 0x688   : > { %v2624_v10 = vsel %vm1556_vm2, %v9122_v28, 0.0  ;;  %v9126_v30 = vpop.eup %7521 }
 0x689   : > { %2998 = vrot.lane.b32.xlu0 %v8652_v45, %s8055_s24  ;;  %v2621_v60 = vsel %vm1556_vm2, %v9126_v30, 0.0 }
 0x6a2   : > { %2625 = vadd.xlane.f32.xlu1 %v2624_v10 }
 0x6a8   : > { %2622 = vadd.xlane.f32.xlu0 %v2621_v60 }
 0x6af   : > { %v2533_v7 = vpop.xlane.xlu0 %2532 }
 0x6b0   : > { %v2575_v49 = vsub.f32 %v9061_v0, %v2533_v7 }
 0x6b2   : > { %v2593_v14 = vmul.f32 1.442695, %v2575_v49 }
 0x6b3   : > { %v2539_v37 = vpop.xlane.xlu0 %2538 }
 0x6b4   : > { %7523 = vpow2.f32 %v2593_v14  ;;  %v2577_v8 = vsub.f32 %v9047_v40, %v2539_v37 }
 0x6b5   : > { %v2542_v51 = vpop.xlane.xlu1 %2541 }
 0x6b6   : > { %v2597_v10 = vmul.f32 1.442695, %v2577_v8  ;;  %v2578_v17 = vsub.f32 %v9049_v21, %v2542_v51 }
 0x6b7   : > { %v2536_v25 = vpop.xlane.xlu0 %2535 }
 0x6b8   : > { %7525 = vpow2.f32 %v2597_v10  ;;  %v2576_v60 = vsub.f32 %v9065_v34, %v2536_v25  ;;  %v2599_v1 = vmul.f32 1.442695, %v2578_v17 }
 0x6b9   : > { %v2548_v36 = vpop.xlane.xlu1 %2547 }
 0x6ba   : > { %v2595_v62 = vmul.f32 1.442695, %v2576_v60  ;;  %v2580_v0 = vsub.f32 %v9079_v47, %v2548_v36 }
 0x6bb   : > { %v2711_v7 = vpop.permute.xlu0 %2710 }
 0x6bc   : > { %7527 = vpow2.f32 %v2595_v62  ;;  %6955 = vmatpush3.bf16.msra.mxu0 %v2711_v7  ;;  %v2603_v14 = vmul.f32 1.442695, %v2580_v0 }
 0x6bd   : > { %v2554_v49 = vpop.xlane.xlu1 %2553  ;;  %6966 = vmatprep.subr.bf16.mxu0 %v10532_v4  ;;  %7529 = vpow2.f32 %v2599_v1 }
 0x6be   : > { %v9140_v40 = vpop.eup %7523  ;;  %v2582_v21 = vsub.f32 %v9059_v39, %v2554_v49  ;;  %7531 = vpow2.f32 %v2603_v14 }
 0x6bf   : > { %v2627_v25 = vsel %vm1556_vm2, %v9140_v40, 0.0 }
 0x6c0   : > { %2628 = vadd.xlane.f32.xlu0 %v2627_v25  ;;  %v2607_v47 = vmul.f32 1.442695, %v2582_v21 }
 0x6c1   : > { %v2560_v17 = vpop.xlane.xlu1 %2559 }
 0x6c2   : > { %v9145_v34 = vpop.eup %7525  ;;  %v2584_v62 = vsub.f32 %v9087_v59, %v2560_v17  ;;  %7533 = vpow2.f32 %v2607_v47 }
 0x6c3   : > { %v2633_v36 = vsel %vm1556_vm2, %v9145_v34, 0.0 }
 0x6c4   : > { %2634 = vadd.xlane.f32.xlu0 %v2633_v36  ;;  %v2611_v39 = vmul.f32 1.442695, %v2584_v62 }
 0x6c5   : > { %v2566_v37 = vpop.xlane.xlu1 %2565 }
 0x6c6   : > { %v9150_v1 = vpop.eup %7527  ;;  %v2586_v8 = vsub.f32 %v9071_v2, %v2566_v37  ;;  %7535 = vpow2.f32 %v2611_v39 }
 0x6c7   : > { %v2630_v51 = vsel %vm1556_vm2, %v9150_v1, 0.0  ;;  %v9155_v10 = vpop.eup %7529 }
 0x6c8   : > { %2631 = vadd.xlane.f32.xlu1 %v2630_v51  ;;  %v2615_v60 = vmul.f32 1.442695, %v2586_v8  ;;  %v2636_v59 = vsel %vm1556_vm2, %v9155_v10, 0.0  ;;  %v9159_v0 = vpop.eup %7531 }
 0x6c9   : > { %v2642_v7 = vsel %vm1556_vm2, %v9159_v0, 0.0 }
 0x6ca   : > { %7537 = vpow2.f32 %v2615_v60 }
 0x6cc   : > { %2637 = vadd.xlane.f32.xlu1 %v2636_v59  ;;  %v9163_v49 = vpop.eup %7533  ;;  %v9180_v59 = vpop.permute.xlu1 %2950 }
 0x6cd   : > { %v2648_v2 = vsel %vm1556_vm2, %v9163_v49, 0.0 }
 0x6d0   : > { %2643 = vadd.xlane.f32.xlu1 %v2642_v7  ;;  %v9167_v14 = vpop.eup %7535 }
 0x6d1   : > { %v2654_v21 = vsel %vm1556_vm2, %v9167_v14, 0.0 }
 0x6d4   : > { %2649 = vadd.xlane.f32.xlu1 %v2648_v2  ;;  %v9171_v25 = vpop.eup %7537 }
 0x6d5   : > { %v2660_v17 = vsel %vm1556_vm2, %v9171_v25, 0.0 }
 0x6d8   : > { %2655 = vadd.xlane.f32.xlu1 %v2654_v21 }
 0x6dc   : > { %2661 = vadd.xlane.f32.xlu1 %v2660_v17 }
 0x6ec   : > { %v2545_v47 = vpop.xlane.xlu0 %2544 }
 0x6ed   : > { %v2579_v62 = vsub.f32 %v9075_v63, %v2545_v47  ;;  %3154 = vrot.lane.b32.xlu1 %v8593_v44, %s8056_s18 }
 0x6ef   : > { %v2601_v36 = vmul.f32 1.442695, %v2579_v62 }
 0x6f0   : > { %v2551_v37 = vpop.xlane.xlu0 %2550 }
 0x6f1   : > { %7539 = vpow2.f32 %v2601_v36  ;;  %v2581_v39 = vsub.f32 %v9057_v58, %v2551_v37 }
 0x6f3   : > { %v2605_v8 = vmul.f32 1.442695, %v2581_v39 }
 0x6f4   : > { %v2557_v51 = vpop.xlane.xlu0 %2556 }
 0x6f5   : > { %7541 = vpow2.f32 %v2605_v8  ;;  %v2583_v60 = vsub.f32 %v9085_v9, %v2557_v51 }
 0x6f7   : > { %v2609_v7 = vmul.f32 1.442695, %v2583_v60 }
 0x6f8   : > { %v2563_v2 = vpop.xlane.xlu0 %2562 }
 0x6f9   : > { %7543 = vpow2.f32 %v2609_v7  ;;  %v2585_v63 = vsub.f32 %v9067_v50, %v2563_v2 }
 0x6fa   : > { %v2572_v21 = vpop.xlane.xlu1 %2571 }
 0x6fb   : > { %v9183_v17 = vpop.eup %7539  ;;  %v2613_v47 = vmul.f32 1.442695, %v2585_v63  ;;  %v2588_v62 = vsub.f32 %v9095_v46, %v2572_v21 }
 0x6fc   : > { %v2569_v36 = vpop.xlane.xlu0 %2568  ;;  %v2639_v58 = vsel %vm1556_vm2, %v9183_v17, 0.0 }
 0x6fd   : > { %7545 = vpow2.f32 %v2613_v47  ;;  %v2587_v9 = vsub.f32 %v9093_v13, %v2569_v36  ;;  %2640 = vadd.xlane.f32.xlu0 %v2639_v58  ;;  %v2619_v39 = vmul.f32 1.442695, %v2588_v62 }
 0x6fe   : > { %v9221_v62 = vpop.permute.xlu1 %3046 }
 0x6ff   : > { %v9189_v37 = vpop.eup %7541  ;;  %v2617_v8 = vmul.f32 1.442695, %v2587_v9 }
 0x700   : > { %v2645_v50 = vsel %vm1556_vm2, %v9189_v37, 0.0  ;;  %v2903_v47 = vpop.permute.xlu0 %2902 }
 0x701   : > { %7547 = vpow2.f32 %v2617_v8  ;;  %2646 = vadd.xlane.f32.xlu0 %v2645_v50 }
 0x702   : > { %7549 = vpow2.f32 %v2619_v39 }
 0x703   : > { %v9193_v51 = vpop.eup %7543 }
 0x704   : > { %v2651_v46 = vsel %vm1556_vm2, %v9193_v51, 0.0  ;;  %v9227_v36 = vpop.permute.xlu0 %2998 }
 0x705   : > { %2652 = vadd.xlane.f32.xlu0 %v2651_v46 }
 0x707   : > { %v9197_v60 = vpop.eup %7545 }
 0x708   : > { %v2657_v13 = vsel %vm1556_vm2, %v9197_v60, 0.0 }
 0x709   : > { %2658 = vadd.xlane.f32.xlu0 %v2657_v13 }
 0x70b   : > { %v9201_v7 = vpop.eup %7547 }
 0x70c   : > { %v2663_v2 = vsel %vm1556_vm2, %v9201_v7, 0.0  ;;  %v9205_v63 = vpop.eup %7549 }
 0x70d   : > { %2664 = vadd.xlane.f32.xlu0 %v2663_v2  ;;  %v2666_v21 = vsel %vm1556_vm2, %v9205_v63, 0.0 }
 0x711   : > { %2667 = vadd.xlane.f32.xlu1 %v2666_v21 }
 0x722   : > { %3205 = vrot.lane.b32.xlu1 %v8616_v33, %s8056_s18 }
 0x723   : > { %3103 = vrot.lane.b32.xlu0 %v8573_v48, %s8056_s18 }
 0x726   : > { %3256 = vrot.lane.b32.xlu1 %v8639_v35, %s8056_s18 }
 0x727   : > { %3101 = vrot.lane.b32.xlu0 %v8571_v20, %s8056_s18 }
 0x72a   : > { %3307 = vrot.lane.b32.xlu1 %v8661_v54, %s8056_s18 }
 0x72b   : > { %3152 = vrot.lane.b32.xlu0 %v8590_v57, %s8056_s18 }
 0x72e   : > { %3358 = vrot.lane.b32.xlu1 %v8676_v6, %s8056_s18 }
 0x72f   : > { %3203 = vrot.lane.b32.xlu0 %v8613_v61, %s8056_s18  ;;  %v2626_v58 = vpop.xlane.xlu1 %2625 }
 0x730   : > { %7551 = vrcp.f32 %v2626_v58 }
 0x732   : > { %3409 = vrot.lane.b32.xlu1 %v8691_v29, %s8056_s18 }
 0x733   : > { %3254 = vrot.lane.b32.xlu0 %v8636_v31, %s8056_s18 }
 0x735   : > { %v2623_v9 = vpop.xlane.xlu0 %2622 }
 0x736   : > { %7553 = vrcp.f32 %v2623_v9  ;;  %3460 = vrot.lane.b32.xlu1 %v8706_v3, %s8056_s18 }
 0x737   : > { %3305 = vrot.lane.b32.xlu0 %v8659_v52, %s8056_s18 }
 0x73a   : > { %3458 = vrot.lane.b32.xlu1 %v8704_v42, %s8056_s18  ;;  %v7552_v39 = vpop.eup %7551 }
 0x73b   : > { %3356 = vrot.lane.b32.xlu0 %v8674_v5, %s8056_s18  ;;  %v2686_v50 = vmul.f32 %v7552_v39, %v9122_v28 }
 0x73f   : > { %3407 = vrot.lane.b32.xlu0 %v8689_v12, %s8056_s18 }
 0x740   : > { %v7554_v8 = vpop.eup %7553 }
 0x741   : > { %v2685_v46 = vmul.f32 %v7554_v8, %v9126_v30 }
 0x743   : > { %v2701_v13 = vpack.c.bf16 %v2686_v50, %v2685_v46 }
 0x745   : > { %6957 = vmatmul.mubr.msk.bf16.vlgmr.msra.gmra.mrb[72].mxu0 %vm1556_vm2, %v2701_v13 }
 0x746   : > { %6967 = vmatpush3.bf16.msra.mxu0 %v9130_v55  ;;  %6968 = vmatprep.mubr.msk.bf16.mxu0 %vm8054_vm0, %v10532_v4 }
 0x747   : > { %6978 = vmatprep.subr.bf16.mxu0 %v10532_v4 }
 0x74d   : > { %v2629_v2 = vpop.xlane.xlu0 %2628 }
 0x74e   : > { %7555 = vrcp.f32 %v2629_v2 }
 0x751   : > { %v2635_v21 = vpop.xlane.xlu0 %2634 }
 0x755   : > { %v2632_v58 = vpop.xlane.xlu1 %2631 }
 0x756   : > { %7557 = vrcp.f32 %v2632_v58 }
 0x757   : > { %7559 = vrcp.f32 %v2635_v21 }
 0x758   : > { %v7556_v28 = vpop.eup %7555 }
 0x759   : > { %v2638_v9 = vpop.xlane.xlu1 %2637  ;;  %v2687_v39 = vmul.f32 %v7556_v28, %v9140_v40 }
 0x75a   : > { %7561 = vrcp.f32 %v2638_v9 }
 0x75d   : > { %v2644_v40 = vpop.xlane.xlu1 %2643 }
 0x75e   : > { %7563 = vrcp.f32 %v2644_v40 }
 0x760   : > { %v7558_v30 = vpop.eup %7557 }
 0x761   : > { %v2688_v8 = vmul.f32 %v7558_v30, %v9150_v1  ;;  %v7560_v55 = vpop.eup %7559 }
 0x762   : > { %v2689_v13 = vmul.f32 %v7560_v55, %v9145_v34  ;;  %v2650_v34 = vpop.xlane.xlu1 %2649 }
 0x763   : > { %v2702_v50 = vpack.c.bf16 %v2688_v8, %v2687_v39 }
 0x764   : > { %v7562_v46 = vpop.eup %7561 }
 0x765   : > { %v2690_v38 = vmul.f32 %v7562_v46, %v9155_v10  ;;  %6963 = vmatmul.mubr.msk.bf16.vlgmr.msra.gmra.mrb[72].mxu1 %vm1556_vm2, %v2702_v50 }
 0x766   : > { %6973 = vmatpush3.bf16.msra.mxu1 %v9133_v22  ;;  %6974 = vmatprep.mubr.msk.bf16.mxu1 %vm8054_vm0, %v10532_v4  ;;  %v2656_v22 = vpop.xlane.xlu1 %2655 }
 0x767   : > { %v2703_v2 = vpack.c.bf16 %v2690_v38, %v2689_v13  ;;  %6984 = vmatprep.subr.bf16.mxu1 %v10532_v4 }
 0x768   : > { %v7564_v58 = vpop.eup %7563 }
 0x769   : > { %6969 = vmatmul.mubr.msk.bf16.vlgmr.msra.gmra.mrb[76].mxu0 %vm1556_vm2, %v2703_v2  ;;  %v2692_v9 = vmul.f32 %v7564_v58, %v9159_v0 }
 0x76a   : > { %6979 = vmatpush3.bf16.msra.mxu0 %v2903_v47  ;;  %6980 = vmatprep.mubr.msk.bf16.mxu0 %vm8054_vm0, %v10532_v4  ;;  %v2662_v38 = vpop.xlane.xlu1 %2661 }
 0x76b   : > { %6990 = vmatprep.subr.bf16.mxu0 %v10532_v4 }
 0x76e   : > { %v3155_v46 = vpop.permute.xlu1 %3154 }
 0x78a   : > { %v2641_v1 = vpop.xlane.xlu0 %2640 }
 0x78b   : > { %7565 = vrcp.f32 %v2641_v1 }
 0x78c   : > { %7567 = vrcp.f32 %v2650_v34 }
 0x78e   : > { %v2647_v10 = vpop.xlane.xlu0 %2646 }
 0x78f   : > { %7569 = vrcp.f32 %v2647_v10 }
 0x790   : > { %7571 = vrcp.f32 %v2656_v22 }
 0x792   : > { %v2653_v21 = vpop.xlane.xlu0 %2652 }
 0x793   : > { %7573 = vrcp.f32 %v2653_v21 }
 0x794   : > { %7575 = vrcp.f32 %v2662_v38 }
 0x795   : > { %v7566_v47 = vpop.eup %7565 }
 0x796   : > { %v2691_v28 = vmul.f32 %v7566_v47, %v9183_v17  ;;  %v2659_v30 = vpop.xlane.xlu0 %2658  ;;  %v7568_v39 = vpop.eup %7567 }
 0x797   : > { %7577 = vrcp.f32 %v2659_v30  ;;  %v2694_v50 = vmul.f32 %v7568_v39, %v9163_v49  ;;  %v3160_v39 = vsel %vm1179_vm1, %v3155_v46, 0 }
 0x798   : > { %v2704_v8 = vpack.c.bf16 %v2692_v9, %v2691_v28 }
 0x799   : > { %v7570_v55 = vpop.eup %7569 }
 0x79a   : > { %v2693_v13 = vmul.f32 %v7570_v55, %v9189_v37  ;;  %v2665_v2 = vpop.xlane.xlu0 %2664  ;;  %6975 = vmatmul.mubr.msk.bf16.vlgmr.msra.gmra.mrb[76].mxu1 %vm1556_vm2, %v2704_v8  ;;  %v7572_v40 = vpop.eup %7571 }
 0x79b   : > { %6985 = vmatpush3.bf16.msra.mxu1 %v9180_v59  ;;  %6986 = vmatprep.mubr.msk.bf16.mxu1 %vm8054_vm0, %v10532_v4  ;;  %7579 = vrcp.f32 %v2665_v2  ;;  %v2696_v34 = vmul.f32 %v7572_v40, %v9167_v14 }
 0x79c   : > { %v2705_v0 = vpack.c.bf16 %v2694_v50, %v2693_v13  ;;  %6996 = vmatprep.subr.bf16.mxu1 %v10532_v4 }
 0x79d   : > { %v7574_v17 = vpop.eup %7573 }
 0x79e   : > { %v2695_v49 = vmul.f32 %v7574_v17, %v9193_v51  ;;  %v3104_v1 = vpop.permute.xlu0 %3103  ;;  %6981 = vmatmul.mubr.msk.bf16.vlgmr.msra.gmra.mrb[80].mxu0 %vm1556_vm2, %v2705_v0  ;;  %v2668_v37 = vpop.xlane.xlu1 %2667 }
 0x79f   : > { %v7576_v22 = vpop.eup %7575  ;;  %6991 = vmatpush3.bf16.msra.mxu0 %v9227_v36  ;;  %7581 = vrcp.f32 %v2668_v37  ;;  %6992 = vmatprep.mubr.msk.bf16.mxu0 %vm8054_vm0, %v10532_v4  ;;  %v3109_v47 = vsel %vm1179_vm1, %v3104_v1, 0 }
 0x7a0   : > { %v2706_v59 = vpack.c.bf16 %v2696_v34, %v2695_v49  ;;  %7002 = vmatprep.subr.bf16.mxu0 %v10532_v4  ;;  %v2698_v38 = vmul.f32 %v7576_v22, %v9171_v25 }
 0x7a1   : > { %v7578_v10 = vpop.eup %7577 }
 0x7a2   : > { %v2697_v14 = vmul.f32 %v7578_v10, %v9197_v60  ;;  %v3102_v51 = vpop.permute.xlu0 %3101  ;;  %6987 = vmatmul.mubr.msk.bf16.vlgmr.msra.gmra.mrb[80].mxu1 %vm1556_vm2, %v2706_v59  ;;  %v3206_v36 = vpop.permute.xlu1 %3205 }
 0x7a3   : > { %6997 = vmatpush3.bf16.msra.mxu1 %v9221_v62  ;;  %6998 = vmatprep.mubr.msk.bf16.mxu1 %vm8054_vm0, %v10532_v4  ;;  %v3211_v55 = vsel %vm1179_vm1, %v3206_v36, 0 }
 0x7a4   : > { %v2707_v21 = vpack.c.bf16 %v2698_v38, %v2697_v14  ;;  %7008 = vmatprep.subr.bf16.mxu1 %v10532_v4 }
 0x7a5   : > { %v7580_v58 = vpop.eup %7579 }
 0x7a6   : > { %6993 = vmatmul.mubr.msk.bf16.vlgmr.msra.gmra.mrb[84].mxu0 %vm1556_vm2, %v2707_v21  ;;  %v3153_v25 = vpop.permute.xlu0 %3152  ;;  %v2699_v62 = vmul.f32 %v7580_v58, %v9201_v7  ;;  %v3257_v28 = vpop.permute.xlu1 %3256 }
 0x7a7   : > { %7004 = vmatprep.mubr.msk.bf16.mxu0 %vm8054_vm0, %v10532_v4 }
 0x7a8   : > { %7003 = vmatpush3.bf16.xpose.msra.mxu0 %v3109_v47 }
 0x7a9   : > { %v7582_v60 = vpop.eup %7581  ;;  %7014 = vmatprep.subr.bf16.mxu0 %v10532_v4 }
 0x7aa   : > { %v2700_v9 = vmul.f32 %v7582_v60, %v9205_v63  ;;  %v3204_v8 = vpop.permute.xlu0 %3203  ;;  %v3308_v50 = vpop.permute.xlu1 %3307  ;;  %v3262_v63 = vsel %vm1179_vm1, %v3257_v28, 0 }
 0x7ab   : > { %v3313_v13 = vsel %vm1179_vm1, %v3308_v50, 0 }
 0x7ac   : > { %v2708_v30 = vpack.c.bf16 %v2700_v9, %v2699_v62 }
 0x7ae   : > { %6999 = vmatmul.mubr.msk.bf16.vlgmr.msra.gmra.mrb[84].mxu1 %vm1556_vm2, %v2708_v30  ;;  %v3255_v7 = vpop.permute.xlu0 %3254  ;;  %v3359_v46 = vpop.permute.xlu1 %3358 }
 0x7af   : > { %7005 = vmatmul.mubr.msk.bf16.vlgmr.msra.gmra.mrb[88].mxu0 %vm1179_vm1, %v3102_v51  ;;  %7009 = vmatpush3.bf16.xpose.msra.mxu1 %v3160_v39  ;;  %v3364_v0 = vsel %vm1179_vm1, %v3359_v46, 0 }
 0x7b0   : > { %7015 = vmatpush3.bf16.xpose.msra.mxu0 %v3211_v55  ;;  %7010 = vmatprep.mubr.msk.bf16.mxu1 %vm8054_vm0, %v10532_v4 }
 0x7b1   : > { %7016 = vmatprep.mubr.msk.bf16.mxu0 %vm8054_vm0, %v10532_v4  ;;  %7020 = vmatprep.subr.bf16.mxu1 %v10532_v4 }
 0x7b2   : > { %7026 = vmatprep.subr.bf16.mxu0 %v10532_v4  ;;  %v3306_v2 = vpop.permute.xlu0 %3305  ;;  %v3410_v40 = vpop.permute.xlu1 %3409 }
 0x7b3   : > { %v3415_v17 = vsel %vm1179_vm1, %v3410_v40, 0 }
 0x7b6   : > { %7011 = vmatmul.mubr.msk.bf16.vlgmr.msra.gmra.mrb[88].mxu1 %vm1179_vm1, %v3153_v25  ;;  %v3357_v34 = vpop.permute.xlu0 %3356  ;;  %v3461_v49 = vpop.permute.xlu1 %3460 }
 0x7b7   : > { %7017 = vmatmul.mubr.msk.bf16.vlgmr.msra.gmra.mrb[92].mxu0 %vm1179_vm1, %v3204_v8  ;;  %7021 = vmatpush3.bf16.xpose.msra.mxu1 %v3262_v63  ;;  %v3466_v1 = vsel %vm1179_vm1, %v3461_v49, 0 }
 0x7b8   : > { %7027 = vmatpush3.bf16.xpose.msra.mxu0 %v3313_v13  ;;  %7022 = vmatprep.mubr.msk.bf16.mxu1 %vm8054_vm0, %v10532_v4 }
 0x7b9   : > { %7028 = vmatprep.mubr.msk.bf16.mxu0 %vm8054_vm0, %v10532_v4  ;;  %7032 = vmatprep.subr.bf16.mxu1 %v10532_v4 }
 0x7ba   : > { %7038 = vmatprep.subr.bf16.mxu0 %v10532_v4  ;;  %v3408_v37 = vpop.permute.xlu0 %3407  ;;  %v3459_v22 = vpop.permute.xlu1 %3458 }
 0x7be   : > { %7023 = vmatmul.mubr.msk.bf16.vlgmr.msra.gmra.mrb[92].mxu1 %vm1179_vm1, %v3255_v7 }
 0x7bf   : > { %7029 = vmatmul.mubr.msk.bf16.vlgmr.msra.gmra.mrb[96].mxu0 %vm1179_vm1, %v3306_v2  ;;  %7033 = vmatpush3.bf16.xpose.msra.mxu1 %v3364_v0 }
 0x7c0   : > { %7039 = vmatpush3.bf16.xpose.msra.mxu0 %v3415_v17  ;;  %7034 = vmatprep.mubr.msk.bf16.mxu1 %vm8054_vm0, %v10532_v4 }
 0x7c1   : > { %7040 = vmatprep.mubr.msk.bf16.mxu0 %vm8054_vm0, %v10532_v4  ;;  %7044 = vmatprep.subr.bf16.mxu1 %v10532_v4 }
 0x7c2   : > { %7050 = vmatprep.subr.bf16.mxu0 %v10532_v4 }
 0x7c6   : > { %7035 = vmatmul.mubr.msk.bf16.vlgmr.msra.gmra.mrb[96].mxu1 %vm1179_vm1, %v3357_v34 }
 0x7c7   : > { %7041 = vmatmul.mubr.msk.bf16.vlgmr.msra.gmra.mrb[100].mxu0 %vm1179_vm1, %v3408_v37  ;;  %7045 = vmatpush3.bf16.xpose.msra.mxu1 %v3466_v1 }
 0x7c8   : > { %7046 = vmatprep.mubr.msk.bf16.mxu1 %vm8054_vm0, %v10532_v4  ;;  %7056 = vmatprep.subr.bf16.mxu1 %v10532_v4 }
 0x7c9   : > { %7052 = vmatprep.mubr.msk.bf16.mxu0 %vm8054_vm0, %v10532_v4 }
 0x7ce   : > { %7047 = vmatmul.mubr.msk.bf16.vlgmr.msra.gmra.mrb[100].mxu1 %vm1179_vm1, %v3459_v22 }
 0x7cf   : > { %7058 = vmatprep.mubr.msk.bf16.mxu1 %vm8054_vm0, %v10532_v4 }
 0x818   : > { %v9334_v59 = vpop.f32.mrb[72].mxu0 }
 0x819   : > { %v6958_v10 = vpop.f32.mrb[73].mxu0 }
 0x81a   : > { %v9336_v38 = vpop.f32.mrb[74].mxu0 }
 0x81b   : > { %v6959_v51 = vpop.f32.mrb[75].mxu0 }
 0x838   : > { %v9340_v36 = vpop.f32.mrb[72].mxu1 }
 0x839   : > { %v6964_v21 = vpop.f32.mrb[73].mxu1 }
 0x83a   : > { %v9342_v58 = vpop.f32.mrb[74].mxu1 }
 0x83b   : > { %v6965_v25 = vpop.f32.mrb[75].mxu1 }
 0x83c   : > { %v9346_v60 = vpop.f32.mrb[76].mxu0 }
 0x83d   : > { %v6970_v62 = vpop.f32.mrb[77].mxu0 }
 0x83e   : > { %v9348_v9 = vpop.f32.mrb[78].mxu0 }
 0x83f   : > { %v6971_v30 = vpop.f32.mrb[79].mxu0 }
 0x86d   : > { %v9352_v39 = vpop.f32.mrb[76].mxu1 }
 0x86e   : > { %10533 = vst [vmem:[#allocation35_spill] sm:$0xff] %v9352_v39  ;;  %v6976_v8 = vpop.f32.mrb[77].mxu1 }
 0x86f   : > { %v9354_v55 = vpop.f32.mrb[78].mxu1 }
 0x870   : > { %v6977_v7 = vpop.f32.mrb[79].mxu1 }
 0x871   : > { %v9358_v63 = vpop.f32.mrb[80].mxu0 }
 0x872   : > { %10534 = vst [vmem:[#allocation36_spill] sm:$0xff] %v9358_v63  ;;  %v6982_v46 = vpop.f32.mrb[81].mxu0 }
 0x873   : > { %v9360_v13 = vpop.f32.mrb[82].mxu0 }
 0x874   : > { %10535 = vst [vmem:[#allocation37_spill] sm:$0xff] %v9360_v13  ;;  %v6983_v40 = vpop.f32.mrb[83].mxu0 }
 0x875   : > { %v9364_v0 = vpop.f32.mrb[80].mxu1 }
 0x876   : > { %10536 = vst [vmem:[#allocation38_spill] sm:$0xff] %v9364_v0  ;;  %v6988_v17 = vpop.f32.mrb[81].mxu1 }
 0x877   : > { %v9366_v34 = vpop.f32.mrb[82].mxu1 }
 0x878   : > { %10537 = vst [vmem:[#allocation39_spill] sm:$0xff] %v9366_v34  ;;  %v6989_v1 = vpop.f32.mrb[83].mxu1 }
 0x879   : > { %v9370_v37 = vpop.f32.mrb[84].mxu0 }
 0x87a   : > { %10538 = vst [vmem:[#allocation40_spill] sm:$0xff] %v9370_v37  ;;  %v6994_v22 = vpop.f32.mrb[85].mxu0 }
 0x87b   : > { %v9372_v10 = vpop.f32.mrb[86].mxu0 }
 0x87c   : > { %10539 = vst [vmem:[#allocation41_spill] sm:$0xff] %v9372_v10  ;;  %v6995_v21 = vpop.f32.mrb[87].mxu0 }
 0x881   : > { %v9376_v25 = vpop.f32.mrb[84].mxu1 }
 0x882   : > { %10540 = vst [vmem:[#allocation42_spill] sm:$0xff] %v9376_v25  ;;  %v9378_v62 = vpop.f32.mrb[88].mxu0  ;;  %v7000_v30 = vpop.f32.mrb[85].mxu1 }
 0x883   : > { %v7006_v8 = vpop.f32.mrb[89].mxu0  ;;  %v3509_v7 = vsel %vm1556_vm2, %v9378_v62, -inf  ;;  %v9382_v46 = vpop.f32.mrb[86].mxu1 }
 0x884   : > { %10541 = vst [vmem:[#allocation43_spill] sm:$0xff] %v9382_v46  ;;  %3510 = vmax.xlane.f32.xlu0 %v3509_v7  ;;  %v9386_v17 = vpop.f32.mrb[90].mxu0  ;;  %v7001_v1 = vpop.f32.mrb[87].mxu1 }
 0x885   : > { %v7007_v22 = vpop.f32.mrb[91].mxu0  ;;  %v3512_v21 = vsel %vm1556_vm2, %v9386_v17, -inf }
 0x886   : > { %3513 = vmax.xlane.f32.xlu1 %v3512_v21 }
 0x889   : > { %v9390_v49 = vpop.f32.mrb[88].mxu1 }
 0x88a   : > { %v9392_v30 = vpop.f32.mrb[92].mxu0  ;;  %v7012_v8 = vpop.f32.mrb[89].mxu1  ;;  %v3515_v51 = vsel %vm1556_vm2, %v9390_v49, -inf }
 0x88b   : > { %v7018_v7 = vpop.f32.mrb[93].mxu0  ;;  %3516 = vmax.xlane.f32.xlu0 %v3515_v51  ;;  %v9396_v2 = vpop.f32.mrb[90].mxu1  ;;  %v3521_v50 = vsel %vm1556_vm2, %v9392_v30, -inf }
 0x88c   : > { %v9398_v40 = vpop.f32.mrb[94].mxu0  ;;  %v7013_v1 = vpop.f32.mrb[91].mxu1  ;;  %v3518_v47 = vsel %vm1556_vm2, %v9396_v2, -inf }
 0x88d   : > { %v7019_v22 = vpop.f32.mrb[95].mxu0 }
 0x88f   : > { %3522 = vmax.xlane.f32.xlu0 %v3521_v50 }
 0x891   : > { %v9402_v21 = vpop.f32.mrb[92].mxu1 }
 0x892   : > { %v9404_v28 = vpop.f32.mrb[96].mxu0  ;;  %v7024_v8 = vpop.f32.mrb[93].mxu1 }
 0x893   : > { %v7030_v7 = vpop.f32.mrb[97].mxu0  ;;  %3519 = vmax.xlane.f32.xlu0 %v3518_v47  ;;  %v9408_v51 = vpop.f32.mrb[94].mxu1 }
 0x894   : > { %v9410_v14 = vpop.f32.mrb[98].mxu0  ;;  %v7025_v1 = vpop.f32.mrb[95].mxu1 }
 0x895   : > { %v7031_v22 = vpop.f32.mrb[99].mxu0 }
 0x897   : > { %3740 = vrot.lane.b32.xlu1 %v8581_v24, %s8056_s18 }
 0x899   : > { %v9414_v50 = vpop.f32.mrb[96].mxu1 }
 0x89a   : > { %v9416_v32 = vpop.f32.mrb[100].mxu0  ;;  %v7036_v27 = vpop.f32.mrb[97].mxu1 }
 0x89b   : > { %3787 = vrot.lane.b32.xlu1 %v8606_v53, %s8056_s18  ;;  %v7042_v8 = vpop.f32.mrb[101].mxu0  ;;  %v9420_v7 = vpop.f32.mrb[98].mxu1  ;;  %v3524_v27 = vsel %vm1556_vm2, %v9398_v40, -inf }
 0x89c   : > { %v9422_v47 = vpop.f32.mrb[102].mxu0  ;;  %v7037_v15 = vpop.f32.mrb[99].mxu1  ;;  %v3536_v8 = vsel %vm1556_vm2, %v9410_v14, -inf }
 0x89d   : > { %v7043_v16 = vpop.f32.mrb[103].mxu0  ;;  %v3530_v15 = vsel %vm1556_vm2, %v9408_v51, -inf }
 0x89e   : > { %v3527_v16 = vsel %vm1556_vm2, %v9402_v21, -inf }
 0x89f   : > { %3834 = vrot.lane.b32.xlu1 %v8602_v11, %s8056_s18 }
 0x8a1   : > { %v9426_v1 = vpop.f32.mrb[100].mxu1 }
 0x8a2   : > { %v7048_v22 = vpop.f32.mrb[101].mxu1 }
 0x8a3   : > { %v9428_v26 = vpop.f32.mrb[102].mxu1  ;;  %v3542_v22 = vsel %vm1556_vm2, %v9420_v7, -inf }
 0x8a4   : > { %v7049_v25 = vpop.f32.mrb[103].mxu1 }
 0x8a5   : > { %v3533_v25 = vsel %vm1556_vm2, %v9404_v28, -inf }
 0x8a9   : > { %3693 = vrot.lane.b32.xlu0 %v8583_v56, %s8056_s18 }
 0x8c3   : > { %3525 = vmax.xlane.f32.xlu1 %v3524_v27  ;;  %v3539_v27 = vsel %vm1556_vm2, %v9414_v50, -inf }
 0x8c7   : > { %3531 = vmax.xlane.f32.xlu1 %v3530_v15  ;;  %v3548_v15 = vsel %vm1556_vm2, %v9422_v47, -inf }
 0x8c8   : > { %3528 = vmax.xlane.f32.xlu0 %v3527_v16  ;;  %v3545_v16 = vsel %vm1556_vm2, %v9416_v32, -inf }
 0x8cb   : > { %3537 = vmax.xlane.f32.xlu1 %v3536_v8  ;;  %v3551_v8 = vsel %vm1556_vm2, %v9426_v1, -inf }
 0x8cc   : > { %3534 = vmax.xlane.f32.xlu0 %v3533_v25  ;;  %v3554_v25 = vsel %vm1556_vm2, %v9428_v26, -inf }
 0x8cf   : > { %3543 = vmax.xlane.f32.xlu1 %v3542_v22 }
 0x8d0   : > { %3540 = vmax.xlane.f32.xlu0 %v3539_v27 }
 0x8d3   : > { %3549 = vmax.xlane.f32.xlu1 %v3548_v15 }
 0x8d4   : > { %3546 = vmax.xlane.f32.xlu0 %v3545_v16 }
 0x8d8   : > { %3552 = vmax.xlane.f32.xlu0 %v3551_v8 }
 0x8e4   : > { %3928 = vrot.lane.b32.xlu1 %v8625_v18, %s8056_s18 }
 0x8ee   : > { %3881 = vrot.lane.b32.xlu0 %v8629_v19, %s8056_s18 }
 0x8f2   : > { %3975 = vrot.lane.b32.xlu0 %v8652_v45, %s8056_s18 }
 0x908   : > { %3555 = vmax.xlane.f32.xlu1 %v3554_v25 }
 0x911   : > { %v3511_v22 = vpop.xlane.xlu0 %3510 }
 0x912   : > { %v3557_v27 = vsub.f32 %v9378_v62, %v3511_v22 }
 0x913   : > { %v3514_v15 = vpop.xlane.xlu1 %3513 }
 0x914   : > { %v3573_v16 = vmul.f32 1.442695, %v3557_v27 }
 0x916   : > { %7583 = vpow2.f32 %v3573_v16 }
 0x917   : > { %v3741_v8 = vpop.permute.xlu1 %3740 }
 0x918   : > { %7057 = vmatpush3.bf16.msra.mxu1 %v3741_v8  ;;  %v3517_v46 = vpop.xlane.xlu0 %3516 }
 0x919   : > { %v3559_v0 = vsub.f32 %v9390_v49, %v3517_v46  ;;  %4022 = vrot.lane.b32.xlu1 %v8648_v43, %s8056_s18  ;;  %7068 = vmatprep.subr.bf16.mxu1 %v10532_v4 }
 0x91b   : > { %v3577_v34 = vmul.f32 1.442695, %v3559_v0  ;;  %v3558_v0 = vsub.f32 %v9386_v17, %v3514_v15 }
 0x91c   : > { %v3523_v37 = vpop.xlane.xlu0 %3522 }
 0x91d   : > { %7585 = vpow2.f32 %v3577_v34  ;;  %v3561_v25 = vsub.f32 %v9392_v30, %v3523_v37  ;;  %v3575_v30 = vmul.f32 1.442695, %v3558_v0 }
 0x91f   : > { %v3581_v10 = vmul.f32 1.442695, %v3561_v25 }
 0x920   : > { %v9466_v62 = vpop.eup %7583  ;;  %v3520_v22 = vpop.xlane.xlu0 %3519 }
 0x921   : > { %7587 = vpow2.f32 %v3581_v10  ;;  %v3605_v27 = vsel %vm1556_vm2, %v9466_v62, 0.0  ;;  %v3560_v10 = vsub.f32 %v9396_v2, %v3520_v22  ;;  %v9489_v2 = vpop.permute.xlu1 %3787 }
 0x922   : > { %3606 = vadd.xlane.f32.xlu0 %v3605_v27  ;;  %7589 = vpow2.f32 %v3575_v30 }
 0x923   : > { %v3579_v8 = vmul.f32 1.442695, %v3560_v10 }
 0x924   : > { %v3694_v49 = vpop.permute.xlu0 %3693 }
 0x925   : > { %7051 = vmatpush3.bf16.msra.mxu0 %v3694_v49  ;;  %7591 = vpow2.f32 %v3579_v8  ;;  %v9491_v22 = vpop.permute.xlu1 %3834 }
 0x926   : > { %7062 = vmatprep.subr.bf16.mxu0 %v10532_v4 }
 0x927   : > { %v9471_v46 = vpop.eup %7585 }
 0x928   : > { %v3611_v34 = vsel %vm1556_vm2, %v9471_v46, 0.0 }
 0x929   : > { %3612 = vadd.xlane.f32.xlu0 %v3611_v34 }
 0x92b   : > { %v9476_v37 = vpop.eup %7587 }
 0x92c   : > { %v3617_v16 = vsel %vm1556_vm2, %v9476_v37, 0.0  ;;  %v9481_v25 = vpop.eup %7589 }
 0x92d   : > { %3618 = vadd.xlane.f32.xlu0 %v3617_v16  ;;  %v3608_v17 = vsel %vm1556_vm2, %v9481_v25, 0.0 }
 0x92f   : > { %v9485_v15 = vpop.eup %7591 }
 0x930   : > { %v3614_v27 = vsel %vm1556_vm2, %v9485_v15, 0.0 }
 0x93d   : > { %3609 = vadd.xlane.f32.xlu1 %v3608_v17 }
 0x941   : > { %3615 = vadd.xlane.f32.xlu1 %v3614_v27 }
 0x950   : > { %v3526_v49 = vpop.xlane.xlu1 %3525 }
 0x951   : > { %v3562_v0 = vsub.f32 %v9398_v40, %v3526_v49 }
 0x953   : > { %v3583_v34 = vmul.f32 1.442695, %v3562_v0 }
 0x954   : > { %v3532_v30 = vpop.xlane.xlu1 %3531 }
 0x955   : > { %7593 = vpow2.f32 %v3583_v34  ;;  %v3564_v10 = vsub.f32 %v9408_v51, %v3532_v30  ;;  %v3529_v16 = vpop.xlane.xlu0 %3528 }
 0x956   : > { %v3563_v8 = vsub.f32 %v9402_v21, %v3529_v16 }
 0x957   : > { %v3587_v17 = vmul.f32 1.442695, %v3564_v10 }
 0x958   : > { %v3585_v41 = vmul.f32 1.442695, %v3563_v8  ;;  %v3538_v23 = vpop.xlane.xlu1 %3537 }
 0x959   : > { %7595 = vpow2.f32 %v3587_v17  ;;  %v3566_v27 = vsub.f32 %v9410_v14, %v3538_v23  ;;  %v3535_v63 = vpop.xlane.xlu0 %3534 }
 0x95a   : > { %7597 = vpow2.f32 %v3585_v41  ;;  %v3565_v13 = vsub.f32 %v9404_v28, %v3535_v63 }
 0x95b   : > { %v3591_v39 = vmul.f32 1.442695, %v3566_v27 }
 0x95c   : > { %v3589_v40 = vmul.f32 1.442695, %v3565_v13  ;;  %v3544_v49 = vpop.xlane.xlu1 %3543 }
 0x95d   : > { %7599 = vpow2.f32 %v3591_v39  ;;  %v3568_v0 = vsub.f32 %v9420_v7, %v3544_v49  ;;  %v3541_v51 = vpop.xlane.xlu0 %3540 }
 0x95e   : > { %7601 = vpow2.f32 %v3589_v40  ;;  %v3567_v21 = vsub.f32 %v9414_v50, %v3541_v51 }
 0x95f   : > { %v9500_v34 = vpop.eup %7593  ;;  %v3595_v30 = vmul.f32 1.442695, %v3568_v0 }
 0x960   : > { %v3593_v10 = vmul.f32 1.442695, %v3567_v21  ;;  %v3550_v16 = vpop.xlane.xlu1 %3549  ;;  %v3620_v41 = vsel %vm1556_vm2, %v9500_v34, 0.0 }
 0x961   : > { %7603 = vpow2.f32 %v3595_v30  ;;  %v3570_v23 = vsub.f32 %v9422_v47, %v3550_v16  ;;  %3621 = vadd.xlane.f32.xlu1 %v3620_v41  ;;  %v3547_v14 = vpop.xlane.xlu0 %3546 }
 0x962   : > { %7605 = vpow2.f32 %v3593_v10  ;;  %v3569_v28 = vsub.f32 %v9416_v32, %v3547_v14 }
 0x963   : > { %v9506_v39 = vpop.eup %7595  ;;  %v3599_v63 = vmul.f32 1.442695, %v3570_v23 }
 0x964   : > { %v9508_v13 = vpop.eup %7597  ;;  %v3597_v50 = vmul.f32 1.442695, %v3569_v28  ;;  %v3626_v7 = vsel %vm1556_vm2, %v9506_v39, 0.0 }
 0x965   : > { %7607 = vpow2.f32 %v3599_v63  ;;  %3627 = vadd.xlane.f32.xlu1 %v3626_v7  ;;  %v3553_v8 = vpop.xlane.xlu0 %3552  ;;  %v3623_v47 = vsel %vm1556_vm2, %v9508_v13, 0.0  ;;  %v9547_v63 = vpop.permute.xlu1 %3928 }
 0x966   : > { %7609 = vpow2.f32 %v3597_v50  ;;  %v3571_v17 = vsub.f32 %v9426_v1, %v3553_v8  ;;  %3624 = vadd.xlane.f32.xlu0 %v3623_v47 }
 0x967   : > { %v9515_v32 = vpop.eup %7599 }
 0x968   : > { %v9517_v27 = vpop.eup %7601  ;;  %v3601_v40 = vmul.f32 1.442695, %v3571_v17  ;;  %v3632_v49 = vsel %vm1556_vm2, %v9515_v32, 0.0 }
 0x969   : > { %3633 = vadd.xlane.f32.xlu1 %v3632_v49  ;;  %v3629_v0 = vsel %vm1556_vm2, %v9517_v27, 0.0 }
 0x96a   : > { %7611 = vpow2.f32 %v3601_v40  ;;  %3630 = vadd.xlane.f32.xlu0 %v3629_v0 }
 0x96b   : > { %v9523_v51 = vpop.eup %7603 }
 0x96c   : > { %v9525_v21 = vpop.eup %7605  ;;  %v3638_v1 = vsel %vm1556_vm2, %v9523_v51, 0.0 }
 0x96d   : > { %3639 = vadd.xlane.f32.xlu1 %v3638_v1  ;;  %v3635_v30 = vsel %vm1556_vm2, %v9525_v21, 0.0 }
 0x96e   : > { %3636 = vadd.xlane.f32.xlu0 %v3635_v30 }
 0x96f   : > { %v9531_v10 = vpop.eup %7607 }
 0x970   : > { %v9533_v16 = vpop.eup %7609  ;;  %v3644_v41 = vsel %vm1556_vm2, %v9531_v10, 0.0 }
 0x971   : > { %3645 = vadd.xlane.f32.xlu1 %v3644_v41  ;;  %v3641_v23 = vsel %vm1556_vm2, %v9533_v16, 0.0 }
 0x972   : > { %3642 = vadd.xlane.f32.xlu0 %v3641_v23 }
 0x974   : > { %v9539_v14 = vpop.eup %7611 }
 0x975   : > { %v3647_v28 = vsel %vm1556_vm2, %v9539_v14, 0.0 }
 0x976   : > { %3648 = vadd.xlane.f32.xlu0 %v3647_v28 }
 0x98c   : > { %4079 = vrot.lane.b32.xlu0 %v8573_v48, %s8057_s10 }
 0x990   : > { %4077 = vrot.lane.b32.xlu0 %v8571_v20, %s8057_s10 }
 0x994   : > { %4181 = vrot.lane.b32.xlu0 %v8616_v33, %s8057_s10 }
 0x995   : > { %v3556_v50 = vpop.xlane.xlu1 %3555 }
 0x996   : > { %v3572_v7 = vsub.f32 %v9428_v26, %v3556_v50 }
 0x998   : > { %v3603_v8 = vmul.f32 1.442695, %v3572_v7  ;;  %4179 = vrot.lane.b32.xlu0 %v8613_v61, %s8057_s10  ;;  %v3882_v61 = vpop.permute.xlu0 %3881 }
 0x99a   : > { %7613 = vpow2.f32 %v3603_v8 }
 0x99c   : > { %4283 = vrot.lane.b32.xlu0 %v8661_v54, %s8057_s10  ;;  %v9572_v33 = vpop.permute.xlu0 %3975 }
 0x9a0   : > { %4281 = vrot.lane.b32.xlu0 %v8659_v52, %s8057_s10  ;;  %v9576_v52 = vpop.permute.xlu1 %4022 }
 0x9a4   : > { %v9558_v20 = vpop.eup %7613  ;;  %4385 = vrot.lane.b32.xlu0 %v8691_v29, %s8057_s10 }
 0x9a5   : > { %v3650_v48 = vsel %vm1556_vm2, %v9558_v20, 0.0 }
 0x9a6   : > { %3651 = vadd.xlane.f32.xlu1 %v3650_v48 }
 0x9a8   : > { %4383 = vrot.lane.b32.xlu0 %v8689_v12, %s8057_s10 }
 0x9af   : > { %v3607_v54 = vpop.xlane.xlu0 %3606 }
 0x9b0   : > { %7615 = vrcp.f32 %v3607_v54 }
 0x9b7   : > { %4130 = vrot.lane.b32.xlu1 %v8593_v44, %s8057_s10  ;;  %v3613_v44 = vpop.xlane.xlu0 %3612 }
 0x9bb   : > { %4128 = vrot.lane.b32.xlu1 %v8590_v57, %s8057_s10 }
 0x9bf   : > { %4232 = vrot.lane.b32.xlu1 %v8639_v35, %s8057_s10 }
 0x9c3   : > { %4230 = vrot.lane.b32.xlu1 %v8636_v31, %s8057_s10  ;;  %v7616_v31 = vpop.eup %7615 }
 0x9c7   : > { %4334 = vrot.lane.b32.xlu1 %v8676_v6, %s8057_s10  ;;  %v3669_v6 = vmul.f32 %v7616_v31, %v9466_v62 }
 0x9ca   : > { %v3610_v12 = vpop.xlane.xlu1 %3609 }
 0x9cb   : > { %7617 = vrcp.f32 %v3610_v12  ;;  %4332 = vrot.lane.b32.xlu1 %v8674_v5, %s8057_s10 }
 0x9cc   : > { %7619 = vrcp.f32 %v3613_v44 }
 0x9ce   : > { %v3616_v57 = vpop.xlane.xlu1 %3615 }
 0x9cf   : > { %7621 = vrcp.f32 %v3616_v57  ;;  %4436 = vrot.lane.b32.xlu1 %v8706_v3, %s8057_s10  ;;  %v3619_v3 = vpop.xlane.xlu0 %3618 }
 0x9d0   : > { %7623 = vrcp.f32 %v3619_v3 }
 0x9d3   : > { %4434 = vrot.lane.b32.xlu1 %v8704_v42, %s8057_s10 }
 0x9d5   : > { %v7618_v35 = vpop.eup %7617 }
 0x9d6   : > { %v3670_v29 = vmul.f32 %v7618_v35, %v9481_v25  ;;  %v7620_v26 = vpop.eup %7619 }
 0x9d7   : > { %v3671_v5 = vmul.f32 %v7620_v26, %v9471_v46 }
 0x9d8   : > { %v3685_v47 = vpack.c.bf16 %v3670_v29, %v3669_v6 }
 0x9d9   : > { %v7622_v17 = vpop.eup %7621 }
 0x9da   : > { %v3672_v40 = vmul.f32 %v7622_v17, %v9485_v15  ;;  %7053 = vmatmul.mubr.msk.bf16.vlgmr.msra.gmra.mrb[104].mxu0 %vm1556_vm2, %v3685_v47 }
 0x9db   : > { %7063 = vmatpush3.bf16.msra.mxu0 %v9489_v2  ;;  %7064 = vmatprep.mubr.msk.bf16.mxu0 %vm8054_vm0, %v10532_v4  ;;  %v7624_v2 = vpop.eup %7623 }
 0x9dc   : > { %v3686_v42 = vpack.c.bf16 %v3672_v40, %v3671_v5  ;;  %7074 = vmatprep.subr.bf16.mxu0 %v10532_v4 }
 0x9de   : > { %7059 = vmatmul.mubr.msk.bf16.vlgmr.msra.gmra.mrb[104].mxu1 %vm1556_vm2, %v3686_v42 }
 0x9df   : > { %7069 = vmatpush3.bf16.msra.mxu1 %v9491_v22  ;;  %7070 = vmatprep.mubr.msk.bf16.mxu1 %vm8054_vm0, %v10532_v4  ;;  %v3673_v22 = vmul.f32 %v7624_v2, %v9476_v37 }
 0x9e0   : > { %7080 = vmatprep.subr.bf16.mxu1 %v10532_v4 }
 0x9ee   : > { %v3622_v62 = vpop.xlane.xlu1 %3621 }
 0x9ef   : > { %7625 = vrcp.f32 %v3622_v62 }
 0x9f2   : > { %v3628_v46 = vpop.xlane.xlu1 %3627 }
 0x9f3   : > { %7627 = vrcp.f32 %v3628_v46  ;;  %v3625_v25 = vpop.xlane.xlu0 %3624 }
 0x9f4   : > { %7629 = vrcp.f32 %v3625_v25 }
 0x9f6   : > { %v3634_v15 = vpop.xlane.xlu1 %3633 }
 0x9f7   : > { %7631 = vrcp.f32 %v3634_v15  ;;  %v3631_v49 = vpop.xlane.xlu0 %3630 }
 0x9f8   : > { %7633 = vrcp.f32 %v3631_v49 }
 0x9f9   : > { %v7626_v0 = vpop.eup %7625 }
 0x9fa   : > { %v3674_v1 = vmul.f32 %v7626_v0, %v9500_v34  ;;  %v3640_v30 = vpop.xlane.xlu1 %3639 }
 0x9fb   : > { %7635 = vrcp.f32 %v3640_v30  ;;  %v3637_v41 = vpop.xlane.xlu0 %3636 }
 0x9fc   : > { %7637 = vrcp.f32 %v3637_v41  ;;  %v3687_v23 = vpack.c.bf16 %v3674_v1, %v3673_v22 }
 0x9fd   : > { %v7628_v28 = vpop.eup %7627 }
 0x9fe   : > { %v7630_v50 = vpop.eup %7629  ;;  %7065 = vmatmul.mubr.msk.bf16.vlgmr.msra.gmra.mrb[108].mxu0 %vm1556_vm2, %v3687_v23  ;;  %v3646_v7 = vpop.xlane.xlu1 %3645  ;;  %v3676_v8 = vmul.f32 %v7628_v28, %v9506_v39 }
 0x9ff   : > { %v3675_v48 = vmul.f32 %v7630_v50, %v9508_v13  ;;  %7075 = vmatpush3.bf16.msra.mxu0 %v3882_v61  ;;  %7639 = vrcp.f32 %v3646_v7  ;;  %v3643_v54 = vpop.xlane.xlu0 %3642  ;;  %7076 = vmatprep.mubr.msk.bf16.mxu0 %vm8054_vm0, %v10532_v4 }
 0xa00   : > { %7641 = vrcp.f32 %v3643_v54  ;;  %7086 = vmatprep.subr.bf16.mxu0 %v10532_v4 }
 0xa01   : > { %v7632_v37 = vpop.eup %7631  ;;  %v3688_v34 = vpack.c.bf16 %v3676_v8, %v3675_v48 }
 0xa02   : > { %v7634_v44 = vpop.eup %7633  ;;  %v3678_v12 = vmul.f32 %v7632_v37, %v9515_v32 }
 0xa03   : > { %v3677_v57 = vmul.f32 %v7634_v44, %v9517_v27  ;;  %v3649_v31 = vpop.xlane.xlu0 %3648  ;;  %7071 = vmatmul.mubr.msk.bf16.vlgmr.msra.gmra.mrb[108].mxu1 %vm1556_vm2, %v3688_v34 }
 0xa04   : > { %7081 = vmatpush3.bf16.msra.mxu1 %v9547_v63  ;;  %7082 = vmatprep.mubr.msk.bf16.mxu1 %vm8054_vm0, %v10532_v4  ;;  %7643 = vrcp.f32 %v3649_v31 }
 0xa05   : > { %v7636_v39 = vpop.eup %7635  ;;  %v3689_v13 = vpack.c.bf16 %v3678_v12, %v3677_v57  ;;  %7092 = vmatprep.subr.bf16.mxu1 %v10532_v4 }
 0xa06   : > { %v7638_v61 = vpop.eup %7637  ;;  %v3680_v35 = vmul.f32 %v7636_v39, %v9523_v51 }
 0xa07   : > { %v3679_v6 = vmul.f32 %v7638_v61, %v9525_v21  ;;  %v4080_v32 = vpop.permute.xlu0 %4079  ;;  %7077 = vmatmul.mubr.msk.bf16.vlgmr.msra.gmra.mrb[112].mxu0 %vm1556_vm2, %v3689_v13 }
 0xa08   : > { %7087 = vmatpush3.bf16.msra.mxu0 %v9572_v33  ;;  %7088 = vmatprep.mubr.msk.bf16.mxu0 %vm8054_vm0, %v10532_v4  ;;  %v4085_v17 = vsel %vm1179_vm1, %v4080_v32, 0 }
 0xa09   : > { %v7640_v27 = vpop.eup %7639  ;;  %v3690_v63 = vpack.c.bf16 %v3680_v35, %v3679_v6  ;;  %7098 = vmatprep.subr.bf16.mxu0 %v10532_v4 }
 0xa0a   : > { %v7642_v29 = vpop.eup %7641  ;;  %v3682_v26 = vmul.f32 %v7640_v27, %v9531_v10 }
 0xa0b   : > { %v3681_v47 = vmul.f32 %v7642_v29, %v9533_v16  ;;  %v4078_v51 = vpop.permute.xlu0 %4077  ;;  %7083 = vmatmul.mubr.msk.bf16.vlgmr.msra.gmra.mrb[112].mxu1 %vm1556_vm2, %v3690_v63 }
 0xa0c   : > { %7093 = vmatpush3.bf16.msra.mxu1 %v9576_v52  ;;  %7094 = vmatprep.mubr.msk.bf16.mxu1 %vm8054_vm0, %v10532_v4 }
 0xa0d   : > { %v3691_v21 = vpack.c.bf16 %v3682_v26, %v3681_v47  ;;  %7104 = vmatprep.subr.bf16.mxu1 %v10532_v4 }
 0xa0e   : > { %v7644_v2 = vpop.eup %7643 }
 0xa0f   : > { %v4182_v33 = vpop.permute.xlu0 %4181  ;;  %7089 = vmatmul.mubr.msk.bf16.vlgmr.msra.gmra.mrb[116].mxu0 %vm1556_vm2, %v3691_v21  ;;  %v3683_v0 = vmul.f32 %v7644_v2, %v9539_v14 }
 0xa10   : > { %7100 = vmatprep.mubr.msk.bf16.mxu0 %vm8054_vm0, %v10532_v4  ;;  %v4187_v16 = vsel %vm1179_vm1, %v4182_v33, 0 }
 0xa11   : > { %7099 = vmatpush3.bf16.xpose.msra.mxu0 %v4085_v17 }
 0xa12   : > { %7110 = vmatprep.subr.bf16.mxu0 %v10532_v4 }
 0xa13   : > { %v4180_v10 = vpop.permute.xlu0 %4179 }
 0xa17   : > { %v4284_v52 = vpop.permute.xlu0 %4283 }
 0xa18   : > { %7101 = vmatmul.mubr.msk.bf16.vlgmr.msra.gmra.mrb[120].mxu0 %vm1179_vm1, %v4078_v51  ;;  %v4289_v40 = vsel %vm1179_vm1, %v4284_v52, 0 }
 0xa19   : > { %7111 = vmatpush3.bf16.xpose.msra.mxu0 %v4187_v16  ;;  %7112 = vmatprep.mubr.msk.bf16.mxu0 %vm8054_vm0, %v10532_v4 }
 0xa1a   : > { %7122 = vmatprep.subr.bf16.mxu0 %v10532_v4 }
 0xa1b   : > { %v4282_v5 = vpop.permute.xlu0 %4281 }
 0xa1f   : > { %v4386_v42 = vpop.permute.xlu0 %4385 }
 0xa20   : > { %7113 = vmatmul.mubr.msk.bf16.vlgmr.msra.gmra.mrb[124].mxu0 %vm1179_vm1, %v4180_v10  ;;  %v4391_v3 = vsel %vm1179_vm1, %v4386_v42, 0 }
 0xa21   : > { %7123 = vmatpush3.bf16.xpose.msra.mxu0 %v4289_v40  ;;  %7124 = vmatprep.mubr.msk.bf16.mxu0 %vm8054_vm0, %v10532_v4 }
 0xa22   : > { %7134 = vmatprep.subr.bf16.mxu0 %v10532_v4 }
 0xa23   : > { %v4384_v62 = vpop.permute.xlu0 %4383 }
 0xa28   : > { %7125 = vmatmul.mubr.msk.bf16.vlgmr.msra.gmra.mrb[128].mxu0 %vm1179_vm1, %v4282_v5 }
 0xa29   : > { %7135 = vmatpush3.bf16.xpose.msra.mxu0 %v4391_v3  ;;  %7136 = vmatprep.mubr.msk.bf16.mxu0 %vm8054_vm0, %v10532_v4 }
 0xa2a   : > { %7146 = vmatprep.subr.bf16.mxu0 %v10532_v4 }
 0xa30   : > { %7137 = vmatmul.mubr.msk.bf16.vlgmr.msra.gmra.mrb[132].mxu0 %vm1179_vm1, %v4384_v62 }
 0xa31   : > { %7148 = vmatprep.mubr.msk.bf16.mxu0 %vm8054_vm0, %v10532_v4 }
 0xa33   : > { %v3652_v46 = vpop.xlane.xlu1 %3651 }
 0xa34   : > { %7645 = vrcp.f32 %v3652_v46 }
 0xa37   : > { %v4131_v25 = vpop.permute.xlu1 %4130 }
 0xa38   : > { %v4136_v41 = vsel %vm1179_vm1, %v4131_v25, 0 }
 0xa3b   : > { %v4129_v15 = vpop.permute.xlu1 %4128 }
 0xa3e   : > { %v7646_v49 = vpop.eup %7645 }
 0xa3f   : > { %v3684_v22 = vmul.f32 %v7646_v49, %v9558_v20  ;;  %v4233_v1 = vpop.permute.xlu1 %4232 }
 0xa40   : > { %v4238_v28 = vsel %vm1179_vm1, %v4233_v1, 0 }
 0xa41   : > { %v3692_v30 = vpack.c.bf16 %v3684_v22, %v3683_v0 }
 0xa43   : > { %7095 = vmatmul.mubr.msk.bf16.vlgmr.msra.gmra.mrb[116].mxu1 %vm1556_vm2, %v3692_v30  ;;  %v4231_v23 = vpop.permute.xlu1 %4230 }
 0xa44   : > { %7105 = vmatpush3.bf16.xpose.msra.mxu1 %v4136_v41  ;;  %7106 = vmatprep.mubr.msk.bf16.mxu1 %vm8054_vm0, %v10532_v4 }
 0xa45   : > { %7116 = vmatprep.subr.bf16.mxu1 %v10532_v4 }
 0xa47   : > { %v4335_v14 = vpop.permute.xlu1 %4334 }
 0xa48   : > { %v4340_v50 = vsel %vm1179_vm1, %v4335_v14, 0 }
 0xa4b   : > { %7107 = vmatmul.mubr.msk.bf16.vlgmr.msra.gmra.mrb[120].mxu1 %vm1179_vm1, %v4129_v15  ;;  %v4333_v20 = vpop.permute.xlu1 %4332 }
 0xa4c   : > { %7117 = vmatpush3.bf16.xpose.msra.mxu1 %v4238_v28  ;;  %7118 = vmatprep.mubr.msk.bf16.mxu1 %vm8054_vm0, %v10532_v4 }
 0xa4d   : > { %7128 = vmatprep.subr.bf16.mxu1 %v10532_v4 }
 0xa4f   : > { %v4437_v7 = vpop.permute.xlu1 %4436 }
 0xa50   : > { %v4442_v8 = vsel %vm1179_vm1, %v4437_v7, 0 }
 0xa53   : > { %7119 = vmatmul.mubr.msk.bf16.vlgmr.msra.gmra.mrb[124].mxu1 %vm1179_vm1, %v4231_v23  ;;  %v4435_v48 = vpop.permute.xlu1 %4434 }
 0xa54   : > { %7129 = vmatpush3.bf16.xpose.msra.mxu1 %v4340_v50  ;;  %7130 = vmatprep.mubr.msk.bf16.mxu1 %vm8054_vm0, %v10532_v4 }
 0xa55   : > { %7140 = vmatprep.subr.bf16.mxu1 %v10532_v4 }
 0xa5b   : > { %7131 = vmatmul.mubr.msk.bf16.vlgmr.msra.gmra.mrb[128].mxu1 %vm1179_vm1, %v4333_v20 }
 0xa5c   : > { %7141 = vmatpush3.bf16.xpose.msra.mxu1 %v4442_v8  ;;  %7142 = vmatprep.mubr.msk.bf16.mxu1 %vm8054_vm0, %v10532_v4 }
 0xa5d   : > { %7152 = vmatprep.subr.bf16.mxu1 %v10532_v4 }
 0xa63   : > { %7143 = vmatmul.mubr.msk.bf16.vlgmr.msra.gmra.mrb[132].mxu1 %vm1179_vm1, %v4435_v48 }
 0xa64   : > { %7154 = vmatprep.mubr.msk.bf16.mxu1 %vm8054_vm0, %v10532_v4 }
 0xaad   : > { %v9677_v54 = vpop.f32.mrb[104].mxu0 }
 0xaae   : > { %v7054_v37 = vpop.f32.mrb[105].mxu0 }
 0xaaf   : > { %v9679_v34 = vpop.f32.mrb[106].mxu0 }
 0xab0   : > { %v4069_v44 = vpack.c.bf16 %v9679_v34, %v9677_v54  ;;  %v7055_v12 = vpop.f32.mrb[107].mxu0  ;;  %v10543_v34 = vpack.c.bf16 %v9342_v58, %v9340_v36 }
 0xab1   : > { %v9683_v57 = vpop.f32.mrb[104].mxu1 }
 0xab2   : > { %v7060_v31 = vpop.f32.mrb[105].mxu1 }
 0xab3   : > { %v9685_v39 = vpop.f32.mrb[106].mxu1 }
 0xab4   : > { %v4070_v13 = vpack.c.bf16 %v9685_v39, %v9683_v57  ;;  %v7061_v61 = vpop.f32.mrb[107].mxu1 }
 0xad1   : > { %v9689_v35 = vpop.f32.mrb[108].mxu0 }
 0xad2   : > { %v7066_v6 = vpop.f32.mrb[109].mxu0 }
 0xad3   : > { %v9691_v32 = vpop.f32.mrb[110].mxu0 }
 0xad4   : > { %v4071_v27 = vpack.c.bf16 %v9691_v32, %v9689_v35  ;;  %v7067_v63 = vpop.f32.mrb[111].mxu0  ;;  %v7382_v35 = vld [vmem:[#allocation7 + $0x38] sm:$0xff]  }
 0xad6   : > { %v9695_v29 = vpop.f32.mrb[108].mxu1 }
 0xad7   : > { %v7072_v26 = vpop.f32.mrb[109].mxu1 }
 0xad8   : > { %v9697_v47 = vpop.f32.mrb[110].mxu1 }
 0xad9   : > { %v4072_v51 = vpack.c.bf16 %v9697_v47, %v9695_v29  ;;  %v7073_v21 = vpop.f32.mrb[111].mxu1  ;;  %v10551_v29 = vld [vmem:[#allocation20_spill] sm:$0xff]  ;;  %v10552_v47 = vld [vmem:[#allocation19_spill] sm:$0xff] }
 0xada   : > { %v9701_v33 = vpop.f32.mrb[112].mxu0 }
 0xadb   : > { %v7078_v17 = vpop.f32.mrb[113].mxu0 }
 0xadc   : > { %v9703_v10 = vpop.f32.mrb[114].mxu0 }
 0xadd   : > { %v4073_v16 = vpack.c.bf16 %v9703_v10, %v9701_v33  ;;  %v7079_v52 = vpop.f32.mrb[115].mxu0 }
 0xade   : > { %v9707_v5 = vpop.f32.mrb[112].mxu1 }
 0xadf   : > { %v7084_v40 = vpop.f32.mrb[113].mxu1 }
 0xae0   : > { %v9709_v42 = vpop.f32.mrb[114].mxu1 }
 0xae1   : > { %v7085_v62 = vpop.f32.mrb[115].mxu1 }
 0xae2   : > { %v9713_v46 = vpop.f32.mrb[116].mxu0 }
 0xae3   : > { %v7090_v25 = vpop.f32.mrb[117].mxu0 }
 0xae4   : > { %v9715_v15 = vpop.f32.mrb[118].mxu0 }
 0xae5   : > { %v7091_v49 = vpop.f32.mrb[119].mxu0 }
 0xaeb   : > { %v9719_v0 = vpop.f32.mrb[120].mxu0 }
 0xaec   : > { %v7102_v22 = vpop.f32.mrb[121].mxu0  ;;  %v4485_v1 = vsel %vm1556_vm2, %v9719_v0, -inf }
 0xaed   : > { %4486 = vmax.xlane.f32.xlu0 %v4485_v1  ;;  %v9723_v30 = vpop.f32.mrb[122].mxu0 }
 0xaee   : > { %v7103_v41 = vpop.f32.mrb[123].mxu0  ;;  %v4488_v23 = vsel %vm1556_vm2, %v9723_v30, -inf }
 0xaef   : > { %4489 = vmax.xlane.f32.xlu1 %v4488_v23 }
 0xaf3   : > { %v9727_v28 = vpop.f32.mrb[124].mxu0 }
 0xaf4   : > { %v7114_v14 = vpop.f32.mrb[125].mxu0 }
 0xaf5   : > { %v9729_v20 = vpop.f32.mrb[126].mxu0 }
 0xaf6   : > { %v7115_v50 = vpop.f32.mrb[127].mxu0  ;;  %v4500_v7 = vsel %vm1556_vm2, %v9729_v20, -inf }
 0xaf7   : > { %4501 = vmax.xlane.f32.xlu1 %v4500_v7 }
 0xafb   : > { %v9733_v8 = vpop.f32.mrb[128].mxu0 }
 0xafc   : > { %v7126_v48 = vpop.f32.mrb[129].mxu0 }
 0xafd   : > { %v9735_v37 = vpop.f32.mrb[130].mxu0 }
 0xafe   : > { %v7127_v12 = vpop.f32.mrb[131].mxu0 }
 0xb03   : > { %v9737_v31 = vpop.f32.mrb[132].mxu0 }
 0xb04   : > { %v7138_v61 = vpop.f32.mrb[133].mxu0 }
 0xb05   : > { %v9739_v6 = vpop.f32.mrb[134].mxu0 }
 0xb06   : > { %v7139_v63 = vpop.f32.mrb[135].mxu0 }
 0xb08   : > { %4716 = vrot.lane.b32.xlu1 %v8581_v24, %s8057_s10  ;;  %v4497_v24 = vsel %vm1556_vm2, %v9727_v28, -inf }
 0xb16   : > { %v9743_v26 = vpop.f32.mrb[116].mxu1 }
 0xb17   : > { %v7096_v21 = vpop.f32.mrb[117].mxu1 }
 0xb18   : > { %v9745_v17 = vpop.f32.mrb[118].mxu1  ;;  %v4512_v21 = vsel %vm1556_vm2, %v9735_v37, -inf }
 0xb19   : > { %v7097_v40 = vpop.f32.mrb[119].mxu1 }
 0xb1e   : > { %v9749_v62 = vpop.f32.mrb[120].mxu1 }
 0xb1f   : > { %v7108_v25 = vpop.f32.mrb[121].mxu1  ;;  %v4491_v49 = vsel %vm1556_vm2, %v9749_v62, -inf }
 0xb20   : > { %4492 = vmax.xlane.f32.xlu0 %v4491_v49  ;;  %v9753_v22 = vpop.f32.mrb[122].mxu1 }
 0xb21   : > { %v7109_v1 = vpop.f32.mrb[123].mxu1  ;;  %v4494_v14 = vsel %vm1556_vm2, %v9753_v22, -inf }
 0xb24   : > { %4498 = vmax.xlane.f32.xlu0 %v4497_v24 }
 0xb26   : > { %v9757_v41 = vpop.f32.mrb[124].mxu1 }
 0xb27   : > { %v7120_v23 = vpop.f32.mrb[125].mxu1  ;;  %v4503_v48 = vsel %vm1556_vm2, %v9757_v41, -inf }
 0xb28   : > { %4495 = vmax.xlane.f32.xlu0 %v4494_v14  ;;  %v9761_v50 = vpop.f32.mrb[126].mxu1  ;;  %v4524_v23 = vsel %vm1556_vm2, %v9739_v6, -inf }
 0xb29   : > { %v7121_v7 = vpop.f32.mrb[127].mxu1  ;;  %v4506_v12 = vsel %vm1556_vm2, %v9761_v50, -inf }
 0xb2c   : > { %4504 = vmax.xlane.f32.xlu0 %v4503_v48  ;;  %4507 = vmax.xlane.f32.xlu1 %v4506_v12  ;;  %v4509_v12 = vsel %vm1556_vm2, %v9733_v8, -inf }
 0xb2e   : > { %v9767_v61 = vpop.f32.mrb[128].mxu1 }
 0xb2f   : > { %v7132_v63 = vpop.f32.mrb[129].mxu1 }
 0xb30   : > { %4513 = vmax.xlane.f32.xlu1 %v4512_v21  ;;  %v9771_v40 = vpop.f32.mrb[130].mxu1  ;;  %v4515_v63 = vsel %vm1556_vm2, %v9767_v61, -inf  ;;  %v4521_v21 = vsel %vm1556_vm2, %v9737_v31, -inf }
 0xb31   : > { %v7133_v25 = vpop.f32.mrb[131].mxu1  ;;  %v4518_v49 = vsel %vm1556_vm2, %v9771_v40, -inf }
 0xb34   : > { %4519 = vmax.xlane.f32.xlu1 %v4518_v49 }
 0xb36   : > { %v9775_v1 = vpop.f32.mrb[132].mxu1 }
 0xb37   : > { %v7144_v24 = vpop.f32.mrb[133].mxu1  ;;  %v4527_v25 = vsel %vm1556_vm2, %v9775_v1, -inf }
 0xb38   : > { %4525 = vmax.xlane.f32.xlu1 %v4524_v23  ;;  %v9779_v14 = vpop.f32.mrb[134].mxu1 }
 0xb39   : > { %v7145_v7 = vpop.f32.mrb[135].mxu1  ;;  %v4530_v48 = vsel %vm1556_vm2, %v9779_v14, -inf }
 0xb3c   : > { %4531 = vmax.xlane.f32.xlu1 %v4530_v48 }
 0xb42   : > { %4669 = vrot.lane.b32.xlu0 %v8583_v56, %s8057_s10 }
 0xb61   : > { %4510 = vmax.xlane.f32.xlu0 %v4509_v12 }
 0xb65   : > { %4516 = vmax.xlane.f32.xlu0 %v4515_v63 }
 0xb69   : > { %4522 = vmax.xlane.f32.xlu0 %v4521_v21 }
 0xb6d   : > { %4528 = vmax.xlane.f32.xlu0 %v4527_v25 }
 0xb7a   : > { %v4487_v49 = vpop.xlane.xlu0 %4486 }
 0xb7b   : > { %v4533_v24 = vsub.f32 %v9719_v0, %v4487_v49 }
 0xb7c   : > { %v4490_v56 = vpop.xlane.xlu1 %4489 }
 0xb7d   : > { %v4549_v23 = vmul.f32 1.442695, %v4533_v24  ;;  %v4534_v7 = vsub.f32 %v9723_v30, %v4490_v56 }
 0xb7f   : > { %7647 = vpow2.f32 %v4549_v23  ;;  %v4551_v48 = vmul.f32 1.442695, %v4534_v7 }
 0xb81   : > { %7649 = vpow2.f32 %v4551_v48 }
 0xb84   : > { %v4502_v12 = vpop.xlane.xlu1 %4501 }
 0xb85   : > { %v4538_v23 = vsub.f32 %v9729_v20, %v4502_v12 }
 0xb88   : > { %v4717_v63 = vpop.permute.xlu1 %4716 }
 0xb89   : > { %v9795_v52 = vpop.eup %7647  ;;  %7153 = vmatpush3.bf16.msra.mxu1 %v4717_v63  ;;  %v4559_v63 = vmul.f32 1.442695, %v4538_v23 }
 0xb8a   : > { %v4581_v21 = vsel %vm1556_vm2, %v9795_v52, 0.0  ;;  %7164 = vmatprep.subr.bf16.mxu1 %v10532_v4 }
 0xb8b   : > { %v9800_v25 = vpop.eup %7649  ;;  %4582 = vadd.xlane.f32.xlu0 %v4581_v21 }
 0xb8c   : > { %v4584_v0 = vsel %vm1556_vm2, %v9800_v25, 0.0 }
 0xb8d   : > { %4585 = vadd.xlane.f32.xlu1 %v4584_v0 }
 0xb9e   : > { %4810 = vrot.lane.b32.xlu1 %v8602_v11, %s8057_s10 }
 0xbad   : > { %v4493_v30 = vpop.xlane.xlu0 %4492 }
 0xbae   : > { %v4535_v49 = vsub.f32 %v9749_v62, %v4493_v30 }
 0xbb0   : > { %v4553_v24 = vmul.f32 1.442695, %v4535_v49 }
 0xbb1   : > { %v4499_v56 = vpop.xlane.xlu0 %4498 }
 0xbb2   : > { %7651 = vpow2.f32 %v4553_v24  ;;  %v4537_v49 = vsub.f32 %v9727_v28, %v4499_v56 }
 0xbb4   : > { %v4557_v24 = vmul.f32 1.442695, %v4537_v49 }
 0xbb5   : > { %v4496_v7 = vpop.xlane.xlu0 %4495 }
 0xbb6   : > { %v4536_v48 = vsub.f32 %v9753_v22, %v4496_v7 }
 0xbb8   : > { %v4555_v21 = vmul.f32 1.442695, %v4536_v48 }
 0xbb9   : > { %v4505_v3 = vpop.xlane.xlu0 %4504  ;;  %v4508_v30 = vpop.xlane.xlu1 %4507 }
 0xbba   : > { %7653 = vpow2.f32 %v4555_v21  ;;  %v4539_v23 = vsub.f32 %v9757_v41, %v4505_v3 }
 0xbbb   : > { %7655 = vpow2.f32 %v4559_v63 }
 0xbbc   : > { %v9809_v2 = vpop.eup %7651  ;;  %7657 = vpow2.f32 %v4557_v24  ;;  %v4561_v48 = vmul.f32 1.442695, %v4539_v23 }
 0xbbd   : > { %v4670_v0 = vpop.permute.xlu0 %4669  ;;  %v4587_v11 = vsel %vm1556_vm2, %v9809_v2, 0.0  ;;  %v4514_v7 = vpop.xlane.xlu1 %4513 }
 0xbbe   : > { %7147 = vmatpush3.bf16.msra.mxu0 %v4670_v0  ;;  %4588 = vadd.xlane.f32.xlu0 %v4587_v11  ;;  %v4542_v63 = vsub.f32 %v9735_v37, %v4514_v7  ;;  %7659 = vpow2.f32 %v4561_v48  ;;  %v4540_v11 = vsub.f32 %v9761_v50, %v4508_v30 }
 0xbbf   : > { %7158 = vmatprep.subr.bf16.mxu0 %v10532_v4 }
 0xbc0   : > { %v4567_v0 = vmul.f32 1.442695, %v4542_v63  ;;  %v4563_v56 = vmul.f32 1.442695, %v4540_v11 }
 0xbc1   : > { %v4520_v21 = vpop.xlane.xlu1 %4519 }
 0xbc2   : > { %7661 = vpow2.f32 %v4567_v0  ;;  %v4544_v30 = vsub.f32 %v9771_v40, %v4520_v21 }
 0xbc4   : > { %v9814_v62 = vpop.eup %7653  ;;  %v4571_v0 = vmul.f32 1.442695, %v4544_v30 }
 0xbc5   : > { %v4590_v20 = vsel %vm1556_vm2, %v9814_v62, 0.0  ;;  %v9818_v22 = vpop.eup %7655 }
 0xbc6   : > { %4591 = vadd.xlane.f32.xlu1 %v4590_v20  ;;  %v4596_v12 = vsel %vm1556_vm2, %v9818_v22, 0.0  ;;  %v4526_v20 = vpop.xlane.xlu1 %4525 }
 0xbc7   : > { %v4546_v3 = vsub.f32 %v9739_v6, %v4526_v20 }
 0xbc9   : > { %v4575_v23 = vmul.f32 1.442695, %v4546_v3 }
 0xbca   : > { %4597 = vadd.xlane.f32.xlu1 %v4596_v12 }
 0xbd4   : > { %4763 = vrot.lane.b32.xlu0 %v8606_v53, %s8057_s10  ;;  %v9828_v53 = vpop.eup %7657 }
 0xbd5   : > { %v4593_v37 = vsel %vm1556_vm2, %v9828_v53, 0.0  ;;  %v9834_v24 = vpop.eup %7659 }
 0xbd6   : > { %v4599_v6 = vsel %vm1556_vm2, %v9834_v24, 0.0  ;;  %v9840_v48 = vpop.eup %7661 }
 0xbd7   : > { %v4608_v20 = vsel %vm1556_vm2, %v9840_v48, 0.0 }
 0xbee   : > { %v4511_v12 = vpop.xlane.xlu0 %4510 }
 0xbef   : > { %v4541_v28 = vsub.f32 %v9733_v8, %v4511_v12 }
 0xbf1   : > { %v4565_v41 = vmul.f32 1.442695, %v4541_v28 }
 0xbf2   : > { %v4517_v49 = vpop.xlane.xlu0 %4516 }
 0xbf3   : > { %7663 = vpow2.f32 %v4565_v41  ;;  %v4543_v50 = vsub.f32 %v9767_v61, %v4517_v49  ;;  %4594 = vadd.xlane.f32.xlu0 %v4593_v37 }
 0xbf4   : > { %7665 = vpow2.f32 %v4563_v56 }
 0xbf5   : > { %v4569_v7 = vmul.f32 1.442695, %v4543_v50 }
 0xbf6   : > { %v4523_v8 = vpop.xlane.xlu0 %4522 }
 0xbf7   : > { %7667 = vpow2.f32 %v4569_v7  ;;  %v4545_v63 = vsub.f32 %v9737_v31, %v4523_v8  ;;  %4600 = vadd.xlane.f32.xlu0 %v4599_v6  ;;  %v4532_v6 = vpop.xlane.xlu1 %4531 }
 0xbf8   : > { %7669 = vpow2.f32 %v4575_v23 }
 0xbf9   : > { %v4573_v11 = vmul.f32 1.442695, %v4545_v63 }
 0xbfa   : > { %v4529_v61 = vpop.xlane.xlu0 %4528 }
 0xbfb   : > { %7671 = vpow2.f32 %v4573_v11  ;;  %v4547_v40 = vsub.f32 %v9775_v1, %v4529_v61  ;;  %4609 = vadd.xlane.f32.xlu0 %v4608_v20  ;;  %v10542_v20 = vpack.c.bf16 %v9336_v38, %v9334_v59 }
 0xbfc   : > { %7673 = vpow2.f32 %v4571_v0 }
 0xbfd   : > { %v9846_v21 = vpop.eup %7663  ;;  %v4577_v12 = vmul.f32 1.442695, %v4547_v40 }
 0xbfe   : > { %v4605_v28 = vsel %vm1556_vm2, %v9846_v21, 0.0  ;;  %v9850_v31 = vpop.eup %7665 }
 0xbff   : > { %7675 = vpow2.f32 %v4577_v12  ;;  %4606 = vadd.xlane.f32.xlu1 %v4605_v28  ;;  %v4602_v1 = vsel %vm1556_vm2, %v9850_v31, 0.0 }
 0xc01   : > { %v9852_v56 = vpop.eup %7667 }
 0xc02   : > { %v4611_v3 = vsel %vm1556_vm2, %v9852_v56, 0.0  ;;  %v9858_v41 = vpop.eup %7669 }
 0xc03   : > { %4612 = vadd.xlane.f32.xlu0 %v4611_v3  ;;  %4603 = vadd.xlane.f32.xlu1 %v4602_v1  ;;  %v4620_v37 = vsel %vm1556_vm2, %v9858_v41, 0.0 }
 0xc05   : > { %v9860_v49 = vpop.eup %7671 }
 0xc06   : > { %v4617_v50 = vsel %vm1556_vm2, %v9860_v49, 0.0  ;;  %v9866_v30 = vpop.eup %7673 }
 0xc07   : > { %4621 = vadd.xlane.f32.xlu0 %v4620_v37  ;;  %4618 = vadd.xlane.f32.xlu1 %v4617_v50  ;;  %v4614_v8 = vsel %vm1556_vm2, %v9866_v30, 0.0 }
 0xc09   : > { %v9868_v23 = vpop.eup %7675 }
 0xc0a   : > { %v4623_v7 = vsel %vm1556_vm2, %v9868_v23, 0.0 }
 0xc0b   : > { %4624 = vadd.xlane.f32.xlu0 %v4623_v7  ;;  %4615 = vadd.xlane.f32.xlu1 %v4614_v8 }
 0xc18   : > { %v4583_v63 = vpop.xlane.xlu0 %4582 }
 0xc19   : > { %7677 = vrcp.f32 %v4583_v63 }
 0xc1a   : > { %v4586_v0 = vpop.xlane.xlu1 %4585 }
 0xc1b   : > { %7679 = vrcp.f32 %v4586_v0 }
 0xc1c   : > { %4904 = vrot.lane.b32.xlu1 %v8625_v18, %s8057_s10  ;;  %v4548_v18 = vsub.f32 %v9779_v14, %v4532_v6 }
 0xc20   : > { %4951 = vrot.lane.b32.xlu1 %v8652_v45, %s8057_s10 }
 0xc21   : > { %4857 = vrot.lane.b32.xlu0 %v8629_v19, %s8057_s10  ;;  %v4579_v19 = vmul.f32 1.442695, %v4548_v18 }
 0xc23   : > { %v7678_v11 = vpop.eup %7677  ;;  %7681 = vpow2.f32 %v4579_v19 }
 0xc24   : > { %v4645_v40 = vmul.f32 %v7678_v11, %v9795_v52  ;;  %v4811_v52 = vpop.permute.xlu1 %4810 }
 0xc25   : > { %v7680_v61 = vpop.eup %7679  ;;  %5061 = vrot.lane.b32.xlu0 %v10542_v20, %s8057_s10 }
 0xc26   : > { %v4646_v12 = vmul.f32 %v7680_v61, %v9800_v25 }
 0xc28   : > { %v4661_v28 = vpack.c.bf16 %v4646_v12, %v4645_v40 }
 0xc29   : > { %5085 = vrot.lane.b32.xlu0 %v4069_v44, %s8056_s18 }
 0xc2a   : > { %7149 = vmatmul.mubr.msk.bf16.vlgmr.msra.gmra.mrb[136].mxu0 %vm1556_vm2, %v4661_v28 }
 0xc2b   : > { %7160 = vmatprep.mubr.msk.bf16.mxu0 %vm8054_vm0, %v10532_v4 }
 0xc2d   : > { %v9894_v45 = vpop.eup %7681 }
 0xc2e   : > { %v4626_v59 = vsel %vm1556_vm2, %v9894_v45, 0.0 }
 0xc44   : > { %4627 = vadd.xlane.f32.xlu1 %v4626_v59 }
 0xc4b   : > { %v4589_v38 = vpop.xlane.xlu0 %4588 }
 0xc4c   : > { %7683 = vrcp.f32 %v4589_v38 }
 0xc4f   : > { %v4764_v25 = vpop.permute.xlu0 %4763 }
 0xc50   : > { %7159 = vmatpush3.bf16.msra.mxu0 %v4764_v25 }
 0xc51   : > { %7170 = vmatprep.subr.bf16.mxu0 %v10532_v4 }
 0xc53   : > { %v4592_v54 = vpop.xlane.xlu1 %4591 }
 0xc54   : > { %7685 = vrcp.f32 %v4592_v54 }
 0xc55   : > { %4998 = vrot.lane.b32.xlu1 %v8648_v43, %s8057_s10 }
 0xc56   : > { %v7684_v44 = vpop.eup %7683 }
 0xc57   : > { %v4647_v3 = vmul.f32 %v7684_v44, %v9809_v2  ;;  %v4598_v43 = vpop.xlane.xlu1 %4597 }
 0xc58   : > { %7687 = vrcp.f32 %v4598_v43 }
 0xc59   : > { %5063 = vrot.lane.b32.xlu1 %v10543_v34, %s8057_s10 }
 0xc5d   : > { %5087 = vrot.lane.b32.xlu1 %v4070_v13, %s8056_s18 }
 0xc5e   : > { %v7686_v14 = vpop.eup %7685 }
 0xc5f   : > { %v4648_v1 = vmul.f32 %v7686_v14, %v9814_v62 }
 0xc61   : > { %v4662_v37 = vpack.c.bf16 %v4648_v1, %v4647_v3 }
 0xc62   : > { %v7688_v57 = vpop.eup %7687 }
 0xc63   : > { %7155 = vmatmul.mubr.msk.bf16.vlgmr.msra.gmra.mrb[136].mxu1 %vm1556_vm2, %v4662_v37  ;;  %v4650_v13 = vmul.f32 %v7688_v57, %v9818_v22  ;;  %v10544_v57 = vmov 0  }
 0xc64   : > { %7165 = vmatpush3.bf16.msra.mxu1 %v4811_v52  ;;  %7166 = vmatprep.mubr.msk.bf16.mxu1 %vm8054_vm0, %v10532_v4 }
 0xc65   : > { %7176 = vmatprep.subr.bf16.mxu1 %v10532_v4 }
 0xc80   : > { %v4595_v36 = vpop.xlane.xlu0 %4594 }
 0xc81   : > { %7689 = vrcp.f32 %v4595_v36 }
 0xc84   : > { %v4601_v58 = vpop.xlane.xlu0 %4600 }
 0xc88   : > { %v4610_v62 = vpop.xlane.xlu0 %4609 }
 0xc8b   : > { %v7690_v39 = vpop.eup %7689 }
 0xc8c   : > { %v4649_v2 = vmul.f32 %v7690_v39, %v9828_v53  ;;  %v4607_v50 = vpop.xlane.xlu1 %4606 }
 0xc8d   : > { %7691 = vrcp.f32 %v4607_v50  ;;  %v10545_v50 = vpack.c.bf16 %v9348_v9, %v9346_v60  ;;  %v7380_v60 = vld [vmem:[#allocation7 + $0x28] sm:$0xff]   ;;  %v7381_v9 = vld [vmem:[#allocation7 + $0x30] sm:$0xff]  }
 0xc8e   : > { %v4663_v7 = vpack.c.bf16 %v4650_v13, %v4649_v2  ;;  %7693 = vrcp.f32 %v4610_v62 }
 0xc8f   : > { %7695 = vrcp.f32 %v4601_v58 }
 0xc90   : > { %v4613_v8 = vpop.xlane.xlu0 %4612  ;;  %7161 = vmatmul.mubr.msk.bf16.vlgmr.msra.gmra.mrb[140].mxu0 %vm1556_vm2, %v4663_v7  ;;  %v4604_v6 = vpop.xlane.xlu1 %4603  ;;  %v7377_v7 = vld [vmem:[#allocation7 + $0x10] sm:$0xff]  }
 0xc91   : > { %7172 = vmatprep.mubr.msk.bf16.mxu0 %vm8054_vm0, %v10532_v4  ;;  %7697 = vrcp.f32 %v4604_v6  ;;  %v7379_v6 = vld [vmem:[#allocation7 + $0x20] sm:$0xff]  }
 0xc94   : > { %v4622_v63 = vpop.xlane.xlu0 %4621  ;;  %v4619_v0 = vpop.xlane.xlu1 %4618 }
 0xc95   : > { %7699 = vrcp.f32 %v4622_v63 }
 0xc96   : > { %7701 = vrcp.f32 %v4619_v0 }
 0xc97   : > { %v7692_v22 = vpop.eup %7691  ;;  %7703 = vrcp.f32 %v4613_v8  ;;  %v7378_v8 = vld [vmem:[#allocation7 + $0x18] sm:$0xff]  }
 0xc98   : > { %v4625_v53 = vpop.xlane.xlu0 %4624  ;;  %v4616_v11 = vpop.xlane.xlu1 %4615  ;;  %v4653_v40 = vmul.f32 %v7692_v22, %v9846_v21 }
 0xc99   : > { %v7694_v61 = vpop.eup %7693  ;;  %7705 = vrcp.f32 %v4616_v11 }
 0xc9a   : > { %v7696_v20 = vpop.eup %7695  ;;  %v4654_v28 = vmul.f32 %v7694_v61, %v9840_v48  ;;  %7707 = vrcp.f32 %v4625_v53  ;;  %v10546_v53 = vld [vmem:[#allocation35_spill] sm:$0xff] }
 0xc9b   : > { %v7698_v12 = vpop.eup %7697  ;;  %v4651_v59 = vmul.f32 %v7696_v20, %v9834_v24  ;;  %v10547_v11 = vpack.c.bf16 %v9354_v55, %v10546_v53 }
 0xc9c   : > { %v4858_v18 = vpop.permute.xlu0 %4857  ;;  %v4905_v19 = vpop.permute.xlu1 %4904  ;;  %v4652_v38 = vmul.f32 %v7698_v12, %v9850_v31  ;;  %v4665_v52 = vpack.c.bf16 %v4654_v28, %v4653_v40 }
 0xc9d   : > { %7171 = vmatpush3.bf16.msra.mxu0 %v4858_v18 }
 0xc9e   : > { %7182 = vmatprep.subr.bf16.mxu0 %v10532_v4  ;;  %v4664_v54 = vpack.c.bf16 %v4652_v38, %v4651_v59  ;;  %v10549_v59 = vld [vmem:[#allocation36_spill] sm:$0xff] }
 0xc9f   : > { %v7700_v25 = vpop.eup %7699 }
 0xca0   : > { %v7702_v34 = vpop.eup %7701  ;;  %7173 = vmatmul.mubr.msk.bf16.vlgmr.msra.gmra.mrb[144].mxu0 %vm1556_vm2, %v4665_v52  ;;  %v4952_v21 = vpop.permute.xlu1 %4951  ;;  %7167 = vmatmul.mubr.msk.bf16.vlgmr.msra.gmra.mrb[140].mxu1 %vm1556_vm2, %v4664_v54  ;;  %v4658_v44 = vmul.f32 %v7700_v25, %v9858_v41 }
 0xca1   : > { %7183 = vmatpush3.bf16.msra.mxu0 %v4952_v21  ;;  %v7704_v48 = vpop.eup %7703  ;;  %v4657_v24 = vmul.f32 %v7702_v34, %v9860_v49  ;;  %7177 = vmatpush3.bf16.msra.mxu1 %v4905_v19  ;;  %v5062_v18 = vpop.permute.xlu0 %5061  ;;  %v10548_v19 = vld [vmem:[#allocation37_spill] sm:$0xff] }
 0xca2   : > { %7178 = vmatprep.mubr.msk.bf16.mxu1 %vm8054_vm0, %v10532_v4  ;;  %7184 = vmatprep.mubr.msk.bf16.mxu0 %vm8054_vm0, %v10532_v4  ;;  %v4655_v14 = vmul.f32 %v7704_v48, %v9852_v56  ;;  %v10550_v38 = vpack.c.bf16 %v10548_v19, %v10549_v59 }
 0xca3   : > { %7188 = vmatprep.subr.bf16.mxu1 %v10532_v4  ;;  %v7706_v31 = vpop.eup %7705  ;;  %v4667_v1 = vpack.c.bf16 %v4658_v44, %v4657_v24 }
 0xca4   : > { %v4656_v3 = vmul.f32 %v7706_v31, %v9866_v30  ;;  %v7708_v43 = vpop.eup %7707 }
 0xca5   : > { %v4659_v56 = vmul.f32 %v7708_v43, %v9868_v23  ;;  %v7375_v23 = vld [vmem:[#allocation7] sm:$0xff]   ;;  %v5086_v55 = vpop.permute.xlu0 %5085 }
 0xca6   : > { %v4666_v37 = vpack.c.bf16 %v4656_v3, %v4655_v14  ;;  %7194 = vmatprep.subr.bf16.mxu0 %v7375_v23 }
 0xca8   : > { %7185 = vmatmul.mubr.msk.bf16.vlgmr.msra.gmra.mrb[148].mxu0 %vm1556_vm2, %v4667_v1  ;;  %7179 = vmatmul.mubr.msk.bf16.vlgmr.msra.gmra.mrb[144].mxu1 %vm1556_vm2, %v4666_v37 }
 0xca9   : > { %7190 = vmatprep.mubr.msk.bf16.mxu1 %vm8054_vm0, %v10532_v4  ;;  %7195 = vmatpush3.bf16.msra.mxu0 %v7375_v23 }
 0xcd1   : > { %v4628_v41 = vpop.xlane.xlu1 %4627 }
 0xcd2   : > { %7709 = vrcp.f32 %v4628_v41  ;;  %v10554_v41 = vld [vmem:[#allocation41_spill] sm:$0xff] }
 0xcd5   : > { %v4999_v49 = vpop.permute.xlu1 %4998 }
 0xcd6   : > { %7189 = vmatpush3.bf16.msra.mxu1 %v4999_v49  ;;  %v10555_v49 = vld [vmem:[#allocation40_spill] sm:$0xff] }
 0xcd7   : > { %v10556_v43 = vpack.c.bf16 %v10554_v41, %v10555_v49 }
 0xcdc   : > { %v7710_v36 = vpop.eup %7709 }
 0xcdd   : > { %v4660_v30 = vmul.f32 %v7710_v36, %v9894_v45  ;;  %v7376_v45 = vld [vmem:[#allocation7 + $0x8] sm:$0xff]  }
 0xcde   : > { %7196 = vmatprep.subr.bf16.mxu0 %v7376_v45 }
 0xcdf   : > { %v4668_v58 = vpack.c.bf16 %v4660_v30, %v4659_v56  ;;  %7197 = vmatpush3.bf16.msra.mxu0 %v7376_v45  ;;  %v10557_v56 = vld [vmem:[#allocation39_spill] sm:$0xff]  ;;  %v10558_v30 = vld [vmem:[#allocation38_spill] sm:$0xff]  ;;  %v10560_v45 = vpack.c.bf16 %v9715_v15, %v9713_v46  ;;  %v5064_v46 = vpop.permute.xlu1 %5063 }
 0xce0   : > { %7198 = vmatprep.subr.bf16.mxu0 %v7377_v7 }
 0xce1   : > { %7191 = vmatmul.mubr.msk.bf16.vlgmr.msra.gmra.mrb[148].mxu1 %vm1556_vm2, %v4668_v58  ;;  %v10559_v58 = vpack.c.bf16 %v10557_v56, %v10558_v30 }
 0xce2   : > { %5745 = vmatprep.mubr.bf16.mxu1 %v10544_v57 }
 0xce3   : > { %7199 = vmatpush3.bf16.msra.mxu0 %v7377_v7  ;;  %v10561_v7 = vpack.c.bf16 %v9709_v42, %v9707_v5  ;;  %v5088_v15 = vpop.permute.xlu1 %5087 }
 0xce4   : > { %7200 = vmatprep.subr.bf16.mxu0 %v7378_v8 }
 0xce7   : > { %7201 = vmatpush3.bf16.msra.mxu0 %v7378_v8  ;;  %v10562_v8 = vld [vmem:[#allocation43_spill] sm:$0xff] }
 0xce8   : > { %7202 = vmatprep.subr.bf16.mxu0 %v7379_v6 }
 0xceb   : > { %7203 = vmatpush3.bf16.msra.mxu0 %v7379_v6  ;;  %v10563_v6 = vld [vmem:[#allocation42_spill] sm:$0xff] }
 0xcec   : > { %7204 = vmatprep.subr.bf16.mxu0 %v7380_v60 }
 0xcef   : > { %7205 = vmatpush3.bf16.msra.mxu0 %v7380_v60  ;;  %v10564_v60 = vpack.c.bf16 %v10562_v8, %v10563_v6 }
 0xcf0   : > { %7206 = vmatprep.subr.bf16.mxu0 %v7381_v9 }
 0xcf3   : > { %7207 = vmatpush3.bf16.msra.mxu0 %v7381_v9  ;;  %v10565_v9 = vpack.c.bf16 %v9745_v17, %v9743_v26 }
 0xcf4   : > { %7208 = vmatprep.subr.bf16.mxu0 %v7382_v35 }
 0xcf7   : > { %7209 = vmatpush3.bf16.msra.mxu0 %v7382_v35  ;;  %v10566_v35 = vld [vmem:[#allocation22_spill] sm:$0xff] }
 0xcfd   : > { %v4709_v39 = vpop.f32.mrb[136].mxu0 }
 0xcfe   : > { %v7150_v13 = vpop.f32.mrb[137].mxu0 }
 0xcff   : > { %v4712_v2 = vpop.f32.mrb[138].mxu0 }
 0xd00   : > { %v5045_v4 = vpack.c.bf16 %v4712_v2, %v4709_v39  ;;  %v7151_v62 = vpop.f32.mrb[139].mxu0 }
 0xd02   : > { %5109 = vrot.lane.b32.xlu0 %v5045_v4, %s8055_s24 }
 0xd06   : > { %5065 = vrot.lane.b32.xlu0 %v10545_v50, %s8057_s10 }
 0xd0a   : > { %5089 = vrot.lane.b32.xlu0 %v4071_v27, %s8056_s18 }
 0xd36   : > { %v4756_v32 = vpop.f32.mrb[136].mxu1 }
 0xd37   : > { %v7156_v27 = vpop.f32.mrb[137].mxu1 }
 0xd38   : > { %v4759_v63 = vpop.f32.mrb[138].mxu1 }
 0xd39   : > { %v5046_v0 = vpack.c.bf16 %v4759_v63, %v4756_v32  ;;  %v7157_v22 = vpop.f32.mrb[139].mxu1  ;;  %v10567_v32 = vld [vmem:[#allocation21_spill] sm:$0xff] }
 0xd3a   : > { %v10568_v5 = vpack.c.bf16 %v10566_v35, %v10567_v32 }
 0xd3b   : > { %5111 = vrot.lane.b32.xlu1 %v5046_v0, %s8055_s24 }
 0xd3c   : > { %v5130_v42 = vsel %vm1179_vm1, %v10568_v5, %v5064_v46 }
 0xd3d   : > { %v5153_v27 = vsel %vm5149_vm3, %v5130_v42, %v5088_v15  ;;  %v10051_v42 = vld [vmem:[%s10442_s6] ss:$0 sm:$0xff] }
 0xd3f   : > { %5067 = vrot.lane.b32.xlu1 %v10547_v11, %s8057_s10 }
 0xd43   : > { %5091 = vrot.lane.b32.xlu1 %v4072_v51, %s8056_s18  ;;  %v10553_v51 = vpack.c.bf16 %v10551_v29, %v10552_v47 }
 0xd45   : > { %v5127_v52 = vsel %vm1179_vm1, %v10553_v51, %v5062_v18 }
 0xd46   : > { %v5151_v54 = vsel %vm5149_vm3, %v5127_v52, %v5086_v55  ;;  %v10572_v52 = vld [vmem:[#allocation26_spill] sm:$0xff] }
 0xd63   : > { %v4803_v61 = vpop.f32.mrb[140].mxu0 }
 0xd64   : > { %v7162_v20 = vpop.f32.mrb[141].mxu0 }
 0xd65   : > { %v4806_v40 = vpop.f32.mrb[142].mxu0 }
 0xd66   : > { %v5047_v12 = vpack.c.bf16 %v4806_v40, %v4803_v61  ;;  %v7163_v28 = vpop.f32.mrb[143].mxu0  ;;  %v10569_v40 = vld [vmem:[#allocation24_spill] sm:$0xff] }
 0xd68   : > { %5113 = vrot.lane.b32.xlu0 %v5047_v12, %s8055_s24  ;;  %v10570_v12 = vld [vmem:[#allocation23_spill] sm:$0xff] }
 0xd69   : > { %v10571_v28 = vpack.c.bf16 %v10569_v40, %v10570_v12  ;;  %v7809_v12 = vld [vmem:[%s8343_s23 + $0x10] sm:$0xff] }
 0xd6c   : > { %5069 = vrot.lane.b32.xlu0 %v10550_v38, %s8057_s10 }
 0xd70   : > { %5093 = vrot.lane.b32.xlu0 %v4073_v16, %s8056_s18 }
 0xd73   : > { %v4897_v25 = vpop.f32.mrb[144].mxu0  ;;  %v4850_v34 = vpop.f32.mrb[140].mxu1 }
 0xd74   : > { %v5110_v21 = vpop.permute.xlu0 %5109  ;;  %v7168_v48 = vpop.f32.mrb[141].mxu1 }
 0xd75   : > { %v7174_v44 = vpop.f32.mrb[145].mxu0  ;;  %v5168_v24 = vsel %vm5166_vm4, %v5151_v54, %v5110_v21  ;;  %v4853_v31 = vpop.f32.mrb[142].mxu1  ;;  %v10575_v21 = vld [vmem:[#allocation28_spill] sm:$0xff]  ;;  %v10576_v48 = vld [vmem:[#allocation27_spill] sm:$0xff] }
 0xd76   : > { %v4900_v14 = vpop.f32.mrb[146].mxu0  ;;  %7210 = vmatprep.mubr.bf16.mxu0 %v5168_v24  ;;  %v5048_v33 = vpack.c.bf16 %v4853_v31, %v4850_v34  ;;  %v7169_v16 = vpop.f32.mrb[143].mxu1  ;;  %v10577_v44 = vpack.c.bf16 %v10575_v21, %v10576_v48  ;;  %v7812_v48 = vld [vmem:[%s8343_s23 + $0x28] sm:$0xff] }
 0xd77   : > { %v5049_v10 = vpack.c.bf16 %v4900_v14, %v4897_v25  ;;  %v7175_v3 = vpop.f32.mrb[147].mxu0  ;;  %v10573_v25 = vld [vmem:[#allocation25_spill] sm:$0xff] }
 0xd78   : > { %5115 = vrot.lane.b32.xlu1 %v5048_v33, %s8055_s24  ;;  %v5066_v26 = vpop.permute.xlu0 %5065  ;;  %v10574_v54 = vpack.c.bf16 %v10572_v52, %v10573_v25  ;;  %v7811_v25 = vld [vmem:[%s8343_s23 + $0x20] sm:$0xff] }
 0xd79   : > { %5117 = vrot.lane.b32.xlu0 %v5049_v10, %s8055_s24  ;;  %v5133_v18 = vsel %vm1179_vm1, %v10571_v28, %v5066_v26 }
 0xd7b   : > { %v4991_v1 = vpop.f32.mrb[148].mxu0  ;;  %v4944_v37 = vpop.f32.mrb[144].mxu1 }
 0xd7c   : > { %v7186_v36 = vpop.f32.mrb[149].mxu0  ;;  %5071 = vrot.lane.b32.xlu1 %v10559_v58, %s8057_s10  ;;  %v7180_v39 = vpop.f32.mrb[145].mxu1  ;;  %v10581_v58 = vld [vmem:[#allocation30_spill] sm:$0xff] }
 0xd7d   : > { %5073 = vrot.lane.b32.xlu0 %v10556_v43, %s8057_s10  ;;  %v4947_v13 = vpop.f32.mrb[146].mxu1  ;;  %v4994_v2 = vpop.f32.mrb[150].mxu0  ;;  %v10578_v43 = vld [vmem:[#allocation32_spill] sm:$0xff]  ;;  %v10579_v36 = vld [vmem:[#allocation31_spill] sm:$0xff]  ;;  %v10582_v39 = vld [vmem:[#allocation29_spill] sm:$0xff] }
 0xd7e   : > { %v5050_v4 = vpack.c.bf16 %v4947_v13, %v4944_v37  ;;  %v5051_v62 = vpack.c.bf16 %v4994_v2, %v4991_v1  ;;  %v7181_v50 = vpop.f32.mrb[147].mxu1  ;;  %v7187_v23 = vpop.f32.mrb[151].mxu0  ;;  %v10580_v56 = vpack.c.bf16 %v10578_v43, %v10579_v36  ;;  %v10583_v13 = vpack.c.bf16 %v10581_v58, %v10582_v39  ;;  %v7817_v39 = vld [vmem:[%s8343_s23 + $0x50] sm:$0xff] }
 0xd7f   : > { %v5090_v17 = vpop.permute.xlu0 %5089 }
 0xd80   : > { %5095 = vrot.lane.b32.xlu1 %v10561_v7, %s8056_s18  ;;  %v5155_v19 = vsel %vm5149_vm3, %v5133_v18, %v5090_v17  ;;  %v7808_v17 = vld [vmem:[%s8343_s23 + $0x8] sm:$0xff] }
 0xd81   : > { %5097 = vrot.lane.b32.xlu0 %v10560_v45, %s8056_s18 }
 0xd84   : > { %5119 = vrot.lane.b32.xlu1 %v5050_v4, %s8055_s24 }
 0xd85   : > { %5121 = vrot.lane.b32.xlu0 %v5051_v62, %s8055_s24 }
 0xd88   : > { %5075 = vrot.lane.b32.xlu1 %v10564_v60, %s8057_s10  ;;  %v10584_v60 = vld [vmem:[#allocation34_spill] sm:$0xff]  ;;  %s10592_s10 = sld [smem:[#allocation47_spill]] }
 0xd8c   : > { %5099 = vrot.lane.b32.xlu1 %v10565_v9, %s8056_s18  ;;  %v10585_v9 = vld [vmem:[#allocation33_spill] sm:$0xff] }
 0xd8d   : > { %v10586_v46 = vpack.c.bf16 %v10584_v60, %v10585_v9 }
 0xdad   : > { %v5112_v63 = vpop.permute.xlu1 %5111 }
 0xdae   : > { %v5171_v0 = vsel %vm5166_vm4, %v5153_v27, %v5112_v63 }
 0xdaf   : > { %7211 = vmatmul.mubr.bf16.vlgmr.msra.gmra.mrb[152].mxu0 %v5171_v0 }
 0xdb1   : > { %v5068_v55 = vpop.permute.xlu1 %5067 }
 0xdb2   : > { %v5136_v34 = vsel %vm1179_vm1, %v10574_v54, %v5068_v55 }
 0xdb4   : > { %v5038_v22 = vpop.f32.mrb[148].mxu1 }
 0xdb5   : > { %v7192_v53 = vpop.f32.mrb[149].mxu1  ;;  %v5092_v47 = vpop.permute.xlu1 %5091 }
 0xdb6   : > { %v5041_v11 = vpop.f32.mrb[150].mxu1  ;;  %v5157_v31 = vsel %vm5149_vm3, %v5136_v34, %v5092_v47 }
 0xdb7   : > { %v5052_v61 = vpack.c.bf16 %v5041_v11, %v5038_v22  ;;  %v7193_v20 = vpop.f32.mrb[151].mxu1 }
 0xdb9   : > { %5123 = vrot.lane.b32.xlu1 %v5052_v61, %s8055_s24  ;;  %v7807_v61 = vld [vmem:[%s8343_s23] sm:$0xff] }
 0xdda   : > { %v5114_v59 = vpop.permute.xlu0 %5113 }
 0xddb   : > { %v5174_v38 = vsel %vm5166_vm4, %v5155_v19, %v5114_v59  ;;  %v7810_v19 = vld [vmem:[%s8343_s23 + $0x18] sm:$0xff] }
 0xddc   : > { %7214 = vmatprep.mubr.bf16.mxu0 %v5174_v38 }
 0xdde   : > { %v5070_v29 = vpop.permute.xlu0 %5069 }
 0xddf   : > { %v5139_v24 = vsel %vm1179_vm1, %v10577_v44, %v5070_v29 }
 0xde2   : > { %v5094_v51 = vpop.permute.xlu0 %5093 }
 0xde3   : > { %v5159_v14 = vsel %vm5149_vm3, %v5139_v24, %v5094_v51  ;;  %v7813_v24 = vld [vmem:[%s8343_s23 + $0x30] sm:$0xff] }
 0xdea   : > { %v5116_v10 = vpop.permute.xlu1 %5115 }
 0xdeb   : > { %v5118_v33 = vpop.permute.xlu0 %5117  ;;  %v5177_v16 = vsel %vm5166_vm4, %v5157_v31, %v5116_v10 }
 0xdec   : > { %v5180_v3 = vsel %vm5166_vm4, %v5159_v14, %v5118_v33  ;;  %7215 = vmatmul.mubr.bf16.gmra.mrb[156].mxu0 %v5177_v16  ;;  %v7814_v14 = vld [vmem:[%s8343_s23 + $0x38] sm:$0xff] }
 0xded   : > { %7218 = vmatprep.mubr.bf16.mxu0 %v5180_v3 }
 0xdee   : > { %v5072_v37 = vpop.permute.xlu1 %5071 }
 0xdef   : > { %v5074_v1 = vpop.permute.xlu0 %5073  ;;  %v5142_v2 = vsel %vm1179_vm1, %v10583_v13, %v5072_v37 }
 0xdf0   : > { %v5145_v30 = vsel %vm1179_vm1, %v10580_v56, %v5074_v1 }
 0xdf2   : > { %v5096_v49 = vpop.permute.xlu1 %5095 }
 0xdf3   : > { %v5098_v41 = vpop.permute.xlu0 %5097  ;;  %v5161_v62 = vsel %vm5149_vm3, %v5142_v2, %v5096_v49  ;;  %v7815_v49 = vld [vmem:[%s8343_s23 + $0x40] sm:$0xff]  ;;  %v7818_v2 = vld [vmem:[%s8343_s23 + $0x58] sm:$0xff] }
 0xdf4   : > { %v5163_v4 = vsel %vm5149_vm3, %v5145_v30, %v5098_v41  ;;  %v7816_v30 = vld [vmem:[%s8343_s23 + $0x48] sm:$0xff] }
 0xdf6   : > { %v5120_v23 = vpop.permute.xlu1 %5119 }
 0xdf7   : > { %v5122_v50 = vpop.permute.xlu0 %5121  ;;  %v5183_v45 = vsel %vm5166_vm4, %v5161_v62, %v5120_v23 }
 0xdf8   : > { %v5186_v7 = vsel %vm5166_vm4, %v5163_v4, %v5122_v50  ;;  %7219 = vmatmul.mubr.bf16.gmra.mrb[160].mxu0 %v5183_v45 }
 0xdf9   : > { %7222 = vmatprep.mubr.bf16.mxu0 %v5186_v7 }
 0xdfa   : > { %v5076_v8 = vpop.permute.xlu1 %5075 }
 0xdfb   : > { %v5148_v15 = vsel %vm1179_vm1, %v10586_v46, %v5076_v8 }
 0xdfe   : > { %v5100_v6 = vpop.permute.xlu1 %5099 }
 0xdff   : > { %v5165_v35 = vsel %vm5149_vm3, %v5148_v15, %v5100_v6  ;;  %v7819_v6 = vld [vmem:[%s8343_s23 + $0x60] sm:$0xff]  ;;  %v7820_v15 = vld [vmem:[%s8343_s23 + $0x68] sm:$0xff] }
 0xe2b   : > { %v5124_v32 = vpop.permute.xlu1 %5123 }
 0xe2c   : > { %v5189_v5 = vsel %vm5166_vm4, %v5165_v35, %v5124_v32  ;;  %v7821_v32 = vld [vmem:[%s8343_s23 + $0x70] sm:$0xff] }
 0xe2d   : > { %7223 = vmatmul.mubr.bf16.gmra.mrb[164].mxu0 %v5189_v5 }
 0xe82   : > { %v7212_v27 = vpop.f32.mrb[152].mxu0 }
 0xe83   : > { %v5296_v63 = vpop.f32.mrb[153].mxu0  ;;  %v5305_v11 = vadd.f32 %v7212_v27, %v10051_v42  ;;  %v7822_v27 = vld [vmem:[%s8343_s23 + $0x78] sm:$0xff] }
 0xe84   : > { %v5297_v0 = vadd.f32 %v10051_v42, %v5296_v63  ;;  %v7213_v22 = vpop.f32.mrb[154].mxu0 }
 0xe85   : > { %v5299_v53 = vpop.f32.mrb[155].mxu0  ;;  %v10064_v28 = vadd.f32 %v7809_v12, %v5305_v11  ;;  %v5308_v18 = vadd.f32 %v7213_v22, %v10051_v42 }
 0xe86   : > { %v10056_v20 = vadd.f32 %v7807_v61, %v5297_v0  ;;  %v5300_v26 = vadd.f32 %v10051_v42, %v5299_v53 }
 0xe87   : > { %v10070_v59 = vadd.f32 %v7810_v19, %v5308_v18 }
 0xe88   : > { %v10060_v40 = vadd.f32 %v7808_v17, %v5300_v26  ;;  %5377 = vadd.xlane.f32.xlu0 %v10056_v20 }
 0xe8a   : > { %5379 = vadd.xlane.f32.xlu1 %v10060_v40 }
 0xe8c   : > { %5381 = vadd.xlane.f32.xlu0 %v10064_v28 }
 0xe90   : > { %5383 = vadd.xlane.f32.xlu0 %v10070_v59 }
 0xebf   : > { %v7216_v38 = vpop.f32.mrb[156].mxu0 }
 0xec0   : > { %v5312_v55 = vpop.f32.mrb[157].mxu0  ;;  %v5321_v52 = vadd.f32 %v7216_v38, %v10051_v42 }
 0xec1   : > { %v5313_v29 = vadd.f32 %v10051_v42, %v5312_v55  ;;  %v7217_v47 = vpop.f32.mrb[158].mxu0 }
 0xec2   : > { %v5315_v51 = vpop.f32.mrb[159].mxu0  ;;  %v5324_v21 = vadd.f32 %v7217_v47, %v10051_v42  ;;  %v10085_v31 = vadd.f32 %v7813_v24, %v5321_v52  ;;  %v7385_v52 = vld [vmem:[#allocation8 + $0x4] ss:$8 sps:$4 sm:$0xff]   ;;  %v7389_v24 = vld [vmem:[#allocation8 + $0x20] ss:$8 sps:$4 sm:$0xff]  }
 0xec3   : > { %v10076_v54 = vadd.f32 %v7811_v25, %v5313_v29  ;;  %v5316_v34 = vadd.f32 %v10051_v42, %v5315_v51  ;;  %v7383_v51 = vld [vmem:[#allocation8] ss:$8 sps:$4 sm:$0xff]   ;;  %v7388_v25 = vld [vmem:[#allocation8 + $0x14] ss:$8 sps:$4 sm:$0xff]   ;;  %5713 = vmatprep.subr.bf16.mxu1 %v7385_v52 }
 0xec4   : > { %v10089_v33 = vadd.f32 %v7814_v14, %v5324_v21  ;;  %5714 = vmatpush1.bf16.msra.mxu1 %v7383_v51  ;;  %v7386_v21 = vld [vmem:[#allocation8 + $0x10] ss:$8 sps:$4 sm:$0xff]   ;;  %v7394_v14 = vld [vmem:[#allocation8 + $0x34] ss:$8 sps:$4 sm:$0xff]  }
 0xec5   : > { %v10081_v44 = vadd.f32 %v7812_v48, %v5316_v34  ;;  %5385 = vadd.xlane.f32.xlu0 %v10076_v54  ;;  %5715 = vmatprep.subr.bf16.mxu1 %v7388_v25  ;;  %v7391_v48 = vld [vmem:[#allocation8 + $0x24] ss:$8 sps:$4 sm:$0xff]  }
 0xec7   : > { %5387 = vadd.xlane.f32.xlu1 %v10081_v44 }
 0xec8   : > { %5716 = vmatpush1.bf16.msra.mxu1 %v7386_v21 }
 0xec9   : > { %5389 = vadd.xlane.f32.xlu0 %v10085_v31  ;;  %5717 = vmatprep.subr.bf16.mxu1 %v7391_v48 }
 0xecb   : > { %v7220_v10 = vpop.f32.mrb[160].mxu0  ;;  %5391 = vadd.xlane.f32.xlu1 %v10089_v33 }
 0xecc   : > { %v5328_v16 = vpop.f32.mrb[161].mxu0  ;;  %v5337_v41 = vadd.f32 %v7220_v10, %v10051_v42  ;;  %5718 = vmatpush1.bf16.msra.mxu1 %v7389_v24  ;;  %v7392_v10 = vld [vmem:[#allocation8 + $0x30] ss:$8 sps:$4 sm:$0xff]  }
 0xecd   : > { %v5329_v3 = vadd.f32 %v10051_v42, %v5328_v16  ;;  %v7221_v1 = vpop.f32.mrb[162].mxu0  ;;  %5719 = vmatprep.subr.bf16.mxu1 %v7394_v14  ;;  %v7397_v16 = vld [vmem:[#allocation8 + $0x44] ss:$8 sps:$4 sm:$0xff]  }
 0xece   : > { %v5331_v37 = vpop.f32.mrb[163].mxu0  ;;  %v5340_v56 = vadd.f32 %v7221_v1, %v10051_v42  ;;  %v10105_v13 = vadd.f32 %v7817_v39, %v5337_v41  ;;  %v7400_v1 = vld [vmem:[#allocation8 + $0x54] ss:$8 sps:$4 sm:$0xff]   ;;  %v7401_v41 = vld [vmem:[#allocation8 + $0x60] ss:$8 sps:$4 sm:$0xff]  }
 0xecf   : > { %v10096_v43 = vadd.f32 %v7815_v49, %v5329_v3  ;;  %v5332_v36 = vadd.f32 %v10051_v42, %v5331_v37  ;;  %v7395_v3 = vld [vmem:[#allocation8 + $0x40] ss:$8 sps:$4 sm:$0xff]   ;;  %v7398_v37 = vld [vmem:[#allocation8 + $0x50] ss:$8 sps:$4 sm:$0xff]   ;;  %v7403_v49 = vld [vmem:[#allocation8 + $0x64] ss:$8 sps:$4 sm:$0xff]  }
 0xed0   : > { %v10109_v4 = vadd.f32 %v7818_v2, %v5340_v56  ;;  %5720 = vmatpush1.bf16.msra.mxu1 %v7392_v10  ;;  %v7404_v56 = vld [vmem:[#allocation8 + $0x70] ss:$8 sps:$4 sm:$0xff]  }
 0xed1   : > { %v10101_v58 = vadd.f32 %v7816_v30, %v5332_v36  ;;  %5393 = vadd.xlane.f32.xlu0 %v10096_v43  ;;  %5721 = vmatprep.subr.bf16.mxu1 %v7397_v16  ;;  %v7406_v36 = vld [vmem:[#allocation8 + $0x74] ss:$8 sps:$4 sm:$0xff]  }
 0xed3   : > { %5395 = vadd.xlane.f32.xlu1 %v10101_v58 }
 0xed4   : > { %5722 = vmatpush1.bf16.msra.mxu1 %v7395_v3 }
 0xed5   : > { %5397 = vadd.xlane.f32.xlu0 %v10105_v13  ;;  %5723 = vmatprep.subr.bf16.mxu1 %v7400_v1 }
 0xed7   : > { %5399 = vadd.xlane.f32.xlu1 %v10109_v4 }
 0xed8   : > { %5724 = vmatpush1.bf16.msra.mxu1 %v7398_v37 }
 0xed9   : > { %5725 = vmatprep.subr.bf16.mxu1 %v7403_v49 }
 0xedc   : > { %5726 = vmatpush1.bf16.msra.mxu1 %v7401_v41 }
 0xedd   : > { %5727 = vmatprep.subr.bf16.mxu1 %v7406_v36 }
 0xee0   : > { %5728 = vmatpush1.bf16.msra.mxu1 %v7404_v56 }
 0xf00   : > { %v7224_v62 = vpop.f32.mrb[164].mxu0 }
 0xf01   : > { %v5344_v50 = vpop.f32.mrb[165].mxu0  ;;  %v5353_v8 = vadd.f32 %v7224_v62, %v10051_v42 }
 0xf02   : > { %v5345_v23 = vadd.f32 %v10051_v42, %v5344_v50  ;;  %v7225_v45 = vpop.f32.mrb[166].mxu0 }
 0xf03   : > { %v5347_v7 = vpop.f32.mrb[167].mxu0  ;;  %v5356_v46 = vadd.f32 %v7225_v45, %v10051_v42  ;;  %v10125_v5 = vadd.f32 %v7821_v32, %v5353_v8 }
 0xf04   : > { %v10116_v60 = vadd.f32 %v7819_v6, %v5345_v23  ;;  %v5348_v9 = vadd.f32 %v10051_v42, %v5347_v7 }
 0xf05   : > { %v10129_v63 = vadd.f32 %v7822_v27, %v5356_v46 }
 0xf06   : > { %v10121_v35 = vadd.f32 %v7820_v15, %v5348_v9  ;;  %5401 = vadd.xlane.f32.xlu0 %v10116_v60 }
 0xf08   : > { %5403 = vadd.xlane.f32.xlu1 %v10121_v35 }
 0xf0a   : > { %5405 = vadd.xlane.f32.xlu0 %v10125_v5 }
 0xf0c   : > { %5407 = vadd.xlane.f32.xlu1 %v10129_v63 }
 0xf15   : > { %v5378_v0 = vpop.xlane.xlu0 %5377 }
 0xf16   : > { %v5409_v22 = vmul.f32 0.0078125, %v5378_v0 }
 0xf17   : > { %v5380_v42 = vpop.xlane.xlu1 %5379 }
 0xf18   : > { %v10134_v53 = vsub.f32 %v10056_v20, %v5409_v22  ;;  %v5410_v11 = vmul.f32 0.0078125, %v5380_v42 }
 0xf19   : > { %v5382_v61 = vpop.xlane.xlu0 %5381 }
 0xf1a   : > { %v10137_v26 = vsub.f32 %v10060_v40, %v5410_v11  ;;  %v5411_v17 = vmul.f32 0.0078125, %v5382_v61  ;;  %v5441_v12 = vmul.f32 %v10134_v53, %v10134_v53 }
 0xf1c   : > { %v10142_v18 = vsub.f32 %v10064_v28, %v5411_v17  ;;  %5457 = vadd.xlane.f32.xlu0 %v5441_v12  ;;  %v5442_v19 = vmul.f32 %v10137_v26, %v10137_v26 }
 0xf1d   : > { %v5384_v38 = vpop.xlane.xlu0 %5383 }
 0xf1e   : > { %v5412_v55 = vmul.f32 0.0078125, %v5384_v38  ;;  %5459 = vadd.xlane.f32.xlu1 %v5442_v19  ;;  %v5443_v29 = vmul.f32 %v10142_v18, %v10142_v18 }
 0xf20   : > { %v10149_v47 = vsub.f32 %v10070_v59, %v5412_v55  ;;  %5461 = vadd.xlane.f32.xlu0 %v5443_v29 }
 0xf22   : > { %v5444_v34 = vmul.f32 %v10149_v47, %v10149_v47 }
 0xf24   : > { %5463 = vadd.xlane.f32.xlu1 %v5444_v34 }
 0xf52   : > { %v5386_v30 = vpop.xlane.xlu0 %5385 }
 0xf53   : > { %v5413_v39 = vmul.f32 0.0078125, %v5386_v30 }
 0xf54   : > { %v5388_v2 = vpop.xlane.xlu1 %5387 }
 0xf55   : > { %v10154_v62 = vsub.f32 %v10076_v54, %v5413_v39  ;;  %v5414_v50 = vmul.f32 0.0078125, %v5388_v2 }
 0xf56   : > { %v5390_v23 = vpop.xlane.xlu0 %5389 }
 0xf57   : > { %v10157_v45 = vsub.f32 %v10081_v44, %v5414_v50  ;;  %v5415_v7 = vmul.f32 0.0078125, %v5390_v23  ;;  %v5445_v8 = vmul.f32 %v10154_v62, %v10154_v62 }
 0xf58   : > { %v5392_v6 = vpop.xlane.xlu1 %5391 }
 0xf59   : > { %v10162_v9 = vsub.f32 %v10085_v31, %v5415_v7  ;;  %v5416_v46 = vmul.f32 0.0078125, %v5392_v6  ;;  %5465 = vadd.xlane.f32.xlu0 %v5445_v8  ;;  %v5446_v15 = vmul.f32 %v10157_v45, %v10157_v45 }
 0xf5b   : > { %v10167_v32 = vsub.f32 %v10089_v33, %v5416_v46  ;;  %5467 = vadd.xlane.f32.xlu1 %v5446_v15  ;;  %v5447_v27 = vmul.f32 %v10162_v9, %v10162_v9 }
 0xf5d   : > { %5469 = vadd.xlane.f32.xlu0 %v5447_v27  ;;  %v5448_v0 = vmul.f32 %v10167_v32, %v10167_v32 }
 0xf5e   : > { %v5394_v22 = vpop.xlane.xlu0 %5393 }
 0xf5f   : > { %v5417_v42 = vmul.f32 0.0078125, %v5394_v22  ;;  %5471 = vadd.xlane.f32.xlu1 %v5448_v0 }
 0xf60   : > { %v5396_v11 = vpop.xlane.xlu1 %5395 }
 0xf61   : > { %v10174_v61 = vsub.f32 %v10096_v43, %v5417_v42  ;;  %v5418_v17 = vmul.f32 0.0078125, %v5396_v11 }
 0xf62   : > { %v5398_v12 = vpop.xlane.xlu0 %5397 }
 0xf63   : > { %v10177_v19 = vsub.f32 %v10101_v58, %v5418_v17  ;;  %v5419_v38 = vmul.f32 0.0078125, %v5398_v12  ;;  %v5449_v55 = vmul.f32 %v10174_v61, %v10174_v61 }
 0xf64   : > { %v5400_v29 = vpop.xlane.xlu1 %5399 }
 0xf65   : > { %v10182_v51 = vsub.f32 %v10105_v13, %v5419_v38  ;;  %v5420_v52 = vmul.f32 0.0078125, %v5400_v29  ;;  %5473 = vadd.xlane.f32.xlu0 %v5449_v55  ;;  %v5450_v25 = vmul.f32 %v10177_v19, %v10177_v19  ;;  %v10216_v55 = vld [vmem:[%s10443_s7] ss:$0 sm:$0xff] }
 0xf67   : > { %v10187_v34 = vsub.f32 %v10109_v4, %v5420_v52  ;;  %5475 = vadd.xlane.f32.xlu1 %v5450_v25  ;;  %v5451_v21 = vmul.f32 %v10182_v51, %v10182_v51 }
 0xf69   : > { %5477 = vadd.xlane.f32.xlu0 %v5451_v21  ;;  %v5452_v48 = vmul.f32 %v10187_v34, %v10187_v34 }
 0xf6b   : > { %5479 = vadd.xlane.f32.xlu1 %v5452_v48 }
 0xf93   : > { %v5402_v24 = vpop.xlane.xlu0 %5401 }
 0xf94   : > { %v5421_v14 = vmul.f32 0.0078125, %v5402_v24  ;;  %v10224_v24 = vld [vmem:[%s10587_s22] ss:$0 sm:$0xff]  ;;  %s7965_s22 = scalar_lea.vmem %s10390_s19, 2048 }
 0xf95   : > { %v5404_v10 = vpop.xlane.xlu1 %5403  ;;  %p7966_p6 = scmp.ne.s32.totalorder %s10390_s19, %s7965_s22 }
 0xf96   : > { %v10194_v16 = vsub.f32 %v10116_v60, %v5421_v14  ;;  %v5422_v3 = vmul.f32 0.0078125, %v5404_v10 }
 0xf97   : > { %v5406_v1 = vpop.xlane.xlu0 %5405  ;;  %p7967_p8 = pnand %p7966_p6, %p8282_p4 }
 0xf98   : > { %v10197_v37 = vsub.f32 %v10121_v35, %v5422_v3  ;;  %v5423_v41 = vmul.f32 0.0078125, %v5406_v1  ;;  %v5453_v49 = vmul.f32 %v10194_v16, %v10194_v16 }
 0xf99   : > { %v5408_v36 = vpop.xlane.xlu1 %5407  ;;  %p7968_p13 = pneg %p7967_p8 }
 0xf9a   : > { %v10202_v56 = vsub.f32 %v10125_v5, %v5423_v41  ;;  %v5424_v30 = vmul.f32 0.0078125, %v5408_v36  ;;  %5481 = vadd.xlane.f32.xlu0 %v5453_v49  ;;  %v5454_v39 = vmul.f32 %v10197_v37, %v10197_v37 }
 0xf9c   : > { %v10207_v2 = vsub.f32 %v10129_v63, %v5424_v30  ;;  %5483 = vadd.xlane.f32.xlu1 %v5454_v39  ;;  %v5455_v50 = vmul.f32 %v10202_v56, %v10202_v56 }
 0xf9e   : > { %5485 = vadd.xlane.f32.xlu0 %v5455_v50  ;;  %v5456_v23 = vmul.f32 %v10207_v2, %v10207_v2 }
 0xfa0   : > { %5487 = vadd.xlane.f32.xlu1 %v5456_v23  ;;  %v7407_v23 = vld [vmem:[#allocation10 + $0x40] sm:$0xff]  }
 0xfa1   : > { %6714 = vmatprep.subr.bf16.mxu0 %v7407_v23  ;;  %7226 = vmatprep.subr.bf16.mxu1 %v7407_v23 }
 0xfa9   : > { %v5458_v7 = vpop.xlane.xlu0 %5457 }
 0xfaa   : > { %v5489_v8 = vmul.f32 0.0078125, %v5458_v7  ;;  %v7408_v7 = vld [vmem:[#allocation10] sm:$0xff]  }
 0xfab   : > { %v5460_v6 = vpop.xlane.xlu1 %5459  ;;  %6715 = vmatpush3.bf16.msra.mxu0 %v7408_v7 }
 0xfac   : > { %v5505_v46 = vadd.f32 1e-05, %v5489_v8  ;;  %v5490_v15 = vmul.f32 0.0078125, %v5460_v6  ;;  %v7409_v8 = vld [vmem:[#allocation10 + $0x48] sm:$0xff]  }
 0xfad   : > { %v5462_v27 = vpop.xlane.xlu0 %5461  ;;  %6716 = vmatprep.subr.bf16.mxu0 %v7409_v8 }
 0xfae   : > { %7711 = vrsqrt.f32 %v5505_v46  ;;  %v5506_v0 = vadd.f32 1e-05, %v5490_v15  ;;  %v5491_v22 = vmul.f32 0.0078125, %v5462_v27 }
 0xfb0   : > { %7713 = vrsqrt.f32 %v5506_v0  ;;  %v5507_v42 = vadd.f32 1e-05, %v5491_v22 }
 0xfb1   : > { %v5464_v11 = vpop.xlane.xlu1 %5463 }
 0xfb2   : > { %7715 = vrsqrt.f32 %v5507_v42  ;;  %v5492_v17 = vmul.f32 0.0078125, %v5464_v11 }
 0xfb4   : > { %v5508_v12 = vadd.f32 1e-05, %v5492_v17 }
 0xfb6   : > { %7717 = vrsqrt.f32 %v5508_v12 }
 0xfb8   : > { %v7712_v38 = vpop.eup %7711 }
 0xfb9   : > { %v5537_v29 = vmul.f32 %v7712_v38, %v10134_v53 }
 0xfba   : > { %v7714_v52 = vpop.eup %7713 }
 0xfbb   : > { %v5538_v25 = vmul.f32 %v7714_v52, %v10137_v26  ;;  %v5559_v21 = vmul.f32 %v10216_v55, %v5537_v29 }
 0xfbc   : > { %v7716_v48 = vpop.eup %7715 }
 0xfbd   : > { %v5560_v14 = vmul.f32 %v10216_v55, %v5538_v25  ;;  %v5581_v10 = vadd.f32 %v10224_v24, %v5559_v21  ;;  %v5539_v1 = vmul.f32 %v7716_v48, %v10142_v18  ;;  %v7410_v18 = vld [vmem:[#allocation10 + $0x8] sm:$0xff]  }
 0xfbe   : > { %6717 = vmatpush3.bf16.msra.mxu0 %v7410_v18 }
 0xfbf   : > { %v5582_v3 = vadd.f32 %v10224_v24, %v5560_v14  ;;  %v5561_v49 = vmul.f32 %v10216_v55, %v5539_v1 }
 0xfc0   : > { %v7718_v53 = vpop.eup %7717 }
 0xfc1   : > { %v5597_v41 = vpack.c.bf16 %v5582_v3, %v5581_v10  ;;  %v5540_v26 = vmul.f32 %v7718_v53, %v10149_v47  ;;  %v5583_v39 = vadd.f32 %v10224_v24, %v5561_v49 }
 0xfc3   : > { %5746 = vmatmul.mubr.bf16.vlgmr.msra.gmra.mrb[152].mxu1 %v5597_v41  ;;  %v5562_v36 = vmul.f32 %v10216_v55, %v5540_v26 }
 0xfc4   : > { %5755 = vmatprep.mubr.bf16.mxu1 %v10544_v57  ;;  %7234 = vmatpush3.bf16.msra.mxu1 %v7408_v7 }
 0xfc5   : > { %v5584_v30 = vadd.f32 %v10224_v24, %v5562_v36  ;;  %7227 = vmatprep.subr.bf16.mxu1 %v7409_v8 }
 0xfc7   : > { %v5598_v50 = vpack.c.bf16 %v5584_v30, %v5583_v39 }
 0xfc8   : > { %7235 = vmatpush3.bf16.msra.mxu1 %v7410_v18 }
 0xfcb   : > { %5756 = vmatmul.mubr.bf16.gmra.mrb[156].mxu1 %v5598_v50 }
 0xfcc   : > { %5765 = vmatprep.mubr.bf16.mxu1 %v10544_v57 }
 0xfe6   : > { %v5466_v47 = vpop.xlane.xlu0 %5465 }
 0xfe7   : > { %v5493_v6 = vmul.f32 0.0078125, %v5466_v47 }
 0xfe8   : > { %v5468_v46 = vpop.xlane.xlu1 %5467 }
 0xfe9   : > { %v5509_v15 = vadd.f32 1e-05, %v5493_v6  ;;  %v5494_v27 = vmul.f32 0.0078125, %v5468_v46 }
 0xfea   : > { %v5470_v0 = vpop.xlane.xlu0 %5469 }
 0xfeb   : > { %7719 = vrsqrt.f32 %v5509_v15  ;;  %v5510_v22 = vadd.f32 1e-05, %v5494_v27  ;;  %v5495_v42 = vmul.f32 0.0078125, %v5470_v0 }
 0xfec   : > { %v5472_v11 = vpop.xlane.xlu1 %5471 }
 0xfed   : > { %7721 = vrsqrt.f32 %v5510_v22  ;;  %v5511_v17 = vadd.f32 1e-05, %v5495_v42  ;;  %v5496_v12 = vmul.f32 0.0078125, %v5472_v11 }
 0xfef   : > { %7723 = vrsqrt.f32 %v5511_v17  ;;  %v5512_v38 = vadd.f32 1e-05, %v5496_v12 }
 0xff1   : > { %7725 = vrsqrt.f32 %v5512_v38 }
 0xff2   : > { %v5474_v29 = vpop.xlane.xlu0 %5473 }
 0xff3   : > { %v5497_v52 = vmul.f32 0.0078125, %v5474_v29 }
 0xff4   : > { %v5476_v25 = vpop.xlane.xlu1 %5475 }
 0xff5   : > { %v7720_v21 = vpop.eup %7719  ;;  %v5513_v48 = vadd.f32 1e-05, %v5497_v52  ;;  %v5498_v14 = vmul.f32 0.0078125, %v5476_v25 }
 0xff6   : > { %v5478_v10 = vpop.xlane.xlu0 %5477  ;;  %v5541_v3 = vmul.f32 %v7720_v21, %v10154_v62 }
 0xff7   : > { %v7722_v1 = vpop.eup %7721  ;;  %7727 = vrsqrt.f32 %v5513_v48  ;;  %v5514_v53 = vadd.f32 1e-05, %v5498_v14  ;;  %v5499_v41 = vmul.f32 0.0078125, %v5478_v10 }
 0xff8   : > { %v5480_v26 = vpop.xlane.xlu1 %5479  ;;  %v5542_v49 = vmul.f32 %v7722_v1, %v10157_v45  ;;  %v5563_v36 = vmul.f32 %v10216_v55, %v5541_v3 }
 0xff9   : > { %v7724_v30 = vpop.eup %7723  ;;  %7729 = vrsqrt.f32 %v5514_v53  ;;  %v5500_v39 = vmul.f32 0.0078125, %v5480_v26  ;;  %v5515_v7 = vadd.f32 1e-05, %v5499_v41  ;;  %v7411_v53 = vld [vmem:[#allocation10 + $0x50] sm:$0xff]   ;;  %v7414_v41 = vld [vmem:[#allocation10 + $0x18] sm:$0xff]   ;;  %v7415_v26 = vld [vmem:[#allocation10 + $0x60] sm:$0xff]  }
 0xffa   : > { %v5564_v50 = vmul.f32 %v10216_v55, %v5542_v49  ;;  %v5585_v18 = vadd.f32 %v10224_v24, %v5563_v36  ;;  %v5543_v47 = vmul.f32 %v7724_v30, %v10162_v9  ;;  %6718 = vmatprep.subr.bf16.mxu0 %v7411_v53  ;;  %7228 = vmatprep.subr.bf16.mxu1 %v7411_v53  ;;  %v7416_v49 = vld [vmem:[#allocation10 + $0x20] sm:$0xff]   ;;  %v7417_v36 = vld [vmem:[#allocation10 + $0x68] sm:$0xff]  }
 0xffb   : > { %v7726_v23 = vpop.eup %7725  ;;  %v5516_v8 = vadd.f32 1e-05, %v5500_v39  ;;  %v7418_v30 = vld [vmem:[#allocation10 + $0x28] sm:$0xff]  }
 0xffc   : > { %v5586_v62 = vadd.f32 %v10224_v24, %v5564_v50  ;;  %v5544_v6 = vmul.f32 %v7726_v23, %v10167_v32  ;;  %v5565_v15 = vmul.f32 %v10216_v55, %v5543_v47  ;;  %v7419_v23 = vld [vmem:[#allocation10 + $0x70] sm:$0xff]  }
 0xffd   : > { %7731 = vrsqrt.f32 %v5516_v8  ;;  %v7420_v8 = vld [vmem:[#allocation10 + $0x30] sm:$0xff]  }
 0xffe   : > { %v5599_v45 = vpack.c.bf16 %v5586_v62, %v5585_v18  ;;  %v5566_v46 = vmul.f32 %v10216_v55, %v5544_v6  ;;  %7733 = vrsqrt.f32 %v5515_v7  ;;  %v5587_v42 = vadd.f32 %v10224_v24, %v5565_v15 }
0x1000   : > { %5766 = vmatmul.mubr.bf16.gmra.mrb[160].mxu1 %v5599_v45  ;;  %v5588_v0 = vadd.f32 %v10224_v24, %v5566_v46  ;;  %v7421_v46 = vld [vmem:[#allocation10 + $0x78] sm:$0xff]  }
0x1001   : > { %v7728_v27 = vpop.eup %7727  ;;  %5775 = vmatprep.mubr.bf16.mxu1 %v10544_v57 }
0x1002   : > { %v5545_v9 = vmul.f32 %v7728_v27, %v10174_v61  ;;  %v5600_v11 = vpack.c.bf16 %v5588_v0, %v5587_v42  ;;  %v7422_v27 = vld [vmem:[#allocation10 + $0x38] sm:$0xff]  }
0x1003   : > { %v7730_v22 = vpop.eup %7729 }
0x1004   : > { %v5546_v32 = vmul.f32 %v7730_v22, %v10177_v19  ;;  %v5567_v38 = vmul.f32 %v10216_v55, %v5545_v9 }
0x1006   : > { %v5568_v17 = vmul.f32 %v10216_v55, %v5546_v32  ;;  %v5589_v21 = vadd.f32 %v10224_v24, %v5567_v38 }
0x1007   : > { %v7732_v12 = vpop.eup %7731 }
0x1008   : > { %5776 = vmatmul.mubr.bf16.gmra.mrb[164].mxu1 %v5600_v11  ;;  %v7734_v29 = vpop.eup %7733  ;;  %v5590_v52 = vadd.f32 %v10224_v24, %v5568_v17  ;;  %v5548_v25 = vmul.f32 %v7732_v12, %v10187_v34  ;;  %v7412_v34 = vld [vmem:[#allocation10 + $0x10] sm:$0xff]  }
0x1009   : > { %5785 = vmatprep.mubr.bf16.mxu1 %v10544_v57  ;;  %v5547_v61 = vmul.f32 %v7734_v29, %v10182_v51  ;;  %6719 = vmatpush3.bf16.msra.mxu0 %v7412_v34  ;;  %v7413_v51 = vld [vmem:[#allocation10 + $0x58] sm:$0xff]  }
0x100a   : > { %v5601_v48 = vpack.c.bf16 %v5590_v52, %v5589_v21  ;;  %v5570_v19 = vmul.f32 %v10216_v55, %v5548_v25  ;;  %7236 = vmatpush3.bf16.msra.mxu1 %v7412_v34  ;;  %6720 = vmatprep.subr.bf16.mxu0 %v7413_v51 }
0x100b   : > { %v5569_v14 = vmul.f32 %v10216_v55, %v5547_v61  ;;  %7229 = vmatprep.subr.bf16.mxu1 %v7413_v51 }
0x100c   : > { %v5592_v10 = vadd.f32 %v10224_v24, %v5570_v19 }
0x100d   : > { %v5591_v3 = vadd.f32 %v10224_v24, %v5569_v14  ;;  %6721 = vmatpush3.bf16.msra.mxu0 %v7414_v41 }
0x100e   : > { %7237 = vmatpush3.bf16.msra.mxu1 %v7414_v41  ;;  %6722 = vmatprep.subr.bf16.mxu0 %v7415_v26 }
0x100f   : > { %v5602_v1 = vpack.c.bf16 %v5592_v10, %v5591_v3  ;;  %7230 = vmatprep.subr.bf16.mxu1 %v7415_v26 }
0x1010   : > { %5786 = vmatmul.mubr.bf16.gmra.mrb[168].mxu1 %v5601_v48 }
0x1011   : > { %5795 = vmatprep.mubr.bf16.mxu1 %v10544_v57  ;;  %6723 = vmatpush3.bf16.msra.mxu0 %v7416_v49 }
0x1012   : > { %7238 = vmatpush3.bf16.msra.mxu1 %v7416_v49  ;;  %6724 = vmatprep.subr.bf16.mxu0 %v7417_v36 }
0x1013   : > { %7231 = vmatprep.subr.bf16.mxu1 %v7417_v36 }
0x1015   : > { %6725 = vmatpush3.bf16.msra.mxu0 %v7418_v30 }
0x1016   : > { %7239 = vmatpush3.bf16.msra.mxu1 %v7418_v30  ;;  %6726 = vmatprep.subr.bf16.mxu0 %v7419_v23 }
0x1017   : > { %7232 = vmatprep.subr.bf16.mxu1 %v7419_v23 }
0x1018   : > { %5796 = vmatmul.mubr.bf16.gmra.mrb[172].mxu1 %v5602_v1  ;;  %v10589_v1 = vld [vmem:[#allocation18_spill] sm:$0xff] }
0x1019   : > { %5805 = vmatprep.mubr.bf16.mxu1 %v10544_v57  ;;  %6727 = vmatpush3.bf16.msra.mxu0 %v7420_v8  ;;  %v10591_v34 = vsub.s32 1, %v10589_v1 }
0x101a   : > { %7240 = vmatpush3.bf16.msra.mxu1 %v7420_v8  ;;  %6728 = vmatprep.subr.bf16.mxu0 %v7421_v46 }
0x101b   : > { %7233 = vmatprep.subr.bf16.mxu1 %v7421_v46 }
0x101d   : > { %6729 = vmatpush3.bf16.msra.mxu0 %v7422_v27 }
0x101e   : > { %7241 = vmatpush3.bf16.msra.mxu1 %v7422_v27 }
0x1027   : > { %v5482_v39 = vpop.xlane.xlu0 %5481 }
0x1028   : > { %v5501_v50 = vmul.f32 0.0078125, %v5482_v39 }
0x1029   : > { %v5484_v7 = vpop.xlane.xlu1 %5483 }
0x102a   : > { %v5517_v18 = vadd.f32 1e-05, %v5501_v50  ;;  %v5502_v62 = vmul.f32 0.0078125, %v5484_v7 }
0x102b   : > { %v5486_v47 = vpop.xlane.xlu0 %5485 }
0x102c   : > { %7735 = vrsqrt.f32 %v5517_v18  ;;  %v5518_v6 = vadd.f32 1e-05, %v5502_v62  ;;  %v5503_v45 = vmul.f32 0.0078125, %v5486_v47 }
0x102d   : > { %v5488_v15 = vpop.xlane.xlu1 %5487 }
0x102e   : > { %7737 = vrsqrt.f32 %v5518_v6  ;;  %v5519_v0 = vadd.f32 1e-05, %v5503_v45  ;;  %v5504_v22 = vmul.f32 0.0078125, %v5488_v15 }
0x1030   : > { %7739 = vrsqrt.f32 %v5519_v0  ;;  %v5520_v42 = vadd.f32 1e-05, %v5504_v22 }
0x1032   : > { %7741 = vrsqrt.f32 %v5520_v42 }
0x1036   : > { %v7736_v9 = vpop.eup %7735 }
0x1037   : > { %v5549_v32 = vmul.f32 %v7736_v9, %v10194_v16 }
0x1038   : > { %v7738_v11 = vpop.eup %7737 }
0x1039   : > { %v5550_v17 = vmul.f32 %v7738_v11, %v10197_v37  ;;  %v5571_v12 = vmul.f32 %v10216_v55, %v5549_v32 }
0x103a   : > { %v7740_v38 = vpop.eup %7739 }
0x103b   : > { %v5572_v29 = vmul.f32 %v10216_v55, %v5550_v17  ;;  %v5593_v25 = vadd.f32 %v10224_v24, %v5571_v12  ;;  %v5551_v61 = vmul.f32 %v7740_v38, %v10202_v56  ;;  %v5621_v56 = vld [vmem:[%s10588_s30] sm:$0x3]  ;;  %s7971_s30 = scalar_lea.vmem %s7970_s3, 4096 }
0x103c   : > { %v7742_v52 = vpop.eup %7741  ;;  %v10287_v51 = vrot.slane %v5621_v56, %v10591_v34  ;;  %p7973_p7 = scmp.lt.s32.totalorder %s7971_s30, %s7965_s22 }
0x103d   : > { %v5594_v21 = vadd.f32 %v10224_v24, %v5572_v29  ;;  %v5552_v48 = vmul.f32 %v7742_v52, %v10207_v2  ;;  %v5573_v37 = vmul.f32 %v10216_v55, %v5551_v61  ;;  %v10590_v2 = vsub.s32 0, %v10589_v1 }
0x103e   : > { %p7974_p9 = por %p7973_p7, %p7972_p3 }
0x103f   : > { %v5603_v19 = vpack.c.bf16 %v5594_v21, %v5593_v25  ;;  %v5574_v16 = vmul.f32 %v10216_v55, %v5552_v48  ;;  %v5595_v10 = vadd.f32 %v10224_v24, %v5573_v37  ;;  %v10283_v53 = vrot.slane %v5621_v56, %v10590_v2 }
0x1040   : > { %p7975_p12 = pnand %p7974_p9, %p7968_p13 }
0x1041   : > { %5806 = vmatmul.mubr.bf16.gmra.mrb[176].mxu1 %v5603_v19  ;;  %v5596_v14 = vadd.f32 %v10224_v24, %v5574_v16 }
0x1042   : > { %5815 = vmatprep.mubr.bf16.mxu1 %v10544_v57 }
0x1043   : > { %v5604_v3 = vpack.c.bf16 %v5596_v14, %v5595_v10 }
0x1049   : > { %5816 = vmatmul.mubr.bf16.gmra.mrb[180].mxu1 %v5604_v3 }
0x1096   : > { %v5747_v55 = vpop.f32.mrb[152].mxu1 }
0x1097   : > { %v5748_v57 = vadd.f32 %v5747_v55, %v10283_v53  ;;  %v5749_v41 = vpop.f32.mrb[153].mxu1 }
0x1098   : > { %v5750_v24 = vadd.f32 %v5749_v41, %v10287_v51  ;;  %v5751_v26 = vpop.f32.mrb[154].mxu1 }
0x1099   : > { %v5858_v49 = vmul.f32 0.70710677, %v5748_v57  ;;  %v5752_v36 = vadd.f32 %v5751_v26, %v10283_v53  ;;  %v5753_v30 = vpop.f32.mrb[155].mxu1  ;;  %v5826_v29 = vmul.f32 0.5, %v5748_v57 }
0x109a   : > { %v5859_v39 = vmul.f32 0.70710677, %v5750_v24  ;;  %v5754_v50 = vadd.f32 %v5753_v30, %v10287_v51  ;;  %v5827_v21 = vmul.f32 0.5, %v5750_v24 }
0x109b   : > { %7743 = verf.f32 %v5858_v49  ;;  %v5860_v23 = vmul.f32 0.70710677, %v5752_v36  ;;  %v5828_v52 = vmul.f32 0.5, %v5752_v36 }
0x109c   : > { %7745 = verf.f32 %v5859_v39  ;;  %v5861_v7 = vmul.f32 0.70710677, %v5754_v50  ;;  %v5829_v61 = vmul.f32 0.5, %v5754_v50 }
0x109d   : > { %7747 = verf.f32 %v5860_v23 }
0x109e   : > { %7749 = verf.f32 %v5861_v7  ;;  %v5757_v8 = vpop.f32.mrb[156].mxu1 }
0x109f   : > { %v5758_v18 = vadd.f32 %v5757_v8, %v10283_v53  ;;  %v5759_v62 = vpop.f32.mrb[157].mxu1 }
0x10a0   : > { %v5760_v47 = vadd.f32 %v5759_v62, %v10287_v51  ;;  %v5761_v6 = vpop.f32.mrb[158].mxu1 }
0x10a1   : > { %v5862_v45 = vmul.f32 0.70710677, %v5758_v18  ;;  %v5762_v46 = vadd.f32 %v5761_v6, %v10283_v53  ;;  %v5763_v15 = vpop.f32.mrb[159].mxu1  ;;  %v5830_v26 = vmul.f32 0.5, %v5758_v18 }
0x10a2   : > { %v5863_v27 = vmul.f32 0.70710677, %v5760_v47  ;;  %v5764_v0 = vadd.f32 %v5763_v15, %v10287_v51  ;;  %v5831_v24 = vmul.f32 0.5, %v5760_v47 }
0x10a3   : > { %7751 = verf.f32 %v5862_v45  ;;  %v5864_v22 = vmul.f32 0.70710677, %v5762_v46  ;;  %v5832_v57 = vmul.f32 0.5, %v5762_v46 }
0x10a4   : > { %7753 = verf.f32 %v5863_v27  ;;  %v5865_v42 = vmul.f32 0.70710677, %v5764_v0  ;;  %v5833_v36 = vmul.f32 0.5, %v5764_v0 }
0x10a5   : > { %v7744_v9 = vpop.eup %7743  ;;  %7755 = verf.f32 %v5864_v22 }
0x10a6   : > { %v7746_v32 = vpop.eup %7745  ;;  %v5922_v11 = vadd.f32 1.0, %v7744_v9  ;;  %7757 = verf.f32 %v5865_v42 }
0x10a7   : > { %v7748_v17 = vpop.eup %7747  ;;  %v5923_v12 = vadd.f32 1.0, %v7746_v32 }
0x10a8   : > { %v7750_v38 = vpop.eup %7749  ;;  %v5924_v25 = vadd.f32 1.0, %v7748_v17  ;;  %v5954_v19 = vmul.f32 %v5922_v11, %v5826_v29 }
0x10a9   : > { %v5925_v48 = vadd.f32 1.0, %v7750_v38  ;;  %v5955_v37 = vmul.f32 %v5923_v12, %v5827_v21 }
0x10aa   : > { %v5956_v16 = vmul.f32 %v5924_v25, %v5828_v52 }
0x10ab   : > { %v5957_v14 = vmul.f32 %v5925_v48, %v5829_v61 }
0x10ac   : > { %v5986_v10 = vpack.c.bf16 %v5956_v16, %v5954_v19 }
0x10ad   : > { %v7752_v3 = vpop.eup %7751  ;;  %v5987_v56 = vpack.c.bf16 %v5957_v14, %v5955_v37 }
0x10ae   : > { %v7754_v1 = vpop.eup %7753  ;;  %v5926_v2 = vadd.f32 1.0, %v7752_v3 }
0x10af   : > { %v7756_v34 = vpop.eup %7755  ;;  %v5927_v55 = vadd.f32 1.0, %v7754_v1  ;;  %6169 = vmatprep.mubr.bf16.mxu0 %v5987_v56 }
0x10b0   : > { %v7758_v41 = vpop.eup %7757  ;;  %v5928_v49 = vadd.f32 1.0, %v7756_v34  ;;  %6170 = vmatmul.mubr.bf16.vlgmr.msra.gmra.mrb[168].mxu0 %v5986_v10  ;;  %v5958_v39 = vmul.f32 %v5926_v2, %v5830_v26 }
0x10b1   : > { %v5929_v30 = vadd.f32 1.0, %v7758_v41  ;;  %v5959_v23 = vmul.f32 %v5927_v55, %v5831_v24 }
0x10b2   : > { %v5960_v50 = vmul.f32 %v5928_v49, %v5832_v57 }
0x10b3   : > { %v5961_v7 = vmul.f32 %v5929_v30, %v5833_v36 }
0x10b4   : > { %v5988_v8 = vpack.c.bf16 %v5960_v50, %v5958_v39 }
0x10b5   : > { %v5989_v62 = vpack.c.bf16 %v5961_v7, %v5959_v23 }
0x10b7   : > { %6177 = vmatprep.mubr.bf16.mxu0 %v5989_v62 }
0x10b8   : > { %6178 = vmatmul.mubr.bf16.gmra.mrb[172].mxu0 %v5988_v8 }
0x10d3   : > { %v5767_v6 = vpop.f32.mrb[160].mxu1 }
0x10d4   : > { %v5768_v45 = vadd.f32 %v5767_v6, %v10283_v53  ;;  %v5769_v15 = vpop.f32.mrb[161].mxu1 }
0x10d5   : > { %v5770_v18 = vadd.f32 %v5769_v15, %v10287_v51  ;;  %v5771_v46 = vpop.f32.mrb[162].mxu1 }
0x10d6   : > { %v5866_v27 = vmul.f32 0.70710677, %v5768_v45  ;;  %v5772_v47 = vadd.f32 %v5771_v46, %v10283_v53  ;;  %v5773_v0 = vpop.f32.mrb[163].mxu1  ;;  %v5834_v41 = vmul.f32 0.5, %v5768_v45 }
0x10d7   : > { %v5867_v22 = vmul.f32 0.70710677, %v5770_v18  ;;  %v5774_v42 = vadd.f32 %v5773_v0, %v10287_v51  ;;  %v5835_v36 = vmul.f32 0.5, %v5770_v18 }
0x10d8   : > { %7759 = verf.f32 %v5866_v27  ;;  %v5868_v9 = vmul.f32 0.70710677, %v5772_v47  ;;  %v5836_v26 = vmul.f32 0.5, %v5772_v47 }
0x10d9   : > { %7761 = verf.f32 %v5867_v22  ;;  %v5869_v32 = vmul.f32 0.70710677, %v5774_v42  ;;  %v5837_v30 = vmul.f32 0.5, %v5774_v42 }
0x10da   : > { %7763 = verf.f32 %v5868_v9 }
0x10db   : > { %7765 = verf.f32 %v5869_v32  ;;  %v5777_v11 = vpop.f32.mrb[164].mxu1 }
0x10dc   : > { %v5778_v17 = vadd.f32 %v5777_v11, %v10283_v53  ;;  %v5779_v12 = vpop.f32.mrb[165].mxu1 }
0x10dd   : > { %v5780_v38 = vadd.f32 %v5779_v12, %v10287_v51  ;;  %v5781_v29 = vpop.f32.mrb[166].mxu1 }
0x10de   : > { %v5870_v52 = vmul.f32 0.70710677, %v5778_v17  ;;  %v5782_v25 = vadd.f32 %v5781_v29, %v10283_v53  ;;  %v5783_v21 = vpop.f32.mrb[167].mxu1 }
0x10df   : > { %v5871_v61 = vmul.f32 0.70710677, %v5780_v38  ;;  %v5784_v48 = vadd.f32 %v5783_v21, %v10287_v51 }
0x10e0   : > { %7767 = verf.f32 %v5870_v52  ;;  %v5872_v19 = vmul.f32 0.70710677, %v5782_v25 }
0x10e1   : > { %7769 = verf.f32 %v5871_v61  ;;  %v5873_v16 = vmul.f32 0.70710677, %v5784_v48  ;;  %v5838_v61 = vmul.f32 0.5, %v5778_v17 }
0x10e2   : > { %v7760_v37 = vpop.eup %7759  ;;  %7771 = verf.f32 %v5872_v19  ;;  %v5840_v19 = vmul.f32 0.5, %v5782_v25 }
0x10e3   : > { %v7762_v14 = vpop.eup %7761  ;;  %v5930_v10 = vadd.f32 1.0, %v7760_v37  ;;  %7773 = verf.f32 %v5873_v16  ;;  %v5787_v3 = vpop.f32.mrb[168].mxu1 }
0x10e4   : > { %v7764_v56 = vpop.eup %7763  ;;  %v5931_v1 = vadd.f32 1.0, %v7762_v14  ;;  %v10306_v2 = vadd.f32 %v5787_v3, %v10283_v53  ;;  %v5789_v34 = vpop.f32.mrb[169].mxu1  ;;  %v5841_v3 = vmul.f32 0.5, %v5784_v48 }
0x10e5   : > { %v7766_v55 = vpop.eup %7765  ;;  %v5932_v57 = vadd.f32 1.0, %v7764_v56  ;;  %v10309_v49 = vadd.f32 %v5789_v34, %v10287_v51  ;;  %v5791_v24 = vpop.f32.mrb[170].mxu1  ;;  %v5962_v7 = vmul.f32 %v5930_v10, %v5834_v41  ;;  %v5839_v10 = vmul.f32 0.5, %v5780_v38 }
0x10e6   : > { %v5933_v39 = vadd.f32 1.0, %v7766_v55  ;;  %v5874_v50 = vmul.f32 0.70710677, %v10306_v2  ;;  %v5793_v23 = vpop.f32.mrb[171].mxu1  ;;  %v5792_v6 = vadd.f32 %v5791_v24, %v10283_v53  ;;  %v5963_v15 = vmul.f32 %v5931_v1, %v5835_v36 }
0x10e7   : > { %v5964_v8 = vmul.f32 %v5932_v57, %v5836_v26  ;;  %v5875_v62 = vmul.f32 0.70710677, %v10309_v49  ;;  %v5794_v46 = vadd.f32 %v5793_v23, %v10287_v51 }
0x10e8   : > { %v5965_v45 = vmul.f32 %v5933_v39, %v5837_v30  ;;  %7775 = verf.f32 %v5874_v50  ;;  %v5876_v27 = vmul.f32 0.70710677, %v5792_v6 }
0x10e9   : > { %7777 = verf.f32 %v5875_v62  ;;  %v5990_v47 = vpack.c.bf16 %v5964_v8, %v5962_v7  ;;  %v5877_v0 = vmul.f32 0.70710677, %v5794_v46 }
0x10ea   : > { %v7768_v18 = vpop.eup %7767  ;;  %v5991_v22 = vpack.c.bf16 %v5965_v45, %v5963_v15  ;;  %7779 = verf.f32 %v5876_v27  ;;  %v5842_v15 = vmul.f32 0.5, %v10306_v2  ;;  %v5844_v45 = vmul.f32 0.5, %v5792_v6 }
0x10eb   : > { %v7770_v42 = vpop.eup %7769  ;;  %v5934_v9 = vadd.f32 1.0, %v7768_v18  ;;  %v5797_v32 = vpop.f32.mrb[172].mxu1  ;;  %7781 = verf.f32 %v5877_v0  ;;  %v5845_v18 = vmul.f32 0.5, %v5794_v46 }
0x10ec   : > { %v7772_v11 = vpop.eup %7771  ;;  %v5935_v12 = vadd.f32 1.0, %v7770_v42  ;;  %v5798_v29 = vadd.f32 %v5797_v32, %v10283_v53  ;;  %v5799_v52 = vpop.f32.mrb[173].mxu1  ;;  %6185 = vmatprep.mubr.bf16.mxu0 %v5991_v22 }
0x10ed   : > { %v7774_v21 = vpop.eup %7773  ;;  %v5936_v16 = vadd.f32 1.0, %v7772_v11  ;;  %v5800_v37 = vadd.f32 %v5799_v52, %v10287_v51  ;;  %v5801_v14 = vpop.f32.mrb[174].mxu1  ;;  %6186 = vmatmul.mubr.bf16.gmra.mrb[176].mxu0 %v5990_v47  ;;  %v5966_v55 = vmul.f32 %v5934_v9, %v5838_v61  ;;  %v5843_v47 = vmul.f32 0.5, %v10309_v49 }
0x10ee   : > { %v5937_v56 = vadd.f32 1.0, %v7774_v21  ;;  %v5878_v1 = vmul.f32 0.70710677, %v5798_v29  ;;  %v5803_v34 = vpop.f32.mrb[175].mxu1  ;;  %v5802_v57 = vadd.f32 %v5801_v14, %v10283_v53  ;;  %v5967_v24 = vmul.f32 %v5935_v12, %v5839_v10 }
0x10ef   : > { %v5968_v41 = vmul.f32 %v5936_v16, %v5840_v19  ;;  %v5879_v26 = vmul.f32 0.70710677, %v5800_v37  ;;  %v5804_v17 = vadd.f32 %v5803_v34, %v10287_v51  ;;  %v5846_v2 = vmul.f32 0.5, %v5798_v29 }
0x10f0   : > { %v5969_v36 = vmul.f32 %v5937_v56, %v5841_v3  ;;  %7783 = verf.f32 %v5878_v1  ;;  %v5880_v25 = vmul.f32 0.70710677, %v5802_v57  ;;  %v5848_v6 = vmul.f32 0.5, %v5802_v57 }
0x10f1   : > { %7785 = verf.f32 %v5879_v26  ;;  %v5992_v30 = vpack.c.bf16 %v5968_v41, %v5966_v55  ;;  %v5881_v50 = vmul.f32 0.70710677, %v5804_v17  ;;  %v5847_v49 = vmul.f32 0.5, %v5800_v37 }
0x10f2   : > { %v7776_v39 = vpop.eup %7775  ;;  %v5993_v38 = vpack.c.bf16 %v5969_v36, %v5967_v24  ;;  %7787 = verf.f32 %v5880_v25  ;;  %v5849_v46 = vmul.f32 0.5, %v5804_v17 }
0x10f3   : > { %v7778_v48 = vpop.eup %7777  ;;  %v5938_v23 = vadd.f32 1.0, %v7776_v39  ;;  %7789 = verf.f32 %v5881_v50 }
0x10f4   : > { %6193 = vmatprep.mubr.bf16.mxu0 %v5993_v38  ;;  %v7780_v7 = vpop.eup %7779  ;;  %v5939_v8 = vadd.f32 1.0, %v7778_v48 }
0x10f5   : > { %6194 = vmatmul.mubr.bf16.gmra.mrb[180].mxu0 %v5992_v30  ;;  %v7782_v62 = vpop.eup %7781  ;;  %v5940_v27 = vadd.f32 1.0, %v7780_v7  ;;  %v5970_v22 = vmul.f32 %v5938_v23, %v5842_v15 }
0x10f6   : > { %v5941_v0 = vadd.f32 1.0, %v7782_v62  ;;  %v5971_v9 = vmul.f32 %v5939_v8, %v5843_v47 }
0x10f7   : > { %v5972_v42 = vmul.f32 %v5940_v27, %v5844_v45 }
0x10f8   : > { %v5973_v32 = vmul.f32 %v5941_v0, %v5845_v18 }
0x10f9   : > { %v5994_v12 = vpack.c.bf16 %v5972_v42, %v5970_v22 }
0x10fa   : > { %v7784_v11 = vpop.eup %7783  ;;  %v5995_v21 = vpack.c.bf16 %v5973_v32, %v5971_v9 }
0x10fb   : > { %v7786_v52 = vpop.eup %7785  ;;  %v5942_v61 = vadd.f32 1.0, %v7784_v11 }
0x10fc   : > { %v7788_v19 = vpop.eup %7787  ;;  %v5943_v16 = vadd.f32 1.0, %v7786_v52  ;;  %6201 = vmatprep.mubr.bf16.mxu0 %v5995_v21 }
0x10fd   : > { %v7790_v14 = vpop.eup %7789  ;;  %v5944_v10 = vadd.f32 1.0, %v7788_v19  ;;  %6202 = vmatmul.mubr.bf16.gmra.mrb[184].mxu0 %v5994_v12  ;;  %v5974_v56 = vmul.f32 %v5942_v61, %v5846_v2 }
0x10fe   : > { %v5945_v3 = vadd.f32 1.0, %v7790_v14  ;;  %v5975_v34 = vmul.f32 %v5943_v16, %v5847_v49 }
0x10ff   : > { %v5976_v1 = vmul.f32 %v5944_v10, %v5848_v6 }
0x1100   : > { %v5977_v55 = vmul.f32 %v5945_v3, %v5849_v46 }
0x1101   : > { %v5996_v41 = vpack.c.bf16 %v5976_v1, %v5974_v56 }
0x1102   : > { %v5997_v26 = vpack.c.bf16 %v5977_v55, %v5975_v34 }
0x1104   : > { %6209 = vmatprep.mubr.bf16.mxu0 %v5997_v26 }
0x1105   : > { %6210 = vmatmul.mubr.bf16.gmra.mrb[188].mxu0 %v5996_v41 }
0x1114   : > { %v5807_v24 = vpop.f32.mrb[176].mxu1 }
0x1115   : > { %v5808_v36 = vadd.f32 %v5807_v24, %v10283_v53  ;;  %v5809_v25 = vpop.f32.mrb[177].mxu1 }
0x1116   : > { %v5810_v29 = vadd.f32 %v5809_v25, %v10287_v51  ;;  %v5811_v57 = vpop.f32.mrb[178].mxu1 }
0x1117   : > { %v5882_v30 = vmul.f32 0.70710677, %v5808_v36  ;;  %v5812_v37 = vadd.f32 %v5811_v57, %v10283_v53  ;;  %v5813_v17 = vpop.f32.mrb[179].mxu1  ;;  %v5850_v61 = vmul.f32 0.5, %v5808_v36 }
0x1118   : > { %v5883_v39 = vmul.f32 0.70710677, %v5810_v29  ;;  %v5814_v50 = vadd.f32 %v5813_v17, %v10287_v51 }
0x1119   : > { %7791 = verf.f32 %v5882_v30  ;;  %v5884_v38 = vmul.f32 0.70710677, %v5812_v37  ;;  %v5852_v19 = vmul.f32 0.5, %v5812_v37 }
0x111a   : > { %7793 = verf.f32 %v5883_v39  ;;  %v5885_v48 = vmul.f32 0.70710677, %v5814_v50  ;;  %v5853_v14 = vmul.f32 0.5, %v5814_v50 }
0x111b   : > { %7795 = verf.f32 %v5884_v38 }
0x111c   : > { %7797 = verf.f32 %v5885_v48  ;;  %v5817_v23 = vpop.f32.mrb[180].mxu1 }
0x111d   : > { %v5818_v7 = vadd.f32 %v5817_v23, %v10283_v53  ;;  %v5819_v8 = vpop.f32.mrb[181].mxu1 }
0x111e   : > { %v5820_v62 = vadd.f32 %v5819_v8, %v10287_v51  ;;  %v5821_v15 = vpop.f32.mrb[182].mxu1 }
0x111f   : > { %v5886_v45 = vmul.f32 0.70710677, %v5818_v7  ;;  %v5822_v27 = vadd.f32 %v5821_v15, %v10283_v53  ;;  %v5823_v47 = vpop.f32.mrb[183].mxu1  ;;  %v5851_v53 = vmul.f32 0.5, %v5810_v29  ;;  %v5854_v24 = vmul.f32 0.5, %v5818_v7 }
0x1120   : > { %v5887_v18 = vmul.f32 0.70710677, %v5820_v62  ;;  %v5824_v0 = vadd.f32 %v5823_v47, %v10287_v51  ;;  %v5855_v29 = vmul.f32 0.5, %v5820_v62  ;;  %v10332_v7 = vld [vmem:[%s10592_s10] ss:$0 sm:$0xff] }
0x1121   : > { %7799 = verf.f32 %v5886_v45  ;;  %v5888_v22 = vmul.f32 0.70710677, %v5822_v27  ;;  %v5856_v36 = vmul.f32 0.5, %v5822_v27 }
0x1122   : > { %7801 = verf.f32 %v5887_v18  ;;  %v5889_v42 = vmul.f32 0.70710677, %v5824_v0  ;;  %v5857_v57 = vmul.f32 0.5, %v5824_v0 }
0x1123   : > { %v7792_v9 = vpop.eup %7791  ;;  %7803 = verf.f32 %v5888_v22 }
0x1124   : > { %v7794_v32 = vpop.eup %7793  ;;  %v5946_v11 = vadd.f32 1.0, %v7792_v9  ;;  %7805 = verf.f32 %v5889_v42 }
0x1125   : > { %v7796_v12 = vpop.eup %7795  ;;  %v5947_v52 = vadd.f32 1.0, %v7794_v32 }
0x1126   : > { %v7798_v21 = vpop.eup %7797  ;;  %v5948_v16 = vadd.f32 1.0, %v7796_v12  ;;  %v5978_v6 = vmul.f32 %v5946_v11, %v5850_v61 }
0x1127   : > { %v5949_v2 = vadd.f32 1.0, %v7798_v21  ;;  %v5979_v10 = vmul.f32 %v5947_v52, %v5851_v53 }
0x1128   : > { %v5980_v51 = vmul.f32 %v5948_v16, %v5852_v19 }
0x1129   : > { %v5981_v49 = vmul.f32 %v5949_v2, %v5853_v14 }
0x112a   : > { %v5998_v46 = vpack.c.bf16 %v5980_v51, %v5978_v6 }
0x112b   : > { %v7800_v3 = vpop.eup %7799  ;;  %v5999_v56 = vpack.c.bf16 %v5981_v49, %v5979_v10 }
0x112c   : > { %v7802_v1 = vpop.eup %7801  ;;  %v5950_v34 = vadd.f32 1.0, %v7800_v3 }
0x112d   : > { %v7804_v55 = vpop.eup %7803  ;;  %v5951_v41 = vadd.f32 1.0, %v7802_v1  ;;  %6217 = vmatprep.mubr.bf16.mxu1 %v5999_v56 }
0x112e   : > { %v7806_v26 = vpop.eup %7805  ;;  %v5952_v25 = vadd.f32 1.0, %v7804_v55  ;;  %6218 = vmatmul.mubr.bf16.vlgmr.msra.gmra.mrb[184].mxu1 %v5998_v46  ;;  %v5982_v37 = vmul.f32 %v5950_v34, %v5854_v24 }
0x112f   : > { %v5953_v30 = vadd.f32 1.0, %v7806_v26  ;;  %v5983_v39 = vmul.f32 %v5951_v41, %v5855_v29 }
0x1130   : > { %v5984_v17 = vmul.f32 %v5952_v25, %v5856_v36 }
0x1131   : > { %v5985_v50 = vmul.f32 %v5953_v30, %v5857_v57 }
0x1132   : > { %v6000_v38 = vpack.c.bf16 %v5984_v17, %v5982_v37 }
0x1133   : > { %v6001_v48 = vpack.c.bf16 %v5985_v50, %v5983_v39 }
0x1135   : > { %6225 = vmatprep.mubr.bf16.mxu1 %v6001_v48 }
0x1136   : > { %6226 = vmatmul.mubr.bf16.gmra.mrb[188].mxu1 %v6000_v38 }
0x1183   : > { %v6730_v23 = vpop.f32.mrb[168].mxu0 }
0x1184   : > { %v6731_v8 = vpop.f32.mrb[169].mxu0 }
0x1185   : > { %v6732_v15 = vadd.f32 %v6731_v8, %v6730_v23  ;;  %v6733_v62 = vpop.f32.mrb[170].mxu0 }
0x1186   : > { %v6734_v45 = vpop.f32.mrb[171].mxu0 }
0x1187   : > { %v6172_v27 = vadd.f32 %v6732_v15, %v10332_v7  ;;  %v6735_v47 = vadd.f32 %v6734_v45, %v6733_v62 }
0x1189   : > { %v6234_v18 = vadd.f32 %v6172_v27, %v10056_v20  ;;  %v6175_v0 = vadd.f32 %v6735_v47, %v10332_v7 }
0x118b   : > { %6250 = vst [vmem:[%s10339_s15] sm:$0xff] %v6234_v18  ;;  %v6235_v22 = vadd.f32 %v6175_v0, %v10060_v40  ;;  %v6736_v42 = vpop.f32.mrb[172].mxu0 }
0x118c   : > { %v6737_v9 = vpop.f32.mrb[173].mxu0 }
0x118d   : > { %6251 = vst [vmem:[%s10339_s15 + $0x8] sm:$0xff] %v6235_v22  ;;  %v6738_v32 = vadd.f32 %v6737_v9, %v6736_v42  ;;  %v6739_v11 = vpop.f32.mrb[174].mxu0 }
0x118e   : > { %v6740_v12 = vpop.f32.mrb[175].mxu0 }
0x118f   : > { %v6180_v20 = vadd.f32 %v6738_v32, %v10332_v7  ;;  %v6741_v52 = vadd.f32 %v6740_v12, %v6739_v11 }
0x1191   : > { %v6236_v21 = vadd.f32 %v6180_v20, %v10064_v28  ;;  %v6183_v61 = vadd.f32 %v6741_v52, %v10332_v7 }
0x1193   : > { %6252 = vst [vmem:[%s10339_s15 + $0x10] sm:$0xff] %v6236_v21  ;;  %v6237_v19 = vadd.f32 %v6183_v61, %v10070_v59 }
0x1195   : > { %6253 = vst [vmem:[%s10339_s15 + $0x18] sm:$0xff] %v6237_v19 }
0x11c0   : > { %v6742_v40 = vpop.f32.mrb[176].mxu0 }
0x11c1   : > { %v6743_v16 = vpop.f32.mrb[177].mxu0 }
0x11c2   : > { %v6744_v53 = vadd.f32 %v6743_v16, %v6742_v40  ;;  %v6745_v14 = vpop.f32.mrb[178].mxu0 }
0x11c3   : > { %v6746_v2 = vpop.f32.mrb[179].mxu0 }
0x11c4   : > { %v6188_v6 = vadd.f32 %v6744_v53, %v10332_v7  ;;  %v6747_v51 = vadd.f32 %v6746_v2, %v6745_v14 }
0x11c6   : > { %v6238_v10 = vadd.f32 %v6188_v6, %v10076_v54  ;;  %v6191_v28 = vadd.f32 %v6747_v51, %v10332_v7 }
0x11c8   : > { %6254 = vst [vmem:[%s10339_s15 + $0x20] sm:$0xff] %v6238_v10  ;;  %v6239_v49 = vadd.f32 %v6191_v28, %v10081_v44  ;;  %v6748_v46 = vpop.f32.mrb[180].mxu0 }
0x11c9   : > { %v6749_v59 = vpop.f32.mrb[181].mxu0 }
0x11ca   : > { %6255 = vst [vmem:[%s10339_s15 + $0x28] sm:$0xff] %v6239_v49  ;;  %v6750_v3 = vadd.f32 %v6749_v59, %v6748_v46  ;;  %v6751_v56 = vpop.f32.mrb[182].mxu0 }
0x11cb   : > { %v6752_v1 = vpop.f32.mrb[183].mxu0 }
0x11cc   : > { %v6196_v34 = vadd.f32 %v6750_v3, %v10332_v7  ;;  %v6753_v55 = vadd.f32 %v6752_v1, %v6751_v56 }
0x11ce   : > { %v6240_v41 = vadd.f32 %v6196_v34, %v10085_v31  ;;  %v6199_v54 = vadd.f32 %v6753_v55, %v10332_v7 }
0x11d0   : > { %6256 = vst [vmem:[%s10339_s15 + $0x30] sm:$0xff] %v6240_v41  ;;  %v6241_v26 = vadd.f32 %v6199_v54, %v10089_v33  ;;  %v6754_v24 = vpop.f32.mrb[184].mxu0 }
0x11d1   : > { %v6755_v44 = vpop.f32.mrb[185].mxu0 }
0x11d2   : > { %6257 = vst [vmem:[%s10339_s15 + $0x38] sm:$0xff] %v6241_v26  ;;  %v6756_v36 = vadd.f32 %v6755_v44, %v6754_v24  ;;  %v6757_v25 = vpop.f32.mrb[186].mxu0 }
0x11d3   : > { %v6758_v29 = vpop.f32.mrb[187].mxu0 }
0x11d4   : > { %v6204_v57 = vadd.f32 %v6756_v36, %v10332_v7  ;;  %v6759_v30 = vadd.f32 %v6758_v29, %v6757_v25 }
0x11d6   : > { %v6242_v37 = vadd.f32 %v6204_v57, %v10096_v43  ;;  %v6207_v31 = vadd.f32 %v6759_v30, %v10332_v7 }
0x11d8   : > { %6258 = vst [vmem:[%s10339_s15 + $0x40] sm:$0xff] %v6242_v37  ;;  %v6243_v17 = vadd.f32 %v6207_v31, %v10101_v58  ;;  %v6760_v39 = vpop.f32.mrb[188].mxu0 }
0x11d9   : > { %v6761_v33 = vpop.f32.mrb[189].mxu0 }
0x11da   : > { %6259 = vst [vmem:[%s10339_s15 + $0x48] sm:$0xff] %v6243_v17  ;;  %v6762_v50 = vadd.f32 %v6761_v33, %v6760_v39  ;;  %v6763_v38 = vpop.f32.mrb[190].mxu0 }
0x11db   : > { %v6764_v48 = vpop.f32.mrb[191].mxu0 }
0x11dc   : > { %v6212_v23 = vadd.f32 %v6762_v50, %v10332_v7  ;;  %v6765_v8 = vadd.f32 %v6764_v48, %v6763_v38 }
0x11de   : > { %v6244_v15 = vadd.f32 %v6212_v23, %v10105_v13  ;;  %v6215_v43 = vadd.f32 %v6765_v8, %v10332_v7 }
0x11e0   : > { %6260 = vst [vmem:[%s10339_s15 + $0x50] sm:$0xff] %v6244_v15  ;;  %v6245_v62 = vadd.f32 %v6215_v43, %v10109_v4 }
0x11e2   : > { %6261 = vst [vmem:[%s10339_s15 + $0x58] sm:$0xff] %v6245_v62 }
0x1201   : > { %v6766_v58 = vpop.f32.mrb[184].mxu1 }
0x1202   : > { %v6767_v45 = vpop.f32.mrb[185].mxu1 }
0x1203   : > { %v6768_v27 = vadd.f32 %v6767_v45, %v6766_v58  ;;  %v6769_v47 = vpop.f32.mrb[186].mxu1 }
0x1204   : > { %v6770_v18 = vpop.f32.mrb[187].mxu1 }
0x1205   : > { %v6220_v0 = vadd.f32 %v6768_v27, %v10332_v7  ;;  %v6771_v22 = vadd.f32 %v6770_v18, %v6769_v47 }
0x1207   : > { %v6246_v42 = vadd.f32 %v6220_v0, %v10116_v60  ;;  %v6223_v13 = vadd.f32 %v6771_v22, %v10332_v7 }
0x1209   : > { %6262 = vst [vmem:[%s10339_s15 + $0x60] sm:$0xff] %v6246_v42  ;;  %v6247_v9 = vadd.f32 %v6223_v13, %v10121_v35  ;;  %v6772_v4 = vpop.f32.mrb[188].mxu1 }
0x120a   : > { %v6773_v32 = vpop.f32.mrb[189].mxu1 }
0x120b   : > { %6263 = vst [vmem:[%s10339_s15 + $0x68] sm:$0xff] %v6247_v9  ;;  %v6774_v11 = vadd.f32 %v6773_v32, %v6772_v4  ;;  %v6775_v12 = vpop.f32.mrb[190].mxu1 }
0x120c   : > { %v6776_v20 = vpop.f32.mrb[191].mxu1 }
0x120d   : > { %v6228_v52 = vadd.f32 %v6774_v11, %v10332_v7  ;;  %v6777_v21 = vadd.f32 %v6776_v20, %v6775_v12 }
0x120f   : > { %v6248_v60 = vadd.f32 %v6228_v52, %v10125_v5  ;;  %v6231_v61 = vadd.f32 %v6777_v21, %v10332_v7 }
0x1211   : > { %6264 = vst [vmem:[%s10339_s15 + $0x70] sm:$0xff] %v6248_v60  ;;  %v6249_v35 = vadd.f32 %v6231_v61, %v10129_v63 }
0x1213   : > { %6265 = vst [vmem:[%s10339_s15 + $0x78] sm:$0xff] %v6249_v35 }
0x1214   : > { %7978 = shalt.err (!%p7975_p12)
}
0x1215   : > { %s7979_s24 = scalar_lea.hbm %s10388_s16, 2048  ;;  %s7983_s15 = scalar_lea.hbm %s10593_s14, 8192 }
0x1216   : > { %p7980_p0 = scmp.ne.s32.totalorder %s10388_s16, %s7979_s24  ;;  %p7984_p11 = scmp.lt.u32.totalorder %s10388_s16, %s10593_s14 }
0x1217   : > { %p7985_p1 = scmp.lt.u32.totalorder %s7983_s15, %s7979_s24  ;;  %p7987_p6 = scmp.lt.u32.totalorder %s7979_s24, %s10388_s16 }
0x1218   : > { %p7981_p5 = pnand %p7980_p0, %p8282_p4 }
0x1219   : > { %p7986_p2 = por %p7985_p1, %p7984_p11 }
0x121a   : > { %p7982_p10 = pneg %p7981_p5 }
0x121b   : > { %p7988_p8 = por %p7987_p6, %p7986_p2 }
0x121d   : > { %p7989_p13 = pnand %p7988_p8, %p7982_p10 }
0x121f   : > { %7992 = shalt.err (!%p7989_p13)
}
0x1220   : > { %s8059_s23 = smov 128   ;;  %s8060_s22 = smov 8  }
0x1221   : > { %7260 = dma.vmem_to_hbm [thread:$0]  (%p8282_p4), %s10390_s19, 2048, %s10388_s16, %s6267_s29, %s8059_s23, %s8059_s23, %s8060_s22  }
0x1222 PF: > { %s10594_s21 = sld [smem:[#allocation16_spill]]  ;;  %s10595_s3 = sld [smem:[#allocation17_spill]] }
0x1223   : > { %p7292_p3 = scmp.ge.s32.totalorder %s8039_s28, 2 }
0x1228   : > { %s6296_s30 = sand.u32 1, %s10594_s21   ;;  %p10596_p7 = scmp.ne.s32.totalorder %s10595_s3, 0 }
0x1229   : > { %s6297_s24 = scalar_lea.sflag [#allocation4], %s6296_s30 }
0x122a   : > { %p7280_p9 = pnand %p7292_p3, %p10596_p7 }
0x122c   : > { %8022 = dma.done.wait (!%p7280_p9), %s6297_s24, 2048  }
0x122d   : > { %8024 = vsyncadd (!%p7280_p9), %s6297_s24, 4294965248  ;;  %s10597_s18 = smov %s8288_s25  ;;  %p28_p12 = scmp.ge.s32.totalorder %s8272_s17, 6  }
0x122e   : > { %s10598_s25 = smov %s8031_s26  ;;  %s10599_s26 = smov %s8035_s27 }
0x122f   : > { %s10600_s27 = smov %s10597_s18  ;;  %s10601_s28 = smov %s8272_s17 }
0x1230   :  { %30 = sbr.rel (!%p28_p12) target bundleno = 13 (0xd), region = 133 }
0x1237   :  { %6302 = vsyncpa [#allocation3], 1 }
0x1238   :  { %6304 = vsyncpa [#allocation3 + $0x1], 1 }
0x1239   :  { %6305 = vsyncpa [#allocation6], 1 }
0x123a   :  { %6306 = vsyncpa [#allocation9], 1 }
0x123b   :  { %6307 = vsyncpa [#allocation4], 1 }
0x123c   :  { %6309 = vsyncpa [#allocation4 + $0x1], 1 }

</bundles_post_ra>
